<compile_context>
chip_gen: v6e
topology: v6e:2x2x1
jax: 0.10.0
libtpu: 0.0.40
codegen_flags: <defaults>
</compile_context>

<pallas_src>
import functools
import math

import jax
import jax.numpy as jnp
from jax import lax
from jax.experimental import pallas as pl
from jax.experimental.pallas import tpu as pltpu

_TWO_PI = 2.0 * math.pi


def _default_vmem_limit_bytes():
    """Scoped-VMEM budget: ~3/4 of physical VMEM (96 MiB on v5e/v6e, 48 MiB on
    v7x), falling back to 32 MiB if the hardware query is unavailable."""
    try:
        info = pltpu.get_tpu_info()
        phys = getattr(info, "vmem_capacity_bytes", None)
        if phys:
            return int(min(96 * 1024 * 1024,
                           max(32 * 1024 * 1024, phys * 3 // 4)))
    except Exception:
        pass
    return 32 * 1024 * 1024


_VMEM_LIMIT = _default_vmem_limit_bytes()


def _round_up(x, m):
    return ((x + m - 1) // m) * m


def _pick_tile(dim_padded, target):
    """Largest multiple of 128 that divides dim_padded and is <= target.
    dim_padded is always a multiple of 128, so 128 is a valid floor."""
    t = min(target, dim_padded)
    t = max(128, (t // 128) * 128)
    while dim_padded % t:
        t -= 128
    return t


def _make_type3_kernel(B, compute_dtype):
    """(T-tile, R-tile) step kernel.  Grid = (T blocks [parallel],
    R blocks [arbitrary/reduction]).  Output blocks are resident across the R
    axis and double as the accumulators; the t-only post-phase rotation is
    fused into the epilogue."""

    def kernel(phis_ref, alphas_ref, xr_ref, xi_ref, post_ref, yr_ref, yi_ref):
        # phis_ref   : (tR, B)      centered/scaled spatial maps, R-major
        # alphas_ref : (B, tT)      centered/scaled temporal coefficients
        # xr/xi_ref  : (n_pad, tR)  pre-phased image planes (f32 or bf16)
        # post_ref   : (2, tT)      [cos; sin] of the t-only post phase
        # yr/yi_ref  : (n_pad, tT)  output planes; resident accumulators
        k = pl.program_id(1)

        @pl.when(k == 0)
        def _():
            yr_ref[...] = jnp.zeros_like(yr_ref)
            yi_ref[...] = jnp.zeros_like(yi_ref)

        # --- phase in turns via VPU broadcast-FMAs (B is tiny & static) ------
        # ph[r, t] = sum_b phis[r, b] * alphas[b, t].  Keeping this off the MXU
        # avoids the K=B multi-pass f32 matmul that dominated at small N.
        pt = phis_ref[...]                                   # (tR, B)  f32
        al = alphas_ref[...]                                 # (B, tT)  f32
        ph = pt[:, 0:1] * al[0:1, :]
        for b in range(1, B):
            ph = ph + pt[:, b:b + 1] * al[b:b + 1, :]
        # Range-reduce to [-0.5, 0.5] turns before the 2*pi scale so the f32
        # sin/cos argument-reduction error stays bounded.
        ph = ph - jnp.floor(ph + jnp.float32(0.5))
        ph = ph * jnp.float32(_TWO_PI)
        c = jnp.cos(ph).astype(compute_dtype)
        s = jnp.sin(ph).astype(compute_dtype)

        xr = xr_ref[...]
        xi = xi_ref[...]
        # (xr + i*xi) @ (cos - i*sin), accumulated straight into the outputs.
        yr_ref[...] += (jnp.dot(xr, c, preferred_element_type=jnp.float32)
                        + jnp.dot(xi, s, preferred_element_type=jnp.float32))
        yi_ref[...] += (jnp.dot(xi, c, preferred_element_type=jnp.float32)
                        - jnp.dot(xr, s, preferred_element_type=jnp.float32))

        # --- fused stage-3 post-phase rotation (depends on t only) -----------
        @pl.when(k == pl.num_programs(1) - 1)
        def _():
            p = post_ref[...]
            c2 = p[0:1, :]
            s2 = p[1:2, :]
            yr = yr_ref[...]
            yi = yi_ref[...]
            yr_ref[...] = yr * c2 + yi * s2
            yi_ref[...] = yi * c2 - yr * s2

    return kernel


@functools.partial(jax.jit, static_argnames=("tile_t", "tile_r", "bf16_matmul"))
def type3_nufft_forward(x, phis, alphas, *, tile_t=512, tile_r=512,
                        bf16_matmul=None):
    """Forward type-3 NUFFT (naive DFT semantics).

    Args:
      x      : complex64, shape (N, *im_size)
      phis   : float32,   shape (B, *im_size)
      alphas : float32,   shape (B, *trj_size)
      tile_t, tile_r : tile sizes (multiples of 128); raise to 1024 on v6e for
        large problems (128 MiB VMEM), keep at 512 on v7x (64 MiB VMEM).
      bf16_matmul : None = auto (enabled when padded N >= 64); casts the two
        big matmul operands (not the phase / sin-cos path) to bf16 with f32
        accumulation for ~3x MXU throughput at large N.
    Returns:
      y : complex64, shape (N, *trj_size)
    """
    B = phis.shape[0]
    im_size = phis.shape[1:]
    trj_size = alphas.shape[1:]
    N = x.shape[0]

    R = math.prod(im_size)
    T = math.prod(trj_size)

    phis_flt = phis.reshape(B, R).astype(jnp.float32)
    alphas_flt = alphas.reshape(B, T).astype(jnp.float32)

    # --- centering / scaling: exact decomposition of phis.T @ alphas ---------
    phis_mp = (jnp.min(phis_flt, axis=1) + jnp.max(phis_flt, axis=1)) * 0.5
    alphas_mp = (jnp.min(alphas_flt, axis=1) + jnp.max(alphas_flt, axis=1)) * 0.5
    phis_c = phis_flt - phis_mp[:, None]
    alphas_c = alphas_flt - alphas_mp[:, None]
    scales = jnp.max(jnp.abs(phis_c), axis=1) * 2.0
    scales = jnp.where(scales == 0.0, 1.0, scales)   # guard: constant basis map
    phis_c = phis_c / scales[:, None]
    phis_mp = phis_mp / scales
    alphas_c = alphas_c * scales[:, None]
    alphas_mp = alphas_mp * scales

    # --- stage 1 (pre-phase, r-only) hoisted; exact f32 VPU ops --------------
    phz_pre = jnp.sum(phis_c * alphas_mp[:, None], axis=0)          # (R,)
    c1 = jnp.cos(jnp.float32(_TWO_PI) * phz_pre)
    s1 = jnp.sin(jnp.float32(_TWO_PI) * phz_pre)
    x_flt = x.reshape(N, R)
    xr = jnp.real(x_flt).astype(jnp.float32)
    xi = jnp.imag(x_flt).astype(jnp.float32)
    xmr = xr * c1 + xi * s1
    xmi = xi * c1 - xr * s1

    # --- stage 3 (post-phase, t-only) -> fused into the kernel epilogue ------
    phz_post = jnp.sum((alphas_c + alphas_mp[:, None]) * phis_mp[:, None],
                       axis=0)                                      # (T,)
    post = jnp.stack([jnp.cos(jnp.float32(_TWO_PI) * phz_post),
                      jnp.sin(jnp.float32(_TWO_PI) * phz_post)], axis=0)

    # --- padding: N -> mult of 8 (sublane), R/T -> mult of 128 (lane) --------
    n_pad = _round_up(max(N, 1), 8)
    R_pad = _round_up(R, 128)
    T_pad = _round_up(T, 128)

    if bf16_matmul is None:
        bf16_matmul = bool(n_pad >= 64)   # MXU-bound regime only
    compute_dtype = jnp.bfloat16 if bf16_matmul else jnp.float32

    xmr = jnp.pad(xmr, ((0, n_pad - N), (0, R_pad - R))).astype(compute_dtype)
    xmi = jnp.pad(xmi, ((0, n_pad - N), (0, R_pad - R))).astype(compute_dtype)
    phis_t = jnp.pad(phis_c.T, ((0, R_pad - R), (0, 0)))            # (R_pad, B)
    alphas_p = jnp.pad(alphas_c, ((0, 0), (0, T_pad - T)))          # (B, T_pad)
    post_p = jnp.pad(post, ((0, 0), (0, T_pad - T)))                # (2, T_pad)

    tT = _pick_tile(T_pad, tile_t)
    # v7x megacore: prefer >= 2 T blocks so both TensorCores get work.
    if T_pad // tT < 2 and T_pad > 128:
        tT = _pick_tile(T_pad, max(128, (T_pad // 2 // 128) * 128))
    tR = _pick_tile(R_pad, tile_r)
    grid = (T_pad // tT, R_pad // tR)       # reduction axis (R) last

    # TODO(synk): for very large N on v7x (64 MiB VMEM), add an outermost
    # "parallel" N grid axis (256-512 rows) and accept recomputing cos/sin per
    # N tile; on v5e, consider making xr/xi fully resident when they fit.
    yr, yi = pl.pallas_call(
        _make_type3_kernel(B, compute_dtype),
        out_shape=(jax.ShapeDtypeStruct((n_pad, T_pad), jnp.float32),
                   jax.ShapeDtypeStruct((n_pad, T_pad), jnp.float32)),
        grid_spec=pltpu.PrefetchScalarGridSpec(
            num_scalar_prefetch=0,
            grid=grid,
            in_specs=[
                pl.BlockSpec((tR, B), lambda j, k: (k, 0)),          # phis (R-major)
                pl.BlockSpec((B, tT), lambda j, k: (0, j)),          # alphas
                pl.BlockSpec((n_pad, tR), lambda j, k: (0, k)),      # x real
                pl.BlockSpec((n_pad, tR), lambda j, k: (0, k)),      # x imag
                pl.BlockSpec((2, tT), lambda j, k: (0, j)),          # post cos/sin
            ],
            out_specs=[
                pl.BlockSpec((n_pad, tT), lambda j, k: (0, j)),      # y real
                pl.BlockSpec((n_pad, tT), lambda j, k: (0, j)),      # y imag
            ],
        ),
        compiler_params=pltpu.CompilerParams(
            dimension_semantics=("parallel", "arbitrary"),
            vmem_limit_bytes=_VMEM_LIMIT),
    )(phis_t, alphas_p, xmr, xmi, post_p)

    y = lax.complex(yr[:N, :T], yi[:N, :T]).astype(jnp.complex64)
    return y.reshape((N,) + tuple(trj_size))


def _reference_forward(x, phis, alphas):
    """Plain-JAX reference: exact type-3 DFT with the original phis/alphas."""
    B = phis.shape[0]
    N = x.shape[0]
    phis_flt = phis.reshape(B, -1)
    alphas_flt = alphas.reshape(B, -1)
    phase = jnp.einsum("br,bt->rt", phis_flt, alphas_flt,
                       precision=lax.Precision.HIGHEST)             # (R, T)
    kern = jnp.exp(-2j * jnp.pi * phase).astype(jnp.complex64)
    y = jnp.einsum("nr,rt->nt", x.reshape(N, -1), kern,
                   precision=lax.Precision.HIGHEST)
    return y.reshape((N,) + tuple(alphas.shape[1:]))


if __name__ == "__main__":
    key = jax.random.PRNGKey(0)
    kp, ka, kr, ki = jax.random.split(key, 4)

    # Small shapes: B=3 bases, im_size=(16, 16) -> R=256, trj_size=(128,) -> T=128
    N = 2
    B = 3
    im_size = (16, 16)
    trj_size = (128,)

    phis = jax.random.uniform(kp, (B,) + im_size, jnp.float32, -0.5, 0.5)
    alphas = jax.random.uniform(ka, (B,) + trj_size, jnp.float32, -3.0, 3.0)
    x = (jax.random.normal(kr, (N,) + im_size, jnp.float32)
         + 1j * jax.random.normal(ki, (N,) + im_size, jnp.float32)
         ).astype(jnp.complex64)

    y = type3_nufft_forward(x, phis, alphas)
    y = jax.block_until_ready(y)
    assert y.shape == (N,) + trj_size and y.dtype == jnp.complex64

    y_ref = _reference_forward(x, phis, alphas)
    err = jnp.max(jnp.abs(y - y_ref)) / (jnp.max(jnp.abs(y_ref)) + 1e-12)
    assert float(err) < 2e-3, f"mismatch vs reference: rel err {float(err)}"

    print("KERNEL_OK")
</pallas_src>

<mosaic_0001>
module attributes {stable_mosaic.version = 11 : i64} {
  func.func @kernel(%arg0: i32, %arg1: i32, %arg2: memref<256x3xf32, #tpu.memory_space<vmem>>, %arg3: memref<3x128xf32, #tpu.memory_space<vmem>>, %arg4: memref<8x256xf32, #tpu.memory_space<vmem>>, %arg5: memref<8x256xf32, #tpu.memory_space<vmem>>, %arg6: memref<2x128xf32, #tpu.memory_space<vmem>>, %arg7: memref<8x128xf32, #tpu.memory_space<vmem>>, %arg8: memref<8x128xf32, #tpu.memory_space<vmem>>) attributes {dimension_semantics = [#tpu.dimension_semantics<parallel>, #tpu.dimension_semantics<arbitrary>], iteration_bounds = array<i64: 1, 1>, scalar_prefetch = 0 : i64, scratch_operands = 0 : i64, tpu.core_type = #tpu.core_type<tc>, window_params = [{transform_indices = @transform_0, window_bounds = array<i64: 256, 3>}, {transform_indices = @transform_1, window_bounds = array<i64: 3, 128>}, {transform_indices = @transform_2, window_bounds = array<i64: 8, 256>}, {transform_indices = @transform_3, window_bounds = array<i64: 8, 256>}, {transform_indices = @transform_4, window_bounds = array<i64: 2, 128>}, {transform_indices = @transform_5, window_bounds = array<i64: 8, 128>}, {transform_indices = @transform_6, window_bounds = array<i64: 8, 128>}]} {
    %c0_i32 = arith.constant 0 : i32
    %0 = arith.cmpi eq, %arg1, %c0_i32 : i32
    %1 = arith.extui %0 : i1 to i32
    %c0_i32_0 = arith.constant 0 : i32
    %2 = arith.cmpi ne, %1, %c0_i32_0 : i32
    scf.if %2 {
      %cst_23 = arith.constant 0.000000e+00 : f32
      %47 = vector.broadcast %cst_23 : f32 to vector<8x128xf32>
      %c0_24 = arith.constant 0 : index
      %c0_25 = arith.constant 0 : index
      %48 = vector.load %arg7[%c0_24, %c0_25] : memref<8x128xf32, #tpu.memory_space<vmem>>, vector<8x128xf32>
      tpu.vector_store %arg7[%c0_24, %c0_25], %47 {strides = array<i32>} : memref<8x128xf32, #tpu.memory_space<vmem>>, vector<8x128xf32>,
      %cst_26 = arith.constant 0.000000e+00 : f32
      %49 = vector.broadcast %cst_26 : f32 to vector<8x128xf32>
      %c0_27 = arith.constant 0 : index
      %c0_28 = arith.constant 0 : index
      %50 = vector.load %arg8[%c0_27, %c0_28] : memref<8x128xf32, #tpu.memory_space<vmem>>, vector<8x128xf32>
      tpu.vector_store %arg8[%c0_27, %c0_28], %49 {strides = array<i32>} : memref<8x128xf32, #tpu.memory_space<vmem>>, vector<8x128xf32>,
    } else {
    }
    %c0 = arith.constant 0 : index
    %c0_1 = arith.constant 0 : index
    %3 = vector.load %arg2[%c0, %c0_1] : memref<256x3xf32, #tpu.memory_space<vmem>>, vector<256x3xf32>
    %c0_2 = arith.constant 0 : index
    %c0_3 = arith.constant 0 : index
    %4 = vector.load %arg3[%c0_2, %c0_3] : memref<3x128xf32, #tpu.memory_space<vmem>>, vector<3x128xf32>
    %5 = vector.extract_strided_slice %3 {offsets = [0, 0], sizes = [256, 1], strides = [1, 1]} : vector<256x3xf32> to vector<256x1xf32>
    %6 = vector.extract_strided_slice %4 {offsets = [0, 0], sizes = [1, 128], strides = [1, 1]} : vector<3x128xf32> to vector<1x128xf32>
    %7 = vector.broadcast %5 : vector<256x1xf32> to vector<256x128xf32>
    %8 = vector.broadcast %6 : vector<1x128xf32> to vector<256x128xf32>
    %9 = arith.mulf %7, %8 : vector<256x128xf32>
    %10 = vector.extract_strided_slice %3 {offsets = [0, 1], sizes = [256, 1], strides = [1, 1]} : vector<256x3xf32> to vector<256x1xf32>
    %11 = vector.extract_strided_slice %4 {offsets = [1, 0], sizes = [1, 128], strides = [1, 1]} : vector<3x128xf32> to vector<1x128xf32>
    %12 = vector.broadcast %10 : vector<256x1xf32> to vector<256x128xf32>
    %13 = vector.broadcast %11 : vector<1x128xf32> to vector<256x128xf32>
    %14 = arith.mulf %12, %13 : vector<256x128xf32>
    %15 = arith.addf %9, %14 : vector<256x128xf32>
    %16 = vector.extract_strided_slice %3 {offsets = [0, 2], sizes = [256, 1], strides = [1, 1]} : vector<256x3xf32> to vector<256x1xf32>
    %17 = vector.extract_strided_slice %4 {offsets = [2, 0], sizes = [1, 128], strides = [1, 1]} : vector<3x128xf32> to vector<1x128xf32>
    %18 = vector.broadcast %16 : vector<256x1xf32> to vector<256x128xf32>
    %19 = vector.broadcast %17 : vector<1x128xf32> to vector<256x128xf32>
    %20 = arith.mulf %18, %19 : vector<256x128xf32>
    %21 = arith.addf %15, %20 : vector<256x128xf32>
    %cst = arith.constant 5.000000e-01 : f32
    %22 = vector.broadcast %cst : f32 to vector<256x128xf32>
    %23 = arith.addf %21, %22 : vector<256x128xf32>
    %24 = math.floor %23 : vector<256x128xf32>
    %25 = arith.subf %21, %24 : vector<256x128xf32>
    %cst_4 = arith.constant 6.28318548 : f32
    %26 = vector.broadcast %cst_4 : f32 to vector<256x128xf32>
    %27 = arith.mulf %25, %26 : vector<256x128xf32>
    %28 = math.cos %27 : vector<256x128xf32>
    %29 = math.sin %27 : vector<256x128xf32>
    %c0_5 = arith.constant 0 : index
    %c0_6 = arith.constant 0 : index
    %30 = vector.load %arg4[%c0_5, %c0_6] : memref<8x256xf32, #tpu.memory_space<vmem>>, vector<8x256xf32>
    %c0_7 = arith.constant 0 : index
    %c0_8 = arith.constant 0 : index
    %31 = vector.load %arg5[%c0_7, %c0_8] : memref<8x256xf32, #tpu.memory_space<vmem>>, vector<8x256xf32>
    %c0_9 = arith.constant 0 : index
    %c0_10 = arith.constant 0 : index
    %32 = vector.load %arg7[%c0_9, %c0_10] : memref<8x128xf32, #tpu.memory_space<vmem>>, vector<8x128xf32>
    %cst_11 = arith.constant dense<0.000000e+00> : vector<8x128xf32>
    %33 = tpu.matmul %30, %28, %cst_11 {dimension_numbers = #tpu.dot_dimension_numbers<[1], [0], [0], [1], [0, 0, 1, 1], [], []>} : vector<8x256xf32>, vector<256x128xf32>, vector<8x128xf32> -> vector<8x128xf32>
    %cst_12 = arith.constant dense<0.000000e+00> : vector<8x128xf32>
    %34 = tpu.matmul %31, %29, %cst_12 {dimension_numbers = #tpu.dot_dimension_numbers<[1], [0], [0], [1], [0, 0, 1, 1], [], []>} : vector<8x256xf32>, vector<256x128xf32>, vector<8x128xf32> -> vector<8x128xf32>
    %35 = arith.addf %33, %34 : vector<8x128xf32>
    %36 = arith.addf %32, %35 : vector<8x128xf32>
    %c0_13 = arith.constant 0 : index
    %c0_14 = arith.constant 0 : index
    %37 = vector.load %arg7[%c0_13, %c0_14] : memref<8x128xf32, #tpu.memory_space<vmem>>, vector<8x128xf32>
    tpu.vector_store %arg7[%c0_13, %c0_14], %36 {strides = array<i32>} : memref<8x128xf32, #tpu.memory_space<vmem>>, vector<8x128xf32>,
    %c0_15 = arith.constant 0 : index
    %c0_16 = arith.constant 0 : index
    %38 = vector.load %arg8[%c0_15, %c0_16] : memref<8x128xf32, #tpu.memory_space<vmem>>, vector<8x128xf32>
    %cst_17 = arith.constant dense<0.000000e+00> : vector<8x128xf32>
    %39 = tpu.matmul %31, %28, %cst_17 {dimension_numbers = #tpu.dot_dimension_numbers<[1], [0], [0], [1], [0, 0, 1, 1], [], []>} : vector<8x256xf32>, vector<256x128xf32>, vector<8x128xf32> -> vector<8x128xf32>
    %cst_18 = arith.constant dense<0.000000e+00> : vector<8x128xf32>
    %40 = tpu.matmul %30, %29, %cst_18 {dimension_numbers = #tpu.dot_dimension_numbers<[1], [0], [0], [1], [0, 0, 1, 1], [], []>} : vector<8x256xf32>, vector<256x128xf32>, vector<8x128xf32> -> vector<8x128xf32>
    %41 = arith.subf %39, %40 : vector<8x128xf32>
    %42 = arith.addf %38, %41 : vector<8x128xf32>
    %c0_19 = arith.constant 0 : index
    %c0_20 = arith.constant 0 : index
    %43 = vector.load %arg8[%c0_19, %c0_20] : memref<8x128xf32, #tpu.memory_space<vmem>>, vector<8x128xf32>
    tpu.vector_store %arg8[%c0_19, %c0_20], %42 {strides = array<i32>} : memref<8x128xf32, #tpu.memory_space<vmem>>, vector<8x128xf32>,
    %c0_i32_21 = arith.constant 0 : i32
    %44 = arith.cmpi eq, %arg1, %c0_i32_21 : i32
    %45 = arith.extui %44 : i1 to i32
    %c0_i32_22 = arith.constant 0 : i32
    %46 = arith.cmpi ne, %45, %c0_i32_22 : i32
    scf.if %46 {
      %c0_23 = arith.constant 0 : index
      %c0_24 = arith.constant 0 : index
      %47 = vector.load %arg6[%c0_23, %c0_24] : memref<2x128xf32, #tpu.memory_space<vmem>>, vector<2x128xf32>
      %48 = vector.extract_strided_slice %47 {offsets = [0, 0], sizes = [1, 128], strides = [1, 1]} : vector<2x128xf32> to vector<1x128xf32>
      %49 = vector.extract_strided_slice %47 {offsets = [1, 0], sizes = [1, 128], strides = [1, 1]} : vector<2x128xf32> to vector<1x128xf32>
      %c0_25 = arith.constant 0 : index
      %c0_26 = arith.constant 0 : index
      %50 = vector.load %arg7[%c0_25, %c0_26] : memref<8x128xf32, #tpu.memory_space<vmem>>, vector<8x128xf32>
      %c0_27 = arith.constant 0 : index
      %c0_28 = arith.constant 0 : index
      %51 = vector.load %arg8[%c0_27, %c0_28] : memref<8x128xf32, #tpu.memory_space<vmem>>, vector<8x128xf32>
      %52 = vector.broadcast %48 : vector<1x128xf32> to vector<8x128xf32>
      %53 = arith.mulf %50, %52 : vector<8x128xf32>
      %54 = vector.broadcast %49 : vector<1x128xf32> to vector<8x128xf32>
      %55 = arith.mulf %51, %54 : vector<8x128xf32>
      %56 = arith.addf %53, %55 : vector<8x128xf32>
      %c0_29 = arith.constant 0 : index
      %c0_30 = arith.constant 0 : index
      %57 = vector.load %arg7[%c0_29, %c0_30] : memref<8x128xf32, #tpu.memory_space<vmem>>, vector<8x128xf32>
      tpu.vector_store %arg7[%c0_29, %c0_30], %56 {strides = array<i32>} : memref<8x128xf32, #tpu.memory_space<vmem>>, vector<8x128xf32>,
      %58 = vector.broadcast %48 : vector<1x128xf32> to vector<8x128xf32>
      %59 = arith.mulf %51, %58 : vector<8x128xf32>
      %60 = vector.broadcast %49 : vector<1x128xf32> to vector<8x128xf32>
      %61 = arith.mulf %50, %60 : vector<8x128xf32>
      %62 = arith.subf %59, %61 : vector<8x128xf32>
      %c0_31 = arith.constant 0 : index
      %c0_32 = arith.constant 0 : index
      %63 = vector.load %arg8[%c0_31, %c0_32] : memref<8x128xf32, #tpu.memory_space<vmem>>, vector<8x128xf32>
      tpu.vector_store %arg8[%c0_31, %c0_32], %62 {strides = array<i32>} : memref<8x128xf32, #tpu.memory_space<vmem>>, vector<8x128xf32>,
    } else {
    }
    return
  }
  func.func @transform_0(%arg0: i32, %arg1: i32) -> (i32, i32) {
    %c0_i32 = arith.constant 0 : i32
    %c0_i32_0 = arith.constant 0 : i32
    return %arg1, %c0_i32 : i32, i32
  }
  func.func @transform_1(%arg0: i32, %arg1: i32) -> (i32, i32) {
    %c0_i32 = arith.constant 0 : i32
    %c0_i32_0 = arith.constant 0 : i32
    return %c0_i32, %arg0 : i32, i32
  }
  func.func @transform_2(%arg0: i32, %arg1: i32) -> (i32, i32) {
    %c0_i32 = arith.constant 0 : i32
    %c0_i32_0 = arith.constant 0 : i32
    return %c0_i32, %arg1 : i32, i32
  }
  func.func @transform_3(%arg0: i32, %arg1: i32) -> (i32, i32) {
    %c0_i32 = arith.constant 0 : i32
    %c0_i32_0 = arith.constant 0 : i32
    return %c0_i32, %arg1 : i32, i32
  }
  func.func @transform_4(%arg0: i32, %arg1: i32) -> (i32, i32) {
    %c0_i32 = arith.constant 0 : i32
    %c0_i32_0 = arith.constant 0 : i32
    return %c0_i32, %arg0 : i32, i32
  }
  func.func @transform_5(%arg0: i32, %arg1: i32) -> (i32, i32) {
    %c0_i32 = arith.constant 0 : i32
    %c0_i32_0 = arith.constant 0 : i32
    return %c0_i32, %arg0 : i32, i32
  }
  func.func @transform_6(%arg0: i32, %arg1: i32) -> (i32, i32) {
    %c0_i32 = arith.constant 0 : i32
    %c0_i32_0 = arith.constant 0 : i32
    return %c0_i32, %arg0 : i32, i32
  }
}

</mosaic_0001>

<bundles_post_ra>
// kernel: custom-call
= control target key start
LH: loop header
LB: loop body
LE: loop exit
PB: predicated region body
PF: predicated region fallthrough
CT: control target
= control target key end

     0   :  { %2 = vsyncpa [#allocation0], 0  ;;  %s47_s0 = inlined_call_operand.hbm [shape: c64[2,16,16], index: 0, kind: input, shape index: {}]   ;;  %s48_s1 = inlined_call_operand.vmem [shape: f32[2,16,16], index: 1, kind: output, shape index: {}]  }
   0x1   :  { %s3_s8 = sshll.u32 %s48_s1, 4  ;;  %s4_s8 = int_to_ptr.vmem [resolvable:$true] %s3_s8 }
   0x2   :  { %s17_s9 = scalar_lea.vmem %s4_s8, 512  ;;  %p22_p1 = scmp.lt.s32.totalorder %s4_s8, %s4_s8 }
   0x3   :  { %p18_p0 = scmp.ne.s32.totalorder %s4_s8, %s17_s9  ;;  %p23_p2 = scmp.lt.s32.totalorder %s17_s9, %s17_s9 }
   0x5   :  { %p24_p3 = por %p23_p2, %p22_p1 }
   0x7   :  { %p25_p4 = pnand %p24_p3, %p18_p0 }
   0x9   :  { %28 = shalt.err (!%p25_p4)  }
   0xa   :  { %6 = dma.hbm_to_vmem [thread:$0]  %s47_s0, 512, %s4_s8, [#allocation0] }
   0xb   :  { %29 = dma.done.wait [#allocation0], 512  }
   0xc   :  { %30 = vsyncadd [#allocation0], 4294966784 }
   0xd   :  { %8 = vsyncpa [#allocation0], 1 }

// kernel: custom-call.1
= control target key start
LH: loop header
LB: loop body
LE: loop exit
PB: predicated region body
PF: predicated region fallthrough
CT: control target
= control target key end

     0   :  { %s51_s0 = inlined_call_operand.hbm [shape: c64[2,16,16], index: 0, kind: input, shape index: {}]   ;;  %s52_s1 = inlined_call_operand.vmem [shape: f32[2,16,16], index: 1, kind: output, shape index: {}]  }
   0x1   :  { %s2_s8 = scalar_lea.hbm %s51_s0, 512 }
   0x2   :  { %3 = vsyncpa [#allocation0], 0  ;;  %s4_s11 = sshll.u32 %s52_s1, 4  ;;  %s5_s11 = int_to_ptr.vmem [resolvable:$true] %s4_s11 }
   0x3   :  { %s20_s12 = scalar_lea.vmem %s5_s11, 512  ;;  %p25_p1 = scmp.lt.s32.totalorder %s5_s11, %s5_s11 }
   0x4   :  { %p21_p0 = scmp.ne.s32.totalorder %s5_s11, %s20_s12  ;;  %p26_p2 = scmp.lt.s32.totalorder %s20_s12, %s20_s12 }
   0x6   :  { %p27_p3 = por %p26_p2, %p25_p1 }
   0x8   :  { %p28_p4 = pnand %p27_p3, %p21_p0 }
   0xa   :  { %31 = shalt.err (!%p28_p4)  }
   0xb   :  { %7 = dma.hbm_to_vmem [thread:$0]  %s2_s8, 512, %s5_s11, [#allocation0] }
   0xc   :  { %33 = dma.done.wait [#allocation0], 512  }
   0xd   :  { %34 = vsyncadd [#allocation0], 4294966784 }
   0xe   :  { %9 = vsyncpa [#allocation0], 1 }

// kernel: custom-call.2
= control target key start
LH: loop header
LB: loop body
LE: loop exit
PB: predicated region body
PF: predicated region fallthrough
CT: control target
= control target key end

     0   :  { %s92_s0 = inlined_call_operand.vmem [shape: f32[2,128], index: 0, kind: input, shape index: {}]   ;;  %s93_s1 = inlined_call_operand.vmem [shape: f32[2,128], index: 1, kind: input, shape index: {}]   ;;  %s94_s2 = inlined_call_operand.hbm [shape: c64[2,128], index: 2, kind: output, shape index: {}]  }
   0x1   :  { %s3_s11 = scalar_lea.hbm %s94_s2, 32 }
   0x2   :  { %4 = vsyncpa [#allocation0], 0  ;;  %s5_s14 = sshll.u32 %s92_s0, 4  ;;  %s6_s14 = int_to_ptr.vmem [resolvable:$true] %s5_s14 }
   0x3   :  { %s18_s15 = scalar_lea.vmem %s6_s14, 32  ;;  %p23_p1 = scmp.lt.s32.totalorder %s6_s14, %s6_s14 }
   0x4   :  { %p19_p0 = scmp.ne.s32.totalorder %s6_s14, %s18_s15  ;;  %p24_p2 = scmp.lt.s32.totalorder %s18_s15, %s18_s15 }
   0x6   :  { %p25_p3 = por %p24_p2, %p23_p1 }
   0x8   :  { %p26_p4 = pnand %p25_p3, %p19_p0 }
   0xa   :  { %29 = shalt.err (!%p26_p4)  }
   0xb   :  { %8 = dma.vmem_to_hbm [thread:$0]  %s6_s14, 32, %s94_s2, [#allocation0] }
   0xc   :  { %61 = dma.done.wait [#allocation0], 32  }
   0xd   :  { %62 = vsyncadd [#allocation0], 4294967264 }
   0xe   :  { %10 = vsyncpa [#allocation0], 1 }
   0xf   :  { %11 = vsyncpa [#allocation1], 0  ;;  %s12_s0 = sshll.u32 %s93_s1, 4  ;;  %s13_s0 = int_to_ptr.vmem [resolvable:$true] %s12_s0 }
  0x10   :  { %s38_s20 = scalar_lea.vmem %s13_s0, 32  ;;  %p43_p6 = scmp.lt.s32.totalorder %s13_s0, %s13_s0 }
  0x11   :  { %p39_p5 = scmp.ne.s32.totalorder %s13_s0, %s38_s20  ;;  %p44_p7 = scmp.lt.s32.totalorder %s38_s20, %s38_s20 }
  0x13   :  { %p45_p8 = por %p44_p7, %p43_p6 }
  0x15   :  { %p46_p9 = pnand %p45_p8, %p39_p5 }
  0x17   :  { %49 = shalt.err (!%p46_p9)  }
  0x18   :  { %15 = dma.vmem_to_hbm [thread:$0]  %s13_s0, 32, %s3_s11, [#allocation1] }
  0x19   :  { %63 = dma.done.wait [#allocation1], 32  }
  0x1a   :  { %64 = vsyncadd [#allocation1], 4294967264 }
  0x1b   :  { %17 = vsyncpa [#allocation1], 1 }

// kernel: type3_nufft_forward.1
= control target key start
LH: loop header
LB: loop body
LE: loop exit
PB: predicated region body
PF: predicated region fallthrough
CT: control target
= control target key end

     0   :  { %v13541_v0 = vmov 0   ;;  %v13547_v4 = vmov 1   ;;  %v13558_v9 = vmov 2   ;;  %v221_v36 = vlaneseq  ;;  %s13532_s0 = inlined_call_operand.vmem [shape: f32[256,3], index: 0, kind: input, shape index: {}]   ;;  %s13533_s1 = inlined_call_operand.vmem [shape: f32[3,128], index: 1, kind: input, shape index: {}]   ;;  %s13534_s3 = inlined_call_operand.vmem [shape: f32[8,256], index: 3, kind: input, shape index: {}]   ;;  %s13535_s2 = inlined_call_operand.vmem [shape: f32[8,256], index: 2, kind: input, shape index: {}]   ;;  %s13536_s4 = inlined_call_operand.vmem [shape: f32[2,128], index: 4, kind: input, shape index: {}]   ;;  %s13537_s5 = inlined_call_operand.vmem [shape: f32[8,128], index: 5, kind: output, shape index: {0}]   ;;  %s13538_s6 = inlined_call_operand.vmem [shape: f32[8,128], index: 6, kind: output, shape index: {1}]  }
   0x1   :  { %8257 = vset.pattern.permute.xlu1 %v13541_v0  ;;  %8256 = vset.pattern.permute.xlu0 %v13541_v0  ;;  %v59_v1 = vld [vmem:[%s13532_s0 + $0xf8] sm:$0xff]  ;;  %v8499_v3 = vld [vmem:[%s13532_s0 + $0x70] sm:$0xff]  ;;  %v57_v5 = vld [vmem:[%s13532_s0 + $0xe8] sm:$0xff] }
   0x2   :  { %v43_v2 = vld [vmem:[%s13532_s0 + $0x78] sm:$0xff]  ;;  %218 = vperm.xlu0 %8256, %v59_v1   ;;  %v8509_v6 = vld [vmem:[%s13532_s0 + $0xf0] sm:$0xff]  ;;  %v8529_v10 = vld [vmem:[%s13532_s0 + $0x48] sm:$0xff]  ;;  %v8684_v39 = vshrl.u32 %v221_v36, 7 }
   0x3   :  { %138 = vperm.xlu1 %8257, %v43_v2   ;;  %v8515_v7 = vld [vmem:[%s13532_s0 + $0xd8] sm:$0xff]  ;;  %v8537_v11 = vld [vmem:[%s13532_s0 + $0xc0] sm:$0xff]  ;;  %v8544_v12 = vld [vmem:[%s13532_s0 + $0xb0] sm:$0xff] }
   0x4   :  { %v8522_v8 = vld [vmem:[%s13532_s0 + $0x58] sm:$0xff]  ;;  %v8551_v13 = vld [vmem:[%s13532_s0 + $0x30] sm:$0xff]  ;;  %v41_v14 = vld [vmem:[%s13532_s0 + $0x68] sm:$0xff]  ;;  %13726 = vst [vmem:[#allocation4_spill] sm:$0xff] %v8684_v39  ;;  %v13539_v41 = vsub.s32 1, %v8684_v39  ;;  %v13540_v43 = vsub.s32 0, %v8684_v39 }
   0x5   :  { %v8560_v15 = vld [vmem:[%s13532_s0 + $0x20] sm:$0xff]  ;;  %v8567_v16 = vld [vmem:[%s13532_s0 + $0x98] sm:$0xff]  ;;  %v8574_v17 = vld [vmem:[%s13532_s0 + $0x88] sm:$0xff]  ;;  %v583_v48 = vsub.s32 2, %v8684_v39 }
   0x6   :  { %133 = vperm.xlu0 %8256, %v8499_v3   ;;  %v56_v18 = vld [vmem:[%s13532_s0 + $0xe0] sm:$0xff]  ;;  %v8584_v19 = vld [vmem:[%s13532_s0 + $0x8] sm:$0xff]  ;;  %v38_v21 = vld [vmem:[%s13532_s0 + $0x50] sm:$0xff] }
   0x7   :  { %8258 = vset.pattern.permute.xlu1 %v13547_v4  ;;  %13724 = vst [vmem:[#allocation2_spill] sm:$0xff] %v8584_v19  ;;  %v40_v20 = vld [vmem:[%s13532_s0 + $0x60] sm:$0xff]  ;;  %v53_v22 = vld [vmem:[%s13532_s0 + $0xc8] sm:$0xff]  ;;  %v8608_v23 = vld [vmem:[%s13532_s0 + $0xb8] sm:$0xff] }
   0x8   :  { %318 = vperm.xlu1 %8258, %v43_v2   ;;  %v54_v24 = vld [vmem:[%s13532_s0 + $0xd0] sm:$0xff]  ;;  %v8618_v25 = vld [vmem:[%s13532_s0 + $0x38] sm:$0xff]  ;;  %v8625_v26 = vld [vmem:[%s13532_s0 + $0x28] sm:$0xff] }
   0x9   :  { %v8632_v27 = vld [vmem:[%s13532_s0 + $0xa0] sm:$0xff]  ;;  %v8639_v28 = vld [vmem:[%s13532_s0 + $0x90] sm:$0xff] }
   0xa   :  { %208 = vperm.xlu0 %8256, %v57_v5   ;;  %v8646_v29 = vld [vmem:[%s13532_s0 + $0x10] sm:$0xff]  ;;  %v8653_v30 = vld [vmem:[%s13532_s0] sm:$0xff] }
   0xb   :  { %13725 = vst [vmem:[#allocation3_spill] sm:$0xff] %v8653_v30  ;;  %v36_v31 = vld [vmem:[%s13532_s0 + $0x40] sm:$0xff] }
   0xc   :  { %8259 = vset.pattern.permute.xlu1 %v13541_v0  ;;  %v60_v45 = vld [vmem:[%s13533_s1] sm:$0x7] }
   0xd   :  { %213 = vperm.xlu1 %8259, %v8509_v6   ;;  %v8703_v46 = vrot.slane %v60_v45, %v13539_v41  ;;  %v8708_v47 = vrot.slane %v60_v45, %v13540_v43  ;;  %v8720_v53 = vrot.slane %v60_v45, %v583_v48  ;;  %v13555_v43 = vmov 2475754826  }
   0xe   :  { %198 = vperm.xlu0 %8256, %v8515_v7  }
  0x11   :  { %8260 = vset.pattern.permute.xlu1 %v13558_v9 }
  0x12   :  { %578 = vperm.xlu1 %8260, %v59_v1   ;;  %118 = vperm.xlu0 %8256, %v8522_v8  }
  0x16   :  { %8261 = vset.pattern.permute.xlu1 %v13547_v4  ;;  %108 = vperm.xlu0 %8256, %v8529_v10  }
  0x17   :  { %314 = vperm.xlu1 %8261, %v8499_v3  }
  0x1a   :  { %183 = vperm.xlu0 %8256, %v8537_v11  }
  0x1b   :  { %8262 = vset.pattern.permute.xlu1 %v13558_v9 }
  0x1c   :  { %514 = vperm.xlu1 %8262, %v43_v2  }
  0x1e   :  { %173 = vperm.xlu0 %8256, %v8544_v12  }
  0x20   :  { %8263 = vset.pattern.permute.xlu1 %v13547_v4 }
  0x21   :  { %374 = vperm.xlu1 %8263, %v57_v5  }
  0x22   :  { %93 = vperm.xlu0 %8256, %v8551_v13  }
  0x25   :  { %8264 = vset.pattern.permute.xlu1 %v13541_v0 }
  0x26   :  { %128 = vperm.xlu1 %8264, %v41_v14   ;;  %83 = vperm.xlu0 %8256, %v8560_v15  }
  0x2a   :  { %8265 = vset.pattern.permute.xlu1 %v13547_v4  ;;  %158 = vperm.xlu0 %8256, %v8567_v16  }
  0x2b   :  { %310 = vperm.xlu1 %8265, %v41_v14  }
  0x2e   :  { %148 = vperm.xlu0 %8256, %v8574_v17  }
  0x2f   :  { %8266 = vset.pattern.permute.xlu1 %v13541_v0 }
  0x30   :  { %203 = vperm.xlu1 %8266, %v56_v18  }
  0x32   :  { %68 = vperm.xlu0 %8256, %v8584_v19  }
  0x34   :  { %8267 = vset.pattern.permute.xlu1 %v13558_v9 }
  0x35   :  { %570 = vperm.xlu1 %8267, %v57_v5  }
  0x36   :  { %8308 = vset.pattern.permute.xlu0 %v13547_v4 }
  0x37   :  { %382 = vperm.xlu0 %8308, %v59_v1  }
  0x39   :  { %8268 = vset.pattern.permute.xlu1 %v13541_v0 }
  0x3a   :  { %123 = vperm.xlu1 %8268, %v40_v20  }
  0x3b   :  { %378 = vperm.xlu0 %8308, %v8509_v6  }
  0x3e   :  { %8269 = vset.pattern.permute.xlu1 %v13558_v9 }
  0x3f   :  { %506 = vperm.xlu1 %8269, %v41_v14   ;;  %370 = vperm.xlu0 %8308, %v56_v18   ;;  %v8756_v14 = vld [vmem:[%s13532_s0 + $0xa8] sm:$0xff] }
  0x43   :  { %8270 = vset.pattern.permute.xlu1 %v13547_v4  ;;  %306 = vperm.xlu0 %8308, %v40_v20  }
  0x44   :  { %366 = vperm.xlu1 %8270, %v8515_v7  }
  0x47   :  { %298 = vperm.xlu0 %8308, %v38_v21  }
  0x48   :  { %8271 = vset.pattern.permute.xlu1 %v13558_v9 }
  0x49   :  { %566 = vperm.xlu1 %8271, %v56_v18  }
  0x4b   :  { %358 = vperm.xlu0 %8308, %v53_v22  }
  0x4d   :  { %8272 = vset.pattern.permute.xlu1 %v13547_v4 }
  0x4e   :  { %302 = vperm.xlu1 %8272, %v8522_v8  }
  0x4f   :  { %350 = vperm.xlu0 %8308, %v8608_v23  }
  0x52   :  { %8273 = vset.pattern.permute.xlu1 %v13541_v0 }
  0x53   :  { %193 = vperm.xlu1 %8273, %v54_v24   ;;  %286 = vperm.xlu0 %8308, %v8618_v25  }
  0x57   :  { %8274 = vset.pattern.permute.xlu1 %v13547_v4  ;;  %278 = vperm.xlu0 %8308, %v8625_v26  }
  0x58   :  { %362 = vperm.xlu1 %8274, %v54_v24  }
  0x5b   :  { %338 = vperm.xlu0 %8308, %v8632_v27  }
  0x5c   :  { %8275 = vset.pattern.permute.xlu1 %v13541_v0 }
  0x5d   :  { %113 = vperm.xlu1 %8275, %v38_v21  }
  0x5f   :  { %330 = vperm.xlu0 %8308, %v8639_v28  }
  0x61   :  { %8276 = vset.pattern.permute.xlu1 %v13558_v9 }
  0x62   :  { %498 = vperm.xlu1 %8276, %v8522_v8  }
  0x63   :  { %266 = vperm.xlu0 %8308, %v8646_v29  }
  0x66   :  { %8277 = vset.pattern.permute.xlu1 %v13541_v0 }
  0x67   :  { %188 = vperm.xlu1 %8277, %v53_v22   ;;  %258 = vperm.xlu0 %8308, %v8653_v30  }
  0x6b   :  { %8278 = vset.pattern.permute.xlu1 %v13558_v9  ;;  %8313 = vset.pattern.permute.xlu0 %v13558_v9 }
  0x6c   :  { %558 = vperm.xlu1 %8278, %v54_v24   ;;  %574 = vperm.xlu0 %8313, %v8509_v6  }
  0x70   :  { %8279 = vset.pattern.permute.xlu1 %v13547_v4  ;;  %510 = vperm.xlu0 %8313, %v8499_v3  }
  0x71   :  { %294 = vperm.xlu1 %8279, %v8529_v10  }
  0x74   :  { %502 = vperm.xlu0 %8313, %v40_v20  }
  0x75   :  { %8280 = vset.pattern.permute.xlu1 %v13558_v9 }
  0x76   :  { %494 = vperm.xlu1 %8280, %v38_v21  }
  0x78   :  { %562 = vperm.xlu0 %8313, %v8515_v7  }
  0x7a   :  { %8281 = vset.pattern.permute.xlu1 %v13547_v4 }
  0x7b   :  { %354 = vperm.xlu1 %8281, %v8537_v11  }
  0x7c   :  { %554 = vperm.xlu0 %8313, %v53_v22  }
  0x7d   :  { %v8670_v33 = vpop.permute.xlu0 %218 }
  0x7e   :  { %v139_v32 = vpop.permute.xlu1 %138 }
  0x7f   :  { %8282 = vset.pattern.permute.xlu1 %v13541_v0  ;;  %v240_v52 = vmul.f32 %v8708_v47, %v139_v32 }
  0x80   :  { %103 = vperm.xlu1 %8282, %v36_v31   ;;  %490 = vperm.xlu0 %8313, %v8529_v10  }
  0x81   :  { %v8674_v34 = vpop.permute.xlu0 %133 }
  0x83   :  { %v319_v35 = vpop.permute.xlu1 %318 }
  0x84   :  { %8283 = vset.pattern.permute.xlu1 %v13547_v4  ;;  %482 = vperm.xlu0 %8313, %v8618_v25   ;;  %v404_v51 = vmul.f32 %v8703_v46, %v319_v35 }
  0x85   :  { %290 = vperm.xlu1 %8283, %v36_v31   ;;  %v8678_v37 = vpop.permute.xlu0 %208 }
  0x86   :  { %v436_v56 = vadd.f32 %v404_v51, %v240_v52 }
  0x88   :  { %v8680_v38 = vpop.permute.xlu1 %213  ;;  %542 = vperm.xlu0 %8313, %v8544_v12  }
  0x89   :  { %8284 = vset.pattern.permute.xlu1 %v13541_v0  ;;  %v8687_v40 = vpop.permute.xlu0 %198 }
  0x8a   :  { %178 = vperm.xlu1 %8284, %v8608_v23  }
  0x8c   :  { %534 = vperm.xlu0 %8313, %v8632_v27  }
  0x8d   :  { %v8690_v42 = vpop.permute.xlu1 %578  ;;  %v8695_v44 = vpop.permute.xlu0 %118 }
  0x8e   :  { %8285 = vset.pattern.permute.xlu1 %v13558_v9  ;;  %v616_v35 = vmul.f32 %v8720_v53, %v8690_v42 }
  0x8f   :  { %550 = vperm.xlu1 %8285, %v8537_v11  }
  0x90   :  { %470 = vperm.xlu0 %8313, %v8560_v15  }
  0x91   :  { %v8713_v50 = vpop.permute.xlu0 %108 }
  0x92   :  { %v8711_v49 = vpop.permute.xlu1 %314 }
  0x93   :  { %8286 = vset.pattern.permute.xlu1 %v13541_v0 }
  0x94   :  { %98 = vperm.xlu1 %8286, %v8618_v25   ;;  %462 = vperm.xlu0 %8313, %v8646_v29  }
  0x95   :  { %v8722_v54 = vpop.permute.xlu0 %183 }
  0x97   :  { %v515_v55 = vpop.permute.xlu1 %514 }
  0x98   :  { %v600_v57 = vmul.f32 %v8720_v53, %v515_v55  ;;  %8287 = vset.pattern.permute.xlu1 %v13558_v9  ;;  %522 = vperm.xlu0 %8313, %v8574_v17  }
  0x99   :  { %486 = vperm.xlu1 %8287, %v36_v31   ;;  %v8727_v59 = vpop.permute.xlu0 %173 }
  0x9a   :  { %v632_v58 = vadd.f32 %v600_v57, %v436_v56 }
  0x9c   :  { %v664_v60 = vadd.f32 0.5, %v632_v58  ;;  %v8729_v61 = vpop.permute.xlu1 %374  ;;  %454 = vperm.xlu0 %8313, %v8653_v30  }
  0x9d   :  { %8288 = vset.pattern.permute.xlu1 %v13547_v4  ;;  %v8734_v63 = vpop.permute.xlu0 %93 }
  0x9e   :  { %v696_v62 = vfloor.f32 %v664_v60  ;;  %346 = vperm.xlu1 %8288, %v8544_v12   ;;  %v13543_v60 = vmov 1326507024  }
  0xa0   :  { %v728_v1 = vsub.f32 %v632_v58, %v696_v62 }
  0xa1   :  { %v8736_v2 = vpop.permute.xlu1 %128  ;;  %v8741_v5 = vpop.permute.xlu0 %83 }
  0xa2   :  { %v8738_v3 = vmul.f32 6.2831855, %v728_v1  ;;  %8289 = vset.pattern.permute.xlu1 %v13558_v9 }
  0xa3   :  { %546 = vperm.xlu1 %8289, %v8608_v23   ;;  %v256_v23 = vmul.f32 %v8708_v47, %v8670_v33 }
  0xa4   :  { %13727 = vst [vmem:[#allocation5_spill] sm:$0xff] %v8738_v3  ;;  %v2325_v6 = vand.u32 2139095040, %v8738_v3 }
  0xa5   :  { %v8747_v10 = vpop.permute.xlu0 %158 }
  0xa6   :  { %v2326_v7 = vshrl.u32 %v2325_v6, 23  ;;  %v8745_v8 = vpop.permute.xlu1 %310 }
  0xa7   :  { %8290 = vset.pattern.permute.xlu1 %v13547_v4 }
  0xa8   :  { %282 = vperm.xlu1 %8290, %v8551_v13   ;;  %v7782_v11 = vadd.s32 4294967169, %v2326_v7  ;;  %v13557_v7 = vand.u32 2147483647, %v8738_v3 }
  0xa9   :  { %v8751_v12 = vpop.permute.xlu0 %148 }
  0xaa   :  { %13728 = vst [vmem:[#allocation6_spill] sm:$0xff] %v8751_v12  ;;  %v2332_v20 = vadd.s32 1, %v7782_v11  ;;  %v13545_v11 = vmov 920167782  }
  0xab   :  { %v8758_v18 = vpop.permute.xlu1 %203 }
  0xac   :  { %8291 = vset.pattern.permute.xlu1 %v13541_v0  ;;  %vm2333_vm0 = vcmp.gt.s32.totalorder %v2332_v20, 0 }
  0xad   :  { %168 = vperm.xlu1 %8291, %v8756_v14   ;;  %v8762_v21 = vpop.permute.xlu0 %68  ;;  %v2334_v25 = vsel %vm2333_vm0, %v2332_v20, 0 }
  0xae   :  { %13729 = vst [vmem:[#allocation7_spill] sm:$0xff] %v8762_v21  ;;  %v2336_v45 = vand.u32 31, %v2334_v25 }
  0xb0   :  { %v571_v22 = vpop.permute.xlu1 %570  ;;  %v8779_v55 = vsub.s32 32, %v2336_v45  ;;  %v2351_v20 = vshll.u32 %v13545_v11, %v2336_v45 }
  0xb1   :  { %8292 = vset.pattern.permute.xlu1 %v13547_v4 }
  0xb2   :  { %342 = vperm.xlu1 %8292, %v8756_v14   ;;  %v383_v24 = vpop.permute.xlu0 %382  ;;  %v2352_v62 = vshrl.u32 %v13543_v60, %v8779_v55  ;;  %v2342_v60 = vshll.u32 %v13555_v43, %v2336_v45 }
  0xb3   :  { %v420_v31 = vmul.f32 %v8703_v46, %v383_v24 }
  0xb5   :  { %v8769_v32 = vpop.permute.xlu1 %123  ;;  %v452_v36 = vadd.f32 %v420_v31, %v256_v23  ;;  %v8799_v23 = vshrl.u32 %v2334_v25, 5  ;;  %v13553_v31 = vmov 2131351028  }
  0xb6   :  { %13730 = vst [vmem:[#allocation8_spill] sm:$0xff] %v8769_v32  ;;  %8293 = vset.pattern.permute.xlu1 %v13541_v0  ;;  %v8775_v48 = vpop.permute.xlu0 %378  ;;  %v13743_v32 = vmov 1326507024  }
  0xb7   :  { %88 = vperm.xlu1 %8293, %v8625_v26   ;;  %v648_v33 = vadd.f32 %v616_v35, %v452_v36  ;;  %v2343_v35 = vshrl.u32 %v13553_v31, %v8779_v55  ;;  %v13551_v36 = vmov 2102212464   ;;  %vm2357_vm1 = vcmp.lt.s32.totalorder %v8799_v23, 4 }
  0xb8   :  { %v2348_v25 = vshll.u32 %v13551_v36, %v2336_v45  ;;  %vm2354_vm2 = vcmp.lt.s32.totalorder %v8799_v23, 1  ;;  %vm2356_vm3 = vcmp.lt.s32.totalorder %v8799_v23, 3  ;;  %vm2355_vm5 = vcmp.lt.s32.totalorder %v8799_v23, 2 }
  0xb9   :  { %v680_v51 = vadd.f32 0.5, %v648_v33 }
  0xba   :  { %v8777_v52 = vpop.permute.xlu1 %506  ;;  %v8782_v56 = vpop.permute.xlu0 %370 }
  0xbb   :  { %8294 = vset.pattern.permute.xlu1 %v13558_v9  ;;  %v712_v57 = vfloor.f32 %v680_v51  ;;  %v418_v51 = vmul.f32 %v8703_v46, %v8729_v61  ;;  %v13565_v61 = vmov 683565275  }
  0xbc   :  { %478 = vperm.xlu1 %8294, %v8551_v13   ;;  %v2349_v13 = vshrl.u32 %v13545_v11, %v8779_v55  ;;  %v2345_v11 = vshll.u32 %v13553_v31, %v2336_v45  ;;  %v2339_v4 = vshll.u32 %v13565_v61, %v2336_v45  ;;  %v614_v31 = vmul.f32 %v8720_v53, %v571_v22 }
  0xbd   :  { %v744_v42 = vsub.f32 %v648_v33, %v712_v57  ;;  %v254_v33 = vmul.f32 %v8708_v47, %v8678_v37  ;;  %v2329_v37 = vand.u32 8388607, %v13557_v7  ;;  %v13734_v22 = vmov 1  }
  0xbe   :  { %v8785_v58 = vpop.permute.xlu0 %306  ;;  %v2350_v39 = vor.u32 %v2349_v13, %v2348_v25 }
  0xbf   :  { %v8789_v1 = vmul.f32 6.2831855, %v744_v42  ;;  %v8791_v6 = vpop.permute.xlu1 %366  ;;  %v2353_v42 = vor.u32 %v2352_v62, %v2351_v20  ;;  %v8822_v20 = vor.u32 %v2343_v35, %v2342_v60  ;;  %v2330_v60 = vor.u32 8388608, %v2329_v37 }
  0xc0   :  { %8295 = vset.pattern.permute.xlu1 %v13541_v0  ;;  %v2340_v0 = vshrl.u32 %v13555_v43, %v8779_v55  ;;  %v598_v37 = vmul.f32 %v8720_v53, %v8777_v52 }
  0xc1   :  { %13731 = vst [vmem:[#allocation9_spill] sm:$0xff] %v8789_v1  ;;  %163 = vperm.xlu1 %8295, %v8632_v27   ;;  %v3973_v24 = vand.u32 2139095040, %v8789_v1  ;;  %v2346_v27 = vshrl.u32 %v13551_v36, %v8779_v55  ;;  %v2367_v7 = vsel %vm2357_vm1, %v2353_v42, 1326507024  ;;  %v8871_v25 = vshll.u32 %v2330_v60, 8 }
  0xc2   :  { %v8810_v57 = vpop.permute.xlu0 %298  ;;  %v8832_v13 = vor.u32 %v2340_v0, %v2339_v4  ;;  %v2368_v4 = vsel %vm2356_vm3, %v2350_v39, %v2367_v7  ;;  %v253_v7 = vmul.f32 %v8708_v47, %v8758_v18  ;;  %v13738_v60 = vmov 2475754826  }
  0xc3   :  { %13732 = vst [vmem:[#allocation10_spill] sm:$0xff] %v8810_v57  ;;  %v3974_v41 = vshrl.u32 %v3973_v24, 23  ;;  %v8824_v24 = vor.u32 %v2346_v27, %v2345_v11 }
  0xc4   :  { %v567_v62 = vpop.permute.xlu1 %566 }
  0xc5   :  { %8296 = vset.pattern.permute.xlu1 %v13558_v9  ;;  %v7846_v36 = vadd.s32 4294967169, %v3974_v41  ;;  %v450_v9 = vadd.f32 %v418_v51, %v254_v33  ;;  %v402_v41 = vmul.f32 %v8703_v46, %v8745_v8  ;;  %v2366_v0 = vsel %vm2354_vm2, %v8822_v20, %v8824_v24 }
  0xc6   :  { %538 = vperm.xlu1 %8296, %v8756_v14   ;;  %v8828_v43 = vpop.permute.xlu0 %358  ;;  %v2363_v14 = vsel %vm2357_vm1, %v2350_v39, 920167782  ;;  %v238_v8 = vmul.f32 %v8708_v47, %v8736_v2  ;;  %v13562_v51 = vand.u32 2147483647, %v8789_v1  ;;  %v2362_v39 = vsel %vm2354_vm2, %v8832_v13, %v8822_v20 }
  0xc7   :  { %13733 = vst [vmem:[#allocation11_spill] sm:$0xff] %v8828_v43  ;;  %v3980_v45 = vadd.s32 1, %v7846_v36  ;;  %v8849_v11 = vadd.f32 %v614_v31, %v450_v9  ;;  %v2364_v9 = vsel %vm2356_vm3, %v8824_v24, %v2363_v14  ;;  %v13736_v14 = vmov 2  }
  0xc8   :  { %v434_v2 = vadd.f32 %v402_v41, %v238_v8  ;;  %v2365_v41 = vsel %vm2355_vm5, %v2362_v39, %v2364_v9  ;;  %v3977_v18 = vand.u32 8388607, %v13562_v51  ;;  %v13741_v51 = vmov 2102212464  }
  0xc9   :  { %vm3981_vm4 = vcmp.gt.s32.totalorder %v3980_v45, 0  ;;  %v8855_v33 = vpop.permute.xlu1 %302  ;;  %v8874_v42 = vadd.f32 0.5, %v8849_v11  ;;  %v13742_v43 = vmov 920167782  }
  0xca   :  { %8297 = vset.pattern.permute.xlu1 %v13734_v22  ;;  %v3982_v35 = vsel %vm3981_vm4, %v3980_v45, 0  ;;  %v8852_v36 = vpop.permute.xlu0 %350  ;;  %v417_v45 = vmul.f32 %v8703_v46, %v8782_v56  ;;  %v3978_v21 = vor.u32 8388608, %v3977_v18  ;;  %v2359_v18 = vsel %vm2357_vm1, %v8824_v24, 2102212464 }
  0xcb   :  { %274 = vperm.xlu1 %8297, %v8560_v15   ;;  %13735 = vst [vmem:[#allocation12_spill] sm:$0xff] %v8852_v36  ;;  %v3984_v27 = vand.u32 31, %v3982_v35  ;;  %v8867_v15 = vsel %vm2355_vm5, %v2366_v0, %v2368_v4  ;;  %v8894_v56 = vshrl.u32 %v3982_v35, 5  ;;  %v710_v3 = vfloor.f32 %v8874_v42 }
  0xcc   :  { %v8891_v52 = vmul.u32.u64.low %v8871_v25, %v8867_v15  ;;  %v8892_v8 = vmul.u32.u64.high %v8871_v25, %v8867_v15, %v8891_v52  ;;  %v613_v15 = vmul.f32 %v8720_v53, %v567_v62  ;;  %v13744_v42 = vmov 0  }
  0xcd   :  { %v3985_v31 = vsub.s32 32, %v3984_v27  ;;  %v3987_v30 = vshll.u32 %v13565_v61, %v3984_v27  ;;  %v3990_v19 = vshll.u32 %v13738_v60, %v3984_v27  ;;  %v3996_v36 = vshll.u32 %v13741_v51, %v3984_v27 }
  0xce   :  { %v8881_v0 = vpop.permute.xlu0 %286  ;;  %v8899_v9 = vpop.permute.xlu1 %193  ;;  %vm4002_vm6 = vcmp.lt.s32.totalorder %v8894_v56, 1  ;;  %vm4005_vm7 = vcmp.lt.s32.totalorder %v8894_v56, 4  ;;  %vm4004_vm8 = vcmp.lt.s32.totalorder %v8894_v56, 3  ;;  %vm4003_vm9 = vcmp.lt.s32.totalorder %v8894_v56, 2 }
  0xcf   :  { %8298 = vset.pattern.permute.xlu1 %v13736_v14  ;;  %13737 = vst [vmem:[#allocation13_spill] sm:$0xff] %v8881_v0  ;;  %v3988_v4 = vshrl.u32 %v13738_v60, %v3985_v31  ;;  %v13739_v0 = vmov 2131351028   ;;  %13740 = vst [vmem:[#allocation14_spill] sm:$0xff] %v8899_v9  ;;  %v3994_v1 = vshrl.u32 %v13741_v51, %v3985_v31  ;;  %v3997_v57 = vshrl.u32 %v13742_v43, %v3985_v31 }
  0xd0   :  { %474 = vperm.xlu1 %8298, %v8625_v26   ;;  %v3991_v39 = vshrl.u32 %v13739_v0, %v3985_v31  ;;  %v3993_v26 = vshll.u32 %v13739_v0, %v3984_v27  ;;  %v4000_v61 = vshrl.u32 %v13743_v32, %v3985_v31  ;;  %v3999_v0 = vshll.u32 %v13742_v43, %v3984_v27 }
  0xd1   :  { %v3989_v35 = vor.u32 %v3988_v4, %v3987_v30  ;;  %v3998_v12 = vor.u32 %v3997_v57, %v3996_v36  ;;  %v449_v51 = vadd.f32 %v417_v45, %v253_v7  ;;  %v8923_v57 = vld [vmem:[%s13532_s0 + $0x18] sm:$0xff]  ;;  %v4018_v7 = vshll.u32 %v3978_v21, 8 }
  0xd2   :  { %v3992_v52 = vor.u32 %v3991_v39, %v3990_v19  ;;  %v8908_v60 = vpop.permute.xlu0 %278  ;;  %v3995_v9 = vor.u32 %v3994_v1, %v3993_v26  ;;  %v8914_v62 = vmul.u32.u64.low %v8871_v25, %v2365_v41  ;;  %v8915_v30 = vmul.u32.u64.high %v8871_v25, %v2365_v41, %v8914_v62 }
  0xd3   :  { %v630_v19 = vadd.f32 %v598_v37, %v434_v2  ;;  %v4001_v4 = vor.u32 %v4000_v61, %v3999_v0  ;;  %v645_v1 = vadd.f32 %v613_v15, %v449_v51  ;;  %v4011_v27 = vsel %vm4005_vm7, %v3998_v12, 920167782  ;;  %v8930_v2 = vpop.permute.xlu1 %362 }
  0xd4   :  { %8299 = vset.pattern.permute.xlu1 %v13734_v22  ;;  %v4010_v36 = vsel %vm4002_vm6, %v3989_v35, %v3992_v52  ;;  %v4007_v61 = vsel %vm4005_vm7, %v3995_v9, 2102212464  ;;  %v4012_v51 = vsel %vm4004_vm8, %v3995_v9, %v4011_v27  ;;  %v13745_v37 = vmov 683565275  }
  0xd5   :  { %334 = vperm.xlu1 %8299, %v8567_v16   ;;  %v3986_v45 = vshrl.u32 %v13745_v37, %v3985_v31  ;;  %v4013_v0 = vsel %vm4003_vm9, %v4010_v36, %v4012_v51  ;;  %v4014_v41 = vsel %vm4002_vm6, %v3992_v52, %v3995_v9  ;;  %v662_v39 = vadd.f32 0.5, %v630_v19 }
  0xd6   :  { %v8946_v26 = vpop.permute.xlu0 %338  ;;  %v4015_v21 = vsel %vm4005_vm7, %v4001_v4, 1326507024  ;;  %v8951_v15 = vmul.u32.u64.low %v4018_v7, %v4013_v0  ;;  %v8952_v31 = vmul.u32.u64.high %v4018_v7, %v4013_v0, %v8951_v15  ;;  %v4008_v9 = vsel %vm4004_vm8, %v3992_v52, %v4007_v61 }
  0xd7   :  { %v4006_v36 = vsel %vm4002_vm6, %v3986_v45, %v3989_v35  ;;  %v4016_v24 = vsel %vm4004_vm8, %v3998_v12, %v4015_v21  ;;  %v2338_v27 = vshrl.u32 %v13745_v37, %v8779_v55  ;;  %v742_v51 = vsub.f32 %v8849_v11, %v710_v3 }
  0xd8   :  { %v677_v32 = vadd.f32 0.5, %v645_v1  ;;  %v4017_v4 = vsel %vm4003_vm9, %v4014_v41, %v4016_v24  ;;  %v2360_v12 = vsel %vm2356_vm3, %v8822_v20, %v2359_v18  ;;  %v694_v52 = vfloor.f32 %v662_v39  ;;  %v8975_v61 = vpop.permute.xlu1 %113 }
  0xd9   :  { %8300 = vset.pattern.permute.xlu1 %v13744_v42  ;;  %v8966_v0 = vmul.u32.u64.low %v4018_v7, %v4017_v4  ;;  %v8967_v43 = vmul.u32.u64.high %v4018_v7, %v4017_v4, %v8966_v0  ;;  %v2358_v35 = vsel %vm2354_vm2, %v2338_v27, %v8832_v13  ;;  %v4009_v3 = vsel %vm4003_vm9, %v4006_v36, %v4008_v9 }
  0xda   :  { %78 = vperm.xlu1 %8300, %v8923_v57   ;;  %v4028_v55 = vadd.s32 1, %v8952_v31  ;;  %v2380_v11 = vadd.s32 1, %v8915_v30  ;;  %vm2379_vm10 = vc.u32 %v8892_v8, %v8914_v62  ;;  %v8985_v13 = vmul.f32 6.2831855, %v742_v51  ;;  %v8987_v45 = vpop.permute.xlu0 %330 }
  0xdb   :  { %v709_v20 = vfloor.f32 %v677_v32  ;;  %v2361_v41 = vsel %vm2355_vm5, %v2358_v35, %v2360_v12  ;;  %v4025_v18 = vmul.u32 %v4018_v7, %v4009_v3  ;;  %vm4027_vm11 = vc.u32 %v8967_v43, %v8951_v15 }
  0xdc   :  { %13746 = vst [vmem:[#allocation15_spill] sm:$0xff] %v8985_v13  ;;  %v726_v56 = vsub.f32 %v630_v19, %v694_v52  ;;  %v4029_v39 = vsel %vm4027_vm11, %v4028_v55, %v8952_v31  ;;  %v2381_v21 = vsel %vm2379_vm10, %v2380_v11, %v8915_v30  ;;  %v2377_v9 = vmul.u32 %v8871_v25, %v2361_v41 }
  0xdd   :  { %v4030_v36 = vadd.s32 %v4029_v39, %v4025_v18  ;;  %v3767_v32 = vand.u32 2139095040, %v8985_v13  ;;  %v741_v24 = vsub.f32 %v645_v1, %v709_v20  ;;  %v499_v27 = vpop.permute.xlu1 %498  ;;  %v239_v11 = vmul.f32 %v8708_v47, %v8674_v34 }
  0xde   :  { %8301 = vset.pattern.permute.xlu1 %v13734_v22  ;;  %v2382_v23 = vadd.s32 %v2381_v21, %v2377_v9  ;;  %v8999_v7 = vmul.f32 6.2831855, %v726_v56  ;;  %v9001_v51 = vpop.permute.xlu0 %266  ;;  %v403_v20 = vmul.f32 %v8703_v46, %v8711_v49  ;;  %v236_v34 = vmul.f32 %v8708_v47, %v8695_v44 }
  0xdf   :  { %270 = vperm.xlu1 %8301, %v8923_v57   ;;  %v4031_v19 = vadd.s32 536870912, %v4030_v36  ;;  %v3768_v31 = vshrl.u32 %v3767_v32, 23  ;;  %v9003_v4 = vmul.f32 6.2831855, %v741_v24  ;;  %v252_v32 = vmul.f32 %v8708_v47, %v8687_v40 }
  0xe0   :  { %13747 = vst [vmem:[#allocation16_spill] sm:$0xff] %v8999_v7  ;;  %v2383_v25 = vadd.s32 536870912, %v2382_v23  ;;  %v2119_v30 = vand.u32 2139095040, %v8999_v7  ;;  %v9037_v24 = vadd.f32 %v403_v20, %v239_v11  ;;  %v9049_v40 = vmul.f32 %v8708_v47, %v8727_v59  ;;  %v13755_v11 = vld [vmem:[#allocation7_spill] sm:$0xff] }
  0xe1   :  { %13748 = vst [vmem:[#allocation17_spill] sm:$0xff] %v9003_v4  ;;  %v9010_v0 = vshrl.u32 %v4031_v19, 30  ;;  %v7838_v35 = vadd.s32 4294967169, %v3768_v31  ;;  %v3664_v12 = vand.u32 2139095040, %v9003_v4  ;;  %v9041_v19 = vmul.f32 %v8708_v47, %v8713_v50 }
  0xe2   :  { %v9008_v1 = vpop.permute.xlu1 %188  ;;  %v9013_v52 = vpop.permute.xlu0 %258  ;;  %v9016_v3 = vshrl.u32 %v2383_v25, 30  ;;  %v2120_v55 = vshrl.u32 %v2119_v30, 23  ;;  %v400_v44 = vmul.f32 %v8703_v46, %v8855_v33  ;;  %v9061_v50 = vmul.f32 %v8708_v47, %v8741_v5 }
  0xe3   :  { %8302 = vset.pattern.permute.xlu1 %v13744_v42  ;;  %v3774_v41 = vadd.s32 1, %v7838_v35  ;;  %v3665_v18 = vshrl.u32 %v3664_v12, 23  ;;  %v419_v33 = vmul.f32 %v8703_v46, %v8775_v48  ;;  %v416_v5 = vmul.f32 %v8703_v46, %v8791_v6 }
  0xe4   :  { %153 = vperm.xlu1 %8302, %v8639_v28   ;;  %v2385_v39 = vshll.u32 %v9016_v3, 30  ;;  %v7774_v21 = vadd.s32 4294967169, %v2120_v55  ;;  %13750 = vst [vmem:[#allocation19_spill] sm:$0xff] %v9061_v50  ;;  %v13752_v55 = vld [vmem:[#allocation5_spill] sm:$0xff]  ;;  %v9089_v20 = vmul.f32 %v8708_v47, %v13755_v11  ;;  %v432_v6 = vadd.f32 %v400_v44, %v236_v34 }
  0xe5   :  { %vm3775_vm12 = vcmp.gt.s32.totalorder %v3774_v41, 0  ;;  %v7834_v31 = vadd.s32 4294967169, %v3665_v18  ;;  %vm2324_vm13 = vcmp.lt.s32.totalorder %v13752_v55, 0  ;;  %v13757_v18 = vld [vmem:[#allocation8_spill] sm:$0xff]  ;;  %v13758_v48 = vand.u32 2147483647, %v13752_v55 }
  0xe6   :  { %v2126_v25 = vadd.s32 1, %v7774_v21  ;;  %v3776_v30 = vsel %vm3775_vm12, %v3774_v41, 0  ;;  %v9106_v34 = vadd.s32 %v8914_v62, %v8892_v8  ;;  %v9108_v44 = vadd.f32 %v416_v5, %v252_v32  ;;  %v13769_v50 = vld [vmem:[#allocation13_spill] sm:$0xff] }
  0xe7   :  { %v9024_v56 = vpop.permute.xlu1 %558  ;;  %v575_v9 = vpop.permute.xlu0 %574  ;;  %v3671_v35 = vadd.s32 1, %v7834_v31  ;;  %v9092_v41 = vand.u32 31, %v3776_v30  ;;  %vm9100_vm15 = vcmp.le.f32.partialorder %v13758_v48, 0.7853982  ;;  %v2408_v62 = vsub.s32 4, %v9016_v3 }
  0xe8   :  { %8303 = vset.pattern.permute.xlu1 %v13736_v14  ;;  %vm2127_vm14 = vcmp.gt.s32.totalorder %v2126_v25, 0  ;;  %v9124_v32 = vshrl.u32 %v3776_v30, 5  ;;  %v13766_v30 = vld [vmem:[#allocation12_spill] sm:$0xff]  ;;  %v235_v4 = vmul.f32 %v8708_v47, %v8975_v61  ;;  %v9176_v61 = vmul.f32 %v8703_v46, %v8946_v26 }
  0xe9   :  { %530 = vperm.xlu1 %8303, %v8567_v16   ;;  %v4033_v16 = vshll.u32 %v9010_v0, 30  ;;  %vm3672_vm0 = vcmp.gt.s32.totalorder %v3671_v35, 0  ;;  %v9127_v5 = vsub.s32 32, %v9092_v41 }
  0xea   :  { %13774 = vst [vmem:[#allocation13_spill] sm:$0xff] %v9176_v61 }
  0xeb   :  { %v9035_v49 = vsub.s32 %v4030_v36, %v4033_v16  ;;  %v9057_v36 = vmul.f32 %v8708_v47, %v8734_v63  ;;  %v9078_v12 = vpop.permute.xlu0 %510 }
  0xec   :  { %v9067_v59 = vpop.permute.xlu1 %294 }
  0xed   :  { %8304 = vset.pattern.permute.xlu1 %v13744_v42  ;;  %13749 = vst [vmem:[#allocation18_spill] sm:$0xff] %v9057_v36  ;;  %v4036_v63 = vsub.s32 0, %v9035_v49 }
  0xee   :  { %73 = vperm.xlu1 %8304, %v8646_v29   ;;  %v255_v29 = vmul.f32 %v8708_v47, %v8680_v38  ;;  %v9045_v38 = vmul.f32 %v8708_v47, %v8722_v54  ;;  %v9065_v54 = vmul.f32 %v8708_v47, %v8747_v10  ;;  %v401_v10 = vmul.f32 %v8703_v46, %v8785_v58 }
  0xf0   :  { %13751 = vst [vmem:[#allocation20_spill] sm:$0xff] %v9065_v54  ;;  %v451_v21 = vadd.f32 %v419_v33, %v255_v29  ;;  %v13761_v29 = vand.u32 2147483647, %v8985_v13  ;;  %v9158_v54 = vmul.f32 %v8703_v46, %v13769_v50  ;;  %v9172_v50 = vmul.f32 %v8703_v46, %v8908_v60 }
  0xf1   :  { %v599_v60 = vmul.f32 %v8720_v53, %v9078_v12  ;;  %v13778_v12 = vmov 2475754826  }
  0xf2   :  { %8305 = vset.pattern.permute.xlu1 %v13736_v14  ;;  %v9117_v33 = vand.u32 8388607, %v13761_v29  ;;  %v3673_v29 = vsel %vm3672_vm0, %v3671_v35, 0  ;;  %v611_v35 = vmul.f32 %v8720_v53, %v9024_v56  ;;  %v13770_v56 = vld [vmem:[#allocation2_spill] sm:$0xff] }
  0xf3   :  { %466 = vperm.xlu1 %8305, %v8923_v57   ;;  %v9053_v57 = vsub.s32 %v2382_v23, %v2385_v39  ;;  %v596_v23 = vmul.f32 %v8720_v53, %v499_v27  ;;  %v13753_v27 = vld [vmem:[#allocation6_spill] sm:$0xff]  ;;  %v615_v39 = vmul.f32 %v8720_v53, %v575_v9  ;;  %v9112_v9 = vpop.permute.xlu1 %494 }
  0xf4   :  { %v9085_v16 = vmul.f32 %v8708_v47, %v13753_v27  ;;  %13756 = vst [vmem:[#allocation6_spill] sm:$0xff] %v9089_v20  ;;  %v7847_v27 = vmin.u32 %v4036_v63, %v9035_v49  ;;  %13762 = vst [vmem:[#allocation7_spill] sm:$0xff] %v9117_v33  ;;  %v13763_v63 = vld [vmem:[#allocation10_spill] sm:$0xff] }
  0xf5   :  { %v2388_v58 = vsub.s32 0, %v9053_v57  ;;  %v628_v31 = vadd.f32 %v596_v23, %v432_v6  ;;  %v2128_v23 = vsel %vm2127_vm14, %v2126_v25, 0  ;;  %v399_v48 = vmul.f32 %v8703_v46, %v13763_v63  ;;  %v9133_v25 = vpop.permute.xlu0 %502 }
  0xf6   :  { %13754 = vst [vmem:[#allocation5_spill] sm:$0xff] %v9085_v16  ;;  %v9137_v20 = vand.u32 31, %v2128_v23  ;;  %v9141_v16 = vmul.f32 %v8703_v46, %v13766_v30  ;;  %v9154_v30 = vand.u32 31, %v3673_v29  ;;  %v9165_v7 = vshrl.u32 %v2128_v23, 5  ;;  %v9183_v23 = vld [vmem:[%s13532_s0 + $0x80] sm:$0xff] }
  0xf7   :  { %8306 = vset.pattern.permute.xlu1 %v13734_v22  ;;  %v7783_v8 = vmin.u32 %v2388_v58, %v9053_v57  ;;  %v660_v63 = vadd.f32 0.5, %v628_v31  ;;  %v4038_v58 = vclz %v7847_v27  ;;  %v2409_v27 = vsel %vm2324_vm13, %v2408_v62, %v9016_v3  ;;  %v9162_v13 = vpop.permute.xlu1 %354 }
  0xf8   :  { %326 = vperm.xlu1 %8306, %v8574_v17   ;;  %v237_v17 = vmul.f32 %v8708_v47, %v13757_v18  ;;  %13765 = vst [vmem:[#allocation8_spill] sm:$0xff] %v9137_v20  ;;  %13768 = vst [vmem:[#allocation10_spill] sm:$0xff] %v9154_v30  ;;  %v9168_v3 = vsub.s32 32, %v9137_v20  ;;  %v9192_v26 = vsub.s32 32, %v9154_v30  ;;  %v4026_v30 = vadd.s32 %v8951_v15, %v8967_v43 }
  0xf9   :  { %v692_v36 = vfloor.f32 %v660_v63  ;;  %v7848_v33 = vadd.s32 4294967294, %v4038_v58  ;;  %v9178_v62 = vpop.permute.xlu0 %562  ;;  %v9187_v63 = vshrl.u32 %v3673_v29, 5  ;;  %v597_v43 = vmul.f32 %v8720_v53, %v9133_v25 }
  0xfa   :  { %v9110_v18 = vadd.f32 %v401_v10, %v237_v17  ;;  %v13764_v10 = vld [vmem:[#allocation11_spill] sm:$0xff]  ;;  %v647_v17 = vadd.f32 %v615_v39, %v451_v21  ;;  %v13767_v39 = vld [vmem:[#allocation14_spill] sm:$0xff]  ;;  %13772 = vst [vmem:[#allocation12_spill] sm:$0xff] %v9168_v3  ;;  %13776 = vst [vmem:[#allocation21_spill] sm:$0xff] %v9192_v26 }
  0xfb   :  { %v9131_v6 = vmul.f32 %v8703_v46, %v13764_v10  ;;  %v3781_v10 = vshll.u32 %v13745_v37, %v9092_v41  ;;  %v251_v21 = vmul.f32 %v8708_v47, %v13767_v39  ;;  %13771 = vst [vmem:[#allocation11_spill] sm:$0xff] %v9165_v7  ;;  %13773 = vst [vmem:[#allocation14_spill] sm:$0xff] %v9172_v50  ;;  %vm7849_vm1 = vcmp.lt.s32.totalorder %v7848_v33, 0 }
  0xfc   :  { %8307 = vset.pattern.permute.xlu1 %v13736_v14  ;;  %v679_v39 = vadd.f32 0.5, %v647_v17  ;;  %13775 = vst [vmem:[#allocation2_spill] sm:$0xff] %v9187_v63  ;;  %v9198_v50 = vmul.f32 %v8703_v46, %v8987_v45  ;;  %v9212_v45 = vshrl.u32 %v13745_v37, %v9127_v5  ;;  %v13781_v63 = vld [vmem:[#allocation9_spill] sm:$0xff]  ;;  %v4041_v26 = vsel %vm7849_vm1, 0, %v7848_v33 }
  0xfd   :  { %526 = vperm.xlu1 %8307, %v8639_v28   ;;  %v415_v28 = vmul.f32 %v8703_v46, %v8930_v2  ;;  %v2390_v2 = vclz %v7783_v8  ;;  %vm3972_vm3 = vcmp.lt.s32.totalorder %v13781_v63, 0  ;;  %v4046_v15 = vsub.s32 4294967266, %v4041_v26 }
  0xfe   :  { %13777 = vst [vmem:[#allocation22_spill] sm:$0xff] %v9198_v50  ;;  %v711_v61 = vfloor.f32 %v679_v39  ;;  %v250_v39 = vmul.f32 %v8708_v47, %v9008_v1  ;;  %v631_v50 = vadd.f32 %v599_v60, %v9037_v24  ;;  %v4042_v1 = vsub.s32 32, %v4041_v26 }
  0xff   :  { %v447_v8 = vadd.f32 %v415_v28, %v251_v21  ;;  %v2411_v28 = vsel %vm9100_vm15, 0, %v2409_v27  ;;  %v7784_v21 = vadd.s32 4294967294, %v2390_v2  ;;  %v724_v27 = vsub.f32 %v628_v31, %v692_v36 }
 0x100   :  { %v5726_v29 = vadd.s32 3, %v2411_v28  ;;  %v9206_v2 = vmul.f32 %v8703_v46, %v9001_v51  ;;  %v3784_v36 = vshll.u32 %v13778_v12, %v9092_v41  ;;  %v13780_v31 = vmov 2131351028  }
 0x101   :  { %8309 = vset.pattern.permute.xlu1 %v13734_v22  ;;  %v643_v58 = vadd.f32 %v611_v35, %v447_v8  ;;  %v3782_v35 = vshrl.u32 %v13778_v12, %v9127_v5  ;;  %vm7785_vm2 = vcmp.lt.s32.totalorder %v7784_v21, 0  ;;  %v743_v51 = vsub.f32 %v647_v17, %v711_v61 }
 0x102   :  { %262 = vperm.xlu1 %8309, %v13770_v56   ;;  %v9194_v56 = vadd.f32 %v399_v48, %v235_v4  ;;  %13779 = vst [vmem:[#allocation23_spill] sm:$0xff] %v9206_v2  ;;  %v9208_v4 = vpop.permute.xlu1 %103  ;;  %v3785_v48 = vshrl.u32 %v13780_v31, %v9127_v5  ;;  %v555_v2 = vpop.permute.xlu0 %554  ;;  %v9225_v7 = vand.u32 3, %v2411_v28  ;;  %v9227_v20 = vmul.f32 6.2831855, %v724_v27 }
 0x103   :  { %v675_v8 = vadd.f32 0.5, %v643_v58  ;;  %v9230_v3 = vand.u32 3, %v5726_v29  ;;  %v9232_v24 = vor.u32 %v3782_v35, %v3781_v10  ;;  %v9236_v17 = vmul.f32 %v8703_v46, %v9013_v52 }
 0x104   :  { %13782 = vst [vmem:[#allocation9_spill] sm:$0xff] %v9227_v20  ;;  %v2393_v33 = vsel %vm7785_vm2, 0, %v7784_v21  ;;  %v446_v61 = vadd.f32 %v9131_v6, %v250_v39  ;;  %v663_v28 = vadd.f32 0.5, %v631_v50  ;;  %v4044_v60 = vshrl.u32 %v4026_v30, %v4042_v1 }
 0x105   :  { %13783 = vst [vmem:[#allocation24_spill] sm:$0xff] %v9236_v17  ;;  %v9243_v27 = vmul.f32 6.2831855, %v743_v51  ;;  %v13784_v52 = vand.u32 2147483647, %v13781_v63  ;;  %v4043_v25 = vshll.u32 %v9035_v49, %v4041_v26  ;;  %v4047_v35 = vadd.s32 127, %v4046_v15 }
 0x106   :  { %8310 = vset.pattern.permute.xlu1 %v13744_v42  ;;  %v9245_v10 = vpop.permute.xlu1 %290  ;;  %v9254_v17 = vor.u32 %v3785_v48, %v3784_v36  ;;  %v1913_v6 = vand.u32 2139095040, %v9227_v20  ;;  %v595_v30 = vmul.f32 %v8720_v53, %v9112_v9  ;;  %v4056_v21 = vsub.s32 4, %v9010_v0  ;;  %v491_v51 = vpop.permute.xlu0 %490  ;;  %v13787_v15 = vld [vmem:[#allocation3_spill] sm:$0xff] }
 0x107   :  { %143 = vperm.xlu1 %8310, %v9183_v23   ;;  %vm9249_vm4 = vcmp.le.f32.partialorder %v13784_v52, 0.7853982  ;;  %v2394_v39 = vsub.s32 32, %v2393_v33  ;;  %v4045_v1 = vor.u32 %v4044_v60, %v4043_v25  ;;  %v4048_v52 = vshll.u32 %v4047_v35, 23 }
 0x108   :  { %v2395_v49 = vshll.u32 %v9053_v57, %v2393_v33  ;;  %v398_v36 = vmul.f32 %v8703_v46, %v9067_v59  ;;  %v695_v48 = vfloor.f32 %v663_v28  ;;  %v612_v9 = vmul.f32 %v8720_v53, %v9178_v62 }
 0x109   :  { %v3870_v20 = vand.u32 2139095040, %v9243_v27  ;;  %v1914_v60 = vshrl.u32 %v1913_v6, 23  ;;  %v627_v25 = vadd.f32 %v595_v30, %v9194_v56  ;;  %v594_v57 = vmul.f32 %v8720_v53, %v491_v51 }
 0x10a   :  { %v4057_v59 = vsel %vm3972_vm3, %v4056_v21, %v9010_v0  ;;  %v4052_v28 = vcvt.s32.f32 %v4045_v1  ;;  %v2396_v35 = vshrl.u32 %v9106_v34, %v2394_v39  ;;  %v644_v56 = vadd.f32 %v612_v9, %v9108_v44  ;;  %v8443_v21 = vld [vmem:[%s13532_s0 + $0x8] sm:$0xff] }
 0x10b   :  { %8311 = vset.pattern.permute.xlu1 %v13734_v22  ;;  %v707_v22 = vfloor.f32 %v675_v8  ;;  %v629_v8 = vadd.f32 %v597_v43, %v9110_v18  ;;  %v610_v18 = vmul.f32 %v8720_v53, %v555_v2  ;;  %v4049_v43 = vor.u32 4788187, %v4048_v52 }
 0x10c   :  { %322 = vperm.xlu1 %8311, %v9183_v23   ;;  %v430_v2 = vadd.f32 %v398_v36, %v9041_v19  ;;  %v3871_v6 = vshrl.u32 %v3870_v20, 23  ;;  %v659_v1 = vadd.f32 0.5, %v627_v25  ;;  %v4059_v39 = vsel %vm9249_vm4, 0, %v4057_v59 }
 0x10d   :  { %v739_v26 = vsub.f32 %v643_v58, %v707_v22  ;;  %v661_v58 = vadd.f32 0.5, %v629_v8  ;;  %v9275_v22 = vpop.permute.xlu1 %178  ;;  %v4050_v62 = vand.u32 2147483647, %v4049_v43  ;;  %v642_v30 = vadd.f32 %v610_v18, %v446_v61 }
 0x10e   :  { %v626_v34 = vadd.f32 %v594_v57, %v430_v2  ;;  %v9290_v19 = vshll.u32 %v13780_v31, %v9092_v41  ;;  %v2397_v20 = vor.u32 %v2396_v35, %v2395_v49  ;;  %v7766_v61 = vadd.s32 4294967169, %v1914_v60 }
 0x10f   :  { %v4053_v51 = vmul.f32 %v4052_v28, %v4050_v62  ;;  %v693_v44 = vfloor.f32 %v661_v58  ;;  %v676_v36 = vadd.f32 0.5, %v644_v56  ;;  %v674_v9 = vadd.f32 0.5, %v642_v30 }
 0x110   :  { %8312 = vset.pattern.permute.xlu1 %v13744_v42  ;;  %v2398_v42 = vsub.s32 4294967266, %v2393_v33  ;;  %v727_v33 = vsub.f32 %v631_v50, %v695_v48  ;;  %v7842_v48 = vadd.s32 4294967169, %v3871_v6  ;;  %v691_v57 = vfloor.f32 %v659_v1 }
 0x111   :  { %63 = vperm.xlu1 %8312, %v13787_v15   ;;  %v9278_v15 = vmul.f32 6.2831855, %v739_v26  ;;  %v551_v18 = vpop.permute.xlu1 %550  ;;  %v413_v49 = vmul.f32 %v8703_v46, %v9162_v13  ;;  %v658_v59 = vadd.f32 0.5, %v626_v34  ;;  %v725_v58 = vsub.f32 %v629_v8, %v693_v44 }
 0x112   :  { %v2399_v0 = vadd.s32 127, %v2398_v42  ;;  %v9293_v26 = vmul.f32 6.2831855, %v727_v33  ;;  %v2404_v28 = vcvt.s32.f32 %v2397_v20  ;;  %v708_v35 = vfloor.f32 %v676_v36 }
 0x113   :  { %13788 = vst [vmem:[#allocation3_spill] sm:$0xff] %v9278_v15  ;;  %v3458_v52 = vand.u32 2139095040, %v9278_v15  ;;  %v609_v2 = vmul.f32 %v8720_v53, %v551_v18  ;;  %v13789_v33 = vmov 2102212464   ;;  %v3877_v6 = vadd.s32 1, %v7842_v48 }
 0x114   :  { %v2400_v50 = vshll.u32 %v2399_v0, 23  ;;  %v7390_v13 = vadd.s32 3, %v4059_v39  ;;  %v445_v29 = vadd.f32 %v413_v49, %v9045_v38  ;;  %v690_v8 = vfloor.f32 %v658_v59 }
 0x115   :  { %8314 = vset.pattern.permute.xlu1 %v13736_v14  ;;  %v4054_v14 = vxor.u32 2147483648, %v4053_v51  ;;  %v3459_v1 = vshrl.u32 %v3458_v52, 23  ;;  %v2222_v44 = vand.u32 2139095040, %v9293_v26  ;;  %v723_v20 = vsub.f32 %v627_v25, %v691_v57  ;;  %v99_v49 = vpop.permute.xlu1 %98 }
 0x116   :  { %458 = vperm.xlu1 %8314, %v8443_v21   ;;  %v2401_v42 = vor.u32 4788187, %v2400_v50  ;;  %v1920_v21 = vadd.s32 1, %v7766_v61  ;;  %v740_v36 = vsub.f32 %v644_v56, %v708_v35  ;;  %v641_v18 = vadd.f32 %v609_v2, %v445_v29  ;;  %v483_v2 = vpop.permute.xlu0 %482 }
 0x117   :  { %v4055_v43 = vsel %vm3972_vm3, %v4054_v14, %v4053_v51  ;;  %v706_v51 = vfloor.f32 %v674_v9  ;;  %v9310_v14 = vmul.f32 6.2831855, %v725_v58  ;;  %v9316_v48 = vshll.u32 %v13789_v33, %v9092_v41 }
 0x118   :  { %v4058_v60 = vsel %vm9249_vm4, %v13781_v63, %v4055_v43  ;;  %v2402_v62 = vand.u32 2147483647, %v2401_v42  ;;  %v9312_v43 = vand.u32 3, %v4059_v39  ;;  %vm3878_vm5 = vcmp.gt.s32.totalorder %v3877_v6, 0 }
 0x119   :  { %8315 = vcosq.f32 %v4058_v60  ;;  %13790 = vst [vmem:[#allocation25_spill] sm:$0xff] %v9310_v14  ;;  %v738_v61 = vsub.f32 %v642_v30, %v706_v51  ;;  %v7391_v52 = vand.u32 3, %v7390_v13  ;;  %vm1921_vm6 = vcmp.gt.s32.totalorder %v1920_v21, 0 }
 0x11a   :  { %518 = vperm.xlu1 %8314, %v9183_v23   ;;  %8317 = vsinq.f32 %v4058_v60  ;;  %v9306_v23 = vshrl.u32 %v13789_v33, %v9127_v5  ;;  %v2405_v0 = vmul.f32 %v2404_v28, %v2402_v62  ;;  %v7826_v9 = vadd.s32 4294967169, %v3459_v1 }
 0x11b   :  { %v722_v42 = vsub.f32 %v626_v34, %v690_v8  ;;  %v2223_v56 = vshrl.u32 %v2222_v44, 23  ;;  %v2016_v39 = vand.u32 2139095040, %v9310_v14  ;;  %v9324_v57 = vmul.f32 6.2831855, %v723_v20 }
 0x11c   :  { %v2406_v50 = vxor.u32 2147483648, %v2405_v0  ;;  %v3879_v59 = vsel %vm3878_vm5, %v3877_v6, 0  ;;  %v9326_v30 = vmul.f32 6.2831855, %v740_v36  ;;  %v673_v60 = vadd.f32 0.5, %v641_v18 }
 0x11d   :  { %13791 = vst [vmem:[#allocation26_spill] sm:$0xff] %v9324_v57  ;;  %v9328_v58 = vmul.f32 6.2831855, %v738_v61  ;;  %v232_v34 = vmul.f32 %v8708_v47, %v99_v49  ;;  %vm4062_vm7 = vweird.f32 %v13781_v63  ;;  %vm7392_vm8 = vcmp.lt.s32.totalorder %v7391_v52, 2 }
 0x11e   :  { %v2407_v38 = vsel %vm2324_vm13, %v2406_v50, %v2405_v0  ;;  %13792 = vst [vmem:[#allocation27_spill] sm:$0xff] %v9326_v30  ;;  %vm4064_vm9 = vcmp.lt.s32.totalorder %v9312_v43, 2  ;;  %v9334_v11 = vsel %vm1921_vm6, %v1920_v21, 0  ;;  %v9336_v62 = vadd.s32 1, %v7826_v9 }
 0x11f   :  { %v2410_v25 = vsel %vm9100_vm15, %v13752_v55, %v2407_v38  ;;  %13793 = vst [vmem:[#allocation28_spill] sm:$0xff] %v9328_v58  ;;  %v233_v28 = vmul.f32 %v8708_v47, %v9208_v4  ;;  %v9340_v35 = vmul.f32 6.2831855, %v722_v42  ;;  %v9342_v6 = vshrl.u32 %v3879_v59, 5 }
 0x120   :  { %8319 = vcosq.f32 %v2410_v25  ;;  %v9344_v51 = vand.u32 31, %v3879_v59  ;;  %v9346_v13 = vadd.s32 4294967169, %v2223_v56  ;;  %v1810_v0 = vand.u32 2139095040, %v9324_v57  ;;  %v487_v59 = vpop.permute.xlu1 %486 }
 0x121   :  { %8321 = vsinq.f32 %v2410_v25  ;;  %13794 = vst [vmem:[#allocation29_spill] sm:$0xff] %v9340_v35  ;;  %v2017_v29 = vshrl.u32 %v2016_v39, 23  ;;  %v3561_v21 = vand.u32 2139095040, %v9326_v30  ;;  %v397_v8 = vmul.f32 %v8703_v46, %v9245_v10 }
 0x122   :  { %v705_v44 = vfloor.f32 %v673_v60  ;;  %v3355_v20 = vand.u32 2139095040, %v9328_v58  ;;  %v428_v50 = vadd.f32 %v9158_v54, %v232_v34  ;;  %v592_v36 = vmul.f32 %v8720_v53, %v483_v2 }
 0x123   :  { %v1707_v38 = vand.u32 2139095040, %v9340_v35  ;;  %vm7396_vm10 = vcmp.eq.s32.totalorder %v7391_v52, 2  ;;  %vm4068_vm11 = vcmp.eq.s32.totalorder %v9312_v43, 2  ;;  %vm5732_vm12 = vcmp.eq.s32.totalorder %v9230_v3, 2 }
 0x124   :  { %vm2420_vm13 = vcmp.eq.s32.totalorder %v9225_v7, 2  ;;  %vm7393_vm14 = vcmp.eq.s32.totalorder %v7391_v52, 0  ;;  %vm4065_vm15 = vcmp.eq.s32.totalorder %v9312_v43, 0  ;;  %vm5729_vm0 = vcmp.eq.s32.totalorder %v9230_v3, 0 }
 0x125   :  { %vm2417_vm1 = vcmp.eq.s32.totalorder %v9225_v7, 0  ;;  %v3882_v54 = vsub.s32 32, %v9344_v51  ;;  %v737_v49 = vsub.f32 %v641_v18, %v705_v44  ;;  %vm5728_vm2 = vcmp.lt.s32.totalorder %v9230_v3, 2 }
 0x126   :  { %v8316_v1 = vpop.eup %8315  ;;  %vm2416_vm3 = vcmp.lt.s32.totalorder %v9225_v7, 2  ;;  %v9365_v39 = vadd.f32 %v592_v36, %v428_v50  ;;  %vm2414_vm4 = vweird.f32 %v13752_v55  ;;  %v13590_v2 = vand.u32 2147483647, %v9243_v27 }
 0x127   :  { %v8318_v4 = vpop.eup %8317  ;;  %v4069_v61 = vxor.u32 2147483648, %v8316_v1  ;;  %v9374_v18 = vshrl.u32 %v1810_v0, 23  ;;  %v9384_v52 = vshrl.u32 %v3561_v21, 23  ;;  %v9386_v43 = vshrl.u32 %v3355_v20, 23 }
 0x128   :  { %v4066_v9 = vxor.u32 2147483648, %v8318_v4  ;;  %v9388_v50 = vshrl.u32 %v1707_v38, 23  ;;  %v429_v36 = vadd.f32 %v397_v8, %v233_v28  ;;  %v3885_v63 = vshrl.u32 %v13778_v12, %v3882_v54 }
 0x129   :  { %v7398_v10 = vsel %vm7396_vm10, %v4069_v61, %v8318_v4  ;;  %v4070_v42 = vsel %vm4068_vm11, %v4069_v61, %v8318_v4  ;;  %v9372_v4 = vadd.s32 4294967169, %v2017_v29  ;;  %v9392_v29 = vmul.f32 6.2831855, %v737_v49 }
 0x12a   :  { %v7395_v25 = vsel %vm7393_vm14, %v8316_v1, %v4066_v9  ;;  %v4067_v56 = vsel %vm4065_vm15, %v8316_v1, %v4066_v9  ;;  %v593_v61 = vmul.f32 %v8720_v53, %v487_v59  ;;  %v3888_v9 = vshrl.u32 %v13780_v31, %v3882_v54 }
 0x12b   :  { %v7399_v60 = vsel %vm7392_vm8, %v7395_v25, %v7398_v10  ;;  %v4071_v34 = vsel %vm4064_vm9, %v4067_v56, %v4070_v42  ;;  %13797 = vst [vmem:[#allocation32_spill] sm:$0xff] %v9392_v29  ;;  %v9398_v20 = vadd.f32 0.5, %v9365_v39  ;;  %v3874_v28 = vand.u32 8388607, %v13590_v2 }
 0x12c   :  { %v9378_v1 = vsel %vm4062_vm7, nan, %v7399_v60  ;;  %v9382_v44 = vsel %vm4062_vm7, nan, %v4071_v34  ;;  %v3891_v8 = vshrl.u32 %v13789_v33, %v3882_v54  ;;  %v3884_v42 = vshll.u32 %v13745_v37, %v9344_v51 }
 0x12d   :  { %13795 = vst [vmem:[#allocation30_spill] sm:$0xff] %v9378_v1  ;;  %13796 = vst [vmem:[#allocation31_spill] sm:$0xff] %v9382_v44  ;;  %7978 = vmatprep.subr.mxu0 %v9378_v1  ;;  %8013 = vmatprep.subr.mxu1 %v9382_v44  ;;  %v8320_v0 = vpop.eup %8319  ;;  %v3887_v49 = vshll.u32 %v13778_v12, %v9344_v51  ;;  %v13798_v25 = vmov 920167782   ;;  %v3890_v34 = vshll.u32 %v13780_v31, %v9344_v51  ;;  %vm3466_vm5 = vcmp.gt.s32.totalorder %v9336_v62, 0 }
 0x12e   :  { %v8322_v21 = vpop.eup %8321  ;;  %v2421_v38 = vxor.u32 2147483648, %v8320_v0  ;;  %v3894_v56 = vshrl.u32 %v13798_v25, %v3882_v54  ;;  %v3893_v2 = vshll.u32 %v13789_v33, %v9344_v51  ;;  %v3886_v35 = vor.u32 %v3885_v63, %v3884_v42 }
 0x12f   :  { %v2418_v10 = vxor.u32 2147483648, %v8322_v21  ;;  %v3889_v58 = vor.u32 %v3888_v9, %v3887_v49  ;;  %v3252_v30 = vand.u32 2139095040, %v9392_v29  ;;  %v3875_v63 = vor.u32 8388608, %v3874_v28 }
 0x130   :  { %v5734_v59 = vsel %vm5732_vm12, %v2421_v38, %v8322_v21  ;;  %v2422_v60 = vsel %vm2420_vm13, %v2421_v38, %v8322_v21  ;;  %v3892_v38 = vor.u32 %v3891_v8, %v3890_v34  ;;  %v3895_v15 = vor.u32 %v3894_v56, %v3893_v2 }
 0x131   :  { %v5731_v1 = vsel %vm5729_vm0, %v8320_v0, %v2418_v10  ;;  %v2419_v44 = vsel %vm2417_vm1, %v8320_v0, %v2418_v10  ;;  %v625_v3 = vadd.f32 %v593_v61, %v429_v36  ;;  %v3896_v7 = vshll.u32 %v13798_v25, %v9344_v51 }
 0x132   :  { %v5735_v57 = vsel %vm5728_vm2, %v5731_v1, %v5734_v59  ;;  %v2423_v21 = vsel %vm2416_vm3, %v2419_v44, %v2422_v60  ;;  %v13801_v2 = vmov 1326507024   ;;  %vm3899_vm6 = vcmp.lt.s32.totalorder %v9342_v6, 1 }
 0x133   :  { %v9428_v14 = vsel %vm2414_vm4, nan, %v5735_v57  ;;  %v9432_v0 = vsel %vm2414_vm4, nan, %v2423_v21  ;;  %v3897_v1 = vshrl.u32 %v13801_v2, %v3882_v54  ;;  %v688_v57 = vfloor.f32 %v9398_v20 }
 0x134   :  { %13799 = vst [vmem:[#allocation33_spill] sm:$0xff] %v9428_v14  ;;  %13800 = vst [vmem:[#allocation34_spill] sm:$0xff] %v9432_v0  ;;  %7979 = vmatpush3.msra.mxu0 %v9428_v14  ;;  %8014 = vmatpush3.msra.mxu1 %v9432_v0  ;;  %v3883_v44 = vshrl.u32 %v13745_v37, %v3882_v54  ;;  %vm3902_vm7 = vcmp.lt.s32.totalorder %v9342_v6, 4  ;;  %v3907_v55 = vsel %vm3899_vm6, %v3886_v35, %v3889_v58 }
 0x135   :  { %v3898_v9 = vor.u32 %v3897_v1, %v3896_v7  ;;  %vm3901_vm8 = vcmp.lt.s32.totalorder %v9342_v6, 3  ;;  %v3904_v36 = vsel %vm3902_vm7, %v3892_v38, 2102212464  ;;  %v3908_v61 = vsel %vm3902_vm7, %v3895_v15, 920167782 }
 0x136   :  { %vm3900_vm9 = vcmp.lt.s32.totalorder %v9342_v6, 2  ;;  %v3909_v28 = vsel %vm3901_vm8, %v3892_v38, %v3908_v61  ;;  %v3911_v51 = vsel %vm3899_vm6, %v3889_v58, %v3892_v38  ;;  %v3915_v8 = vshll.u32 %v3875_v63, 8  ;;  %v347_v38 = vpop.permute.xlu1 %346 }
 0x137   :  { %v657_v10 = vadd.f32 0.5, %v625_v3  ;;  %v3903_v42 = vsel %vm3899_vm6, %v3883_v44, %v3886_v35  ;;  %v3910_v20 = vsel %vm3900_vm9, %v3907_v55, %v3909_v28  ;;  %v3912_v49 = vsel %vm3902_vm7, %v3898_v9, 1326507024 }
 0x138   :  { %v3905_v54 = vsel %vm3901_vm8, %v3889_v58, %v3904_v36  ;;  %v3913_v56 = vsel %vm3901_vm8, %v3895_v15, %v3912_v49  ;;  %v9447_v59 = vmul.u32.u64.low %v3915_v8, %v3910_v20  ;;  %v9448_v60 = vmul.u32.u64.high %v3915_v8, %v3910_v20, %v9447_v59 }
 0x139   :  { %v2229_v34 = vadd.s32 1, %v9346_v13  ;;  %v2023_v21 = vadd.s32 1, %v9372_v4  ;;  %v7762_v7 = vadd.s32 4294967169, %v9374_v18  ;;  %v3914_v35 = vsel %vm3900_vm9, %v3911_v51, %v3913_v56 }
 0x13a   :  { %v7830_v63 = vadd.s32 4294967169, %v9384_v52  ;;  %v7822_v1 = vadd.s32 4294967169, %v9386_v43  ;;  %v9458_v58 = vmul.u32.u64.low %v3915_v8, %v3914_v35  ;;  %v9459_v15 = vmul.u32.u64.high %v3915_v8, %v3914_v35, %v9458_v58  ;;  %v543_v52 = vpop.permute.xlu0 %542 }
 0x13b   :  { %v9462_v44 = vand.u32 31, %v9334_v11  ;;  %v7758_v13 = vadd.s32 4294967169, %v9388_v50  ;;  %v3253_v55 = vshrl.u32 %v3252_v30, 23  ;;  %v3906_v4 = vsel %vm3900_vm9, %v3903_v42, %v3905_v54 }
 0x13c   :  { %v720_v18 = vsub.f32 %v9365_v39, %v688_v57  ;;  %v689_v9 = vfloor.f32 %v657_v10  ;;  %v411_v36 = vmul.f32 %v8703_v46, %v347_v38  ;;  %v3925_v43 = vadd.s32 1, %v9448_v60 }
 0x13d   :  { %13802 = vst [vmem:[#allocation35_spill] sm:$0xff] %v9462_v44  ;;  %v3467_v61 = vsel %vm3466_vm5, %v9336_v62, 0  ;;  %vm2230_vm10 = vcmp.gt.s32.totalorder %v2229_v34, 0  ;;  %vm2024_vm11 = vcmp.gt.s32.totalorder %v2023_v21, 0  ;;  %v1817_v28 = vadd.s32 1, %v7762_v7 }
 0x13e   :  { %v3568_v50 = vadd.s32 1, %v7830_v63  ;;  %v3362_v30 = vadd.s32 1, %v7822_v1  ;;  %v3922_v51 = vmul.u32 %v3915_v8, %v3906_v4  ;;  %vm3924_vm12 = vc.u32 %v9459_v15, %v9447_v59 }
 0x13f   :  { %v1714_v6 = vadd.s32 1, %v7758_v13  ;;  %v7818_v39 = vadd.s32 4294967169, %v3253_v55  ;;  %v607_v57 = vmul.f32 %v8720_v53, %v543_v52  ;;  %v3926_v10 = vsel %vm3924_vm12, %v3925_v43, %v9448_v60 }
 0x140   :  { %v9477_v42 = vmul.f32 6.2831855, %v720_v18  ;;  %v721_v20 = vsub.f32 %v625_v3, %v689_v9  ;;  %v443_v62 = vadd.f32 %v411_v36, %v9049_v40  ;;  %v3927_v49 = vadd.s32 %v3926_v10, %v3922_v51  ;;  %v547_v3 = vpop.permute.xlu1 %546 }
 0x141   :  { %v9481_v54 = vshrl.u32 %v9334_v11, 5  ;;  %v9484_v8 = vsub.s32 32, %v9462_v44  ;;  %v9486_v56 = vand.u32 31, %v3467_v61  ;;  %v2231_v7 = vsel %vm2230_vm10, %v2229_v34, 0 }
 0x142   :  { %13803 = vst [vmem:[#allocation36_spill] sm:$0xff] %v9477_v42  ;;  %v2025_v38 = vsel %vm2024_vm11, %v2023_v21, 0  ;;  %vm1818_vm13 = vcmp.gt.s32.totalorder %v1817_v28, 0  ;;  %v248_v60 = vmul.f32 %v8708_v47, %v9275_v22  ;;  %v3928_v35 = vadd.s32 536870912, %v3927_v49 }
 0x143   :  { %13804 = vst [vmem:[#allocation37_spill] sm:$0xff] %v9481_v54  ;;  %13805 = vst [vmem:[#allocation38_spill] sm:$0xff] %v9484_v8  ;;  %vm3569_vm14 = vcmp.gt.s32.totalorder %v3568_v50, 0  ;;  %vm3363_vm15 = vcmp.gt.s32.totalorder %v3362_v30, 0  ;;  %vm1715_vm0 = vcmp.gt.s32.totalorder %v1714_v6, 0  ;;  %v3259_v40 = vadd.s32 1, %v7818_v39 }
 0x144   :  { %13806 = vst [vmem:[#allocation39_spill] sm:$0xff] %v9486_v56  ;;  %v1501_v11 = vand.u32 2139095040, %v9477_v42  ;;  %v9493_v63 = vmul.f32 6.2831855, %v721_v20  ;;  %v639_v1 = vadd.f32 %v607_v57, %v443_v62  ;;  %v9495_v58 = vshrl.u32 %v3928_v35, 30 }
 0x145   :  { %v9497_v34 = vshrl.u32 %v3467_v61, 5  ;;  %v9500_v21 = vsub.s32 32, %v9486_v56  ;;  %v9502_v13 = vand.u32 31, %v2231_v7  ;;  %v608_v22 = vmul.f32 %v8720_v53, %v547_v3 }
 0x146   :  { %13807 = vst [vmem:[#allocation40_spill] sm:$0xff] %v9493_v63  ;;  %v9505_v55 = vand.u32 31, %v2025_v38  ;;  %v1819_v4 = vsel %vm1818_vm13, %v1817_v28, 0  ;;  %v3570_v18 = vsel %vm3569_vm14, %v3568_v50, 0  ;;  %v3930_v9 = vshll.u32 %v9495_v58, 30 }
 0x147   :  { %13808 = vst [vmem:[#allocation41_spill] sm:$0xff] %v9497_v34  ;;  %13809 = vst [vmem:[#allocation42_spill] sm:$0xff] %v9500_v21  ;;  %v3364_v36 = vsel %vm3363_vm15, %v3362_v30, 0  ;;  %v1716_v52 = vsel %vm1715_vm0, %v1714_v6, 0  ;;  %v444_v43 = vadd.f32 %v9141_v16, %v248_v60  ;;  %vm3260_vm1 = vcmp.gt.s32.totalorder %v3259_v40, 0  ;;  %v283_v34 = vpop.permute.xlu1 %282 }
 0x148   :  { %v1502_v61 = vshrl.u32 %v1501_v11, 23  ;;  %v1604_v51 = vand.u32 2139095040, %v9493_v63  ;;  %v671_v39 = vadd.f32 0.5, %v639_v1  ;;  %v9511_v57 = vsub.s32 %v3927_v49, %v3930_v9  ;;  %v535_v9 = vpop.permute.xlu0 %534 }
 0x149   :  { %v9513_v10 = vshrl.u32 %v2231_v7, 5  ;;  %v9515_v20 = vand.u32 31, %v1819_v4  ;;  %v9517_v62 = vand.u32 31, %v3570_v18  ;;  %v9519_v28 = vadd.f32 %v608_v22, %v444_v43 }
 0x14a   :  { %v9522_v50 = vsub.s32 32, %v9502_v13  ;;  %v9524_v30 = vshrl.u32 %v2025_v38, 5  ;;  %v9526_v16 = vand.u32 31, %v3364_v36  ;;  %v3933_v6 = vsub.s32 0, %v9511_v57 }
 0x14b   :  { %13810 = vst [vmem:[#allocation43_spill] sm:$0xff] %v9515_v20  ;;  %v9530_v49 = vsub.s32 32, %v9505_v55  ;;  %v9532_v7 = vshrl.u32 %v1819_v4, 5  ;;  %v9534_v60 = vand.u32 31, %v1716_v52  ;;  %v9537_v3 = vsel %vm3260_vm1, %v3259_v40, 0 }
 0x14c   :  { %13811 = vst [vmem:[#allocation44_spill] sm:$0xff] %v9526_v16  ;;  %v7750_v35 = vadd.s32 4294967169, %v1502_v61  ;;  %v1605_v11 = vshrl.u32 %v1604_v51, 23  ;;  %v703_v22 = vfloor.f32 %v671_v39  ;;  %v7843_v38 = vmin.u32 %v3933_v6, %v9511_v57 }
 0x14d   :  { %13812 = vst [vmem:[#allocation45_spill] sm:$0xff] %v9532_v7  ;;  %13813 = vst [vmem:[#allocation46_spill] sm:$0xff] %v9534_v60  ;;  %v9541_v43 = vsub.s32 32, %v9515_v20  ;;  %v9543_v14 = vshrl.u32 %v3570_v18, 5  ;;  %v9546_v0 = vsub.s32 32, %v9517_v62  ;;  %v672_v4 = vadd.f32 0.5, %v9519_v28 }
 0x14e   :  { %v9549_v42 = vshrl.u32 %v3364_v36, 5  ;;  %v9552_v40 = vsub.s32 32, %v9526_v16  ;;  %v3935_v61 = vclz %v7843_v38  ;;  %v9555_v39 = vshrl.u32 %v1716_v52, 5 }
 0x14f   :  { %13814 = vst [vmem:[#allocation47_spill] sm:$0xff] %v9541_v43  ;;  %13815 = vst [vmem:[#allocation48_spill] sm:$0xff] %v9543_v14  ;;  %v9558_v6 = vsub.s32 32, %v9534_v60  ;;  %v9561_v18 = vshrl.u32 %v9537_v3, 5  ;;  %v9564_v63 = vmul.f32 %v8720_v53, %v535_v9  ;;  %v9566_v29 = vadd.s32 1, %v7750_v35 }
 0x150   :  { %13816 = vst [vmem:[#allocation49_spill] sm:$0xff] %v9549_v42  ;;  %13817 = vst [vmem:[#allocation50_spill] sm:$0xff] %v9552_v40  ;;  %v9568_v36 = vadd.s32 4294967169, %v1605_v11  ;;  %v735_v42 = vsub.f32 %v639_v1, %v703_v22  ;;  %v7844_v16 = vadd.s32 4294967294, %v3935_v61  ;;  %v704_v38 = vfloor.f32 %v672_v4 }
 0x151   :  { %13818 = vst [vmem:[#allocation51_spill] sm:$0xff] %v9555_v39  ;;  %13819 = vst [vmem:[#allocation52_spill] sm:$0xff] %v9558_v6  ;;  %v2237_v52 = vshrl.u32 %v13778_v12, %v9522_v50  ;;  %v2240_v51 = vshrl.u32 %v13780_v31, %v9522_v50  ;;  %v2246_v39 = vshrl.u32 %v13798_v25, %v9522_v50  ;;  %v13822_v9 = vand.u32 2147483647, %v9293_v26 }
 0x152   :  { %13820 = vst [vmem:[#allocation53_spill] sm:$0xff] %v9561_v18  ;;  %13821 = vst [vmem:[#allocation54_spill] sm:$0xff] %v9564_v63  ;;  %vm7845_vm2 = vcmp.lt.s32.totalorder %v7844_v16, 0  ;;  %v2236_v35 = vshll.u32 %v13745_v37, %v9502_v13  ;;  %v2243_v1 = vshrl.u32 %v13789_v33, %v9522_v50  ;;  %v2239_v22 = vshll.u32 %v13778_v12, %v9502_v13 }
 0x153   :  { %v2226_v18 = vand.u32 8388607, %v13822_v9  ;;  %v3938_v11 = vsel %vm7845_vm2, 0, %v7844_v16  ;;  %v2245_v4 = vshll.u32 %v13789_v33, %v9502_v13  ;;  %v2249_v61 = vshrl.u32 %v13801_v2, %v9522_v50 }
 0x154   :  { %v3923_v6 = vadd.s32 %v9447_v59, %v9459_v15  ;;  %v3939_v9 = vsub.s32 32, %v3938_v11  ;;  %v3943_v60 = vsub.s32 4294967266, %v3938_v11  ;;  %v2242_v40 = vshll.u32 %v13780_v31, %v9502_v13 }
 0x155   :  { %v2238_v7 = vor.u32 %v2237_v52, %v2236_v35  ;;  %v2241_v43 = vor.u32 %v2240_v51, %v2239_v22  ;;  %v2247_v16 = vor.u32 %v2246_v39, %v2245_v4  ;;  %v2248_v20 = vshll.u32 %v13798_v25, %v9502_v13 }
 0x156   :  { %v3940_v21 = vshll.u32 %v9511_v57, %v3938_v11  ;;  %v3941_v56 = vshrl.u32 %v3923_v6, %v3939_v9  ;;  %v3944_v54 = vadd.s32 127, %v3943_v60  ;;  %v2244_v63 = vor.u32 %v2243_v1, %v2242_v40  ;;  %v9618_v6 = vpop.permute.xlu1 %168 }
 0x157   :  { %vm1509_vm3 = vcmp.gt.s32.totalorder %v9566_v29, 0  ;;  %v9596_v59 = vmul.f32 6.2831855, %v735_v42  ;;  %v2227_v15 = vor.u32 8388608, %v2226_v18  ;;  %v2250_v8 = vor.u32 %v2249_v61, %v2248_v20 }
 0x158   :  { %v3942_v44 = vor.u32 %v3941_v56, %v3940_v21  ;;  %v3945_v14 = vshll.u32 %v3944_v54, 23  ;;  %vm2251_vm4 = vcmp.lt.s32.totalorder %v9513_v10, 1  ;;  %vm2254_vm5 = vcmp.lt.s32.totalorder %v9513_v10, 4 }
 0x159   :  { %13823 = vst [vmem:[#allocation55_spill] sm:$0xff] %v9596_v59  ;;  %v736_v13 = vsub.f32 %v9519_v28, %v704_v38  ;;  %vm3869_vm6 = vcmp.lt.s32.totalorder %v9243_v27, 0  ;;  %vm2253_vm7 = vcmp.lt.s32.totalorder %v9513_v10, 3  ;;  %v2259_v57 = vsel %vm2251_vm4, %v2238_v7, %v2241_v43 }
 0x15a   :  { %v2260_v60 = vsel %vm2254_vm5, %v2247_v16, 920167782  ;;  %v13824_v42 = vand.u32 2147483647, %v9243_v27  ;;  %v3946_v54 = vor.u32 4788187, %v3945_v14  ;;  %v2235_v56 = vshrl.u32 %v13745_v37, %v9522_v50 }
 0x15b   :  { %v2261_v21 = vsel %vm2253_vm7, %v2244_v63, %v2260_v60  ;;  %v2263_v28 = vsel %vm2251_vm4, %v2241_v43, %v2244_v63  ;;  %v3949_v40 = vcvt.s32.f32 %v3942_v44  ;;  %vm2252_vm9 = vcmp.lt.s32.totalorder %v9513_v10, 2 }
 0x15c   :  { %vm9607_vm8 = vcmp.le.f32.partialorder %v13824_v42, 0.7853982  ;;  %v2256_v51 = vsel %vm2254_vm5, %v2244_v63, 2102212464  ;;  %v2264_v39 = vsel %vm2254_vm5, %v2250_v8, 1326507024  ;;  %v2262_v14 = vsel %vm2252_vm9, %v2259_v57, %v2261_v21 }
 0x15d   :  { %v3947_v18 = vand.u32 2147483647, %v3946_v54  ;;  %v2265_v50 = vsel %vm2253_vm7, %v2247_v16, %v2264_v39  ;;  %v2267_v38 = vshll.u32 %v2227_v15, 8  ;;  %v3046_v52 = vand.u32 2139095040, %v9596_v59  ;;  %v343_v54 = vpop.permute.xlu1 %342 }
 0x15e   :  { %v3953_v35 = vsub.s32 4, %v9495_v58  ;;  %v2255_v44 = vsel %vm2251_vm4, %v2235_v56, %v2238_v7  ;;  %v2266_v8 = vsel %vm2252_vm9, %v2263_v28, %v2265_v50  ;;  %v2257_v1 = vsel %vm2253_vm7, %v2241_v43, %v2256_v51 }
 0x15f   :  { %v3950_v63 = vmul.f32 %v3949_v40, %v3947_v18  ;;  %v9632_v11 = vmul.u32.u64.low %v2267_v38, %v2266_v8  ;;  %v9633_v22 = vmul.u32.u64.high %v2267_v38, %v2266_v8, %v9632_v11  ;;  %v9636_v4 = vand.u32 31, %v9537_v3  ;;  %v13827_v8 = vld [vmem:[#allocation7_spill] sm:$0xff] }
 0x160   :  { %v395_v61 = vmul.f32 %v8703_v46, %v283_v34  ;;  %v9639_v9 = vmul.u32.u64.low %v2267_v38, %v2262_v14  ;;  %v9640_v16 = vmul.u32.u64.high %v2267_v38, %v2262_v14, %v9639_v9  ;;  %v1510_v7 = vsel %vm1509_vm3, %v9566_v29, 0 }
 0x161   :  { %v9646_v15 = vmul.f32 6.2831855, %v736_v13  ;;  %v3951_v57 = vxor.u32 2147483648, %v3950_v63  ;;  %v3791_v43 = vshrl.u32 %v13798_v25, %v9127_v5  ;;  %v1611_v60 = vadd.s32 1, %v9568_v36  ;;  %v9685_v14 = vpop.permute.xlu1 %88 }
 0x162   :  { %v3047_v3 = vshrl.u32 %v3046_v52, 23  ;;  %v2258_v34 = vsel %vm2252_vm9, %v2255_v44, %v2257_v1  ;;  %v3794_v42 = vshrl.u32 %v13801_v2, %v9127_v5  ;;  %v3954_v29 = vsel %vm3869_vm6, %v3953_v35, %v9495_v58 }
 0x163   :  { %v3952_v56 = vsel %vm3869_vm6, %v3951_v57, %v3950_v63  ;;  %v3789_v13 = vor.u32 %v9306_v23, %v9290_v19  ;;  %v3793_v36 = vshll.u32 %v13798_v25, %v9092_v41  ;;  %vm2276_vm10 = vc.u32 %v9633_v22, %v9639_v9 }
 0x164   :  { %v3955_v10 = vsel %vm9607_vm8, %v9243_v27, %v3952_v56  ;;  %v2277_v5 = vadd.s32 1, %v9640_v16  ;;  %v3792_v21 = vor.u32 %v3791_v43, %v9316_v48  ;;  %v3149_v28 = vand.u32 2139095040, %v9646_v15 }
 0x165   :  { %8323 = vcosq.f32 %v3955_v10  ;;  %v2274_v58 = vmul.u32 %v2267_v38, %v2258_v34  ;;  %v3795_v40 = vor.u32 %v3794_v42, %v3793_v36  ;;  %v3956_v19 = vsel %vm9607_vm8, 0, %v3954_v29 }
 0x166   :  { %8325 = vsinq.f32 %v3955_v10  ;;  %v2278_v41 = vsel %vm2276_vm10, %v2277_v5, %v9640_v16  ;;  %vm3796_vm11 = vcmp.lt.s32.totalorder %v9124_v32, 1  ;;  %vm3798_vm12 = vcmp.lt.s32.totalorder %v9124_v32, 3 }
 0x167   :  { %v2279_v23 = vadd.s32 %v2278_v41, %v2274_v58  ;;  %vm3799_vm13 = vcmp.lt.s32.totalorder %v9124_v32, 4  ;;  %v3804_v48 = vsel %vm3796_vm11, %v9232_v24, %v9254_v17  ;;  %v3808_v20 = vsel %vm3796_vm11, %v9254_v17, %v3789_v13  ;;  %v479_v41 = vpop.permute.xlu1 %478 }
 0x168   :  { %v3801_v51 = vsel %vm3799_vm13, %v3789_v13, 2102212464  ;;  %v3805_v39 = vsel %vm3799_vm13, %v3792_v21, 920167782  ;;  %v3809_v18 = vsel %vm3799_vm13, %v3795_v40, 1326507024  ;;  %v3800_v57 = vsel %vm3796_vm11, %v9212_v45, %v9232_v24 }
 0x169   :  { %v2280_v50 = vadd.s32 536870912, %v2279_v23  ;;  %vm3797_vm14 = vcmp.lt.s32.totalorder %v9124_v32, 2  ;;  %v3806_v38 = vsel %vm3798_vm12, %v3789_v13, %v3805_v39  ;;  %v3810_v52 = vsel %vm3798_vm12, %v3792_v21, %v3809_v18 }
 0x16a   :  { %vm1612_vm15 = vcmp.gt.s32.totalorder %v1611_v60, 0  ;;  %v3807_v35 = vsel %vm3797_vm14, %v3804_v48, %v3806_v38  ;;  %v3811_v44 = vsel %vm3797_vm14, %v3808_v20, %v3810_v52  ;;  %v13828_v63 = vor.u32 8388608, %v13827_v8 }
 0x16b   :  { %v7286_v11 = vadd.s32 3, %v3956_v19  ;;  %v9698_v16 = vshrl.u32 %v2280_v50, 30  ;;  %v3802_v43 = vsel %vm3798_vm12, %v9254_v17, %v3801_v51  ;;  %v9714_v13 = vsel %vm1612_vm15, %v1611_v60, 0  ;;  %v13830_v17 = vld [vmem:[#allocation18_spill] sm:$0xff] }
 0x16c   :  { %v3812_v1 = vshll.u32 %v13828_v63, 8  ;;  %v7810_v36 = vadd.s32 4294967169, %v3047_v3  ;;  %v3150_v10 = vshrl.u32 %v3149_v28, 23  ;;  %v9718_v21 = vsub.s32 32, %v9636_v4 }
 0x16d   :  { %v2282_v5 = vshll.u32 %v9698_v16, 30  ;;  %v9720_v45 = vshrl.u32 %v1510_v7, 5  ;;  %v9722_v24 = vand.u32 31, %v1510_v7  ;;  %v427_v58 = vadd.f32 %v395_v61, %v13830_v17 }
 0x16e   :  { %v9707_v34 = vmul.u32.u64.low %v3812_v1, %v3811_v44  ;;  %v9708_v42 = vmul.u32.u64.high %v3812_v1, %v3811_v44, %v9707_v34  ;;  %v9710_v56 = vmul.u32.u64.low %v3812_v1, %v3807_v35  ;;  %v9711_v29 = vmul.u32.u64.high %v3812_v1, %v3807_v35, %v9710_v56 }
 0x16f   :  { %13829 = vst [vmem:[#allocation7_spill] sm:$0xff] %v9720_v45  ;;  %v9727_v40 = vmul.f32 %v8708_v47, %v9618_v6  ;;  %v3960_v60 = vand.u32 3, %v3956_v19  ;;  %v9729_v48 = vsub.s32 %v2279_v23, %v2282_v5  ;;  %v3803_v3 = vsel %vm3797_vm14, %v3800_v57, %v3802_v43  ;;  %v13847_v45 = vld [vmem:[#allocation2_spill] sm:$0xff] }
 0x170   :  { %v9734_v28 = vand.u32 31, %v9714_v13  ;;  %v7287_v51 = vand.u32 3, %v7286_v11  ;;  %vm3821_vm0 = vc.u32 %v9708_v42, %v9710_v56  ;;  %v3822_v61 = vadd.s32 1, %v9711_v29 }
 0x171   :  { %v9739_v7 = vadd.s32 1, %v7810_v36  ;;  %v9741_v6 = vadd.s32 4294967169, %v3150_v10  ;;  %v9744_v19 = vmul.f32 %v8703_v46, %v343_v54  ;;  %v2285_v23 = vsub.s32 0, %v9729_v48 }
 0x172   :  { %v8324_v32 = vpop.eup %8323  ;;  %v591_v39 = vmul.f32 %v8720_v53, %v479_v41  ;;  %vm3959_vm1 = vweird.f32 %v9243_v27  ;;  %v3819_v20 = vmul.u32 %v3812_v1, %v3803_v3  ;;  %v3823_v18 = vsel %vm3821_vm0, %v3822_v61, %v9711_v29  ;;  %v13831_v1 = vld [vmem:[#allocation16_spill] sm:$0xff] }
 0x173   :  { %v8326_v50 = vpop.eup %8325  ;;  %v3966_v38 = vxor.u32 2147483648, %v8324_v32  ;;  %vm3961_vm2 = vcmp.lt.s32.totalorder %v3960_v60, 2  ;;  %vm3962_vm3 = vcmp.eq.s32.totalorder %v3960_v60, 0  ;;  %v7779_v52 = vmin.u32 %v2285_v23, %v9729_v48  ;;  %v13837_v27 = vld [vmem:[#allocation12_spill] sm:$0xff] }
 0x174   :  { %v3963_v35 = vxor.u32 2147483648, %v8326_v50  ;;  %vm7292_vm4 = vcmp.eq.s32.totalorder %v7287_v51, 2  ;;  %vm3965_vm5 = vcmp.eq.s32.totalorder %v3960_v60, 2  ;;  %v3824_v54 = vadd.s32 %v3823_v18, %v3819_v20 }
 0x175   :  { %vm7289_vm6 = vcmp.eq.s32.totalorder %v7287_v51, 0  ;;  %v7294_v44 = vsel %vm7292_vm4, %v3966_v38, %v8326_v50  ;;  %v3967_v8 = vsel %vm3965_vm5, %v3966_v38, %v8326_v50  ;;  %v2287_v63 = vclz %v7779_v52 }
 0x176   :  { %vm7288_vm7 = vcmp.lt.s32.totalorder %v7287_v51, 2  ;;  %v7291_v11 = vsel %vm7289_vm6, %v8324_v32, %v3963_v35  ;;  %v3964_v57 = vsel %vm3962_vm3, %v8324_v32, %v3963_v35  ;;  %v13635_v43 = vand.u32 2147483647, %v13831_v1 }
 0x177   :  { %v7295_v34 = vsel %vm7288_vm7, %v7291_v11, %v7294_v44  ;;  %v3968_v29 = vsel %vm3961_vm2, %v3964_v57, %v3967_v8  ;;  %v7780_v36 = vadd.s32 4294967294, %v2287_v63  ;;  %v3825_v10 = vadd.s32 536870912, %v3824_v54 }
 0x178   :  { %v9753_v5 = vadd.f32 %v591_v39, %v427_v58  ;;  %v9757_v17 = vsel %vm3959_vm1, nan, %v7295_v34  ;;  %v9761_v41 = vsel %vm3959_vm1, nan, %v3968_v29  ;;  %vm2221_vm8 = vcmp.lt.s32.totalorder %v9293_v26, 0 }
 0x179   :  { %13832 = vst [vmem:[#allocation18_spill] sm:$0xff] %v9757_v17  ;;  %13833 = vst [vmem:[#allocation16_spill] sm:$0xff] %v9761_v41  ;;  %7980 = vmatprep.subr.mxu0 %v9757_v17  ;;  %8015 = vmatprep.subr.mxu1 %v9761_v41  ;;  %v13834_v60 = vand.u32 2147483647, %v9293_v26  ;;  %v2275_v58 = vadd.s32 %v9639_v9, %v9633_v22  ;;  %vm7781_vm10 = vcmp.lt.s32.totalorder %v7780_v36, 0  ;;  %v9774_v51 = vshrl.u32 %v3825_v10, 30 }
 0x17a   :  { %v2143_v61 = vshrl.u32 %v13798_v25, %v13837_v27  ;;  %v2290_v23 = vsel %vm7781_vm10, 0, %v7780_v36  ;;  %v2305_v32 = vsub.s32 4, %v9698_v16  ;;  %v2123_v39 = vand.u32 8388607, %v13635_v43  ;;  %v13838_v22 = vld [vmem:[#allocation8_spill] sm:$0xff] }
 0x17b   :  { %vm9768_vm9 = vcmp.le.f32.partialorder %v13834_v60, 0.7853982  ;;  %v2134_v20 = vshrl.u32 %v13778_v12, %v13837_v27  ;;  %v2291_v18 = vsub.s32 32, %v2290_v23  ;;  %v2295_v50 = vsub.s32 4294967266, %v2290_v23 }
 0x17c   :  { %v3827_v38 = vshll.u32 %v9774_v51, 30  ;;  %v2142_v9 = vshll.u32 %v13789_v33, %v13838_v22  ;;  %v2292_v52 = vshll.u32 %v9729_v48, %v2290_v23  ;;  %v2137_v35 = vshrl.u32 %v13780_v31, %v13837_v27 }
 0x17d   :  { %v2140_v44 = vshrl.u32 %v13789_v33, %v13837_v27  ;;  %v2146_v8 = vshrl.u32 %v13801_v2, %v13837_v27  ;;  %v2293_v63 = vshrl.u32 %v2275_v58, %v2291_v18  ;;  %v2296_v11 = vadd.s32 127, %v2295_v50 }
 0x17e   :  { %v9793_v57 = vsub.s32 %v3824_v54, %v3827_v38  ;;  %v2144_v34 = vor.u32 %v2143_v61, %v2142_v9  ;;  %v2306_v29 = vsel %vm2221_vm8, %v2305_v32, %v9698_v16  ;;  %v2133_v48 = vshll.u32 %v13745_v37, %v13838_v22  ;;  %v13839_v16 = vld [vmem:[#allocation11_spill] sm:$0xff] }
 0x17f   :  { %v2136_v36 = vshll.u32 %v13778_v12, %v13838_v22  ;;  %v2139_v10 = vshll.u32 %v13780_v31, %v13838_v22  ;;  %v2294_v60 = vor.u32 %v2293_v63, %v2292_v52  ;;  %v2297_v23 = vshll.u32 %v2296_v11, 23 }
 0x180   :  { %v3830_v58 = vsub.s32 0, %v9793_v57  ;;  %v2145_v54 = vshll.u32 %v13798_v25, %v13838_v22  ;;  %v2135_v61 = vor.u32 %v2134_v20, %v2133_v48  ;;  %vm2151_vm11 = vcmp.lt.s32.totalorder %v13839_v16, 4 }
 0x181   :  { %v2138_v18 = vor.u32 %v2137_v35, %v2136_v36  ;;  %v2141_v50 = vor.u32 %v2140_v44, %v2139_v10  ;;  %v2298_v32 = vor.u32 4788187, %v2297_v23  ;;  %v2157_v43 = vsel %vm2151_vm11, %v2144_v34, 920167782  ;;  %v13840_v35 = vld [vmem:[#allocation15_spill] sm:$0xff] }
 0x182   :  { %v7839_v38 = vmin.u32 %v3830_v58, %v9793_v57  ;;  %v2147_v9 = vor.u32 %v2146_v8, %v2145_v54  ;;  %v2308_v52 = vsel %vm9768_vm9, 0, %v2306_v29  ;;  %v2124_v63 = vor.u32 8388608, %v2123_v39 }
 0x183   :  { %v2132_v11 = vshrl.u32 %v13745_v37, %v13837_v27  ;;  %vm2148_vm12 = vcmp.lt.s32.totalorder %v13839_v16, 1  ;;  %v2299_v20 = vand.u32 2147483647, %v2298_v32  ;;  %v2301_v22 = vcvt.s32.f32 %v2294_v60 }
 0x184   :  { %vm3766_vm13 = vcmp.lt.s32.totalorder %v13840_v35, 0  ;;  %v3832_v44 = vclz %v7839_v38  ;;  %vm2150_vm14 = vcmp.lt.s32.totalorder %v13839_v16, 3  ;;  %v3820_v8 = vadd.s32 %v9710_v56, %v9708_v42 }
 0x185   :  { %v2156_v48 = vsel %vm2148_vm12, %v2135_v61, %v2138_v18  ;;  %v2158_v39 = vsel %vm2150_vm14, %v2141_v50, %v2157_v43  ;;  %v2160_v27 = vsel %vm2148_vm12, %v2138_v18, %v2141_v50  ;;  %v2302_v29 = vmul.f32 %v2301_v22, %v2299_v20 }
 0x186   :  { %v7840_v36 = vadd.s32 4294967294, %v3832_v44  ;;  %vm2149_vm15 = vcmp.lt.s32.totalorder %v13839_v16, 2  ;;  %v2161_v10 = vsel %vm2151_vm11, %v2147_v9, 1326507024  ;;  %v13841_v60 = vand.u32 2147483647, %v13840_v35 }
 0x187   :  { %v3850_v56 = vsub.s32 4, %v9774_v51  ;;  %v2153_v43 = vsel %vm2151_vm11, %v2141_v50, 2102212464  ;;  %v2162_v23 = vsel %vm2150_vm14, %v2144_v34, %v2161_v10  ;;  %v2164_v58 = vshll.u32 %v2124_v63, 8 }
 0x188   :  { %vm9831_vm0 = vcmp.le.f32.partialorder %v13841_v60, 0.7853982  ;;  %v2303_v54 = vxor.u32 2147483648, %v2302_v29  ;;  %vm7841_vm1 = vcmp.lt.s32.totalorder %v7840_v36, 0  ;;  %v2159_v32 = vsel %vm2149_vm15, %v2156_v48, %v2158_v39 }
 0x189   :  { %v2163_v38 = vsel %vm2149_vm15, %v2160_v27, %v2162_v23  ;;  %v3835_v9 = vsel %vm7841_vm1, 0, %v7840_v36  ;;  %v2152_v20 = vsel %vm2148_vm12, %v2132_v11, %v2135_v61  ;;  %v2154_v10 = vsel %vm2150_vm14, %v2138_v18, %v2153_v43  ;;  %v13844_v43 = vld [vmem:[#allocation17_spill] sm:$0xff] }
 0x18a   :  { %v9846_v22 = vmul.u32.u64.low %v2164_v58, %v2163_v38  ;;  %v9847_v44 = vmul.u32.u64.high %v2164_v58, %v2163_v38, %v9846_v22  ;;  %v2304_v50 = vsel %vm2221_vm8, %v2303_v54, %v2302_v29  ;;  %v3836_v34 = vsub.s32 32, %v3835_v9  ;;  %v164_v29 = vpop.permute.xlu1 %163 }
 0x18b   :  { %v3840_v63 = vsub.s32 4294967266, %v3835_v9  ;;  %v2307_v48 = vsel %vm9768_vm9, %v9293_v26, %v2304_v50  ;;  %v5622_v39 = vadd.s32 3, %v2308_v52  ;;  %v3837_v61 = vshll.u32 %v9793_v57, %v3835_v9  ;;  %v13845_v50 = vld [vmem:[#allocation21_spill] sm:$0xff] }
 0x18c   :  { %v9856_v27 = vmul.u32.u64.low %v2164_v58, %v2159_v32  ;;  %v9857_v36 = vmul.u32.u64.high %v2164_v58, %v2159_v32, %v9856_v27  ;;  %8327 = vcosq.f32 %v2307_v48  ;;  %v3838_v11 = vshrl.u32 %v3820_v8, %v3836_v34 }
 0x18d   :  { %v3841_v60 = vadd.s32 127, %v3840_v63  ;;  %8329 = vsinq.f32 %v2307_v48  ;;  %v3851_v18 = vsel %vm3766_vm13, %v3850_v56, %v9774_v51  ;;  %v2155_v3 = vsel %vm2149_vm15, %v2152_v20, %v2154_v10 }
 0x18e   :  { %v13636_v23 = vand.u32 2147483647, %v13844_v43  ;;  %v9869_v54 = vadd.f32 %v9744_v19, %v9727_v40  ;;  %v3839_v32 = vor.u32 %v3838_v11, %v3837_v61  ;;  %vm2173_vm2 = vc.u32 %v9847_v44, %v9856_v27 }
 0x18f   :  { %v3842_v38 = vshll.u32 %v3841_v60, 23  ;;  %v9874_v57 = vadd.f32 0.5, %v9753_v5  ;;  %v9876_v8 = vand.u32 3, %v5622_v39  ;;  %v9878_v51 = vand.u32 3, %v2308_v52 }
 0x190   :  { %v2174_v16 = vadd.s32 1, %v9857_v36  ;;  %v9882_v56 = vmul.f32 %v8708_v47, %v164_v29  ;;  %v3853_v40 = vsel %vm9831_vm0, 0, %v3851_v18  ;;  %v2171_v19 = vmul.u32 %v2164_v58, %v2155_v3 }
 0x191   :  { %v3843_v9 = vor.u32 4788187, %v3842_v38  ;;  %v9889_v22 = vand.u32 8388607, %v13636_v23  ;;  %v3679_v52 = vshrl.u32 %v13778_v12, %v13845_v50  ;;  %v3688_v34 = vshrl.u32 %v13798_v25, %v13845_v50 }
 0x192   :  { %v2175_v20 = vsel %vm2173_vm2, %v2174_v16, %v9857_v36  ;;  %v3846_v10 = vcvt.s32.f32 %v3839_v32  ;;  %v3682_v39 = vshrl.u32 %v13780_v31, %v13845_v50  ;;  %vm5628_vm3 = vcmp.eq.s32.totalorder %v9876_v8, 2  ;;  %v13846_v36 = vld [vmem:[#allocation10_spill] sm:$0xff] }
 0x193   :  { %v3844_v63 = vand.u32 2147483647, %v3843_v9  ;;  %v2176_v48 = vadd.s32 %v2175_v20, %v2171_v19  ;;  %vm2317_vm4 = vcmp.eq.s32.totalorder %v9878_v51, 2  ;;  %v3685_v58 = vshrl.u32 %v13789_v33, %v13845_v50 }
 0x194   :  { %v3687_v61 = vshll.u32 %v13789_v33, %v13846_v36  ;;  %v3690_v11 = vshll.u32 %v13798_v25, %v13846_v36  ;;  %v3691_v60 = vshrl.u32 %v13801_v2, %v13845_v50  ;;  %vm5625_vm5 = vcmp.eq.s32.totalorder %v9876_v8, 0 }
 0x195   :  { %vm2314_vm6 = vcmp.eq.s32.totalorder %v9878_v51, 0  ;;  %v3847_v29 = vmul.f32 %v3846_v10, %v3844_v63  ;;  %v2177_v18 = vadd.s32 536870912, %v2176_v48  ;;  %v3678_v3 = vshll.u32 %v13745_v37, %v13846_v36 }
 0x196   :  { %v3681_v32 = vshll.u32 %v13778_v12, %v13846_v36  ;;  %vm3054_vm7 = vcmp.gt.s32.totalorder %v9739_v7, 0  ;;  %vm5624_vm8 = vcmp.lt.s32.totalorder %v9876_v8, 2  ;;  %vm2313_vm9 = vcmp.lt.s32.totalorder %v9878_v51, 2 }
 0x197   :  { %v7182_v38 = vadd.s32 3, %v3853_v40  ;;  %v3684_v16 = vshll.u32 %v13780_v31, %v13846_v36  ;;  %v3689_v9 = vor.u32 %v3688_v34, %v3687_v61  ;;  %v3692_v19 = vor.u32 %v3691_v60, %v3690_v11 }
 0x198   :  { %vm2311_vm10 = vweird.f32 %v9293_v26  ;;  %v3848_v20 = vxor.u32 2147483648, %v3847_v29  ;;  %v9919_v63 = vshrl.u32 %v2177_v18, 30  ;;  %v3680_v10 = vor.u32 %v3679_v52, %v3678_v3 }
 0x199   :  { %v3683_v23 = vor.u32 %v3682_v39, %v3681_v32  ;;  %v9921_v17 = vand.u32 3, %v3853_v40  ;;  %v3677_v41 = vshrl.u32 %v13745_v37, %v13845_v50  ;;  %v3686_v59 = vor.u32 %v3685_v58, %v3684_v16  ;;  %v8328_v52 = vpop.eup %8327 }
 0x19a   :  { %vm3696_vm11 = vcmp.lt.s32.totalorder %v13847_v45, 4  ;;  %v3849_v36 = vsel %vm3766_vm13, %v3848_v20, %v3847_v29  ;;  %v2179_v34 = vshll.u32 %v9919_v63, 30  ;;  %v3669_v61 = vor.u32 8388608, %v9889_v22  ;;  %v8330_v39 = vpop.eup %8329 }
 0x19b   :  { %v3706_v11 = vsel %vm3696_vm11, %v3692_v19, 1326507024  ;;  %v3852_v40 = vsel %vm9831_vm0, %v13840_v35, %v3849_v36  ;;  %vm3693_vm12 = vcmp.lt.s32.totalorder %v13847_v45, 1  ;;  %vm3695_vm14 = vcmp.lt.s32.totalorder %v13847_v45, 3 }
 0x19c   :  { %v3702_v50 = vsel %vm3696_vm11, %v3689_v9, 920167782  ;;  %v2318_v58 = vxor.u32 2147483648, %v8328_v52  ;;  %8331 = vcosq.f32 %v3852_v40  ;;  %v9939_v60 = vsub.s32 %v2176_v48, %v2179_v34 }
 0x19d   :  { %v3701_v22 = vsel %vm3693_vm12, %v3680_v10, %v3683_v23  ;;  %v2315_v29 = vxor.u32 2147483648, %v8330_v39  ;;  %8333 = vsinq.f32 %v3852_v40  ;;  %v3705_v42 = vsel %vm3693_vm12, %v3683_v23, %v3686_v59 }
 0x19e   :  { %v3707_v18 = vsel %vm3695_vm14, %v3689_v9, %v3706_v11  ;;  %v5630_v3 = vsel %vm5628_vm3, %v2318_v58, %v8330_v39  ;;  %v2319_v32 = vsel %vm2317_vm4, %v2318_v58, %v8330_v39  ;;  %v2182_v48 = vsub.s32 0, %v9939_v60 }
 0x19f   :  { %v3703_v16 = vsel %vm3695_vm14, %v3686_v59, %v3702_v50  ;;  %v5627_v19 = vsel %vm5625_vm5, %v8328_v52, %v2315_v29  ;;  %v2316_v20 = vsel %vm2314_vm6, %v8328_v52, %v2315_v29  ;;  %vm3694_vm13 = vcmp.lt.s32.totalorder %v13847_v45, 2 }
 0x1a0   :  { %v3698_v9 = vsel %vm3696_vm11, %v3686_v59, 2102212464  ;;  %v5631_v36 = vsel %vm5624_vm8, %v5627_v19, %v5630_v3  ;;  %v2320_v34 = vsel %vm2313_vm9, %v2316_v20, %v2319_v32  ;;  %v7775_v11 = vmin.u32 %v2182_v48, %v9939_v60  ;;  %v13850_v32 = vld [vmem:[#allocation13_spill] sm:$0xff] }
 0x1a1   :  { %v3708_v40 = vsel %vm3694_vm13, %v3705_v42, %v3707_v18  ;;  %v9970_v50 = vsel %vm2311_vm10, nan, %v5631_v36  ;;  %v9974_v52 = vsel %vm2311_vm10, nan, %v2320_v34  ;;  %v3704_v59 = vsel %vm3694_vm13, %v3701_v22, %v3703_v16 }
 0x1a2   :  { %13848 = vst [vmem:[#allocation12_spill] sm:$0xff] %v9970_v50  ;;  %13849 = vst [vmem:[#allocation8_spill] sm:$0xff] %v9974_v52  ;;  %v3709_v8 = vshll.u32 %v3669_v61, 8  ;;  %v9981_v51 = vsel %vm3054_vm7, %v9739_v7, 0  ;;  %v9985_v39 = vmul.f32 %v8708_v47, %v9685_v14  ;;  %7981 = vmatpush3.msra.mxu0 %v9970_v50  ;;  %8016 = vmatpush3.msra.mxu1 %v9974_v52  ;;  %v7183_v26 = vand.u32 3, %v7182_v38 }
 0x1a3   :  { %v2184_v58 = vclz %v7775_v11  ;;  %v3697_v29 = vsel %vm3693_vm12, %v3677_v41, %v3680_v10  ;;  %v3699_v61 = vsel %vm3695_vm14, %v3683_v23, %v3698_v9  ;;  %v687_v7 = vfloor.f32 %v9874_v57 }
 0x1a4   :  { %v9993_v22 = vmul.u32.u64.low %v3709_v8, %v3708_v40  ;;  %v9994_v42 = vmul.u32.u64.high %v3709_v8, %v3708_v40, %v9993_v22  ;;  %v9997_v14 = vmul.u32.u64.low %v3709_v8, %v3704_v59  ;;  %v9998_v3 = vmul.u32.u64.high %v3709_v8, %v3704_v59, %v9997_v14 }
 0x1a5   :  { %v7776_v18 = vadd.s32 4294967294, %v2184_v58  ;;  %v10003_v38 = vadd.f32 %v13850_v32, %v9882_v56  ;;  %vm3858_vm15 = vcmp.lt.s32.totalorder %v9921_v17, 2  ;;  %vm2118_vm0 = vcmp.lt.s32.totalorder %v13831_v1, 0 }
 0x1a6   :  { %v2202_v41 = vsub.s32 4, %v9919_v63  ;;  %vm3856_vm1 = vweird.f32 %v13840_v35  ;;  %vm3859_vm2 = vcmp.eq.s32.totalorder %v9921_v17, 0  ;;  %vm3862_vm3 = vcmp.eq.s32.totalorder %v9921_v17, 2 }
 0x1a7   :  { %vm7777_vm4 = vcmp.lt.s32.totalorder %v7776_v18, 0  ;;  %v3700_v23 = vsel %vm3694_vm13, %v3697_v29, %v3699_v61  ;;  %vm7184_vm5 = vcmp.lt.s32.totalorder %v7183_v26, 2  ;;  %vm7185_vm6 = vcmp.eq.s32.totalorder %v7183_v26, 0  ;;  %v13851_v29 = vld [vmem:[#allocation25_spill] sm:$0xff] }
 0x1a8   :  { %v2187_v56 = vsel %vm7777_vm4, 0, %v7776_v18  ;;  %vm3718_vm7 = vc.u32 %v9994_v42, %v9997_v14  ;;  %v2172_v10 = vadd.s32 %v9856_v27, %v9847_v44  ;;  %v3719_v19 = vadd.s32 1, %v9998_v3 }
 0x1a9   :  { %v2188_v48 = vsub.s32 32, %v2187_v56  ;;  %v2192_v16 = vsub.s32 4294967266, %v2187_v56  ;;  %v8332_v20 = vpop.eup %8331  ;;  %vm7188_vm8 = vcmp.eq.s32.totalorder %v7183_v26, 2  ;;  %v2189_v9 = vshll.u32 %v9939_v60, %v2187_v56 }
 0x1aa   :  { %v2203_v45 = vsel %vm2118_vm0, %v2202_v41, %v9919_v63  ;;  %v3716_v36 = vmul.u32 %v3709_v8, %v3700_v23  ;;  %v8334_v34 = vpop.eup %8333  ;;  %v3863_v11 = vxor.u32 2147483648, %v8332_v20  ;;  %v3720_v58 = vsel %vm3718_vm7, %v3719_v19, %v9998_v3 }
 0x1ab   :  { %v2190_v40 = vshrl.u32 %v2172_v10, %v2188_v48  ;;  %v2193_v59 = vadd.s32 127, %v2192_v16  ;;  %v3860_v44 = vxor.u32 2147483648, %v8334_v34  ;;  %v13642_v61 = vand.u32 2147483647, %v13851_v29 }
 0x1ac   :  { %v3721_v27 = vadd.s32 %v3720_v58, %v3716_v36  ;;  %v2030_v22 = vshll.u32 %v13745_v37, %v9505_v55  ;;  %v7190_v18 = vsel %vm7188_vm8, %v3863_v11, %v8334_v34  ;;  %v3864_v60 = vsel %vm3862_vm3, %v3863_v11, %v8334_v34 }
 0x1ad   :  { %v2191_v32 = vor.u32 %v2190_v40, %v2189_v9  ;;  %v2194_v63 = vshll.u32 %v2193_v59, 23  ;;  %v7187_v8 = vsel %vm7185_vm6, %v8332_v20, %v3860_v44  ;;  %v3861_v41 = vsel %vm3859_vm2, %v8332_v20, %v3860_v44 }
 0x1ae   :  { %v3722_v23 = vadd.s32 536870912, %v3721_v27  ;;  %v2031_v3 = vshrl.u32 %v13778_v12, %v9530_v49  ;;  %v7191_v56 = vsel %vm7184_vm5, %v7187_v8, %v7190_v18  ;;  %v3865_v10 = vsel %vm3858_vm15, %v3861_v41, %v3864_v60 }
 0x1af   :  { %v2195_v48 = vor.u32 4788187, %v2194_v63  ;;  %v2034_v16 = vshrl.u32 %v13780_v31, %v9530_v49  ;;  %v10040_v19 = vsel %vm3856_vm1, nan, %v7191_v56  ;;  %v10044_v20 = vsel %vm3856_vm1, nan, %v3865_v10 }
 0x1b0   :  { %13852 = vst [vmem:[#allocation11_spill] sm:$0xff] %v10040_v19  ;;  %13853 = vst [vmem:[#allocation15_spill] sm:$0xff] %v10044_v20  ;;  %v10046_v9 = vshrl.u32 %v3722_v23, 30  ;;  %v2037_v26 = vshrl.u32 %v13789_v33, %v9530_v49  ;;  %7982 = vmatprep.subr.mxu0 %v10040_v19  ;;  %8017 = vmatprep.subr.mxu1 %v10044_v20  ;;  %v2198_v36 = vcvt.s32.f32 %v2191_v32  ;;  %v2020_v40 = vand.u32 8388607, %v13642_v61 }
 0x1b1   :  { %v2196_v17 = vand.u32 2147483647, %v2195_v48  ;;  %v2039_v34 = vshll.u32 %v13789_v33, %v9505_v55  ;;  %v2040_v11 = vshrl.u32 %v13798_v25, %v9530_v49  ;;  %v2033_v59 = vshll.u32 %v13778_v12, %v9505_v55 }
 0x1b2   :  { %v3724_v35 = vshll.u32 %v10046_v9, 30  ;;  %v2036_v58 = vshll.u32 %v13780_v31, %v9505_v55  ;;  %v13854_v44 = vand.u32 2147483647, %v13831_v1  ;;  %v2043_v63 = vshrl.u32 %v13801_v2, %v9530_v49 }
 0x1b3   :  { %v2199_v60 = vmul.f32 %v2198_v36, %v2196_v17  ;;  %v2041_v32 = vor.u32 %v2040_v11, %v2039_v34  ;;  %v2032_v41 = vor.u32 %v2031_v3, %v2030_v22  ;;  %v2035_v23 = vor.u32 %v2034_v16, %v2033_v59 }
 0x1b4   :  { %vm10065_vm9 = vcmp.le.f32.partialorder %v13854_v44, 0.7853982  ;;  %v10071_v8 = vsub.s32 %v3721_v27, %v3724_v35  ;;  %v2038_v56 = vor.u32 %v2037_v26, %v2036_v58  ;;  %v2029_v44 = vshrl.u32 %v13745_v37, %v9530_v49  ;;  %v471_v26 = vpop.permute.xlu0 %470 }
 0x1b5   :  { %v2200_v10 = vxor.u32 2147483648, %v2199_v60  ;;  %v2205_v48 = vsel %vm10065_vm9, 0, %v2203_v45  ;;  %v2042_v61 = vshll.u32 %v13798_v25, %v9505_v55  ;;  %v2021_v36 = vor.u32 8388608, %v2020_v40 }
 0x1b6   :  { %v3727_v17 = vsub.s32 0, %v10071_v8  ;;  %vm2045_vm10 = vcmp.lt.s32.totalorder %v9524_v30, 1  ;;  %vm2048_vm11 = vcmp.lt.s32.totalorder %v9524_v30, 4  ;;  %vm2047_vm12 = vcmp.lt.s32.totalorder %v9524_v30, 3 }
 0x1b7   :  { %v2201_v27 = vsel %vm2118_vm0, %v2200_v10, %v2199_v60  ;;  %v2044_v22 = vor.u32 %v2043_v63, %v2042_v61  ;;  %v2054_v45 = vsel %vm2048_vm11, %v2041_v32, 920167782  ;;  %v2050_v3 = vsel %vm2048_vm11, %v2038_v56, 2102212464 }
 0x1b8   :  { %v2204_v55 = vsel %vm10065_vm9, %v13831_v1, %v2201_v27  ;;  %v7835_v49 = vmin.u32 %v3727_v17, %v10071_v8  ;;  %v2053_v16 = vsel %vm2045_vm10, %v2032_v41, %v2035_v23  ;;  %v5518_v61 = vadd.s32 3, %v2205_v48 }
 0x1b9   :  { %8335 = vcosq.f32 %v2204_v55  ;;  %vm2046_vm14 = vcmp.lt.s32.totalorder %v9524_v30, 2  ;;  %v2055_v34 = vsel %vm2047_vm12, %v2038_v56, %v2054_v45  ;;  %v2049_v35 = vsel %vm2045_vm10, %v2029_v44, %v2032_v41 }
 0x1ba   :  { %8337 = vsinq.f32 %v2204_v55  ;;  %v3729_v11 = vclz %v7835_v49  ;;  %v2057_v40 = vsel %vm2045_vm10, %v2035_v23, %v2038_v56  ;;  %v2051_v59 = vsel %vm2047_vm12, %v2035_v23, %v2050_v3 }
 0x1bb   :  { %v2056_v58 = vsel %vm2046_vm14, %v2053_v16, %v2055_v34  ;;  %v2058_v18 = vsel %vm2048_vm11, %v2044_v22, 1326507024  ;;  %v2061_v60 = vshll.u32 %v2021_v36, 8  ;;  %v10109_v63 = vmul.f32 %v8720_v53, %v471_v26 }
 0x1bc   :  { %v10111_v10 = vand.u32 3, %v2205_v48  ;;  %v7836_v17 = vadd.s32 4294967294, %v3729_v11  ;;  %v2059_v41 = vsel %vm2047_vm12, %v2041_v32, %v2058_v18  ;;  %v3747_v56 = vsub.s32 4, %v10046_v9 }
 0x1bd   :  { %v2060_v23 = vsel %vm2046_vm14, %v2057_v40, %v2059_v41  ;;  %v10118_v44 = vmul.u32.u64.low %v2061_v60, %v2056_v58  ;;  %v10119_v27 = vmul.u32.u64.high %v2061_v60, %v2056_v58, %v10118_v44  ;;  %v2052_v36 = vsel %vm2046_vm14, %v2049_v35, %v2051_v59 }
 0x1be   :  { %vm7837_vm13 = vcmp.lt.s32.totalorder %v7836_v17, 0  ;;  %v10124_v22 = vmul.u32.u64.low %v2061_v60, %v2060_v23  ;;  %v10125_v48 = vmul.u32.u64.high %v2061_v60, %v2060_v23, %v10124_v22  ;;  %v10130_v32 = vsub.f32 %v9753_v5, %v687_v7 }
 0x1bf   :  { %v5519_v45 = vand.u32 3, %v5518_v61  ;;  %vm3663_vm15 = vcmp.lt.s32.totalorder %v13844_v43, 0  ;;  %v3732_v55 = vsel %vm7837_vm13, 0, %v7836_v17  ;;  %v13857_v49 = vand.u32 2147483647, %v13844_v43  ;;  %v13860_v61 = vld [vmem:[#allocation27_spill] sm:$0xff] }
 0x1c0   :  { %v3717_v30 = vadd.s32 %v9997_v14, %v9994_v42  ;;  %v3733_v16 = vsub.s32 32, %v3732_v55  ;;  %v3737_v26 = vsub.s32 4294967266, %v3732_v55  ;;  %vm2211_vm1 = vcmp.eq.s32.totalorder %v10111_v10, 0 }
 0x1c1   :  { %vm10135_vm0 = vcmp.le.f32.partialorder %v13857_v49, 0.7853982  ;;  %v3748_v5 = vsel %vm3663_vm15, %v3747_v56, %v10046_v9  ;;  %v2068_v57 = vmul.u32 %v2061_v60, %v2052_v36  ;;  %v2071_v7 = vadd.s32 1, %v10119_v27 }
 0x1c2   :  { %v13643_v34 = vand.u32 2147483647, %v13860_v61  ;;  %vm2210_vm2 = vcmp.lt.s32.totalorder %v10111_v10, 2  ;;  %v3734_v11 = vshll.u32 %v10071_v8, %v3732_v55  ;;  %v3735_v35 = vshrl.u32 %v3717_v30, %v3733_v16 }
 0x1c3   :  { %v3738_v40 = vadd.s32 127, %v3737_v26  ;;  %vm2070_vm3 = vc.u32 %v10125_v48, %v10118_v44  ;;  %vm2208_vm4 = vweird.f32 %v13831_v1  ;;  %vm5520_vm5 = vcmp.lt.s32.totalorder %v5519_v45, 2 }
 0x1c4   :  { %vm5521_vm6 = vcmp.eq.s32.totalorder %v5519_v45, 0  ;;  %vm5524_vm7 = vcmp.eq.s32.totalorder %v5519_v45, 2  ;;  %v2072_v42 = vsel %vm2070_vm3, %v2071_v7, %v10119_v27  ;;  %vm2214_vm8 = vcmp.eq.s32.totalorder %v10111_v10, 2 }
 0x1c5   :  { %v3736_v14 = vor.u32 %v3735_v35, %v3734_v11  ;;  %v3739_v9 = vshll.u32 %v3738_v40, 23  ;;  %v2073_v59 = vadd.s32 %v2072_v42, %v2068_v57  ;;  %v3750_v8 = vsel %vm10135_vm0, 0, %v3748_v5 }
 0x1c6   :  { %v10158_v58 = vand.u32 8388607, %v13643_v34  ;;  %v3575_v18 = vshll.u32 %v13745_v37, %v9517_v62  ;;  %v3576_v60 = vshrl.u32 %v13778_v12, %v9546_v0  ;;  %v8336_v17 = vpop.eup %8335  ;;  %v3578_v23 = vshll.u32 %v13778_v12, %v9517_v62 }
 0x1c7   :  { %v3740_v41 = vor.u32 4788187, %v3739_v9  ;;  %v2074_v56 = vadd.s32 536870912, %v2073_v59  ;;  %v3579_v27 = vshrl.u32 %v13780_v31, %v9546_v0  ;;  %v8338_v36 = vpop.eup %8337  ;;  %v2215_v22 = vxor.u32 2147483648, %v8336_v17 }
 0x1c8   :  { %v3581_v55 = vshll.u32 %v13780_v31, %v9517_v62  ;;  %v3582_v49 = vshrl.u32 %v13789_v33, %v9546_v0  ;;  %v3585_v30 = vshrl.u32 %v13798_v25, %v9546_v0  ;;  %v2212_v16 = vxor.u32 2147483648, %v8338_v36 }
 0x1c9   :  { %v3741_v26 = vand.u32 2147483647, %v3740_v41  ;;  %v3743_v5 = vcvt.s32.f32 %v3736_v14  ;;  %v2075_v57 = vshrl.u32 %v2074_v56, 30  ;;  %v5526_v7 = vsel %vm5524_vm7, %v2215_v22, %v8338_v36 }
 0x1ca   :  { %v2216_v11 = vsel %vm2214_vm8, %v2215_v22, %v8338_v36  ;;  %v3584_v35 = vshll.u32 %v13789_v33, %v9517_v62  ;;  %v3588_v40 = vshrl.u32 %v13801_v2, %v9546_v0  ;;  %v5523_v42 = vsel %vm5521_vm6, %v8336_v17, %v2212_v16 }
 0x1cb   :  { %v2213_v9 = vsel %vm2211_vm1, %v8336_v17, %v2212_v16  ;;  %v3744_v34 = vmul.f32 %v3743_v5, %v3741_v26  ;;  %v2076_v41 = vshll.u32 %v2075_v57, 30  ;;  %v5527_v14 = vsel %vm5520_vm5, %v5523_v42, %v5526_v7 }
 0x1cc   :  { %v2217_v56 = vsel %vm2210_vm2, %v2213_v9, %v2216_v11  ;;  %v3586_v19 = vor.u32 %v3585_v30, %v3584_v35  ;;  %v3587_v36 = vshll.u32 %v13798_v25, %v9517_v62  ;;  %v10191_v22 = vsel %vm2208_vm4, nan, %v5527_v14  ;;  %v13863_v11 = vld [vmem:[#allocation48_spill] sm:$0xff] }
 0x1cd   :  { %13861 = vst [vmem:[#allocation17_spill] sm:$0xff] %v10191_v22  ;;  %v10195_v20 = vsel %vm2208_vm4, nan, %v2217_v56  ;;  %v3745_v17 = vxor.u32 2147483648, %v3744_v34  ;;  %v10197_v16 = vsub.s32 %v2073_v59, %v2076_v41  ;;  %v10200_v45 = vadd.s32 1, %v9741_v6  ;;  %7983 = vmatpush3.msra.mxu0 %v10191_v22 }
 0x1ce   :  { %13862 = vst [vmem:[#allocation21_spill] sm:$0xff] %v10195_v20  ;;  %8018 = vmatpush3.msra.mxu1 %v10195_v20  ;;  %v3577_v10 = vor.u32 %v3576_v60, %v3575_v18  ;;  %v3580_v62 = vor.u32 %v3579_v27, %v3578_v23  ;;  %v3583_v30 = vor.u32 %v3582_v49, %v3581_v55  ;;  %vm2015_vm9 = vcmp.lt.s32.totalorder %v13851_v29, 0 }
 0x1cf   :  { %v3746_v26 = vsel %vm3663_vm15, %v3745_v17, %v3744_v34  ;;  %v2079_v1 = vsub.s32 0, %v10197_v16  ;;  %v3589_v5 = vor.u32 %v3588_v40, %v3587_v36  ;;  %v7078_v59 = vadd.s32 3, %v3750_v8 }
 0x1d0   :  { %v3749_v6 = vsel %vm10135_vm0, %v13844_v43, %v3746_v26  ;;  %v3566_v7 = vor.u32 8388608, %v10158_v58  ;;  %vm3593_vm10 = vcmp.lt.s32.totalorder %v13863_v11, 4  ;;  %vm3590_vm11 = vcmp.lt.s32.totalorder %v13863_v11, 1 }
 0x1d1   :  { %8339 = vcosq.f32 %v3749_v6  ;;  %v7771_v18 = vmin.u32 %v2079_v1, %v10197_v16  ;;  %v3599_v34 = vsel %vm3593_vm10, %v3586_v19, 920167782  ;;  %vm3592_vm12 = vcmp.lt.s32.totalorder %v13863_v11, 3 }
 0x1d2   :  { %8341 = vsinq.f32 %v3749_v6  ;;  %v3595_v60 = vsel %vm3593_vm10, %v3583_v30, 2102212464  ;;  %v3598_v23 = vsel %vm3590_vm11, %v3577_v10, %v3580_v62  ;;  %v13864_v3 = vand.u32 2147483647, %v13851_v29 }
 0x1d3   :  { %v2081_v58 = vclz %v7771_v18  ;;  %v3600_v55 = vsel %vm3592_vm12, %v3583_v30, %v3599_v34  ;;  %v3602_v49 = vsel %vm3590_vm11, %v3580_v62, %v3583_v30  ;;  %v3603_v35 = vsel %vm3593_vm10, %v3589_v5, 1326507024  ;;  %v13867_v34 = vld [vmem:[#allocation9_spill] sm:$0xff] }
 0x1d4   :  { %vm10220_vm14 = vcmp.le.f32.partialorder %v13864_v3, 0.7853982  ;;  %v10228_v40 = vand.u32 3, %v3750_v8  ;;  %v2099_v42 = vsub.s32 4, %v2075_v57  ;;  %v3574_v9 = vshrl.u32 %v13745_v37, %v9546_v0 }
 0x1d5   :  { %vm3591_vm13 = vcmp.lt.s32.totalorder %v13863_v11, 2  ;;  %v7772_v41 = vadd.s32 4294967294, %v2081_v58  ;;  %v3604_v56 = vsel %vm3592_vm12, %v3586_v19, %v3603_v35  ;;  %v3606_v36 = vshll.u32 %v3566_v7, 8 }
 0x1d6   :  { %v3601_v14 = vsel %vm3591_vm13, %v3598_v23, %v3600_v55  ;;  %v7079_v17 = vand.u32 3, %v7078_v59  ;;  %v3594_v30 = vsel %vm3590_vm11, %v3574_v9, %v3577_v10  ;;  %v3596_v8 = vsel %vm3592_vm12, %v3580_v62, %v3595_v60 }
 0x1d7   :  { %v3605_v0 = vsel %vm3591_vm13, %v3602_v49, %v3604_v56  ;;  %v2069_v26 = vadd.s32 %v10118_v44, %v10125_v48  ;;  %vm7773_vm15 = vcmp.lt.s32.totalorder %v7772_v41, 0  ;;  %v2100_v19 = vsel %vm2015_vm9, %v2099_v42, %v2075_v57 }
 0x1d8   :  { %v10245_v1 = vmul.u32.u64.low %v3606_v36, %v3605_v0  ;;  %v10246_v5 = vmul.u32.u64.high %v3606_v36, %v3605_v0, %v10245_v1  ;;  %v2084_v6 = vsel %vm7773_vm15, 0, %v7772_v41  ;;  %v3597_v18 = vsel %vm3591_vm13, %v3594_v30, %v3596_v8  ;;  %v13869_v41 = vld [vmem:[#allocation38_spill] sm:$0xff] }
 0x1d9   :  { %v10250_v59 = vmul.u32.u64.low %v3606_v36, %v3601_v14  ;;  %v10251_v7 = vmul.u32.u64.high %v3606_v36, %v3601_v14, %v10250_v59  ;;  %v2085_v10 = vsub.s32 32, %v2084_v6  ;;  %v2089_v62 = vsub.s32 4294967266, %v2084_v6 }
 0x1da   :  { %v13646_v60 = vand.u32 2147483647, %v13867_v34  ;;  %vm7080_vm0 = vcmp.lt.s32.totalorder %v7079_v17, 2  ;;  %vm7081_vm1 = vcmp.eq.s32.totalorder %v7079_v17, 0  ;;  %vm3755_vm2 = vcmp.lt.s32.totalorder %v10228_v40, 2 }
 0x1db   :  { %vm3756_vm3 = vcmp.eq.s32.totalorder %v10228_v40, 0  ;;  %vm3759_vm4 = vcmp.eq.s32.totalorder %v10228_v40, 2  ;;  %vm3753_vm5 = vweird.f32 %v13844_v43  ;;  %v2086_v44 = vshll.u32 %v10197_v16, %v2084_v6  ;;  %v13868_v16 = vld [vmem:[#allocation35_spill] sm:$0xff]  ;;  %v13873_v43 = vld [vmem:[#allocation54_spill] sm:$0xff] }
 0x1dc   :  { %v2087_v48 = vshrl.u32 %v2069_v26, %v2085_v10  ;;  %v2090_v57 = vadd.s32 127, %v2089_v62  ;;  %vm3615_vm6 = vc.u32 %v10246_v5, %v10250_v59  ;;  %vm7084_vm7 = vcmp.eq.s32.totalorder %v7079_v17, 2 }
 0x1dd   :  { %v10266_v11 = vsel %vm10220_vm14, 0, %v2100_v19  ;;  %v3613_v23 = vmul.u32 %v3606_v36, %v3597_v18  ;;  %v3616_v3 = vadd.s32 1, %v10251_v7  ;;  %v10271_v49 = vand.u32 8388607, %v13646_v60 }
 0x1de   :  { %v2088_v58 = vor.u32 %v2087_v48, %v2086_v44  ;;  %v2091_v55 = vshll.u32 %v2090_v57, 23  ;;  %v1927_v35 = vshll.u32 %v13745_v37, %v13868_v16  ;;  %v8340_v42 = vpop.eup %8339  ;;  %v1928_v14 = vshrl.u32 %v13778_v12, %v13869_v41 }
 0x1df   :  { %v3617_v9 = vsel %vm3615_vm6, %v3616_v3, %v10251_v7  ;;  %v1930_v56 = vshll.u32 %v13778_v12, %v13868_v16  ;;  %v1931_v36 = vshrl.u32 %v13780_v31, %v13869_v41  ;;  %v8342_v30 = vpop.eup %8341  ;;  %v3760_v8 = vxor.u32 2147483648, %v8340_v42 }
 0x1e0   :  { %v2092_v0 = vor.u32 4788187, %v2091_v55  ;;  %v3618_v26 = vadd.s32 %v3617_v9, %v3613_v23  ;;  %v1933_v1 = vshll.u32 %v13780_v31, %v13868_v16  ;;  %v3757_v6 = vxor.u32 2147483648, %v8342_v30 }
 0x1e1   :  { %v2095_v19 = vcvt.s32.f32 %v2088_v58  ;;  %v1934_v7 = vshrl.u32 %v13789_v33, %v13869_v41  ;;  %v1937_v10 = vshrl.u32 %v13798_v25, %v13869_v41  ;;  %v7086_v62 = vsel %vm7084_vm7, %v3760_v8, %v8342_v30 }
 0x1e2   :  { %v3761_v18 = vsel %vm3759_vm4, %v3760_v8, %v8342_v30  ;;  %v2093_v44 = vand.u32 2147483647, %v2092_v0  ;;  %v3619_v48 = vadd.s32 536870912, %v3618_v26  ;;  %v7083_v57 = vsel %vm7081_vm1, %v8340_v42, %v3757_v6 }
 0x1e3   :  { %v3758_v23 = vsel %vm3756_vm3, %v8340_v42, %v3757_v6  ;;  %v1936_v3 = vshll.u32 %v13789_v33, %v13868_v16  ;;  %v1940_v58 = vshrl.u32 %v13801_v2, %v13869_v41  ;;  %v7087_v55 = vsel %vm7080_vm0, %v7083_v57, %v7086_v62 }
 0x1e4   :  { %v3762_v9 = vsel %vm3755_vm2, %v3758_v23, %v3761_v18  ;;  %v2096_v60 = vmul.f32 %v2095_v19, %v2093_v44  ;;  %v10301_v30 = vshrl.u32 %v3619_v48, 30  ;;  %v10305_v8 = vsel %vm3753_vm5, nan, %v7087_v55 }
 0x1e5   :  { %13870 = vst [vmem:[#allocation10_spill] sm:$0xff] %v10305_v8  ;;  %v10309_v42 = vsel %vm3753_vm5, nan, %v3762_v9  ;;  %v1938_v0 = vor.u32 %v1937_v10, %v1936_v3  ;;  %v1939_v6 = vshll.u32 %v13798_v25, %v13868_v16  ;;  %7984 = vmatprep.subr.mxu0 %v10305_v8  ;;  %v1929_v19 = vor.u32 %v1928_v14, %v1927_v35  ;;  %v13874_v3 = vld [vmem:[#allocation37_spill] sm:$0xff]  ;;  %v539_v14 = vpop.permute.xlu1 %538 }
 0x1e6   :  { %13871 = vst [vmem:[#allocation2_spill] sm:$0xff] %v10309_v42  ;;  %8019 = vmatprep.subr.mxu1 %v10309_v42  ;;  %v2097_v40 = vxor.u32 2147483648, %v2096_v60  ;;  %v3621_v17 = vshll.u32 %v10301_v30, 30  ;;  %v1932_v62 = vor.u32 %v1931_v36, %v1930_v56  ;;  %v10317_v18 = vmul.f32 6.2831855, %v10130_v32 }
 0x1e7   :  { %v10321_v44 = vadd.f32 %v13873_v43, %v10003_v38  ;;  %v1935_v10 = vor.u32 %v1934_v7, %v1933_v1  ;;  %v1941_v48 = vor.u32 %v1940_v58, %v1939_v6  ;;  %v5414_v57 = vadd.s32 3, %v10266_v11 }
 0x1e8   :  { %13872 = vst [vmem:[#allocation13_spill] sm:$0xff] %v10317_v18  ;;  %v2098_v16 = vsel %vm2015_vm9, %v2097_v40, %v2096_v60  ;;  %v10326_v23 = vsub.s32 %v3618_v26, %v3621_v17  ;;  %vm1945_vm8 = vcmp.lt.s32.totalorder %v13874_v3, 4  ;;  %v1918_v35 = vor.u32 8388608, %v10271_v49 }
 0x1e9   :  { %v2101_v32 = vsel %vm10220_vm14, %v13851_v29, %v2098_v16  ;;  %vm1942_vm10 = vcmp.lt.s32.totalorder %v13874_v3, 1  ;;  %v1951_v38 = vsel %vm1945_vm8, %v1938_v0, 920167782  ;;  %vm1944_vm9 = vcmp.lt.s32.totalorder %v13874_v3, 3 }
 0x1ea   :  { %8343 = vcosq.f32 %v2101_v32  ;;  %v3624_v60 = vsub.s32 0, %v10326_v23  ;;  %v1950_v56 = vsel %vm1942_vm10, %v1929_v19, %v1932_v62  ;;  %v1926_v27 = vshrl.u32 %v13745_v37, %v13869_v41 }
 0x1eb   :  { %8345 = vsinq.f32 %v2101_v32  ;;  %v1952_v49 = vsel %vm1944_vm9, %v1935_v10, %v1951_v38  ;;  %v1955_v36 = vsel %vm1945_vm8, %v1941_v48, 1326507024  ;;  %vm1943_vm11 = vcmp.lt.s32.totalorder %v13874_v3, 2 }
 0x1ec   :  { %v7831_v26 = vmin.u32 %v3624_v60, %v10326_v23  ;;  %v1947_v1 = vsel %vm1945_vm8, %v1935_v10, 2102212464  ;;  %v1954_v7 = vsel %vm1942_vm10, %v1932_v62, %v1935_v10  ;;  %v606_v58 = vmul.f32 %v8720_v53, %v539_v14 }
 0x1ed   :  { %v1953_v41 = vsel %vm1943_vm11, %v1950_v56, %v1952_v49  ;;  %v1956_v55 = vsel %vm1944_vm9, %v1938_v0, %v1955_v36  ;;  %v1958_v9 = vshll.u32 %v1918_v35, 8  ;;  %v5415_v6 = vand.u32 3, %v5414_v57 }
 0x1ee   :  { %v2106_v40 = vand.u32 3, %v10266_v11  ;;  %v3626_v17 = vclz %v7831_v26  ;;  %v1946_v43 = vsel %vm1942_vm10, %v1926_v27, %v1929_v19  ;;  %v1948_v48 = vsel %vm1944_vm9, %v1932_v62, %v1947_v1  ;;  %v13875_v26 = vld [vmem:[#allocation3_spill] sm:$0xff] }
 0x1ef   :  { %v1957_v10 = vsel %vm1943_vm11, %v1954_v7, %v1956_v55  ;;  %v10364_v16 = vmul.u32.u64.low %v1958_v9, %v1953_v41  ;;  %v10365_v32 = vmul.u32.u64.high %v1958_v9, %v1953_v41, %v10364_v16  ;;  %v10369_v0 = vadd.f32 0.5, %v10321_v44 }
 0x1f0   :  { %v7832_v57 = vadd.s32 4294967294, %v3626_v17  ;;  %v10371_v35 = vmul.u32.u64.low %v1958_v9, %v1957_v10  ;;  %v10372_v11 = vmul.u32.u64.high %v1958_v9, %v1957_v10, %v10371_v35  ;;  %v10376_v19 = vadd.f32 %v606_v58, %v9869_v54 }
 0x1f1   :  { %vm3560_vm12 = vcmp.lt.s32.totalorder %v13860_v61, 0  ;;  %v3644_v62 = vsub.s32 4, %v10301_v30  ;;  %vm2108_vm14 = vcmp.eq.s32.totalorder %v2106_v40, 0  ;;  %vm2111_vm13 = vcmp.eq.s32.totalorder %v2106_v40, 2 }
 0x1f2   :  { %vm7833_vm15 = vcmp.lt.s32.totalorder %v7832_v57, 0  ;;  %v1949_v14 = vsel %vm1943_vm11, %v1946_v43, %v1948_v48  ;;  %vm5416_vm0 = vcmp.lt.s32.totalorder %v5415_v6, 2  ;;  %vm5417_vm1 = vcmp.eq.s32.totalorder %v5415_v6, 0  ;;  %v13877_v48 = vld [vmem:[#allocation42_spill] sm:$0xff] }
 0x1f3   :  { %vm2107_vm2 = vcmp.lt.s32.totalorder %v2106_v40, 2  ;;  %v3629_v60 = vsel %vm7833_vm15, 0, %v7832_v57  ;;  %v1968_v56 = vadd.s32 1, %v10365_v32  ;;  %vm2105_vm3 = vweird.f32 %v13851_v29 }
 0x1f4   :  { %vm5420_vm4 = vcmp.eq.s32.totalorder %v5415_v6, 2  ;;  %v3614_v54 = vadd.s32 %v10250_v59, %v10246_v5  ;;  %v3630_v27 = vsub.s32 32, %v3629_v60  ;;  %v3634_v49 = vsub.s32 4294967266, %v3629_v60  ;;  %v13876_v59 = vld [vmem:[#allocation39_spill] sm:$0xff] }
 0x1f5   :  { %v3645_v36 = vsel %vm3560_vm12, %v3644_v62, %v10301_v30  ;;  %v1965_v3 = vmul.u32 %v1958_v9, %v1949_v14  ;;  %vm1967_vm5 = vc.u32 %v10372_v11, %v10364_v16  ;;  %v13647_v1 = vand.u32 2147483647, %v13875_v26 }
 0x1f6   :  { %v3631_v7 = vshll.u32 %v10326_v23, %v3629_v60  ;;  %v3632_v58 = vshrl.u32 %v3614_v54, %v3630_v27  ;;  %v3635_v41 = vadd.s32 127, %v3634_v49  ;;  %v1969_v55 = vsel %vm1967_vm5, %v1968_v56, %v10365_v32 }
 0x1f7   :  { %v8344_v17 = vpop.eup %8343  ;;  %v1970_v5 = vadd.s32 %v1969_v55, %v1965_v3  ;;  %v3472_v43 = vshll.u32 %v13745_v37, %v13876_v59  ;;  %v3473_v30 = vshrl.u32 %v13778_v12, %v13877_v48  ;;  %v3475_v9 = vshll.u32 %v13778_v12, %v13876_v59 }
 0x1f8   :  { %v8346_v10 = vpop.eup %8345  ;;  %v2112_v57 = vxor.u32 2147483648, %v8344_v17  ;;  %v3633_v35 = vor.u32 %v3632_v58, %v3631_v7  ;;  %v3636_v62 = vshll.u32 %v3635_v41, 23  ;;  %v3476_v23 = vshrl.u32 %v13780_v31, %v13877_v48 }
 0x1f9   :  { %v2109_v14 = vxor.u32 2147483648, %v8346_v10  ;;  %v1971_v32 = vadd.s32 536870912, %v1970_v5  ;;  %v3462_v60 = vand.u32 8388607, %v13647_v1  ;;  %v3479_v56 = vshrl.u32 %v13789_v33, %v13877_v48 }
 0x1fa   :  { %v5422_v54 = vsel %vm5420_vm4, %v2112_v57, %v8346_v10  ;;  %v2113_v27 = vsel %vm2111_vm13, %v2112_v57, %v8346_v10  ;;  %v3637_v49 = vor.u32 4788187, %v3636_v62  ;;  %v3482_v3 = vshrl.u32 %v13798_v25, %v13877_v48 }
 0x1fb   :  { %v5419_v7 = vsel %vm5417_vm1, %v8344_v17, %v2109_v14  ;;  %v2110_v58 = vsel %vm2108_vm14, %v8344_v17, %v2109_v14  ;;  %v10412_v41 = vshrl.u32 %v1971_v32, 30  ;;  %v3481_v55 = vshll.u32 %v13789_v33, %v13876_v59 }
 0x1fc   :  { %v5423_v1 = vsel %vm5416_vm0, %v5419_v7, %v5422_v54  ;;  %v2114_v38 = vsel %vm2107_vm2, %v2110_v58, %v2113_v27  ;;  %v3638_v8 = vand.u32 2147483647, %v3637_v49  ;;  %v3640_v42 = vcvt.s32.f32 %v3633_v35 }
 0x1fd   :  { %v10420_v10 = vsel %vm2105_vm3, nan, %v5423_v1  ;;  %v10424_v57 = vsel %vm2105_vm3, nan, %v2114_v38  ;;  %v1973_v17 = vshll.u32 %v10412_v41, 30  ;;  %v3478_v62 = vshll.u32 %v13780_v31, %v13876_v59 }
 0x1fe   :  { %13878 = vst [vmem:[#allocation25_spill] sm:$0xff] %v10420_v10  ;;  %13879 = vst [vmem:[#allocation27_spill] sm:$0xff] %v10424_v57  ;;  %7985 = vmatpush3.msra.mxu0 %v10420_v10  ;;  %8020 = vmatpush3.msra.mxu1 %v10424_v57  ;;  %v13880_v6 = vand.u32 2147483647, %v13860_v61  ;;  %v3641_v1 = vmul.f32 %v3640_v42, %v3638_v8  ;;  %v3483_v35 = vor.u32 %v3482_v3, %v3481_v55  ;;  %v13883_v3 = vld [vmem:[#allocation41_spill] sm:$0xff] }
 0x1ff   :  { %v3485_v29 = vshrl.u32 %v13801_v2, %v13877_v48  ;;  %v10439_v38 = vsub.s32 %v1970_v5, %v1973_v17  ;;  %v3474_v14 = vor.u32 %v3473_v30, %v3472_v43  ;;  %v3477_v32 = vor.u32 %v3476_v23, %v3475_v9 }
 0x200   :  { %vm10433_vm6 = vcmp.le.f32.partialorder %v13880_v6, 0.7853982  ;;  %v3480_v54 = vor.u32 %v3479_v56, %v3478_v62  ;;  %v3642_v27 = vxor.u32 2147483648, %v3641_v1  ;;  %v3471_v7 = vshrl.u32 %v13745_v37, %v13877_v48 }
 0x201   :  { %v3647_v49 = vsel %vm10433_vm6, 0, %v3645_v36  ;;  %v3484_v58 = vshll.u32 %v13798_v25, %v13876_v59  ;;  %v1976_v8 = vsub.s32 0, %v10439_v38  ;;  %v3463_v42 = vor.u32 8388608, %v3462_v60 }
 0x202   :  { %vm3487_vm7 = vcmp.lt.s32.totalorder %v13883_v3, 1  ;;  %vm3490_vm8 = vcmp.lt.s32.totalorder %v13883_v3, 4  ;;  %v3643_v5 = vsel %vm3560_vm12, %v3642_v27, %v3641_v1  ;;  %vm3489_vm10 = vcmp.lt.s32.totalorder %v13883_v3, 3 }
 0x203   :  { %v3486_v43 = vor.u32 %v3485_v29, %v3484_v58  ;;  %v3496_v36 = vsel %vm3490_vm8, %v3483_v35, 920167782  ;;  %v3646_v59 = vsel %vm10433_vm6, %v13860_v61, %v3643_v5  ;;  %v7767_v48 = vmin.u32 %v1976_v8, %v10439_v38 }
 0x204   :  { %v3492_v30 = vsel %vm3490_vm8, %v3480_v54, 2102212464  ;;  %v3495_v9 = vsel %vm3487_vm7, %v3474_v14, %v3477_v32  ;;  %8347 = vcosq.f32 %v3646_v59  ;;  %v6974_v23 = vadd.s32 3, %v3647_v49 }
 0x205   :  { %vm3488_vm9 = vcmp.lt.s32.totalorder %v13883_v3, 2  ;;  %v3497_v60 = vsel %vm3489_vm10, %v3480_v54, %v3496_v36  ;;  %8349 = vsinq.f32 %v3646_v59  ;;  %v1978_v56 = vclz %v7767_v48 }
 0x206   :  { %v3491_v55 = vsel %vm3487_vm7, %v3471_v7, %v3474_v14  ;;  %v3499_v17 = vsel %vm3487_vm7, %v3477_v32, %v3480_v54  ;;  %v3493_v62 = vsel %vm3489_vm10, %v3477_v32, %v3492_v30  ;;  %v3498_v6 = vsel %vm3488_vm9, %v3495_v9, %v3497_v60  ;;  %v275_v30 = vpop.permute.xlu1 %274 }
 0x207   :  { %v3500_v40 = vsel %vm3490_vm8, %v3486_v43, 1326507024  ;;  %v3503_v1 = vshll.u32 %v3463_v42, 8  ;;  %v10477_v27 = vand.u32 3, %v3647_v49  ;;  %v7768_v58 = vadd.s32 4294967294, %v1978_v56 }
 0x208   :  { %v3501_v14 = vsel %vm3489_vm10, %v3483_v35, %v3500_v40  ;;  %v1996_v54 = vsub.s32 4, %v10412_v41  ;;  %v3494_v42 = vsel %vm3488_vm9, %v3491_v55, %v3493_v62  ;;  %v13884_v43 = vand.u32 2139095040, %v10317_v18 }
 0x209   :  { %v3502_v32 = vsel %vm3488_vm9, %v3499_v17, %v3501_v14  ;;  %v10484_v7 = vmul.u32.u64.low %v3503_v1, %v3498_v6  ;;  %v10485_v8 = vmul.u32.u64.high %v3503_v1, %v3498_v6, %v10484_v7  ;;  %vm7769_vm11 = vcmp.lt.s32.totalorder %v7768_v58, 0  ;;  %v13888_v17 = vld [vmem:[#allocation26_spill] sm:$0xff] }
 0x20a   :  { %v10490_v5 = vmul.u32.u64.low %v3503_v1, %v3502_v32  ;;  %v10491_v49 = vmul.u32.u64.high %v3503_v1, %v3502_v32, %v10490_v5  ;;  %v10495_v36 = vshrl.u32 %v13884_v43, 23  ;;  %v6975_v35 = vand.u32 3, %v6974_v23 }
 0x20b   :  { %vm1912_vm12 = vcmp.lt.s32.totalorder %v13867_v34, 0  ;;  %v1981_v59 = vsel %vm7769_vm11, 0, %v7768_v58  ;;  %v13885_v48 = vand.u32 2147483647, %v13867_v34  ;;  %v1966_v3 = vadd.s32 %v10364_v16, %v10372_v11 }
 0x20c   :  { %v1982_v9 = vsub.s32 32, %v1981_v59  ;;  %v1986_v60 = vsub.s32 4294967266, %v1981_v59  ;;  %vm3653_vm13 = vcmp.eq.s32.totalorder %v10477_v27, 0  ;;  %v1997_v23 = vsel %vm1912_vm12, %v1996_v54, %v10412_v41  ;;  %v13889_v54 = vld [vmem:[#allocation43_spill] sm:$0xff] }
 0x20d   :  { %vm10500_vm14 = vcmp.le.f32.partialorder %v13885_v48, 0.7853982  ;;  %v3510_v56 = vmul.u32 %v3503_v1, %v3494_v42  ;;  %v3513_v55 = vadd.s32 1, %v10485_v8  ;;  %v13650_v62 = vand.u32 2147483647, %v13888_v17  ;;  %v13890_v42 = vld [vmem:[#allocation47_spill] sm:$0xff] }
 0x20e   :  { %vm3652_vm15 = vcmp.lt.s32.totalorder %v10477_v27, 2  ;;  %v1983_v6 = vshll.u32 %v10439_v38, %v1981_v59  ;;  %v1984_v40 = vshrl.u32 %v1966_v3, %v1982_v9  ;;  %v1987_v58 = vadd.s32 127, %v1986_v60 }
 0x20f   :  { %vm3512_vm0 = vc.u32 %v10491_v49, %v10484_v7  ;;  %vm3650_vm1 = vweird.f32 %v13860_v61  ;;  %vm6976_vm2 = vcmp.lt.s32.totalorder %v6975_v35, 2  ;;  %vm6977_vm3 = vcmp.eq.s32.totalorder %v6975_v35, 0 }
 0x210   :  { %vm3656_vm4 = vcmp.eq.s32.totalorder %v10477_v27, 2  ;;  %v3514_v16 = vsel %vm3512_vm0, %v3513_v55, %v10485_v8  ;;  %vm6980_vm5 = vcmp.eq.s32.totalorder %v6975_v35, 2  ;;  %v1985_v11 = vor.u32 %v1984_v40, %v1983_v6 }
 0x211   :  { %v1988_v41 = vshll.u32 %v1987_v58, 23  ;;  %v3515_v1 = vadd.s32 %v3514_v16, %v3510_v56  ;;  %v1999_v38 = vsel %vm10500_vm14, 0, %v1997_v23  ;;  %v10523_v14 = vand.u32 8388607, %v13650_v62  ;;  %v8348_v43 = vpop.eup %8347 }
 0x212   :  { %v1824_v32 = vshll.u32 %v13745_v37, %v13889_v54  ;;  %v1825_v5 = vshrl.u32 %v13778_v12, %v13890_v42  ;;  %v1827_v48 = vshll.u32 %v13778_v12, %v13889_v54  ;;  %v1828_v3 = vshrl.u32 %v13780_v31, %v13890_v42  ;;  %v8350_v9 = vpop.eup %8349 }
 0x213   :  { %v1989_v59 = vor.u32 4788187, %v1988_v41  ;;  %v3516_v8 = vadd.s32 536870912, %v3515_v1  ;;  %v3657_v60 = vxor.u32 2147483648, %v8348_v43  ;;  %v1830_v23 = vshll.u32 %v13780_v31, %v13889_v54 }
 0x214   :  { %v1831_v56 = vshrl.u32 %v13789_v33, %v13890_v42  ;;  %v1834_v55 = vshrl.u32 %v13798_v25, %v13890_v42  ;;  %v3654_v6 = vxor.u32 2147483648, %v8350_v9  ;;  %v1992_v58 = vcvt.s32.f32 %v1985_v11 }
 0x215   :  { %v1990_v40 = vand.u32 2147483647, %v1989_v59  ;;  %v10539_v16 = vshrl.u32 %v3516_v8, 30  ;;  %v6982_v41 = vsel %vm6980_vm5, %v3657_v60, %v8350_v9  ;;  %v3658_v62 = vsel %vm3656_vm4, %v3657_v60, %v8350_v9 }
 0x216   :  { %v1833_v29 = vshll.u32 %v13789_v33, %v13889_v54  ;;  %v1837_v10 = vshrl.u32 %v13801_v2, %v13890_v42  ;;  %v6979_v57 = vsel %vm6977_vm3, %v8348_v43, %v3654_v6  ;;  %v3655_v22 = vsel %vm3653_vm13, %v8348_v43, %v3654_v6 }
 0x217   :  { %v1993_v59 = vmul.f32 %v1992_v58, %v1990_v40  ;;  %v3518_v11 = vshll.u32 %v10539_v16, 30  ;;  %v6983_v8 = vsel %vm6976_vm2, %v6979_v57, %v6982_v41  ;;  %v3659_v20 = vsel %vm3652_vm15, %v3655_v22, %v3658_v62 }
 0x218   :  { %v1835_v9 = vor.u32 %v1834_v55, %v1833_v29  ;;  %v1836_v60 = vshll.u32 %v13798_v25, %v13889_v54  ;;  %v10559_v50 = vsel %vm3650_vm1, nan, %v6983_v8  ;;  %v10563_v52 = vsel %vm3650_vm1, nan, %v3659_v20  ;;  %v13894_v55 = vld [vmem:[#allocation45_spill] sm:$0xff] }
 0x219   :  { %13891 = vst [vmem:[#allocation48_spill] sm:$0xff] %v10559_v50  ;;  %13892 = vst [vmem:[#allocation9_spill] sm:$0xff] %v10563_v52  ;;  %v1994_v43 = vxor.u32 2147483648, %v1993_v59  ;;  %v10565_v6 = vsub.s32 %v3515_v1, %v3518_v11  ;;  %v13893_v57 = vfloor.f32 %v10369_v0  ;;  %v10573_v22 = vadd.f32 0.5, %v10376_v19  ;;  %7986 = vmatprep.subr.mxu0 %v10559_v50  ;;  %8021 = vmatprep.subr.mxu1 %v10563_v52 }
 0x21a   :  { %v1826_v29 = vor.u32 %v1825_v5, %v1824_v32  ;;  %v1829_v35 = vor.u32 %v1828_v3, %v1827_v48  ;;  %v1832_v62 = vor.u32 %v1831_v56, %v1830_v23  ;;  %v1838_v1 = vor.u32 %v1837_v10, %v1836_v60 }
 0x21b   :  { %v10570_v27 = vsub.f32 %v10321_v44, %v13893_v57  ;;  %v1995_v20 = vsel %vm1912_vm12, %v1994_v43, %v1993_v59  ;;  %v3521_v61 = vsub.s32 0, %v10565_v6  ;;  %v5310_v0 = vadd.s32 3, %v1999_v38 }
 0x21c   :  { %v1998_v44 = vsel %vm10500_vm14, %v13867_v34, %v1995_v20  ;;  %v1815_v54 = vor.u32 8388608, %v10523_v14  ;;  %vm1842_vm6 = vcmp.lt.s32.totalorder %v13894_v55, 4  ;;  %vm1839_vm7 = vcmp.lt.s32.totalorder %v13894_v55, 1 }
 0x21d   :  { %8351 = vcosq.f32 %v1998_v44  ;;  %v7827_v32 = vmin.u32 %v3521_v61, %v10565_v6  ;;  %v1848_v5 = vsel %vm1842_vm6, %v1835_v9, 920167782  ;;  %v10589_v48 = vand.u32 3, %v1999_v38 }
 0x21e   :  { %8353 = vsinq.f32 %v1998_v44  ;;  %vm1841_vm8 = vcmp.lt.s32.totalorder %v13894_v55, 3  ;;  %v1847_v10 = vsel %vm1839_vm7, %v1826_v29, %v1829_v35  ;;  %v1851_v23 = vsel %vm1839_vm7, %v1829_v35, %v1832_v62 }
 0x21f   :  { %v3523_v14 = vclz %v7827_v32  ;;  %v1849_v3 = vsel %vm1841_vm8, %v1832_v62, %v1848_v5  ;;  %v1852_v56 = vsel %vm1842_vm6, %v1838_v1, 1326507024  ;;  %v10600_v40 = vand.u32 3, %v5310_v0 }
 0x220   :  { %v1823_v38 = vshrl.u32 %v13745_v37, %v13890_v42  ;;  %vm1840_vm10 = vcmp.lt.s32.totalorder %v13894_v55, 2  ;;  %v1844_v58 = vsel %vm1842_vm6, %v1832_v62, 2102212464  ;;  %v1853_v11 = vsel %vm1841_vm8, %v1835_v9, %v1852_v56  ;;  %v13897_v56 = vld [vmem:[#allocation44_spill] sm:$0xff] }
 0x221   :  { %v7828_v41 = vadd.s32 4294967294, %v3523_v14  ;;  %v1850_v59 = vsel %vm1840_vm10, %v1847_v10, %v1849_v3  ;;  %v1855_v8 = vshll.u32 %v1815_v54, 8  ;;  %v10612_v60 = vmul.f32 %v8703_v46, %v275_v30  ;;  %v13895_v54 = vld [vmem:[#allocation28_spill] sm:$0xff]  ;;  %v13896_v10 = vld [vmem:[#allocation50_spill] sm:$0xff] }
 0x222   :  { %vm3457_vm9 = vcmp.lt.s32.totalorder %v13875_v26, 0  ;;  %v1843_v42 = vsel %vm1839_vm7, %v1823_v38, %v1826_v29  ;;  %v1854_v43 = vsel %vm1840_vm10, %v1851_v23, %v1853_v11  ;;  %v1845_v57 = vsel %vm1841_vm8, %v1829_v35, %v1844_v58 }
 0x223   :  { %vm7829_vm11 = vcmp.lt.s32.totalorder %v7828_v41, 0  ;;  %v10621_v20 = vmul.u32.u64.low %v1855_v8, %v1854_v43  ;;  %v10622_v61 = vmul.u32.u64.high %v1855_v8, %v1854_v43, %v10621_v20  ;;  %vm2008_vm12 = vcmp.eq.s32.totalorder %v10589_v48, 2 }
 0x224   :  { %v3526_v9 = vsel %vm7829_vm11, 0, %v7828_v41  ;;  %v3541_v62 = vsub.s32 4, %v10539_v16  ;;  %v10626_v1 = vmul.u32.u64.low %v1855_v8, %v1850_v59  ;;  %v10627_v44 = vmul.u32.u64.high %v1855_v8, %v1850_v59, %v10626_v1 }
 0x225   :  { %vm5313_vm14 = vcmp.eq.s32.totalorder %v10600_v40, 0  ;;  %vm2005_vm13 = vcmp.eq.s32.totalorder %v10589_v48, 0  ;;  %v3511_v29 = vadd.s32 %v10484_v7, %v10491_v49  ;;  %v3527_v35 = vsub.s32 32, %v3526_v9 }
 0x226   :  { %v3531_v0 = vsub.s32 4294967266, %v3526_v9  ;;  %v13657_v32 = vand.u32 2147483647, %v13895_v54  ;;  %vm5312_vm15 = vcmp.lt.s32.totalorder %v10600_v40, 2  ;;  %vm5316_vm0 = vcmp.eq.s32.totalorder %v10600_v40, 2 }
 0x227   :  { %vm2004_vm1 = vcmp.lt.s32.totalorder %v10589_v48, 2  ;;  %v1846_v5 = vsel %vm1840_vm10, %v1843_v42, %v1845_v57  ;;  %v3370_v30 = vshrl.u32 %v13778_v12, %v13896_v10  ;;  %v3373_v14 = vshrl.u32 %v13780_v31, %v13896_v10 }
 0x228   :  { %vm2002_vm2 = vweird.f32 %v13867_v34  ;;  %v3528_v7 = vshll.u32 %v10565_v6, %v3526_v9  ;;  %v3529_v49 = vshrl.u32 %v3511_v29, %v3527_v35  ;;  %v3532_v3 = vadd.s32 127, %v3531_v0 }
 0x229   :  { %vm1864_vm3 = vc.u32 %v10622_v61, %v10626_v1  ;;  %v3542_v55 = vsel %vm3457_vm9, %v3541_v62, %v10539_v16  ;;  %v1865_v23 = vadd.s32 1, %v10627_v44  ;;  %v3369_v38 = vshll.u32 %v13745_v37, %v13897_v56 }
 0x22a   :  { %v3372_v58 = vshll.u32 %v13778_v12, %v13897_v56  ;;  %v3530_v41 = vor.u32 %v3529_v49, %v3528_v7  ;;  %v3533_v59 = vshll.u32 %v3532_v3, 23  ;;  %v1862_v6 = vmul.u32 %v1855_v8, %v1846_v5  ;;  %v8352_v42 = vpop.eup %8351 }
 0x22b   :  { %v10658_v11 = vand.u32 8388607, %v13657_v32  ;;  %v1866_v43 = vsel %vm1864_vm3, %v1865_v23, %v10627_v44  ;;  %v10661_v57 = vor.u32 %v3370_v30, %v3369_v38  ;;  %v3379_v20 = vshrl.u32 %v13798_v25, %v13896_v10  ;;  %v8354_v9 = vpop.eup %8353 }
 0x22c   :  { %v10663_v16 = vor.u32 %v3373_v14, %v3372_v58  ;;  %v2009_v62 = vxor.u32 2147483648, %v8352_v42  ;;  %v3534_v29 = vor.u32 4788187, %v3533_v59  ;;  %v1867_v35 = vadd.s32 %v1866_v43, %v1862_v6 }
 0x22d   :  { %v3375_v8 = vshll.u32 %v13780_v31, %v13897_v56  ;;  %v2006_v0 = vxor.u32 2147483648, %v8354_v9  ;;  %v3537_v5 = vcvt.s32.f32 %v3530_v41  ;;  %v3376_v7 = vshrl.u32 %v13789_v33, %v13896_v10 }
 0x22e   :  { %v3378_v44 = vshll.u32 %v13789_v33, %v13897_v56  ;;  %v5318_v30 = vsel %vm5316_vm0, %v2009_v62, %v8354_v9  ;;  %v2010_v14 = vsel %vm2008_vm12, %v2009_v62, %v8354_v9  ;;  %v3535_v49 = vand.u32 2147483647, %v3534_v29 }
 0x22f   :  { %v1868_v3 = vadd.s32 536870912, %v1867_v35  ;;  %v5315_v23 = vsel %vm5313_vm14, %v8352_v42, %v2006_v0  ;;  %v2007_v38 = vsel %vm2005_vm13, %v8352_v42, %v2006_v0  ;;  %v3382_v41 = vshrl.u32 %v13801_v2, %v13896_v10 }
 0x230   :  { %v3380_v58 = vor.u32 %v3379_v20, %v3378_v44  ;;  %v5319_v59 = vsel %vm5312_vm15, %v5315_v23, %v5318_v30  ;;  %v2011_v6 = vsel %vm2004_vm1, %v2007_v38, %v2010_v14  ;;  %v3538_v43 = vmul.f32 %v3537_v5, %v3535_v49  ;;  %v13901_v5 = vld [vmem:[#allocation49_spill] sm:$0xff] }
 0x231   :  { %v10687_v9 = vshrl.u32 %v1868_v3, 30  ;;  %vm3157_vm4 = vcmp.gt.s32.totalorder %v10200_v45, 0  ;;  %v10692_v62 = vsel %vm2002_vm2, nan, %v5319_v59  ;;  %v10696_v42 = vsel %vm2002_vm2, nan, %v2011_v6 }
 0x232   :  { %13898 = vst [vmem:[#allocation35_spill] sm:$0xff] %v10692_v62  ;;  %13899 = vst [vmem:[#allocation38_spill] sm:$0xff] %v10696_v42  ;;  %v3377_v20 = vor.u32 %v3376_v7, %v3375_v8  ;;  %v3381_v40 = vshll.u32 %v13798_v25, %v13897_v56  ;;  %7987 = vmatpush3.msra.mxu0 %v10692_v62  ;;  %8022 = vmatpush3.msra.mxu1 %v10696_v42  ;;  %v13900_v48 = vand.u32 2147483647, %v13875_v26 }
 0x233   :  { %v3539_v29 = vxor.u32 2147483648, %v3538_v43  ;;  %v1870_v0 = vshll.u32 %v10687_v9, 30  ;;  %vm3387_vm6 = vcmp.lt.s32.totalorder %v13901_v5, 4  ;;  %v7746_v34 = vadd.s32 4294967169, %v10495_v36 }
 0x234   :  { %vm3456_vm5 = vcmp.le.f32.partialorder %v13900_v48, 0.7853982  ;;  %v3383_v30 = vor.u32 %v3382_v41, %v3381_v40  ;;  %v3393_v8 = vsel %vm3387_vm6, %v3380_v58, 920167782  ;;  %vm3384_vm7 = vcmp.lt.s32.totalorder %v13901_v5, 1 }
 0x235   :  { %v3544_v44 = vsel %vm3456_vm5, 0, %v3542_v55  ;;  %v3540_v56 = vsel %vm3457_vm9, %v3539_v29, %v3538_v43  ;;  %v10711_v7 = vsub.s32 %v1867_v35, %v1870_v0  ;;  %vm3386_vm8 = vcmp.lt.s32.totalorder %v13901_v5, 3 }
 0x236   :  { %v3543_v14 = vsel %vm3456_vm5, %v13875_v26, %v3540_v56  ;;  %v3360_v49 = vor.u32 8388608, %v10658_v11  ;;  %v3392_v36 = vsel %vm3384_vm7, %v10661_v57, %v10663_v16  ;;  %v3394_v55 = vsel %vm3386_vm8, %v3377_v20, %v3393_v8 }
 0x237   :  { %v702_v3 = vfloor.f32 %v10573_v22  ;;  %8355 = vcosq.f32 %v3543_v14  ;;  %v6870_v35 = vadd.s32 3, %v3544_v44  ;;  %v1873_v23 = vsub.s32 0, %v10711_v7 }
 0x238   :  { %8357 = vsinq.f32 %v3543_v14  ;;  %v3368_v38 = vshrl.u32 %v13745_v37, %v13896_v10  ;;  %vm3385_vm10 = vcmp.lt.s32.totalorder %v13901_v5, 2  ;;  %v3397_v11 = vsel %vm3387_vm6, %v3383_v30, 1326507024  ;;  %v13903_v10 = vld [vmem:[#allocation19_spill] sm:$0xff] }
 0x239   :  { %v7763_v41 = vmin.u32 %v1873_v23, %v10711_v7  ;;  %v3389_v59 = vsel %vm3387_vm6, %v3377_v20, 2102212464  ;;  %v3395_v22 = vsel %vm3385_vm10, %v3392_v36, %v3394_v55  ;;  %v3396_v6 = vsel %vm3384_vm7, %v10663_v16, %v3377_v20 }
 0x23a   :  { %v10739_v43 = vmul.f32 6.2831855, %v10570_v27  ;;  %v425_v40 = vadd.f32 %v10612_v60, %v13903_v10  ;;  %v3398_v48 = vsel %vm3386_vm8, %v3380_v58, %v3397_v11  ;;  %v3400_v29 = vshll.u32 %v3360_v49, 8 }
 0x23b   :  { %v10745_v0 = vand.u32 3, %v6870_v35  ;;  %v10747_v30 = vand.u32 3, %v3544_v44  ;;  %v1875_v8 = vclz %v7763_v41  ;;  %v3388_v56 = vsel %vm3384_vm7, %v3368_v38, %v10661_v57  ;;  %v13904_v57 = vld [vmem:[#allocation14_spill] sm:$0xff] }
 0x23c   :  { %13902 = vst [vmem:[#allocation54_spill] sm:$0xff] %v10739_v43  ;;  %v3390_v27 = vsel %vm3386_vm8, %v10663_v16, %v3389_v59  ;;  %v3399_v60 = vsel %vm3385_vm10, %v3396_v6, %v3398_v48  ;;  %v10757_v20 = vmul.u32.u64.low %v3400_v29, %v3395_v22  ;;  %v10758_v14 = vmul.u32.u64.high %v3400_v29, %v3395_v22, %v10757_v20  ;;  %v13905_v48 = vld [vmem:[#allocation29_spill] sm:$0xff] }
 0x23d   :  { %v10764_v58 = vsel %vm3157_vm4, %v10200_v45, 0  ;;  %v7764_v44 = vadd.s32 4294967294, %v1875_v8  ;;  %v10766_v49 = vmul.u32.u64.low %v3400_v29, %v3399_v60  ;;  %v10767_v36 = vmul.u32.u64.high %v3400_v29, %v3399_v60, %v10766_v49 }
 0x23e   :  { %v10771_v55 = vadd.f32 %v13904_v57, %v9985_v39  ;;  %v10773_v16 = vadd.s32 1, %v7746_v34  ;;  %v734_v23 = vsub.f32 %v10376_v19, %v702_v3  ;;  %v10778_v38 = vadd.f32 %v10109_v63, %v425_v40  ;;  %v10804_v57 = vpop.permute.xlu1 %474 }
 0x23f   :  { %vm3550_vm9 = vcmp.eq.s32.totalorder %v10747_v30, 0  ;;  %vm7765_vm11 = vcmp.lt.s32.totalorder %v7764_v44, 0  ;;  %v3391_v45 = vsel %vm3385_vm10, %v3388_v56, %v3390_v27  ;;  %vm6872_vm12 = vcmp.lt.s32.totalorder %v10745_v0, 2  ;;  %v13907_v56 = vld [vmem:[#allocation52_spill] sm:$0xff] }
 0x240   :  { %vm3549_vm14 = vcmp.lt.s32.totalorder %v10747_v30, 2  ;;  %vm3553_vm13 = vcmp.eq.s32.totalorder %v10747_v30, 2  ;;  %v1878_v39 = vsel %vm7765_vm11, 0, %v7764_v44  ;;  %v3410_v34 = vadd.s32 1, %v10758_v14 }
 0x241   :  { %vm3547_vm15 = vweird.f32 %v13875_v26  ;;  %vm6873_vm0 = vcmp.eq.s32.totalorder %v10745_v0, 0  ;;  %v1863_v63 = vadd.s32 %v10626_v1, %v10622_v61  ;;  %v1879_v19 = vsub.s32 32, %v1878_v39  ;;  %v13906_v1 = vld [vmem:[#allocation46_spill] sm:$0xff] }
 0x242   :  { %v1883_v3 = vsub.s32 4294967266, %v1878_v39  ;;  %vm6876_vm1 = vcmp.eq.s32.totalorder %v10745_v0, 2  ;;  %v1893_v5 = vsub.s32 4, %v10687_v9  ;;  %v3407_v11 = vmul.u32 %v3400_v29, %v3391_v45 }
 0x243   :  { %vm3409_vm2 = vc.u32 %v10767_v36, %v10757_v20  ;;  %v1880_v41 = vshll.u32 %v10711_v7, %v1878_v39  ;;  %v1881_v59 = vshrl.u32 %v1863_v63, %v1879_v19  ;;  %v13658_v61 = vand.u32 2147483647, %v13905_v48 }
 0x244   :  { %v1884_v22 = vadd.s32 127, %v1883_v3  ;;  %v3411_v6 = vsel %vm3409_vm2, %v3410_v34, %v10758_v14  ;;  %v8356_v10 = vpop.eup %8355  ;;  %v1721_v8 = vshll.u32 %v13745_v37, %v13906_v1  ;;  %v1722_v27 = vshrl.u32 %v13778_v12, %v13907_v56 }
 0x245   :  { %v3412_v40 = vadd.s32 %v3411_v6, %v3407_v11  ;;  %v8358_v29 = vpop.eup %8357  ;;  %v3554_v60 = vxor.u32 2147483648, %v8356_v10  ;;  %v1882_v44 = vor.u32 %v1881_v59, %v1880_v41  ;;  %v1724_v7 = vshll.u32 %v13778_v12, %v13906_v1 }
 0x246   :  { %v1885_v49 = vshll.u32 %v1884_v22, 23  ;;  %v3551_v14 = vxor.u32 2147483648, %v8358_v29  ;;  %v1725_v39 = vshrl.u32 %v13780_v31, %v13907_v56  ;;  %v1728_v34 = vshrl.u32 %v13789_v33, %v13907_v56 }
 0x247   :  { %v3413_v45 = vadd.s32 536870912, %v3412_v40  ;;  %v6878_v63 = vsel %vm6876_vm1, %v3554_v60, %v8358_v29  ;;  %v3555_v19 = vsel %vm3553_vm13, %v3554_v60, %v8358_v29  ;;  %v1731_v11 = vshrl.u32 %v13798_v25, %v13907_v56 }
 0x248   :  { %v1886_v3 = vor.u32 4788187, %v1885_v49  ;;  %v6875_v41 = vsel %vm6873_vm0, %v8356_v10, %v3551_v14  ;;  %v3552_v59 = vsel %vm3550_vm9, %v8356_v10, %v3551_v14  ;;  %v1730_v6 = vshll.u32 %v13789_v33, %v13906_v1 }
 0x249   :  { %v10820_v22 = vshrl.u32 %v3413_v45, 30  ;;  %v6879_v32 = vsel %vm6872_vm12, %v6875_v41, %v6878_v63  ;;  %v3556_v29 = vsel %vm3549_vm14, %v3552_v59, %v3555_v19  ;;  %v1889_v49 = vcvt.s32.f32 %v1882_v44  ;;  %v10847_v63 = vpop.permute.xlu1 %334 }
 0x24a   :  { %v1887_v60 = vand.u32 2147483647, %v1886_v3  ;;  %v10830_v35 = vsel %vm3547_vm15, nan, %v6879_v32  ;;  %v10834_v10 = vsel %vm3547_vm15, nan, %v3556_v29  ;;  %v1727_v45 = vshll.u32 %v13780_v31, %v13906_v1 }
 0x24b   :  { %13908 = vst [vmem:[#allocation37_spill] sm:$0xff] %v10830_v35  ;;  %13909 = vst [vmem:[#allocation3_spill] sm:$0xff] %v10834_v10  ;;  %v3415_v14 = vshll.u32 %v10820_v22, 30  ;;  %7988 = vmatprep.subr.mxu0 %v10830_v35  ;;  %8023 = vmatprep.subr.mxu1 %v10834_v10  ;;  %v1711_v30 = vand.u32 8388607, %v13658_v61  ;;  %v1732_v44 = vor.u32 %v1731_v11, %v1730_v6  ;;  %vm1809_vm3 = vcmp.lt.s32.totalorder %v13888_v17, 0 }
 0x24c   :  { %v1890_v0 = vmul.f32 %v1889_v49, %v1887_v60  ;;  %v1734_v32 = vshrl.u32 %v13801_v2, %v13907_v56  ;;  %v10845_v26 = vmul.f32 6.2831855, %v734_v23  ;;  %v1723_v3 = vor.u32 %v1722_v27, %v1721_v8  ;;  %v13914_v61 = vld [vmem:[#allocation51_spill] sm:$0xff] }
 0x24d   :  { %v10850_v19 = vsub.s32 %v3412_v40, %v3415_v14  ;;  %v1726_v59 = vor.u32 %v1725_v39, %v1724_v7  ;;  %v1729_v29 = vor.u32 %v1728_v34, %v1727_v45  ;;  %v1733_v60 = vshll.u32 %v13798_v25, %v13906_v1  ;;  %v10876_v14 = vpop.permute.xlu1 %78 }
 0x24e   :  { %13910 = vst [vmem:[#allocation39_spill] sm:$0xff] %v10845_v26  ;;  %v1891_v41 = vxor.u32 2147483648, %v1890_v0  ;;  %v13911_v11 = vand.u32 2147483647, %v13888_v17  ;;  %v1894_v23 = vsel %vm1809_vm3, %v1893_v5, %v10687_v9  ;;  %vm1739_vm5 = vcmp.lt.s32.totalorder %v13914_v61, 4 }
 0x24f   :  { %v3418_v49 = vsub.s32 0, %v10850_v19  ;;  %v1712_v8 = vor.u32 8388608, %v1711_v30  ;;  %v1735_v27 = vor.u32 %v1734_v32, %v1733_v60  ;;  %v1745_v7 = vsel %vm1739_vm5, %v1732_v44, 920167782 }
 0x250   :  { %vm10856_vm4 = vcmp.le.f32.partialorder %v13911_v11, 0.7853982  ;;  %v1892_v40 = vsel %vm1809_vm3, %v1891_v41, %v1890_v0  ;;  %vm1736_vm6 = vcmp.lt.s32.totalorder %v13914_v61, 1  ;;  %vm1738_vm7 = vcmp.lt.s32.totalorder %v13914_v61, 3 }
 0x251   :  { %v1895_v1 = vsel %vm10856_vm4, %v13888_v17, %v1892_v40  ;;  %v7823_v39 = vmin.u32 %v3418_v49, %v10850_v19  ;;  %v653_v9 = vadd.f32 0.5, %v10778_v38  ;;  %v1744_v5 = vsel %vm1736_vm6, %v1723_v3, %v1726_v59 }
 0x252   :  { %8359 = vcosq.f32 %v1895_v1  ;;  %v1746_v34 = vsel %vm1738_vm7, %v1729_v29, %v1745_v7  ;;  %v1896_v45 = vsel %vm10856_vm4, 0, %v1894_v23  ;;  %v1720_v30 = vshrl.u32 %v13745_v37, %v13907_v56 }
 0x253   :  { %8361 = vsinq.f32 %v1895_v1  ;;  %v3420_v0 = vclz %v7823_v39  ;;  %vm1737_vm8 = vcmp.lt.s32.totalorder %v13914_v61, 2  ;;  %v1741_v32 = vsel %vm1739_vm5, %v1729_v29, 2102212464 }
 0x254   :  { %v1748_v41 = vsel %vm1736_vm6, %v1726_v59, %v1729_v29  ;;  %v1749_v60 = vsel %vm1739_vm5, %v1735_v27, 1326507024  ;;  %v1747_v6 = vsel %vm1737_vm8, %v1744_v5, %v1746_v34  ;;  %v1752_v49 = vshll.u32 %v1712_v8, 8 }
 0x255   :  { %v7824_v11 = vadd.s32 4294967294, %v3420_v0  ;;  %v1750_v23 = vsel %vm1738_vm7, %v1732_v44, %v1749_v60  ;;  %v2943_v56 = vand.u32 2139095040, %v10845_v26  ;;  %v590_v40 = vmul.f32 %v8720_v53, %v10804_v57 }
 0x256   :  { %v1740_v7 = vsel %vm1736_vm6, %v1720_v30, %v1723_v3  ;;  %v1751_v29 = vsel %vm1737_vm8, %v1748_v41, %v1750_v23  ;;  %v1742_v27 = vsel %vm1738_vm7, %v1726_v59, %v1741_v32  ;;  %v5206_v44 = vadd.s32 3, %v1896_v45  ;;  %v10911_v41 = vpop.permute.xlu1 %270 }
 0x257   :  { %vm7825_vm10 = vcmp.lt.s32.totalorder %v7824_v11, 0  ;;  %v10902_v1 = vmul.u32.u64.low %v1752_v49, %v1751_v29  ;;  %v10903_v39 = vmul.u32.u64.high %v1752_v49, %v1751_v29, %v10902_v1  ;;  %v685_v57 = vfloor.f32 %v653_v9 }
 0x258   :  { %v3423_v8 = vsel %vm7825_vm10, 0, %v7824_v11  ;;  %v10905_v5 = vmul.u32.u64.low %v1752_v49, %v1747_v6  ;;  %v10906_v34 = vmul.u32.u64.high %v1752_v49, %v1747_v6, %v10905_v5  ;;  %v3408_v3 = vadd.s32 %v10757_v20, %v10767_v36 }
 0x259   :  { %v3424_v0 = vsub.s32 32, %v3423_v8  ;;  %v3428_v30 = vsub.s32 4294967266, %v3423_v8  ;;  %v13915_v60 = vand.u32 2139095040, %v10739_v43  ;;  %v10916_v32 = vadd.f32 %v590_v40, %v10771_v55 }
 0x25a   :  { %v1900_v23 = vand.u32 3, %v1896_v45  ;;  %v1743_v11 = vsel %vm1737_vm8, %v1740_v7, %v1742_v27  ;;  %v3425_v6 = vshll.u32 %v10850_v19, %v3423_v8  ;;  %vm1761_vm9 = vc.u32 %v10903_v39, %v10905_v5 }
 0x25b   :  { %v2841_v59 = vshrl.u32 %v13915_v60, 23  ;;  %v3426_v9 = vshrl.u32 %v3408_v3, %v3424_v0  ;;  %v3429_v29 = vadd.s32 127, %v3428_v30  ;;  %v2944_v20 = vshrl.u32 %v2943_v56, 23 }
 0x25c   :  { %v5207_v36 = vand.u32 3, %v5206_v44  ;;  %v3438_v1 = vsub.s32 4, %v10820_v22  ;;  %v1762_v60 = vadd.s32 1, %v10906_v34  ;;  %vm1406_vm11 = vcmp.gt.s32.totalorder %v10773_v16, 0 }
 0x25d   :  { %v717_v55 = vsub.f32 %v10778_v38, %v685_v57  ;;  %v3427_v45 = vor.u32 %v3426_v9, %v3425_v6  ;;  %v3430_v61 = vshll.u32 %v3429_v29, 23  ;;  %v1759_v40 = vmul.u32 %v1752_v49, %v1743_v11  ;;  %v10938_v57 = vpop.permute.xlu1 %153 }
 0x25e   :  { %v10928_v19 = vadd.f32 0.5, %v10916_v32  ;;  %v13916_v7 = vand.u32 2147483647, %v13895_v54  ;;  %vm3354_vm14 = vcmp.lt.s32.totalorder %v13895_v54, 0  ;;  %v1763_v56 = vsel %vm1761_vm9, %v1762_v60, %v10906_v34 }
 0x25f   :  { %v8360_v44 = vpop.eup %8359  ;;  %vm1901_vm13 = vcmp.lt.s32.totalorder %v1900_v23, 2  ;;  %vm1902_vm15 = vcmp.eq.s32.totalorder %v1900_v23, 0  ;;  %v3431_v38 = vor.u32 4788187, %v3430_v61  ;;  %v1764_v8 = vadd.s32 %v1763_v56, %v1759_v40 }
 0x260   :  { %vm10932_vm12 = vcmp.le.f32.partialorder %v13916_v7, 0.7853982  ;;  %v8362_v49 = vpop.eup %8361  ;;  %v1906_v3 = vxor.u32 2147483648, %v8360_v44  ;;  %vm5212_vm0 = vcmp.eq.s32.totalorder %v5207_v36, 2  ;;  %vm1905_vm1 = vcmp.eq.s32.totalorder %v1900_v23, 2 }
 0x261   :  { %v3439_v0 = vsel %vm3354_vm14, %v3438_v1, %v10820_v22  ;;  %v1903_v30 = vxor.u32 2147483648, %v8362_v49  ;;  %v3432_v11 = vand.u32 2147483647, %v3431_v38  ;;  %v3434_v6 = vcvt.s32.f32 %v3427_v45 }
 0x262   :  { %v1765_v9 = vadd.s32 536870912, %v1764_v8  ;;  %vm5208_vm2 = vcmp.lt.s32.totalorder %v5207_v36, 2  ;;  %vm5209_vm3 = vcmp.eq.s32.totalorder %v5207_v36, 0  ;;  %v5214_v34 = vsel %vm5212_vm0, %v1906_v3, %v8362_v49 }
 0x263   :  { %v1907_v29 = vsel %vm1905_vm1, %v1906_v3, %v8362_v49  ;;  %v5211_v60 = vsel %vm5209_vm3, %v8360_v44, %v1903_v30  ;;  %v1904_v61 = vsel %vm1902_vm15, %v8360_v44, %v1903_v30  ;;  %v3435_v40 = vmul.f32 %v3434_v6, %v3432_v11  ;;  %v531_v49 = vpop.permute.xlu1 %530 }
 0x264   :  { %v10944_v7 = vshrl.u32 %v1765_v9, 30  ;;  %vm1899_vm4 = vweird.f32 %v13888_v17  ;;  %v5215_v56 = vsel %vm5208_vm2, %v5211_v60, %v5214_v34  ;;  %v1908_v35 = vsel %vm1901_vm13, %v1904_v61, %v1907_v29 }
 0x265   :  { %v3441_v22 = vsel %vm10932_vm12, 0, %v3439_v0  ;;  %v10950_v1 = vsel %vm1899_vm4, nan, %v5215_v56  ;;  %v10952_v45 = vsel %vm1899_vm4, nan, %v1908_v35  ;;  %v3436_v36 = vxor.u32 2147483648, %v3435_v40 }
 0x266   :  { %13919 = vst [vmem:[#allocation42_spill] sm:$0xff] %v10950_v1  ;;  %13920 = vst [vmem:[#allocation41_spill] sm:$0xff] %v10952_v45  ;;  %v1767_v38 = vshll.u32 %v10944_v7, 30  ;;  %v10956_v44 = vsub.s32 32, %v9722_v24  ;;  %v10959_v3 = vshrl.u32 %v9714_v13, 5  ;;  %v10962_v17 = vsub.s32 32, %v9734_v28  ;;  %7989 = vmatpush3.msra.mxu0 %v10950_v1  ;;  %8024 = vmatpush3.msra.mxu1 %v10952_v45 }
 0x267   :  { %v10965_v23 = vand.u32 31, %v9981_v51  ;;  %v10970_v35 = vand.u32 31, %v10764_v58  ;;  %v7802_v0 = vadd.s32 4294967169, %v2841_v59  ;;  %v3437_v30 = vsel %vm3354_vm14, %v3436_v36, %v3435_v40  ;;  %v74_v40 = vpop.permute.xlu1 %73 }
 0x268   :  { %v10974_v11 = vsub.s32 %v1764_v8, %v1767_v38  ;;  %v10979_v13 = vsel %vm1406_vm11, %v10773_v16, 0  ;;  %v7806_v6 = vadd.s32 4294967169, %v2944_v20  ;;  %v3440_v9 = vsel %vm10932_vm12, %v13895_v54, %v3437_v30 }
 0x269   :  { %v6766_v34 = vadd.s32 3, %v3441_v22  ;;  %v10984_v29 = vmul.f32 6.2831855, %v717_v55  ;;  %v686_v59 = vfloor.f32 %v10928_v19  ;;  %8363 = vcosq.f32 %v3440_v9 }
 0x26a   :  { %v1770_v60 = vsub.s32 0, %v10974_v11  ;;  %v10989_v8 = vshrl.u32 %v9981_v51, 5  ;;  %v10992_v61 = vsub.s32 32, %v10965_v23  ;;  %v10995_v16 = vshrl.u32 %v10764_v58, 5  ;;  %v13924_v58 = vld [vmem:[#allocation32_spill] sm:$0xff] }
 0x26b   :  { %13921 = vst [vmem:[#allocation26_spill] sm:$0xff] %v10984_v29  ;;  %8365 = vsinq.f32 %v3440_v9  ;;  %v10998_v20 = vsub.s32 32, %v10970_v35  ;;  %v11001_v55 = vshrl.u32 %v10979_v13, 5  ;;  %v11003_v19 = vadd.s32 1, %v7802_v0 }
 0x26c   :  { %13922 = vst [vmem:[#allocation43_spill] sm:$0xff] %v10989_v8  ;;  %v7759_v27 = vmin.u32 %v1770_v60, %v10974_v11  ;;  %v11006_v51 = vadd.s32 1, %v7806_v6  ;;  %v11008_v56 = vand.u32 3, %v6766_v34  ;;  %v11010_v36 = vand.u32 3, %v3441_v22  ;;  %v13925_v8 = vld [vmem:[#allocation53_spill] sm:$0xff] }
 0x26d   :  { %13923 = vst [vmem:[#allocation47_spill] sm:$0xff] %v11001_v55  ;;  %v13661_v38 = vand.u32 2147483647, %v13924_v58  ;;  %v11015_v9 = vsub.f32 %v10916_v32, %v686_v59  ;;  %v11019_v0 = vmul.f32 %v8703_v46, %v10847_v63  ;;  %v11022_v60 = vmul.f32 %v8720_v53, %v531_v49 }
 0x26e   :  { %v1772_v1 = vclz %v7759_v27  ;;  %v11025_v6 = vmul.f32 %v8708_v47, %v74_v40  ;;  %v3273_v22 = vshrl.u32 %v13789_v33, %v9718_v21  ;;  %v3276_v34 = vshrl.u32 %v13798_v25, %v9718_v21 }
 0x26f   :  { %v1760_v32 = vadd.s32 %v10905_v5, %v10903_v39  ;;  %v3267_v63 = vshrl.u32 %v13778_v12, %v9718_v21  ;;  %v3270_v49 = vshrl.u32 %v13780_v31, %v9718_v21  ;;  %vm6772_vm5 = vcmp.eq.s32.totalorder %v11008_v56, 2 }
 0x270   :  { %v7760_v59 = vadd.s32 4294967294, %v1772_v1  ;;  %vm3450_vm6 = vcmp.eq.s32.totalorder %v11010_v36, 2  ;;  %v3256_v27 = vand.u32 8388607, %v13661_v38  ;;  %v3272_v40 = vshll.u32 %v13780_v31, %v9636_v4 }
 0x271   :  { %v3275_v39 = vshll.u32 %v13789_v33, %v9636_v4  ;;  %v3279_v5 = vshrl.u32 %v13801_v2, %v9718_v21  ;;  %vm6769_vm7 = vcmp.eq.s32.totalorder %v11008_v56, 0  ;;  %vm3447_vm8 = vcmp.eq.s32.totalorder %v11010_v36, 0 }
 0x272   :  { %vm7761_vm10 = vcmp.lt.s32.totalorder %v7760_v59, 0  ;;  %v3265_v1 = vshrl.u32 %v13745_v37, %v9718_v21  ;;  %v3266_v38 = vshll.u32 %v13745_v37, %v9636_v4  ;;  %v3269_v30 = vshll.u32 %v13778_v12, %v9636_v4 }
 0x273   :  { %vm6768_vm9 = vcmp.lt.s32.totalorder %v11008_v56, 2  ;;  %vm3446_vm11 = vcmp.lt.s32.totalorder %v11010_v36, 2  ;;  %v1775_v45 = vsel %vm7761_vm10, 0, %v7760_v59  ;;  %v3274_v10 = vor.u32 %v3273_v22, %v3272_v40 }
 0x274   :  { %v3277_v62 = vor.u32 %v3276_v34, %v3275_v39  ;;  %v3278_v42 = vshll.u32 %v13798_v25, %v9636_v4  ;;  %vm3444_vm12 = vweird.f32 %v13895_v54  ;;  %vm1706_vm14 = vcmp.lt.s32.totalorder %v13905_v48, 0 }
 0x275   :  { %v1776_v21 = vsub.s32 32, %v1775_v45  ;;  %v1780_v50 = vsub.s32 4294967266, %v1775_v45  ;;  %v3268_v52 = vor.u32 %v3267_v63, %v3266_v38  ;;  %v3271_v43 = vor.u32 %v3270_v49, %v3269_v30 }
 0x276   :  { %v1790_v26 = vsub.s32 4, %v10944_v7  ;;  %v3257_v55 = vor.u32 8388608, %v3256_v27  ;;  %v3280_v18 = vor.u32 %v3279_v5, %v3278_v42  ;;  %vm3281_vm13 = vcmp.lt.s32.totalorder %v13925_v8, 1  ;;  %v8364_v4 = vpop.eup %8363 }
 0x277   :  { %v1777_v22 = vshll.u32 %v10974_v11, %v1775_v45  ;;  %v1778_v34 = vshrl.u32 %v1760_v32, %v1776_v21  ;;  %v1781_v59 = vadd.s32 127, %v1780_v50  ;;  %vm3284_vm15 = vcmp.lt.s32.totalorder %v13925_v8, 4 }
 0x278   :  { %vm3282_vm0 = vcmp.lt.s32.totalorder %v13925_v8, 2  ;;  %vm3283_vm1 = vcmp.lt.s32.totalorder %v13925_v8, 3  ;;  %v3286_v40 = vsel %vm3284_vm15, %v3274_v10, 2102212464  ;;  %v3290_v38 = vsel %vm3284_vm15, %v3277_v62, 920167782  ;;  %v8366_v30 = vpop.eup %8365 }
 0x279   :  { %v3451_v63 = vxor.u32 2147483648, %v8364_v4  ;;  %v1779_v49 = vor.u32 %v1778_v34, %v1777_v22  ;;  %v1782_v27 = vshll.u32 %v1781_v59, 23  ;;  %v3289_v42 = vsel %vm3281_vm13, %v3268_v52, %v3271_v43 }
 0x27a   :  { %v3448_v39 = vxor.u32 2147483648, %v8366_v30  ;;  %v3291_v50 = vsel %vm3283_vm1, %v3274_v10, %v3290_v38  ;;  %v3293_v45 = vsel %vm3281_vm13, %v3271_v43, %v3274_v10  ;;  %v3294_v11 = vsel %vm3284_vm15, %v3280_v18, 1326507024 }
 0x27b   :  { %v6774_v32 = vsel %vm6772_vm5, %v3451_v63, %v8366_v30  ;;  %v3452_v5 = vsel %vm3450_vm6, %v3451_v63, %v8366_v30  ;;  %v1783_v21 = vor.u32 4788187, %v1782_v27  ;;  %v1786_v22 = vcvt.s32.f32 %v1779_v49 }
 0x27c   :  { %v6771_v34 = vsel %vm6769_vm7, %v8364_v4, %v3448_v39  ;;  %v3449_v59 = vsel %vm3447_vm8, %v8364_v4, %v3448_v39  ;;  %v3292_v38 = vsel %vm3282_vm0, %v3289_v42, %v3291_v50  ;;  %v3295_v18 = vsel %vm3283_vm1, %v3277_v62, %v3294_v11 }
 0x27d   :  { %v6775_v10 = vsel %vm6768_vm9, %v6771_v34, %v6774_v32  ;;  %v3453_v30 = vsel %vm3446_vm11, %v3449_v59, %v3452_v5  ;;  %v1784_v63 = vand.u32 2147483647, %v1783_v21  ;;  %v3296_v49 = vsel %vm3282_vm0, %v3293_v45, %v3295_v18  ;;  %v13930_v32 = vld [vmem:[#allocation20_spill] sm:$0xff]  ;;  %v13933_v34 = vld [vmem:[#allocation23_spill] sm:$0xff]  ;;  %v463_v18 = vpop.permute.xlu0 %462 }
 0x27e   :  { %v11093_v27 = vsel %vm3444_vm12, nan, %v6775_v10  ;;  %v11097_v4 = vsel %vm3444_vm12, nan, %v3453_v30  ;;  %v1791_v62 = vsel %vm1706_vm14, %v1790_v26, %v10944_v7  ;;  %v3297_v56 = vshll.u32 %v3257_v55, 8 }
 0x27f   :  { %13926 = vst [vmem:[#allocation45_spill] sm:$0xff] %v11093_v27  ;;  %13927 = vst [vmem:[#allocation28_spill] sm:$0xff] %v11097_v4  ;;  %vm2848_vm2 = vcmp.gt.s32.totalorder %v11003_v19, 0  ;;  %7990 = vmatprep.subr.mxu0 %v11093_v27  ;;  %8025 = vmatprep.subr.mxu1 %v11097_v4  ;;  %v1787_v36 = vmul.f32 %v1786_v22, %v1784_v63  ;;  %v3285_v42 = vsel %vm3281_vm13, %v3265_v1, %v3268_v52 }
 0x280   :  { %v3287_v54 = vsel %vm3283_vm1, %v3271_v43, %v3286_v40  ;;  %v11109_v39 = vmul.u32.u64.low %v3297_v56, %v3296_v49  ;;  %v11110_v50 = vmul.u32.u64.high %v3297_v56, %v3296_v49, %v11109_v39  ;;  %v11117_v26 = vand.u32 31, %v10979_v13 }
 0x281   :  { %v11112_v45 = vmul.u32.u64.low %v3297_v56, %v3292_v38  ;;  %v11113_v11 = vmul.u32.u64.high %v3297_v56, %v3292_v38, %v11112_v45  ;;  %v13929_v7 = vand.u32 2139095040, %v10984_v29  ;;  %v440_v5 = vadd.f32 %v11019_v0, %v13930_v32 }
 0x282   :  { %13928 = vst [vmem:[#allocation50_spill] sm:$0xff] %v11117_v26  ;;  %v1788_v52 = vxor.u32 2147483648, %v1787_v36  ;;  %v2849_v1 = vsel %vm2848_vm2, %v11003_v19, 0  ;;  %vm2951_vm3 = vcmp.gt.s32.totalorder %v11006_v51, 0  ;;  %v13931_v43 = vand.u32 2147483647, %v13905_v48 }
 0x283   :  { %v1193_v55 = vshrl.u32 %v13929_v7, 23  ;;  %v3288_v40 = vsel %vm3282_vm0, %v3285_v42, %v3287_v54  ;;  %v11130_v13 = vmul.f32 6.2831855, %v11015_v9  ;;  %v11135_v0 = vadd.f32 %v11022_v60, %v440_v5 }
 0x284   :  { %vm1705_vm4 = vcmp.le.f32.partialorder %v13931_v43, 0.7853982  ;;  %v1789_v21 = vsel %vm1706_vm14, %v1788_v52, %v1787_v36  ;;  %v423_v59 = vadd.f32 %v13933_v34, %v11025_v6  ;;  %vm3306_vm5 = vc.u32 %v11110_v50, %v11112_v45 }
 0x285   :  { %13932 = vst [vmem:[#allocation44_spill] sm:$0xff] %v11130_v13  ;;  %v1793_v22 = vsel %vm1705_vm4, 0, %v1791_v62  ;;  %v1792_v19 = vsel %vm1705_vm4, %v13905_v48, %v1789_v21  ;;  %v3307_v8 = vadd.s32 1, %v11113_v11  ;;  %v11143_v38 = vand.u32 31, %v2849_v1 }
 0x286   :  { %v7738_v9 = vadd.s32 4294967169, %v1193_v55  ;;  %8367 = vcosq.f32 %v1792_v19  ;;  %v3304_v10 = vmul.u32 %v3297_v56, %v3288_v40  ;;  %v5102_v30 = vadd.s32 3, %v1793_v22  ;;  %v523_v40 = vpop.permute.xlu0 %522 }
 0x287   :  { %13934 = vst [vmem:[#allocation49_spill] sm:$0xff] %v11143_v38  ;;  %8369 = vsinq.f32 %v1792_v19  ;;  %v587_v60 = vmul.f32 %v8720_v53, %v463_v18  ;;  %v3308_v63 = vsel %vm3306_vm5, %v3307_v8, %v11113_v11  ;;  %v2952_v6 = vsel %vm2951_vm3, %v11006_v51, 0  ;;  %v467_v19 = vpop.permute.xlu1 %466  ;;  %v13939_v8 = vld [vmem:[#allocation40_spill] sm:$0xff] }
 0x288   :  { %v1295_v49 = vand.u32 2139095040, %v11130_v13  ;;  %v392_v62 = vmul.f32 %v8703_v46, %v10911_v41  ;;  %v3309_v36 = vadd.s32 %v3308_v63, %v3304_v10  ;;  %v11154_v42 = vsub.s32 32, %v11117_v26 }
 0x289   :  { %v11156_v56 = vshrl.u32 %v2849_v1, 5  ;;  %v11159_v54 = vadd.f32 0.5, %v11135_v0  ;;  %v11161_v39 = vadd.f32 %v587_v60, %v423_v59  ;;  %v11164_v11 = vsub.s32 32, %v11143_v38 }
 0x28a   :  { %13935 = vst [vmem:[#allocation19_spill] sm:$0xff] %v11154_v42  ;;  %v228_v51 = vmul.f32 %v8708_v47, %v10876_v14  ;;  %v11168_v7 = vand.u32 3, %v1793_v22  ;;  %v3310_v41 = vadd.s32 536870912, %v3309_v36  ;;  %v11170_v55 = vshrl.u32 %v2952_v6, 5 }
 0x28b   :  { %13936 = vst [vmem:[#allocation14_spill] sm:$0xff] %v11156_v56  ;;  %13937 = vst [vmem:[#allocation29_spill] sm:$0xff] %v11164_v11  ;;  %v11172_v32 = vand.u32 31, %v2952_v6  ;;  %v11174_v5 = vadd.s32 1, %v7738_v9  ;;  %v5103_v52 = vand.u32 3, %v5102_v30  ;;  %v11176_v1 = vshrl.u32 %v1295_v49, 23 }
 0x28c   :  { %13938 = vst [vmem:[#allocation46_spill] sm:$0xff] %v11170_v55  ;;  %v11178_v43 = vadd.f32 %v392_v62, %v228_v51  ;;  %v11180_v21 = vshrl.u32 %v3310_v41, 30  ;;  %v1628_v14 = vshrl.u32 %v13798_v25, %v10962_v17  ;;  %v11185_v22 = vmul.f32 %v8720_v53, %v523_v40 }
 0x28d   :  { %v11189_v59 = vadd.f32 0.5, %v11161_v39  ;;  %v13677_v9 = vand.u32 2147483647, %v13939_v8  ;;  %vm1799_vm6 = vcmp.eq.s32.totalorder %v11168_v7, 0  ;;  %vm1802_vm7 = vcmp.eq.s32.totalorder %v11168_v7, 2 }
 0x28e   :  { %v3312_v18 = vshll.u32 %v11180_v21, 30  ;;  %v1627_v10 = vshll.u32 %v13789_v33, %v9734_v28  ;;  %vm5104_vm8 = vcmp.lt.s32.totalorder %v5103_v52, 2  ;;  %vm1798_vm10 = vcmp.lt.s32.totalorder %v11168_v7, 2 }
 0x28f   :  { %v1619_v30 = vshrl.u32 %v13778_v12, %v10962_v17  ;;  %v1622_v60 = vshrl.u32 %v13780_v31, %v10962_v17  ;;  %v1625_v63 = vshrl.u32 %v13789_v33, %v10962_v17  ;;  %vm1796_vm9 = vweird.f32 %v13905_v48 }
 0x290   :  { %vm5105_vm11 = vcmp.eq.s32.totalorder %v5103_v52, 0  ;;  %v11205_v6 = vsub.s32 %v3309_v36, %v3312_v18  ;;  %v1629_v49 = vor.u32 %v1628_v14, %v1627_v10  ;;  %v1631_v62 = vshrl.u32 %v13801_v2, %v10962_v17  ;;  %v327_v18 = vpop.permute.xlu1 %326 }
 0x291   :  { %v1608_v51 = vand.u32 8388607, %v13677_v9  ;;  %v1618_v41 = vshll.u32 %v13745_v37, %v9734_v28  ;;  %v1621_v40 = vshll.u32 %v13778_v12, %v9734_v28  ;;  %v1624_v34 = vshll.u32 %v13780_v31, %v9734_v28 }
 0x292   :  { %vm5108_vm12 = vcmp.eq.s32.totalorder %v5103_v52, 2  ;;  %v3315_v36 = vsub.s32 0, %v11205_v6  ;;  %v588_v14 = vmul.f32 %v8720_v53, %v467_v19  ;;  %v1630_v10 = vshll.u32 %v13798_v25, %v9734_v28  ;;  %v13942_v52 = vld [vmem:[#allocation5_spill] sm:$0xff] }
 0x293   :  { %v8368_v27 = vpop.eup %8367  ;;  %v1620_v9 = vor.u32 %v1619_v30, %v1618_v41  ;;  %v1623_v4 = vor.u32 %v1622_v60, %v1621_v40  ;;  %v1626_v29 = vor.u32 %v1625_v63, %v1624_v34  ;;  %vm1636_vm14 = vcmp.lt.s32.totalorder %v10959_v3, 4 }
 0x294   :  { %v8370_v56 = vpop.eup %8369  ;;  %v1803_v38 = vxor.u32 2147483648, %v8368_v27  ;;  %v7819_v11 = vmin.u32 %v3315_v36, %v11205_v6  ;;  %v1632_v13 = vor.u32 %v1631_v62, %v1630_v10  ;;  %v1642_v55 = vsel %vm1636_vm14, %v1629_v49, 920167782 }
 0x295   :  { %v1800_v26 = vxor.u32 2147483648, %v8370_v56  ;;  %v406_v19 = vmul.f32 %v8703_v46, %v327_v18  ;;  %v1609_v42 = vor.u32 8388608, %v1608_v51  ;;  %vm1633_vm13 = vcmp.lt.s32.totalorder %v10959_v3, 1 }
 0x296   :  { %vm1200_vm15 = vcmp.gt.s32.totalorder %v11174_v5, 0  ;;  %v5110_v28 = vsel %vm5108_vm12, %v1803_v38, %v8370_v56  ;;  %v1804_v34 = vsel %vm1802_vm7, %v1803_v38, %v8370_v56  ;;  %v3317_v30 = vclz %v7819_v11 }
 0x297   :  { %vm1635_vm0 = vcmp.lt.s32.totalorder %v10959_v3, 3  ;;  %v5107_v60 = vsel %vm5105_vm11, %v8368_v27, %v1800_v26  ;;  %v1801_v63 = vsel %vm1799_vm6, %v8368_v27, %v1800_v26  ;;  %v1641_v62 = vsel %vm1633_vm13, %v1620_v9, %v1623_v4 }
 0x298   :  { %v1643_v51 = vsel %vm1635_vm0, %v1626_v29, %v1642_v55  ;;  %v5111_v41 = vsel %vm5104_vm8, %v5107_v60, %v5110_v28  ;;  %v1805_v40 = vsel %vm1798_vm10, %v1801_v63, %v1804_v34  ;;  %v7820_v38 = vadd.s32 4294967294, %v3317_v30 }
 0x299   :  { %v1646_v56 = vsel %vm1636_vm14, %v1632_v13, 1326507024  ;;  %v11246_v11 = vsel %vm1796_vm9, nan, %v5111_v41  ;;  %v11250_v27 = vsel %vm1796_vm9, nan, %v1805_v40  ;;  %v1617_v26 = vshrl.u32 %v13745_v37, %v10962_v17 }
 0x29a   :  { %13940 = vst [vmem:[#allocation52_spill] sm:$0xff] %v11246_v11  ;;  %13941 = vst [vmem:[#allocation51_spill] sm:$0xff] %v11250_v27  ;;  %vm1634_vm1 = vcmp.lt.s32.totalorder %v10959_v3, 2  ;;  %7991 = vmatpush3.msra.mxu0 %v11246_v11  ;;  %8026 = vmatpush3.msra.mxu1 %v11250_v27  ;;  %vm7821_vm2 = vcmp.lt.s32.totalorder %v7820_v38, 0  ;;  %v1638_v13 = vsel %vm1636_vm14, %v1626_v29, 2102212464  ;;  %v1645_v48 = vsel %vm1633_vm13, %v1623_v4, %v1626_v29 }
 0x29b   :  { %v1644_v7 = vsel %vm1634_vm1, %v1641_v62, %v1643_v51  ;;  %v3320_v55 = vsel %vm7821_vm2, 0, %v7820_v38  ;;  %v438_v36 = vadd.f32 %v406_v19, %v13942_v52  ;;  %v1647_v17 = vsel %vm1635_vm0, %v1629_v49, %v1646_v56 }
 0x29c   :  { %v1649_v18 = vshll.u32 %v1609_v42, 8  ;;  %v3305_v10 = vadd.s32 %v11112_v45, %v11110_v50  ;;  %v3321_v28 = vsub.s32 32, %v3320_v55  ;;  %v3325_v34 = vsub.s32 4294967266, %v3320_v55 }
 0x29d   :  { %v1637_v30 = vsel %vm1633_vm13, %v1617_v26, %v1620_v9  ;;  %v1639_v60 = vsel %vm1635_vm0, %v1623_v4, %v1638_v13  ;;  %v1648_v29 = vsel %vm1634_vm1, %v1645_v48, %v1647_v17  ;;  %v13943_v42 = vfloor.f32 %v11159_v54 }
 0x29e   :  { %v11274_v63 = vmul.u32.u64.low %v1649_v18, %v1644_v7  ;;  %v11275_v19 = vmul.u32.u64.high %v1649_v18, %v1644_v7, %v11274_v63  ;;  %v3322_v50 = vshll.u32 %v11205_v6, %v3320_v55  ;;  %v3323_v45 = vshrl.u32 %v3305_v10, %v3321_v28 }
 0x29f   :  { %v732_v49 = vsub.f32 %v11135_v0, %v13943_v42  ;;  %v3326_v62 = vadd.s32 127, %v3325_v34  ;;  %v683_v9 = vfloor.f32 %v11189_v59  ;;  %v11284_v51 = vadd.f32 %v588_v14, %v11178_v43 }
 0x2a0   :  { %v11286_v4 = vmul.u32.u64.low %v1649_v18, %v1648_v29  ;;  %v11287_v41 = vmul.u32.u64.high %v1649_v18, %v1648_v29, %v11286_v4  ;;  %v3324_v40 = vor.u32 %v3323_v45, %v3322_v50  ;;  %v634_v56 = vadd.f32 %v11185_v22, %v438_v36 }
 0x2a1   :  { %v3327_v38 = vshll.u32 %v3326_v62, 23  ;;  %v1640_v54 = vsel %vm1634_vm1, %v1637_v30, %v1639_v60  ;;  %v11293_v0 = vsub.s32 32, %v11172_v32  ;;  %v1201_v59 = vsel %vm1200_vm15, %v11174_v5, 0 }
 0x2a2   :  { %v3335_v43 = vsub.s32 4, %v11180_v21  ;;  %v1659_v6 = vadd.s32 1, %v11275_v19  ;;  %v11301_v14 = vadd.s32 4294967169, %v11176_v1  ;;  %v11303_v26 = vmul.f32 6.2831855, %v732_v49 }
 0x2a3   :  { %vm3251_vm3 = vcmp.lt.s32.totalorder %v13924_v58, 0  ;;  %v3328_v3 = vor.u32 4788187, %v3327_v38  ;;  %v715_v22 = vsub.f32 %v11161_v39, %v683_v9  ;;  %v652_v13 = vadd.f32 0.5, %v11284_v51 }
 0x2a4   :  { %v1656_v7 = vmul.u32 %v1649_v18, %v1640_v54  ;;  %vm1658_vm4 = vc.u32 %v11287_v41, %v11274_v63  ;;  %v3331_v48 = vcvt.s32.f32 %v3324_v40  ;;  %v666_v55 = vadd.f32 0.5, %v634_v56 }
 0x2a5   :  { %v3329_v5 = vand.u32 2147483647, %v3328_v3  ;;  %v1660_v52 = vsel %vm1658_vm4, %v1659_v6, %v11275_v19  ;;  %v11311_v1 = vshrl.u32 %v1201_v59, 5  ;;  %v3336_v36 = vsel %vm3251_vm3, %v3335_v43, %v11180_v21 }
 0x2a6   :  { %v1661_v17 = vadd.s32 %v1660_v52, %v1656_v7  ;;  %v13691_v39 = vand.u32 2147483647, %v9646_v15  ;;  %v11317_v10 = vand.u32 31, %v1201_v59  ;;  %v11321_v18 = vmul.f32 %v8708_v47, %v10938_v57 }
 0x2a7   :  { %v13944_v28 = vand.u32 2147483647, %v13924_v58  ;;  %v3332_v30 = vmul.f32 %v3331_v48, %v3329_v5  ;;  %v2737_v60 = vand.u32 2139095040, %v11303_v26  ;;  %v11330_v29 = vmul.f32 6.2831855, %v715_v22 }
 0x2a8   :  { %v684_v21 = vfloor.f32 %v652_v13  ;;  %v1662_v19 = vadd.s32 536870912, %v1661_v17  ;;  %v698_v50 = vfloor.f32 %v666_v55  ;;  %v3173_v57 = vshrl.u32 %v13798_v25, %v10998_v20 }
 0x2a9   :  { %vm11325_vm5 = vcmp.le.f32.partialorder %v13944_v28, 0.7853982  ;;  %13947 = vst [vmem:[#allocation32_spill] sm:$0xff] %v11330_v29  ;;  %v3333_v42 = vxor.u32 2147483648, %v3332_v30  ;;  %v3153_v62 = vand.u32 8388607, %v13691_v39  ;;  %v3164_v9 = vshrl.u32 %v13778_v12, %v10998_v20 }
 0x2aa   :  { %v3338_v49 = vsel %vm11325_vm5, 0, %v3336_v36  ;;  %v11336_v45 = vshrl.u32 %v1662_v19, 30  ;;  %v3167_v4 = vshrl.u32 %v13780_v31, %v10998_v20  ;;  %v3170_v38 = vshrl.u32 %v13789_v33, %v10998_v20 }
 0x2ab   :  { %v3334_v40 = vsel %vm3251_vm3, %v3333_v42, %v3332_v30  ;;  %v3172_v54 = vshll.u32 %v13789_v33, %v10970_v35  ;;  %v3176_v59 = vshrl.u32 %v13801_v2, %v10998_v20  ;;  %v3163_v3 = vshll.u32 %v13745_v37, %v10970_v35 }
 0x2ac   :  { %v3337_v43 = vsel %vm11325_vm5, %v13924_v58, %v3334_v40  ;;  %v1664_v6 = vshll.u32 %v11336_v45, 30  ;;  %v3175_v22 = vshll.u32 %v13798_v25, %v10970_v35  ;;  %v3166_v13 = vshll.u32 %v13778_v12, %v10970_v35 }
 0x2ad   :  { %8371 = vcosq.f32 %v3337_v43  ;;  %v3169_v7 = vshll.u32 %v13780_v31, %v10970_v35  ;;  %v3174_v5 = vor.u32 %v3173_v57, %v3172_v54  ;;  %v986_v48 = vand.u32 2139095040, %v11330_v29 }
 0x2ae   :  { %8373 = vsinq.f32 %v3337_v43  ;;  %v11365_v55 = vsub.s32 %v1661_v17, %v1664_v6  ;;  %v3177_v52 = vor.u32 %v3176_v59, %v3175_v22  ;;  %v6662_v36 = vadd.s32 3, %v3338_v49 }
 0x2af   :  { %v3165_v28 = vor.u32 %v3164_v9, %v3163_v3  ;;  %v3168_v34 = vor.u32 %v3167_v4, %v3166_v13  ;;  %v3171_v30 = vor.u32 %v3170_v38, %v3169_v7  ;;  %v716_v19 = vsub.f32 %v11284_v51, %v684_v21 }
 0x2b0   :  { %v730_v42 = vsub.f32 %v634_v56, %v698_v50  ;;  %v1667_v40 = vsub.s32 0, %v11365_v55  ;;  %vm3181_vm6 = vcmp.lt.s32.totalorder %v10995_v16, 4  ;;  %v11370_v39 = vshrl.u32 %v2737_v60, 23 }
 0x2b1   :  { %v11372_v35 = vand.u32 3, %v3338_v49  ;;  %v3154_v57 = vor.u32 8388608, %v3153_v62  ;;  %v3187_v17 = vsel %vm3181_vm6, %v3174_v5, 920167782  ;;  %vm3178_vm7 = vcmp.lt.s32.totalorder %v10995_v16, 1 }
 0x2b2   :  { %v7755_v54 = vmin.u32 %v1667_v40, %v11365_v55  ;;  %vm3180_vm8 = vcmp.lt.s32.totalorder %v10995_v16, 3  ;;  %v3191_v51 = vsel %vm3181_vm6, %v3177_v52, 1326507024  ;;  %v6663_v56 = vand.u32 3, %v6662_v36 }
 0x2b3   :  { %v3186_v60 = vsel %vm3178_vm7, %v3165_v28, %v3168_v34  ;;  %v3188_v21 = vsel %vm3180_vm8, %v3171_v30, %v3187_v17  ;;  %v3190_v49 = vsel %vm3178_vm7, %v3168_v34, %v3171_v30  ;;  %v11387_v50 = vshrl.u32 %v986_v48, 23 }
 0x2b4   :  { %v11389_v62 = vmul.f32 6.2831855, %v716_v19  ;;  %v11391_v9 = vmul.f32 6.2831855, %v730_v42  ;;  %v1669_v4 = vclz %v7755_v54  ;;  %v3162_v38 = vshrl.u32 %v13745_v37, %v10998_v20 }
 0x2b5   :  { %vm3179_vm10 = vcmp.lt.s32.totalorder %v10995_v16, 2  ;;  %v3183_v59 = vsel %vm3181_vm6, %v3171_v30, 2102212464  ;;  %v3192_v43 = vsel %vm3180_vm8, %v3174_v5, %v3191_v51  ;;  %vm3343_vm9 = vcmp.lt.s32.totalorder %v11372_v35, 2  ;;  %v13949_v51 = vld [vmem:[#allocation36_spill] sm:$0xff] }
 0x2b6   :  { %13948 = vst [vmem:[#allocation53_spill] sm:$0xff] %v11391_v9  ;;  %v7756_v6 = vadd.s32 4294967294, %v1669_v4  ;;  %v3189_v3 = vsel %vm3179_vm10, %v3186_v60, %v3188_v21  ;;  %v3193_v22 = vsel %vm3179_vm10, %v3190_v49, %v3192_v43  ;;  %v3194_v13 = vshll.u32 %v3154_v57, 8 }
 0x2b7   :  { %vm3341_vm11 = vweird.f32 %v13924_v58  ;;  %vm6664_vm12 = vcmp.lt.s32.totalorder %v6663_v56, 2  ;;  %vm3344_vm14 = vcmp.eq.s32.totalorder %v11372_v35, 0  ;;  %vm3347_vm13 = vcmp.eq.s32.totalorder %v11372_v35, 2 }
 0x2b8   :  { %v3182_v20 = vsel %vm3178_vm7, %v3162_v38, %v3165_v28  ;;  %vm1603_vm15 = vcmp.lt.s32.totalorder %v13939_v8, 0  ;;  %vm7757_vm0 = vcmp.lt.s32.totalorder %v7756_v6, 0  ;;  %v3184_v7 = vsel %vm3180_vm8, %v3168_v34, %v3183_v59 }
 0x2b9   :  { %v11413_v5 = vmul.u32.u64.low %v3194_v13, %v3193_v22  ;;  %v11414_v48 = vmul.u32.u64.high %v3194_v13, %v3193_v22, %v11413_v5  ;;  %vm6665_vm1 = vcmp.eq.s32.totalorder %v6663_v56, 0  ;;  %v1672_v52 = vsel %vm7757_vm0, 0, %v7756_v6 }
 0x2ba   :  { %v11416_v36 = vmul.u32.u64.low %v3194_v13, %v3189_v3  ;;  %v11417_v30 = vmul.u32.u64.high %v3194_v13, %v3189_v3, %v11416_v36  ;;  %v8372_v19 = vpop.eup %8371  ;;  %vm6668_vm2 = vcmp.eq.s32.totalorder %v6663_v56, 2  ;;  %v1657_v28 = vadd.s32 %v11274_v63, %v11287_v41 }
 0x2bb   :  { %v1673_v42 = vsub.s32 32, %v1672_v52  ;;  %v1677_v40 = vsub.s32 4294967266, %v1672_v52  ;;  %v8374_v57 = vpop.eup %8373  ;;  %v3348_v17 = vxor.u32 2147483648, %v8372_v19  ;;  %v1687_v34 = vsub.s32 4, %v11336_v45 }
 0x2bc   :  { %v3185_v54 = vsel %vm3179_vm10, %v3182_v20, %v3184_v7  ;;  %v13692_v60 = vand.u32 2147483647, %v13949_v51  ;;  %v3345_v21 = vxor.u32 2147483648, %v8374_v57  ;;  %v1674_v49 = vshll.u32 %v11365_v55, %v1672_v52 }
 0x2bd   :  { %v1675_v4 = vshrl.u32 %v1657_v28, %v1673_v42  ;;  %v1678_v38 = vadd.s32 127, %v1677_v40  ;;  %v6670_v59 = vsel %vm6668_vm2, %v3348_v17, %v8374_v57  ;;  %v3349_v63 = vsel %vm3347_vm13, %v3348_v17, %v8374_v57 }
 0x2be   :  { %vm3203_vm3 = vc.u32 %v11414_v48, %v11416_v36  ;;  %v3204_v41 = vadd.s32 1, %v11417_v30  ;;  %v6667_v43 = vsel %vm6665_vm1, %v8372_v19, %v3345_v21  ;;  %v3346_v16 = vsel %vm3344_vm14, %v8372_v19, %v3345_v21 }
 0x2bf   :  { %v13950_v6 = vand.u32 2147483647, %v13939_v8  ;;  %v1676_v3 = vor.u32 %v1675_v4, %v1674_v49  ;;  %v1679_v22 = vshll.u32 %v1678_v38, 23  ;;  %v6671_v20 = vsel %vm6664_vm12, %v6667_v43, %v6670_v59 }
 0x2c0   :  { %v3350_v7 = vsel %vm3343_vm9, %v3346_v16, %v3349_v63  ;;  %v3201_v5 = vmul.u32 %v3194_v13, %v3185_v54  ;;  %v3205_v52 = vsel %vm3203_vm3, %v3204_v41, %v11417_v30  ;;  %v11447_v28 = vsel %vm3341_vm11, nan, %v6671_v20 }
 0x2c1   :  { %vm11437_vm4 = vcmp.le.f32.partialorder %v13950_v6, 0.7853982  ;;  %13953 = vst [vmem:[#allocation20_spill] sm:$0xff] %v11447_v28  ;;  %v11451_v19 = vsel %vm3341_vm11, nan, %v3350_v7  ;;  %v1089_v42 = vand.u32 2139095040, %v11389_v62  ;;  %7992 = vmatprep.subr.mxu0 %v11447_v28  ;;  %v2531_v35 = vand.u32 2139095040, %v11391_v9 }
 0x2c2   :  { %13954 = vst [vmem:[#allocation23_spill] sm:$0xff] %v11451_v19  ;;  %v1680_v40 = vor.u32 4788187, %v1679_v22  ;;  %8027 = vmatprep.subr.mxu1 %v11451_v19  ;;  %v1688_v56 = vsel %vm1603_vm15, %v1687_v34, %v11336_v45  ;;  %v3206_v13 = vadd.s32 %v3205_v52, %v3201_v5  ;;  %v1516_v30 = vshrl.u32 %v13778_v12, %v10956_v44 }
 0x2c3   :  { %v1683_v57 = vcvt.s32.f32 %v1676_v3  ;;  %v1505_v17 = vand.u32 8388607, %v13692_v60  ;;  %v1519_v54 = vshrl.u32 %v13780_v31, %v10956_v44  ;;  %v1515_v49 = vshll.u32 %v13745_v37, %v9722_v24 }
 0x2c4   :  { %v1681_v58 = vand.u32 2147483647, %v1680_v40  ;;  %v3207_v21 = vadd.s32 536870912, %v3206_v13  ;;  %v1518_v4 = vshll.u32 %v13778_v12, %v9722_v24  ;;  %v1522_v45 = vshrl.u32 %v13789_v33, %v10956_v44 }
 0x2c5   :  { %v1521_v38 = vshll.u32 %v13780_v31, %v9722_v24  ;;  %v1524_v59 = vshll.u32 %v13789_v33, %v9722_v24  ;;  %v1525_v63 = vshrl.u32 %v13798_v25, %v10956_v44  ;;  %v1517_v43 = vor.u32 %v1516_v30, %v1515_v49 }
 0x2c6   :  { %v1684_v34 = vmul.f32 %v1683_v57, %v1681_v58  ;;  %v11478_v41 = vshrl.u32 %v3207_v21, 30  ;;  %v1520_v16 = vor.u32 %v1519_v54, %v1518_v4  ;;  %v1528_v6 = vshrl.u32 %v13801_v2, %v10956_v44  ;;  %v13955_v58 = vld [vmem:[#allocation7_spill] sm:$0xff]  ;;  %v527_v21 = vpop.permute.xlu1 %526 }
 0x2c7   :  { %v1523_v22 = vor.u32 %v1522_v45, %v1521_v38  ;;  %v1526_v20 = vor.u32 %v1525_v63, %v1524_v59  ;;  %v1527_v7 = vshll.u32 %v13798_v25, %v9722_v24  ;;  %v1690_v5 = vsel %vm11437_vm4, 0, %v1688_v56 }
 0x2c8   :  { %v1685_v3 = vxor.u32 2147483648, %v1684_v34  ;;  %v3209_v52 = vshll.u32 %v11478_v41, 30  ;;  %v1506_v40 = vor.u32 8388608, %v1505_v17  ;;  %vm1533_vm5 = vcmp.lt.s32.totalorder %v13955_v58, 4 }
 0x2c9   :  { %v1529_v57 = vor.u32 %v1528_v6, %v1527_v7  ;;  %vm1530_vm6 = vcmp.lt.s32.totalorder %v13955_v58, 1  ;;  %v1539_v54 = vsel %vm1533_vm5, %v1526_v20, 920167782  ;;  %vm1532_vm7 = vcmp.lt.s32.totalorder %v13955_v58, 3 }
 0x2ca   :  { %v1686_v30 = vsel %vm1603_vm15, %v1685_v3, %v1684_v34  ;;  %v11496_v56 = vsub.s32 %v3206_v13, %v3209_v52  ;;  %v1538_v17 = vsel %vm1530_vm6, %v1517_v43, %v1520_v16  ;;  %v4998_v49 = vadd.s32 3, %v1690_v5 }
 0x2cb   :  { %v1689_v24 = vsel %vm11437_vm4, %v13939_v8, %v1686_v30  ;;  %v1514_v4 = vshrl.u32 %v13745_v37, %v10956_v44  ;;  %v1540_v45 = vsel %vm1532_vm7, %v1523_v22, %v1539_v54  ;;  %vm1531_vm8 = vcmp.lt.s32.totalorder %v13955_v58, 2 }
 0x2cc   :  { %8375 = vcosq.f32 %v1689_v24  ;;  %v3212_v55 = vsub.s32 0, %v11496_v56  ;;  %v1535_v13 = vsel %vm1533_vm5, %v1523_v22, 2102212464  ;;  %v603_v34 = vmul.f32 %v8720_v53, %v527_v21 }
 0x2cd   :  { %8377 = vsinq.f32 %v1689_v24  ;;  %v1541_v38 = vsel %vm1531_vm8, %v1538_v17, %v1540_v45  ;;  %v1543_v59 = vsel %vm1533_vm5, %v1529_v57, 1326507024  ;;  %v1546_v44 = vshll.u32 %v1506_v40, 8  ;;  %v13956_v40 = vld [vmem:[#allocation22_spill] sm:$0xff] }
 0x2ce   :  { %v11514_v63 = vand.u32 3, %v1690_v5  ;;  %v7815_v6 = vmin.u32 %v3212_v55, %v11496_v56  ;;  %v1534_v3 = vsel %vm1530_vm6, %v1514_v4, %v1517_v43  ;;  %v1542_v7 = vsel %vm1530_vm6, %v1520_v16, %v1523_v22 }
 0x2cf   :  { %v1536_v52 = vsel %vm1532_vm7, %v1520_v16, %v1535_v13  ;;  %v1544_v30 = vsel %vm1532_vm7, %v1526_v20, %v1543_v59  ;;  %v11525_v54 = vmul.u32.u64.low %v1546_v44, %v1541_v38  ;;  %v11526_v24 = vmul.u32.u64.high %v1546_v44, %v1541_v38, %v11525_v54  ;;  %v13957_v38 = vld [vmem:[#allocation55_spill] sm:$0xff] }
 0x2d0   :  { %v11530_v5 = vadd.s32 1, %v11301_v14  ;;  %v439_v57 = vadd.f32 %v13956_v40, %v11321_v18  ;;  %v4999_v43 = vand.u32 3, %v4998_v49  ;;  %v3214_v21 = vclz %v7815_v6 }
 0x2d1   :  { %v11535_v22 = vadd.s32 4294967169, %v11370_v39  ;;  %v11538_v16 = vadd.s32 4294967169, %v11387_v50  ;;  %v11542_v20 = vshrl.u32 %v1089_v42, 23  ;;  %v1545_v17 = vsel %vm1531_vm8, %v1542_v7, %v1544_v30 }
 0x2d2   :  { %v7816_v14 = vadd.s32 4294967294, %v3214_v21  ;;  %v1537_v4 = vsel %vm1531_vm8, %v1534_v3, %v1536_v52  ;;  %v11548_v18 = vmul.u32.u64.low %v1546_v44, %v1545_v17  ;;  %v11549_v49 = vmul.u32.u64.high %v1546_v44, %v1545_v17, %v11548_v18 }
 0x2d3   :  { %v11553_v39 = vshrl.u32 %v2531_v35, 23  ;;  %vm1696_vm10 = vcmp.eq.s32.totalorder %v11514_v63, 0  ;;  %vm1699_vm9 = vcmp.eq.s32.totalorder %v11514_v63, 2  ;;  %v11557_v50 = vadd.f32 %v603_v34, %v439_v57 }
 0x2d4   :  { %vm5000_vm11 = vcmp.lt.s32.totalorder %v4999_v43, 2  ;;  %vm5001_vm12 = vcmp.eq.s32.totalorder %v4999_v43, 0  ;;  %vm1695_vm14 = vcmp.lt.s32.totalorder %v11514_v63, 2  ;;  %vm7817_vm13 = vcmp.lt.s32.totalorder %v7816_v14, 0 }
 0x2d5   :  { %v1556_v42 = vadd.s32 1, %v11526_v24  ;;  %vm1693_vm15 = vweird.f32 %v13939_v8  ;;  %vm5004_vm0 = vcmp.eq.s32.totalorder %v4999_v43, 2  ;;  %v3202_v35 = vadd.s32 %v11416_v36, %v11414_v48 }
 0x2d6   :  { %v3217_v58 = vsel %vm7817_vm13, 0, %v7816_v14  ;;  %v1553_v45 = vmul.u32 %v1546_v44, %v1537_v4  ;;  %v3060_v59 = vshll.u32 %v13745_v37, %v10965_v23  ;;  %vm1555_vm1 = vc.u32 %v11549_v49, %v11525_v54 }
 0x2d7   :  { %v3218_v55 = vsub.s32 32, %v3217_v58  ;;  %v3222_v13 = vsub.s32 4294967266, %v3217_v58  ;;  %v3061_v6 = vshrl.u32 %v13778_v12, %v10992_v61  ;;  %v3063_v3 = vshll.u32 %v13778_v12, %v10965_v23 }
 0x2d8   :  { %v3064_v48 = vshrl.u32 %v13780_v31, %v10992_v61  ;;  %v3219_v44 = vshll.u32 %v11496_v56, %v3217_v58  ;;  %v1557_v30 = vsel %vm1555_vm1, %v1556_v42, %v11526_v24  ;;  %v3066_v17 = vshll.u32 %v13780_v31, %v10965_v23 }
 0x2d9   :  { %v8376_v36 = vpop.eup %8375  ;;  %v3220_v7 = vshrl.u32 %v3202_v35, %v3218_v55  ;;  %v3223_v52 = vadd.s32 127, %v3222_v13  ;;  %v1558_v21 = vadd.s32 %v1557_v30, %v1553_v45  ;;  %v3070_v14 = vshrl.u32 %v13798_v25, %v10992_v61 }
 0x2da   :  { %v8378_v40 = vpop.eup %8377  ;;  %v1700_v57 = vxor.u32 2147483648, %v8376_v36  ;;  %v3069_v34 = vshll.u32 %v13789_v33, %v10965_v23  ;;  %v3067_v35 = vshrl.u32 %v13789_v33, %v10992_v61  ;;  %v3073_v30 = vshrl.u32 %v13801_v2, %v10992_v61 }
 0x2db   :  { %v1697_v4 = vxor.u32 2147483648, %v8378_v40  ;;  %v3221_v18 = vor.u32 %v3220_v7, %v3219_v44  ;;  %v3224_v60 = vshll.u32 %v3223_v52, 23  ;;  %v1559_v42 = vadd.s32 536870912, %v1558_v21 }
 0x2dc   :  { %v5006_v56 = vsel %vm5004_vm0, %v1700_v57, %v8378_v40  ;;  %v1701_v24 = vsel %vm1699_vm9, %v1700_v57, %v8378_v40  ;;  %v3071_v13 = vor.u32 %v3070_v14, %v3069_v34  ;;  %v667_v63 = vadd.f32 0.5, %v11557_v50 }
 0x2dd   :  { %v5003_v58 = vsel %vm5001_vm12, %v8376_v36, %v1697_v4  ;;  %v1698_v45 = vsel %vm1696_vm10, %v8376_v36, %v1697_v4  ;;  %v3225_v55 = vor.u32 4788187, %v3224_v60  ;;  %v11594_v52 = vshrl.u32 %v1559_v42, 30 }
 0x2de   :  { %v5007_v44 = vsel %vm5000_vm11, %v5003_v58, %v5006_v56  ;;  %v1702_v7 = vsel %vm1695_vm14, %v1698_v45, %v1701_v24  ;;  %v3228_v34 = vcvt.s32.f32 %v3221_v18  ;;  %v13960_v36 = vand.u32 2147483647, %v13957_v38 }
 0x2df   :  { %v11600_v40 = vsel %vm1693_vm15, nan, %v5007_v44  ;;  %v11604_v57 = vsel %vm1693_vm15, nan, %v1702_v7  ;;  %v3226_v60 = vand.u32 2147483647, %v3225_v55  ;;  %v1561_v43 = vshll.u32 %v11594_v52, 30  ;;  %v13961_v55 = vld [vmem:[#allocation43_spill] sm:$0xff] }
 0x2e0   :  { %13958 = vst [vmem:[#allocation40_spill] sm:$0xff] %v11600_v40  ;;  %13959 = vst [vmem:[#allocation5_spill] sm:$0xff] %v11604_v57  ;;  %7993 = vmatpush3.msra.mxu0 %v11600_v40  ;;  %8028 = vmatpush3.msra.mxu1 %v11604_v57  ;;  %v3050_v14 = vand.u32 8388607, %v13960_v36  ;;  %v3072_v4 = vshll.u32 %v13798_v25, %v10965_v23  ;;  %vm1303_vm2 = vcmp.gt.s32.totalorder %v11530_v5, 0  ;;  %v3232_v42 = vsub.s32 4, %v11478_v41 }
 0x2e1   :  { %v3229_v8 = vmul.f32 %v3228_v34, %v3226_v60  ;;  %v3062_v56 = vor.u32 %v3061_v6, %v3060_v59  ;;  %v3065_v24 = vor.u32 %v3064_v48, %v3063_v3  ;;  %v3068_v18 = vor.u32 %v3067_v35, %v3066_v17  ;;  %v13978_v40 = vld [vmem:[#allocation50_spill] sm:$0xff] }
 0x2e2   :  { %v11616_v58 = vsub.s32 %v1558_v21, %v1561_v43  ;;  %v3074_v45 = vor.u32 %v3073_v30, %v3072_v4  ;;  %vm3078_vm3 = vcmp.lt.s32.totalorder %v13961_v55, 4  ;;  %v13962_v44 = vand.u32 2147483647, %v9646_v15 }
 0x2e3   :  { %vm3148_vm5 = vcmp.lt.s32.totalorder %v9646_v15, 0  ;;  %v3230_v23 = vxor.u32 2147483648, %v3229_v8  ;;  %v3084_v59 = vsel %vm3078_vm3, %v3071_v13, 920167782  ;;  %v699_v6 = vfloor.f32 %v667_v63 }
 0x2e4   :  { %vm11621_vm4 = vcmp.le.f32.partialorder %v13962_v44, 0.7853982  ;;  %v1564_v3 = vsub.s32 0, %v11616_v58  ;;  %vm3075_vm6 = vcmp.lt.s32.totalorder %v13961_v55, 1  ;;  %vm3077_vm7 = vcmp.lt.s32.totalorder %v13961_v55, 3 }
 0x2e5   :  { %v3231_v48 = vsel %vm3148_vm5, %v3230_v23, %v3229_v8  ;;  %v3051_v21 = vor.u32 8388608, %v3050_v14  ;;  %v3083_v17 = vsel %vm3075_vm6, %v3062_v56, %v3065_v24  ;;  %v3085_v35 = vsel %vm3077_vm7, %v3068_v18, %v3084_v59 }
 0x2e6   :  { %v3233_v30 = vsel %vm3148_vm5, %v3232_v42, %v11478_v41  ;;  %v3234_v60 = vsel %vm11621_vm4, %v9646_v15, %v3231_v48  ;;  %v7751_v34 = vmin.u32 %v1564_v3, %v11616_v58  ;;  %v3088_v63 = vsel %vm3078_vm3, %v3074_v45, 1326507024 }
 0x2e7   :  { %8379 = vcosq.f32 %v3234_v60  ;;  %vm3076_vm8 = vcmp.lt.s32.totalorder %v13961_v55, 2  ;;  %v3080_v43 = vsel %vm3078_vm3, %v3068_v18, 2102212464  ;;  %v3087_v36 = vsel %vm3075_vm6, %v3065_v24, %v3068_v18 }
 0x2e8   :  { %8381 = vsinq.f32 %v3234_v60  ;;  %v1566_v41 = vclz %v7751_v34  ;;  %v3059_v14 = vshrl.u32 %v13745_v37, %v10992_v61  ;;  %v3086_v4 = vsel %vm3076_vm8, %v3083_v17, %v3085_v35 }
 0x2e9   :  { %v731_v8 = vsub.f32 %v11557_v50, %v699_v6  ;;  %v3235_v42 = vsel %vm11621_vm4, 0, %v3233_v30  ;;  %v3089_v45 = vsel %vm3077_vm7, %v3071_v13, %v3088_v63  ;;  %v3091_v44 = vshll.u32 %v3051_v21, 8 }
 0x2ea   :  { %v7752_v23 = vadd.s32 4294967294, %v1566_v41  ;;  %v3079_v18 = vsel %vm3075_vm6, %v3059_v14, %v3062_v56  ;;  %v3081_v59 = vsel %vm3077_vm7, %v3065_v24, %v3080_v43  ;;  %v3090_v61 = vsel %vm3076_vm8, %v3087_v36, %v3089_v45 }
 0x2eb   :  { %v11662_v3 = vmul.u32.u64.low %v3091_v44, %v3090_v61  ;;  %v11663_v48 = vmul.u32.u64.high %v3091_v44, %v3090_v61, %v11662_v3  ;;  %v11665_v50 = vmul.u32.u64.low %v3091_v44, %v3086_v4  ;;  %v11666_v7 = vmul.u32.u64.high %v3091_v44, %v3086_v4, %v11665_v50 }
 0x2ec   :  { %v11672_v13 = vsel %vm1303_vm2, %v11530_v5, 0  ;;  %v11675_v56 = vadd.s32 1, %v11535_v22  ;;  %v11678_v24 = vadd.s32 1, %v11538_v16  ;;  %vm7753_vm10 = vcmp.lt.s32.totalorder %v7752_v23, 0 }
 0x2ed   :  { %v7734_v6 = vadd.s32 4294967169, %v11542_v20  ;;  %v6558_v21 = vadd.s32 3, %v3235_v42  ;;  %v1569_v17 = vsel %vm7753_vm10, 0, %v7752_v23  ;;  %v3082_v35 = vsel %vm3076_vm8, %v3079_v18, %v3081_v59 }
 0x2ee   :  { %v7790_v30 = vadd.s32 4294967169, %v11553_v39  ;;  %v1554_v5 = vadd.s32 %v11525_v54, %v11549_v49  ;;  %v1570_v60 = vsub.s32 32, %v1569_v17  ;;  %v1574_v34 = vsub.s32 4294967266, %v1569_v17 }
 0x2ef   :  { %v11686_v22 = vmul.f32 6.2831855, %v731_v8  ;;  %v3239_v63 = vand.u32 3, %v3235_v42  ;;  %vm3100_vm9 = vc.u32 %v11663_v48, %v11665_v50  ;;  %v3101_v16 = vadd.s32 1, %v11666_v7 }
 0x2f0   :  { %v1571_v20 = vshll.u32 %v11616_v58, %v1569_v17  ;;  %v1572_v43 = vshrl.u32 %v1554_v5, %v1570_v60  ;;  %v1575_v55 = vadd.s32 127, %v1574_v34  ;;  %v3098_v36 = vmul.u32 %v3091_v44, %v3082_v35 }
 0x2f1   :  { %13965 = vst [vmem:[#allocation36_spill] sm:$0xff] %v11686_v22  ;;  %vm2745_vm11 = vcmp.gt.s32.totalorder %v11675_v56, 0  ;;  %vm994_vm12 = vcmp.gt.s32.totalorder %v11678_v24, 0  ;;  %v6559_v54 = vand.u32 3, %v6558_v21  ;;  %v3102_v49 = vsel %vm3100_vm9, %v3101_v16, %v11666_v7 }
 0x2f2   :  { %v1096_v39 = vadd.s32 1, %v7734_v6  ;;  %v1573_v41 = vor.u32 %v1572_v43, %v1571_v20  ;;  %v1576_v14 = vshll.u32 %v1575_v55, 23  ;;  %v3103_v4 = vadd.s32 %v3102_v49, %v3098_v36 }
 0x2f3   :  { %v2538_v8 = vadd.s32 1, %v7790_v30  ;;  %v2634_v42 = vand.u32 2139095040, %v11686_v22  ;;  %vm1500_vm14 = vcmp.lt.s32.totalorder %v13949_v51, 0  ;;  %v1584_v58 = vsub.s32 4, %v11594_v52  ;;  %v263_v30 = vpop.permute.xlu1 %262 }
 0x2f4   :  { %v8380_v45 = vpop.eup %8379  ;;  %vm3240_vm13 = vcmp.lt.s32.totalorder %v3239_v63, 2  ;;  %vm3241_vm15 = vcmp.eq.s32.totalorder %v3239_v63, 0  ;;  %v1577_v44 = vor.u32 4788187, %v1576_v14  ;;  %v3104_v23 = vadd.s32 536870912, %v3103_v4 }
 0x2f5   :  { %v8382_v18 = vpop.eup %8381  ;;  %v3245_v59 = vxor.u32 2147483648, %v8380_v45  ;;  %vm6560_vm0 = vcmp.lt.s32.totalorder %v6559_v54, 2  ;;  %vm6564_vm1 = vcmp.eq.s32.totalorder %v6559_v54, 2  ;;  %vm3244_vm2 = vcmp.eq.s32.totalorder %v3239_v63, 2 }
 0x2f6   :  { %v3242_v61 = vxor.u32 2147483648, %v8382_v18  ;;  %v1578_v3 = vand.u32 2147483647, %v1577_v44  ;;  %v1580_v7 = vcvt.s32.f32 %v1573_v41  ;;  %v11698_v6 = vshrl.u32 %v3104_v23, 30 }
 0x2f7   :  { %vm6561_vm3 = vcmp.eq.s32.totalorder %v6559_v54, 0  ;;  %v6566_v21 = vsel %vm6564_vm1, %v3245_v59, %v8382_v18  ;;  %v3246_v17 = vsel %vm3244_vm2, %v3245_v59, %v8382_v18  ;;  %v1585_v35 = vsel %vm1500_vm14, %v1584_v58, %v11594_v52  ;;  %v455_v59 = vpop.permute.xlu0 %454 }
 0x2f8   :  { %v6563_v5 = vsel %vm6561_vm3, %v8380_v45, %v3242_v61  ;;  %v3243_v60 = vsel %vm3241_vm15, %v8380_v45, %v3242_v61  ;;  %v1581_v34 = vmul.f32 %v1580_v7, %v1578_v3  ;;  %v3106_v16 = vshll.u32 %v11698_v6, 30  ;;  %v11748_v3 = vpop.permute.xlu1 %143 }
 0x2f9   :  { %vm3238_vm4 = vweird.f32 %v9646_v15  ;;  %v6567_v20 = vsel %vm6560_vm0, %v6563_v5, %v6566_v21  ;;  %v3247_v43 = vsel %vm3240_vm13, %v3243_v60, %v3246_v17  ;;  %v13966_v55 = vand.u32 2147483647, %v13949_v51 }
 0x2fa   :  { %v11714_v52 = vsel %vm3238_vm4, nan, %v6567_v20  ;;  %v11716_v49 = vsel %vm3238_vm4, nan, %v3247_v43  ;;  %v1582_v41 = vxor.u32 2147483648, %v1581_v34  ;;  %v11718_v14 = vsub.s32 %v3103_v4, %v3106_v16  ;;  %v13972_v43 = vld [vmem:[#allocation13_spill] sm:$0xff] }
 0x2fb   :  { %vm11710_vm5 = vcmp.le.f32.partialorder %v13966_v55, 0.7853982  ;;  %13969 = vst [vmem:[#allocation7_spill] sm:$0xff] %v11714_v52  ;;  %13970 = vst [vmem:[#allocation22_spill] sm:$0xff] %v11716_v49  ;;  %v11721_v58 = vand.u32 31, %v11672_v13  ;;  %v2746_v15 = vsel %vm2745_vm11, %v11675_v56, 0  ;;  %7994 = vmatprep.subr.mxu0 %v11714_v52  ;;  %8029 = vmatprep.subr.mxu1 %v11716_v49  ;;  %v390_v5 = vmul.f32 %v8703_v46, %v263_v30 }
 0x2fc   :  { %v995_v63 = vsel %vm994_vm12, %v11678_v24, 0  ;;  %v1587_v54 = vsel %vm11710_vm5, 0, %v1585_v35  ;;  %vm1097_vm6 = vcmp.gt.s32.totalorder %v1096_v39, 0  ;;  %v2635_v4 = vshrl.u32 %v2634_v42, 23 }
 0x2fd   :  { %v1583_v45 = vsel %vm1500_vm14, %v1582_v41, %v1581_v34  ;;  %v3109_v44 = vsub.s32 0, %v11718_v14  ;;  %v11737_v56 = vsub.s32 32, %v11317_v10  ;;  %v11740_v23 = vshrl.u32 %v11672_v13, 5 }
 0x2fe   :  { %vm2539_vm7 = vcmp.gt.s32.totalorder %v2538_v8, 0  ;;  %v1586_v24 = vsel %vm11710_vm5, %v13949_v51, %v1583_v45  ;;  %v11745_v18 = vand.u32 31, %v2746_v15  ;;  %v4894_v42 = vadd.s32 3, %v1587_v54 }
 0x2ff   :  { %8383 = vcosq.f32 %v1586_v24  ;;  %v7811_v61 = vmin.u32 %v3109_v44, %v11718_v14  ;;  %v11751_v7 = vsub.s32 32, %v11721_v58  ;;  %v11753_v21 = vand.u32 31, %v995_v63  ;;  %v13976_v44 = vld [vmem:[#allocation6_spill] sm:$0xff] }
 0x300   :  { %v1098_v13 = vsel %vm1097_vm6, %v1096_v39, 0  ;;  %8385 = vsinq.f32 %v1586_v24  ;;  %v11756_v17 = vsel %vm2539_vm7, %v2538_v8, 0  ;;  %v7794_v35 = vadd.s32 4294967169, %v2635_v4 }
 0x301   :  { %13971 = vst [vmem:[#allocation55_spill] sm:$0xff] %v11753_v21  ;;  %v3111_v60 = vclz %v7811_v61  ;;  %v11759_v34 = vshrl.u32 %v2746_v15, 5  ;;  %v11762_v16 = vmul.f32 %v8720_v53, %v455_v59  ;;  %v11764_v20 = vand.u32 3, %v1587_v54 }
 0x302   :  { %v13693_v55 = vand.u32 2147483647, %v13972_v43  ;;  %v11768_v36 = vsub.s32 32, %v11745_v18  ;;  %v11770_v39 = vshrl.u32 %v995_v63, 5  ;;  %v11772_v8 = vand.u32 3, %v4894_v42  ;;  %v323_v63 = vpop.permute.xlu1 %322 }
 0x303   :  { %v7812_v41 = vadd.s32 4294967294, %v3111_v60  ;;  %v11775_v30 = vsub.s32 32, %v11753_v21  ;;  %v11777_v15 = vshrl.u32 %v1098_v13, 5  ;;  %v11779_v4 = vand.u32 31, %v1098_v13 }
 0x304   :  { %13973 = vst [vmem:[#allocation43_spill] sm:$0xff] %v11770_v39  ;;  %v11782_v54 = vand.u32 31, %v11756_v17  ;;  %v11784_v45 = vadd.s32 1, %v7794_v35  ;;  %v11787_v24 = vadd.f32 %v390_v5, %v13976_v44  ;;  %vm3045_vm8 = vcmp.lt.s32.totalorder %v13957_v38, 0 }
 0x305   :  { %13974 = vst [vmem:[#allocation13_spill] sm:$0xff] %v11775_v30  ;;  %13975 = vst [vmem:[#allocation56_spill] sm:$0xff] %v11777_v15  ;;  %vm7813_vm10 = vcmp.lt.s32.totalorder %v7812_v41, 0  ;;  %vm1596_vm9 = vcmp.eq.s32.totalorder %v11764_v20, 2  ;;  %v3129_v42 = vsub.s32 4, %v11698_v6  ;;  %vm4897_vm11 = vcmp.eq.s32.totalorder %v11772_v8, 0 }
 0x306   :  { %v3114_v59 = vsel %vm7813_vm10, 0, %v7812_v41  ;;  %v11794_v61 = vand.u32 8388607, %v13693_v55  ;;  %vm1593_vm12 = vcmp.eq.s32.totalorder %v11764_v20, 0  ;;  %v3099_v13 = vadd.s32 %v11665_v50, %v11663_v48  ;;  %v13977_v41 = vld [vmem:[#allocation19_spill] sm:$0xff] }
 0x307   :  { %v3115_v35 = vsub.s32 32, %v3114_v59  ;;  %v3119_v5 = vsub.s32 4294967266, %v3114_v59  ;;  %vm4896_vm14 = vcmp.lt.s32.totalorder %v11772_v8, 2  ;;  %vm4900_vm13 = vcmp.eq.s32.totalorder %v11772_v8, 2 }
 0x308   :  { %vm1592_vm15 = vcmp.lt.s32.totalorder %v11764_v20, 2  ;;  %v11804_v60 = vmul.f32 %v8703_v46, %v323_v63  ;;  %v1411_v44 = vshrl.u32 %v13745_v37, %v13977_v41  ;;  %v1413_v55 = vshrl.u32 %v13778_v12, %v13977_v41 }
 0x309   :  { %vm1590_vm0 = vweird.f32 %v13949_v51  ;;  %v3116_v48 = vshll.u32 %v11718_v14, %v3114_v59  ;;  %v3117_v50 = vshrl.u32 %v3099_v13, %v3115_v35  ;;  %v3120_v52 = vadd.s32 127, %v3119_v5 }
 0x30a   :  { %v1416_v49 = vshrl.u32 %v13780_v31, %v13977_v41  ;;  %v3130_v46 = vsel %vm3045_vm8, %v3129_v42, %v11698_v6  ;;  %v1403_v63 = vor.u32 8388608, %v11794_v61  ;;  %v1412_v57 = vshll.u32 %v13745_v37, %v13978_v40 }
 0x30b   :  { %v1415_v28 = vshll.u32 %v13778_v12, %v13978_v40  ;;  %v3118_v19 = vor.u32 %v3117_v50, %v3116_v48  ;;  %v3121_v11 = vshll.u32 %v3120_v52, 23  ;;  %v1418_v14 = vshll.u32 %v13780_v31, %v13978_v40 }
 0x30c   :  { %v1419_v59 = vshrl.u32 %v13789_v33, %v13977_v41  ;;  %v8384_v13 = vpop.eup %8383  ;;  %v1414_v35 = vor.u32 %v1413_v55, %v1412_v57  ;;  %v1421_v6 = vshll.u32 %v13789_v33, %v13978_v40  ;;  %v1422_v42 = vshrl.u32 %v13798_v25, %v13977_v41 }
 0x30d   :  { %v1425_v61 = vshrl.u32 %v13801_v2, %v13977_v41  ;;  %v8386_v5 = vpop.eup %8385  ;;  %v1597_v48 = vxor.u32 2147483648, %v8384_v13  ;;  %v13979_v52 = vand.u32 2147483647, %v13957_v38  ;;  %v3122_v27 = vor.u32 4788187, %v3121_v11 }
 0x30e   :  { %v1417_v9 = vor.u32 %v1416_v49, %v1415_v28  ;;  %v1424_v57 = vshll.u32 %v13798_v25, %v13978_v40  ;;  %v1594_v55 = vxor.u32 2147483648, %v8386_v5  ;;  %v3125_v39 = vcvt.s32.f32 %v3118_v19  ;;  %v64_v28 = vpop.permute.xlu1 %63  ;;  %v13982_v40 = vld [vmem:[#allocation47_spill] sm:$0xff] }
 0x30f   :  { %vm11834_vm1 = vcmp.le.f32.partialorder %v13979_v52, 0.7853982  ;;  %v1420_v30 = vor.u32 %v1419_v59, %v1418_v14  ;;  %v1423_v21 = vor.u32 %v1422_v42, %v1421_v6  ;;  %v4902_v41 = vsel %vm4900_vm13, %v1597_v48, %v8386_v5 }
 0x310   :  { %v1598_v29 = vsel %vm1596_vm9, %v1597_v48, %v8386_v5  ;;  %v3123_v22 = vand.u32 2147483647, %v3122_v27  ;;  %v1426_v52 = vor.u32 %v1425_v61, %v1424_v57  ;;  %v4899_v15 = vsel %vm4897_vm11, %v8384_v13, %v1594_v55 }
 0x311   :  { %v1595_v11 = vsel %vm1593_vm12, %v8384_v13, %v1594_v55  ;;  %vm1427_vm2 = vcmp.lt.s32.totalorder %v13982_v40, 1  ;;  %vm1428_vm3 = vcmp.lt.s32.totalorder %v13982_v40, 2  ;;  %v4903_v19 = vsel %vm4896_vm14, %v4899_v15, %v4902_v41 }
 0x312   :  { %v1599_v49 = vsel %vm1592_vm15, %v1595_v11, %v1598_v29  ;;  %v3126_v14 = vmul.f32 %v3125_v39, %v3123_v22  ;;  %vm1430_vm4 = vcmp.lt.s32.totalorder %v13982_v40, 4  ;;  %v11857_v27 = vsel %vm1590_vm0, nan, %v4903_v19  ;;  %v459_v55 = vpop.permute.xlu1 %458  ;;  %v13985_v11 = vld [vmem:[#allocation39_spill] sm:$0xff] }
 0x313   :  { %13983 = vst [vmem:[#allocation6_spill] sm:$0xff] %v11857_v27  ;;  %v11861_v59 = vsel %vm1590_vm0, nan, %v1599_v49  ;;  %v1432_v13 = vsel %vm1430_vm4, %v1420_v30, 2102212464  ;;  %v1435_v6 = vsel %vm1427_vm2, %v1414_v35, %v1417_v9  ;;  %7995 = vmatpush3.msra.mxu0 %v11857_v27  ;;  %vm1429_vm5 = vcmp.lt.s32.totalorder %v13982_v40, 3 }
 0x314   :  { %13984 = vst [vmem:[#allocation19_spill] sm:$0xff] %v11861_v59  ;;  %8030 = vmatpush3.msra.mxu1 %v11861_v59  ;;  %v3127_v29 = vxor.u32 2147483648, %v3126_v14  ;;  %v1436_v22 = vsel %vm1430_vm4, %v1423_v21, 920167782  ;;  %v1439_v20 = vsel %vm1427_vm2, %v1417_v9, %v1420_v30  ;;  %v1431_v51 = vsel %vm1427_vm2, %v1411_v44, %v1414_v35 }
 0x315   :  { %v1437_v39 = vsel %vm1429_vm5, %v1420_v30, %v1436_v22  ;;  %v1440_v8 = vsel %vm1430_vm4, %v1426_v52, 1326507024  ;;  %v1443_v15 = vshll.u32 %v1403_v63, 8  ;;  %v1433_v61 = vsel %vm1429_vm5, %v1417_v9, %v1432_v13 }
 0x316   :  { %v3128_v42 = vsel %vm3045_vm8, %v3127_v29, %v3126_v14  ;;  %v1438_v5 = vsel %vm1428_vm3, %v1435_v6, %v1437_v39  ;;  %v1441_v48 = vsel %vm1429_vm5, %v1423_v21, %v1440_v8  ;;  %v3132_v63 = vsel %vm11834_vm1, 0, %v3130_v46 }
 0x317   :  { %v3131_v57 = vsel %vm11834_vm1, %v13957_v38, %v3128_v42  ;;  %v1442_v41 = vsel %vm1428_vm3, %v1439_v20, %v1441_v48  ;;  %v11881_v44 = vmul.u32.u64.low %v1443_v15, %v1438_v5  ;;  %v11882_v30 = vmul.u32.u64.high %v1443_v15, %v1438_v5, %v11881_v44 }
 0x318   :  { %8387 = vcosq.f32 %v3131_v57  ;;  %v11887_v9 = vmul.u32.u64.low %v1443_v15, %v1442_v41  ;;  %v11888_v35 = vmul.u32.u64.high %v1443_v15, %v1442_v41, %v11887_v9  ;;  %v11891_v21 = vmul.f32 %v8708_v47, %v64_v28 }
 0x319   :  { %8389 = vsinq.f32 %v3131_v57  ;;  %v1434_v52 = vsel %vm1428_vm3, %v1431_v51, %v1433_v61  ;;  %v13713_v19 = vand.u32 2147483647, %v13985_v11  ;;  %v11897_v49 = vmul.f32 %v8720_v53, %v459_v55 }
 0x31a   :  { %v2957_v50 = vshll.u32 %v13745_v37, %v11172_v32  ;;  %v2958_v46 = vshrl.u32 %v13778_v12, %v11293_v0  ;;  %v2961_v14 = vshrl.u32 %v13780_v31, %v11293_v0  ;;  %v6454_v13 = vadd.s32 3, %v3132_v63 }
 0x31b   :  { %v1453_v28 = vadd.s32 1, %v11882_v30  ;;  %v2947_v40 = vand.u32 8388607, %v13713_v19  ;;  %v2960_v6 = vshll.u32 %v13778_v12, %v11172_v32  ;;  %v1450_v29 = vmul.u32 %v1443_v15, %v1434_v52 }
 0x31c   :  { %vm1452_vm6 = vc.u32 %v11888_v35, %v11881_v44  ;;  %v2959_v22 = vor.u32 %v2958_v46, %v2957_v50  ;;  %v2963_v20 = vshll.u32 %v13780_v31, %v11172_v32  ;;  %v2964_v8 = vshrl.u32 %v13789_v33, %v11293_v0  ;;  %v13986_v46 = vld [vmem:[#allocation46_spill] sm:$0xff] }
 0x31d   :  { %v1454_v51 = vsel %vm1452_vm6, %v1453_v28, %v11882_v30  ;;  %v2962_v39 = vor.u32 %v2961_v14, %v2960_v6  ;;  %v2966_v42 = vshll.u32 %v13789_v33, %v11172_v32  ;;  %v2967_v15 = vshrl.u32 %v13798_v25, %v11293_v0 }
 0x31e   :  { %v1455_v61 = vadd.s32 %v1454_v51, %v1450_v29  ;;  %v2969_v5 = vshll.u32 %v13798_v25, %v11172_v32  ;;  %v2970_v48 = vshrl.u32 %v13801_v2, %v11293_v0  ;;  %v6455_v57 = vand.u32 3, %v6454_v13 }
 0x31f   :  { %v3136_v55 = vand.u32 3, %v3132_v63  ;;  %v2948_v41 = vor.u32 8388608, %v2947_v40  ;;  %v2965_v30 = vor.u32 %v2964_v8, %v2963_v20  ;;  %v2968_v52 = vor.u32 %v2967_v15, %v2966_v42 }
 0x320   :  { %v1456_v9 = vadd.s32 536870912, %v1455_v61  ;;  %v2971_v50 = vor.u32 %v2970_v48, %v2969_v5  ;;  %vm2972_vm7 = vcmp.lt.s32.totalorder %v13986_v46, 1  ;;  %v2956_v14 = vshrl.u32 %v13745_v37, %v11293_v0 }
 0x321   :  { %vm2975_vm8 = vcmp.lt.s32.totalorder %v13986_v46, 4  ;;  %v2980_v32 = vsel %vm2972_vm7, %v2959_v22, %v2962_v39  ;;  %v2984_v28 = vsel %vm2972_vm7, %v2962_v39, %v2965_v30  ;;  %vm3135_vm10 = vweird.f32 %v13957_v38 }
 0x322   :  { %v11934_v63 = vshrl.u32 %v1456_v9, 30  ;;  %vm2974_vm9 = vcmp.lt.s32.totalorder %v13986_v46, 3  ;;  %v2981_v13 = vsel %vm2975_vm8, %v2968_v52, 920167782  ;;  %v2985_v40 = vsel %vm2975_vm8, %v2971_v50, 1326507024 }
 0x323   :  { %vm2642_vm11 = vcmp.gt.s32.totalorder %v11784_v45, 0  ;;  %vm2973_vm12 = vcmp.lt.s32.totalorder %v13986_v46, 2  ;;  %v2982_v0 = vsel %vm2974_vm9, %v2965_v30, %v2981_v13  ;;  %v2986_v6 = vsel %vm2974_vm9, %v2968_v52, %v2985_v40 }
 0x324   :  { %v2988_v29 = vshll.u32 %v2948_v41, 8  ;;  %v1458_v20 = vshll.u32 %v11934_v63, 30  ;;  %v2977_v51 = vsel %vm2975_vm8, %v2965_v30, 2102212464  ;;  %v2983_v8 = vsel %vm2973_vm12, %v2980_v32, %v2982_v0 }
 0x325   :  { %v2987_v42 = vsel %vm2973_vm12, %v2984_v28, %v2986_v6  ;;  %v8388_v15 = vpop.eup %8387  ;;  %vm3138_vm14 = vcmp.eq.s32.totalorder %v3136_v55, 0  ;;  %vm3141_vm13 = vcmp.eq.s32.totalorder %v3136_v55, 2  ;;  %vm6457_vm15 = vcmp.eq.s32.totalorder %v6455_v57, 0 }
 0x326   :  { %v11948_v5 = vmul.u32.u64.low %v2988_v29, %v2987_v42  ;;  %v11949_v48 = vmul.u32.u64.high %v2988_v29, %v2987_v42, %v11948_v5  ;;  %v11951_v9 = vmul.u32.u64.low %v2988_v29, %v2983_v8  ;;  %v11952_v50 = vmul.u32.u64.high %v2988_v29, %v2983_v8, %v11951_v9  ;;  %v8390_v13 = vpop.eup %8389 }
 0x327   :  { %v3142_v52 = vxor.u32 2147483648, %v8388_v15  ;;  %v11955_v41 = vsub.s32 %v1455_v61, %v1458_v20  ;;  %v3139_v30 = vxor.u32 2147483648, %v8390_v13  ;;  %vm6460_vm0 = vcmp.eq.s32.totalorder %v6455_v57, 2  ;;  %v13987_v20 = vld [vmem:[#allocation24_spill] sm:$0xff] }
 0x328   :  { %v2976_v32 = vsel %vm2972_vm7, %v2956_v14, %v2959_v22  ;;  %v2978_v6 = vsel %vm2974_vm9, %v2962_v39, %v2977_v51  ;;  %vm6456_vm1 = vcmp.lt.s32.totalorder %v6455_v57, 2  ;;  %vm3137_vm2 = vcmp.lt.s32.totalorder %v3136_v55, 2  ;;  %v519_v51 = vpop.permute.xlu1 %518 }
 0x329   :  { %v6462_v28 = vsel %vm6460_vm0, %v3142_v52, %v8390_v13  ;;  %v3143_v40 = vsel %vm3141_vm13, %v3142_v52, %v8390_v13  ;;  %v1461_v0 = vsub.s32 0, %v11955_v41  ;;  %v6459_v8 = vsel %vm6457_vm15, %v8388_v15, %v3139_v30 }
 0x32a   :  { %v3140_v42 = vsel %vm3138_vm14, %v8388_v15, %v3139_v30  ;;  %v6463_v5 = vsel %vm6456_vm1, %v6459_v8, %v6462_v28  ;;  %v421_v19 = vadd.f32 %v13987_v20, %v11891_v21  ;;  %v11975_v39 = vadd.f32 %v11897_v49, %v11787_v24 }
 0x32b   :  { %v3144_v61 = vsel %vm3137_vm2, %v3140_v42, %v3143_v40  ;;  %v7747_v27 = vmin.u32 %v1461_v0, %v11955_v41  ;;  %v11967_v22 = vsel %vm3135_vm10, nan, %v6463_v5  ;;  %v2979_v57 = vsel %vm2973_vm12, %v2976_v32, %v2978_v6 }
 0x32c   :  { %13988 = vst [vmem:[#allocation50_spill] sm:$0xff] %v11967_v22  ;;  %v11971_v14 = vsel %vm3135_vm10, nan, %v3144_v61  ;;  %v11980_v55 = vsub.s32 32, %v11779_v4  ;;  %v11983_v21 = vshrl.u32 %v11756_v17, 5  ;;  %7996 = vmatprep.subr.mxu0 %v11967_v22  ;;  %v241_v38 = vmul.f32 %v8708_v47, %v11748_v3  ;;  %v14000_v22 = vld [vmem:[#allocation14_spill] sm:$0xff] }
 0x32d   :  { %13989 = vst [vmem:[#allocation47_spill] sm:$0xff] %v11971_v14  ;;  %8031 = vmatprep.subr.mxu1 %v11971_v14  ;;  %v1463_v15 = vclz %v7747_v27  ;;  %v11990_v24 = vsub.s32 32, %v11782_v54  ;;  %v1481_v49 = vsub.s32 4, %v11934_v63  ;;  %vm2997_vm3 = vc.u32 %v11949_v48, %v11951_v9 }
 0x32e   :  { %v2998_v17 = vadd.s32 1, %v11952_v50  ;;  %v11999_v46 = vsel %vm2642_vm11, %v11784_v45, 0  ;;  %v437_v13 = vadd.f32 %v11804_v60, %v241_v38  ;;  %v2995_v3 = vmul.u32 %v2988_v29, %v2979_v57 }
 0x32f   :  { %v7748_v47 = vadd.s32 4294967294, %v1463_v15  ;;  %v12003_v27 = vadd.f32 %v11762_v16, %v421_v19  ;;  %v12006_v52 = vadd.f32 0.5, %v11975_v39  ;;  %v601_v30 = vmul.f32 %v8720_v53, %v519_v51  ;;  %v13993_v19 = vld [vmem:[#allocation44_spill] sm:$0xff] }
 0x330   :  { %v2999_v32 = vsel %vm2997_vm3, %v2998_v17, %v11952_v50  ;;  %v13990_v28 = vand.u32 2147483647, %v13972_v43  ;;  %vm1397_vm5 = vcmp.lt.s32.totalorder %v13972_v43, 0  ;;  %v1451_v45 = vadd.s32 %v11881_v44, %v11888_v35 }
 0x331   :  { %vm7749_vm6 = vcmp.lt.s32.totalorder %v7748_v47, 0  ;;  %v3000_v16 = vadd.s32 %v2999_v32, %v2995_v3  ;;  %v1482_v53 = vsel %vm1397_vm5, %v1481_v49, %v11934_v63  ;;  %v13716_v29 = vand.u32 2147483647, %v13993_v19 }
 0x332   :  { %vm12012_vm4 = vcmp.le.f32.partialorder %v13990_v28, 0.7853982  ;;  %v1466_v60 = vsel %vm7749_vm6, 0, %v7748_v47  ;;  %v1309_v50 = vshll.u32 %v13745_v37, %v11721_v58  ;;  %v1310_v42 = vshrl.u32 %v13778_v12, %v11751_v7 }
 0x333   :  { %v1467_v0 = vsub.s32 32, %v1466_v60  ;;  %v1471_v6 = vsub.s32 4294967266, %v1466_v60  ;;  %v3001_v8 = vadd.s32 536870912, %v3000_v16  ;;  %v1313_v44 = vshrl.u32 %v13780_v31, %v11751_v7 }
 0x334   :  { %v1316_v35 = vshrl.u32 %v13789_v33, %v11751_v7  ;;  %v1318_v63 = vshll.u32 %v13789_v33, %v11721_v58  ;;  %v1319_v5 = vshrl.u32 %v13798_v25, %v11751_v7  ;;  %v1468_v61 = vshll.u32 %v11955_v41, %v1466_v60 }
 0x335   :  { %v1469_v20 = vshrl.u32 %v1451_v45, %v1467_v0  ;;  %v1472_v57 = vadd.s32 127, %v1471_v6  ;;  %v12036_v38 = vshrl.u32 %v3001_v8, 30  ;;  %v1312_v51 = vshll.u32 %v13778_v12, %v11721_v58 }
 0x336   :  { %v1315_v15 = vshll.u32 %v13780_v31, %v11721_v58  ;;  %v1320_v49 = vor.u32 %v1319_v5, %v1318_v63  ;;  %v1322_v17 = vshrl.u32 %v13801_v2, %v11751_v7  ;;  %v1321_v41 = vshll.u32 %v13798_v25, %v11721_v58 }
 0x337   :  { %v1470_v47 = vor.u32 %v1469_v20, %v1468_v61  ;;  %v1473_v3 = vshll.u32 %v1472_v57, 23  ;;  %v3003_v32 = vshll.u32 %v12036_v38, 30  ;;  %v1299_v28 = vand.u32 8388607, %v13716_v29 }
 0x338   :  { %v1311_v45 = vor.u32 %v1310_v42, %v1309_v50  ;;  %v1314_v60 = vor.u32 %v1313_v44, %v1312_v51  ;;  %v1317_v0 = vor.u32 %v1316_v35, %v1315_v15  ;;  %v1323_v63 = vor.u32 %v1322_v17, %v1321_v41 }
 0x339   :  { %v1474_v6 = vor.u32 4788187, %v1473_v3  ;;  %v12049_v8 = vsub.s32 %v3000_v16, %v3003_v32  ;;  %vm1327_vm7 = vcmp.lt.s32.totalorder %v11740_v23, 4  ;;  %v12053_v5 = vadd.f32 0.5, %v12003_v27 }
 0x33a   :  { %v12055_v61 = vadd.f32 %v601_v30, %v437_v13  ;;  %v1484_v58 = vsel %vm12012_vm4, 0, %v1482_v53  ;;  %v1333_v20 = vsel %vm1327_vm7, %v1320_v49, 920167782  ;;  %v1477_v42 = vcvt.s32.f32 %v1470_v47 }
 0x33b   :  { %v1475_v50 = vand.u32 2147483647, %v1474_v6  ;;  %v3006_v44 = vsub.s32 0, %v12049_v8  ;;  %vm1324_vm8 = vcmp.lt.s32.totalorder %v11740_v23, 1  ;;  %v682_v16 = vfloor.f32 %v12006_v52 }
 0x33c   :  { %v1300_v35 = vor.u32 8388608, %v1299_v28  ;;  %vm1326_vm10 = vcmp.lt.s32.totalorder %v11740_v23, 3  ;;  %v1332_v13 = vsel %vm1324_vm8, %v1311_v45, %v1314_v60  ;;  %v1337_v51 = vsel %vm1327_vm7, %v1323_v63, 1326507024 }
 0x33d   :  { %v1478_v30 = vmul.f32 %v1477_v42, %v1475_v50  ;;  %v7807_v53 = vmin.u32 %v3006_v44, %v12049_v8  ;;  %v1334_v57 = vsel %vm1326_vm10, %v1317_v0, %v1333_v20  ;;  %v12073_v15 = vadd.f32 0.5, %v12055_v61 }
 0x33e   :  { %v4790_v17 = vadd.s32 3, %v1484_v58  ;;  %v1308_v52 = vshrl.u32 %v13745_v37, %v11751_v7  ;;  %v1336_v47 = vsel %vm1324_vm8, %v1314_v60, %v1317_v0  ;;  %vm1325_vm9 = vcmp.lt.s32.totalorder %v11740_v23, 2 }
 0x33f   :  { %v1479_v3 = vxor.u32 2147483648, %v1478_v30  ;;  %v3008_v32 = vclz %v7807_v53  ;;  %v1329_v41 = vsel %vm1327_vm7, %v1317_v0, 2102212464  ;;  %v3026_v28 = vsub.s32 4, %v12036_v38 }
 0x340   :  { %v1335_v6 = vsel %vm1325_vm9, %v1332_v13, %v1334_v57  ;;  %v1338_v63 = vsel %vm1326_vm10, %v1320_v49, %v1337_v51  ;;  %v1340_v20 = vshll.u32 %v1300_v35, 8  ;;  %v1328_v42 = vsel %vm1324_vm8, %v1308_v52, %v1311_v45 }
 0x341   :  { %v1480_v7 = vsel %vm1397_vm5, %v1479_v3, %v1478_v30  ;;  %v7808_v50 = vadd.s32 4294967294, %v3008_v32  ;;  %v1339_v44 = vsel %vm1325_vm9, %v1336_v47, %v1338_v63  ;;  %v1330_v13 = vsel %vm1326_vm10, %v1314_v60, %v1329_v41 }
 0x342   :  { %v1483_v0 = vsel %vm12012_vm4, %v13972_v43, %v1480_v7  ;;  %v12098_v53 = vmul.u32.u64.low %v1340_v20, %v1339_v44  ;;  %v12099_v49 = vmul.u32.u64.high %v1340_v20, %v1339_v44, %v12098_v53  ;;  %v12105_v45 = vand.u32 3, %v1484_v58  ;;  %v13994_v58 = vld [vmem:[#allocation54_spill] sm:$0xff]  ;;  %v13998_v44 = vld [vmem:[#allocation29_spill] sm:$0xff] }
 0x343   :  { %8391 = vcosq.f32 %v1483_v0  ;;  %vm7809_vm11 = vcmp.lt.s32.totalorder %v7808_v50, 0  ;;  %v12101_v35 = vmul.u32.u64.low %v1340_v20, %v1335_v6  ;;  %v12102_v30 = vmul.u32.u64.high %v1340_v20, %v1335_v6, %v12101_v35 }
 0x344   :  { %8393 = vsinq.f32 %v1483_v0  ;;  %vm2942_vm12 = vcmp.lt.s32.totalorder %v13985_v11, 0  ;;  %v3011_v57 = vsel %vm7809_vm11, 0, %v7808_v50  ;;  %v2996_v40 = vadd.s32 %v11951_v9, %v11949_v48 }
 0x345   :  { %v3012_v51 = vsub.s32 32, %v3011_v57  ;;  %v3016_v60 = vsub.s32 4294967266, %v3011_v57  ;;  %v1331_v52 = vsel %vm1325_vm9, %v1328_v42, %v1330_v13  ;;  %v12112_v47 = vand.u32 3, %v4790_v17 }
 0x346   :  { %v3027_v3 = vsel %vm2942_vm12, %v3026_v28, %v12036_v38  ;;  %vm1349_vm14 = vc.u32 %v12099_v49, %v12101_v35  ;;  %v13715_v32 = vand.u32 2147483647, %v13994_v58  ;;  %v3013_v41 = vshll.u32 %v12049_v8, %v3011_v57 }
 0x347   :  { %v3014_v6 = vshrl.u32 %v2996_v40, %v3012_v51  ;;  %v3017_v48 = vadd.s32 127, %v3016_v60  ;;  %v1350_v9 = vadd.s32 1, %v12102_v30  ;;  %v12124_v17 = vsub.f32 %v11975_v39, %v682_v16  ;;  %v13999_v51 = vld [vmem:[#allocation49_spill] sm:$0xff] }
 0x348   :  { %v13995_v63 = vand.u32 2147483647, %v13985_v11  ;;  %v1347_v28 = vmul.u32 %v1340_v20, %v1331_v52  ;;  %vm4796_vm15 = vcmp.eq.s32.totalorder %v12112_v47, 2  ;;  %vm1493_vm0 = vcmp.eq.s32.totalorder %v12105_v45, 2 }
 0x349   :  { %v3015_v7 = vor.u32 %v3014_v6, %v3013_v41  ;;  %v3018_v50 = vshll.u32 %v3017_v48, 23  ;;  %v1351_v42 = vsel %vm1349_vm14, %v1350_v9, %v12102_v30  ;;  %v12141_v16 = vand.u32 8388607, %v13715_v32 }
 0x34a   :  { %vm12128_vm13 = vcmp.le.f32.partialorder %v13995_v63, 0.7853982  ;;  %v1352_v39 = vadd.s32 %v1351_v42, %v1347_v28  ;;  %vm4793_vm1 = vcmp.eq.s32.totalorder %v12112_v47, 0  ;;  %vm1490_vm2 = vcmp.eq.s32.totalorder %v12105_v45, 0 }
 0x34b   :  { %v12134_v8 = vsel %vm12128_vm13, 0, %v3027_v3  ;;  %v3019_v20 = vor.u32 4788187, %v3018_v50  ;;  %v2855_v0 = vshrl.u32 %v13778_v12, %v13998_v44  ;;  %v2858_v13 = vshrl.u32 %v13780_v31, %v13998_v44 }
 0x34c   :  { %v2864_v53 = vshrl.u32 %v13798_v25, %v13998_v44  ;;  %vm4792_vm3 = vcmp.lt.s32.totalorder %v12112_v47, 2  ;;  %vm1489_vm4 = vcmp.lt.s32.totalorder %v12105_v45, 2  ;;  %v6350_v30 = vadd.s32 3, %v12134_v8 }
 0x34d   :  { %v1353_v57 = vadd.s32 536870912, %v1352_v39  ;;  %v2861_v40 = vshrl.u32 %v13789_v33, %v13998_v44  ;;  %v2863_v60 = vshll.u32 %v13789_v33, %v13999_v51  ;;  %vm1487_vm5 = vweird.f32 %v13972_v43 }
 0x34e   :  { %v3020_v52 = vand.u32 2147483647, %v3019_v20  ;;  %v3022_v3 = vcvt.s32.f32 %v3015_v7  ;;  %v2854_v41 = vshll.u32 %v13745_v37, %v13999_v51  ;;  %v2857_v6 = vshll.u32 %v13778_v12, %v13999_v51 }
 0x34f   :  { %v12163_v48 = vshrl.u32 %v1353_v57, 30  ;;  %v2860_v9 = vshll.u32 %v13780_v31, %v13999_v51  ;;  %v2865_v63 = vor.u32 %v2864_v53, %v2863_v60  ;;  %v2867_v28 = vshrl.u32 %v13801_v2, %v13998_v44 }
 0x350   :  { %v3023_v50 = vmul.f32 %v3022_v3, %v3020_v52  ;;  %v2845_v42 = vor.u32 8388608, %v12141_v16  ;;  %v2856_v20 = vor.u32 %v2855_v0, %v2854_v41  ;;  %v2859_v7 = vor.u32 %v2858_v13, %v2857_v6  ;;  %v8392_v32 = vpop.eup %8391 }
 0x351   :  { %v1355_v29 = vshll.u32 %v12163_v48, 30  ;;  %v2862_v23 = vor.u32 %v2861_v40, %v2860_v9  ;;  %v2866_v57 = vshll.u32 %v13798_v25, %v13999_v51  ;;  %vm2869_vm6 = vcmp.lt.s32.totalorder %v14000_v22, 1  ;;  %v8394_v14 = vpop.eup %8393 }
 0x352   :  { %v1494_v59 = vxor.u32 2147483648, %v8392_v32  ;;  %v3024_v53 = vxor.u32 2147483648, %v3023_v50  ;;  %vm2871_vm7 = vcmp.lt.s32.totalorder %v14000_v22, 3  ;;  %vm2872_vm8 = vcmp.lt.s32.totalorder %v14000_v22, 4 }
 0x353   :  { %v1491_v60 = vxor.u32 2147483648, %v8394_v14  ;;  %v12176_v16 = vsub.s32 %v1352_v39, %v1355_v29  ;;  %v2868_v0 = vor.u32 %v2867_v28, %v2866_v57  ;;  %v2878_v13 = vsel %vm2872_vm8, %v2865_v63, 920167782 }
 0x354   :  { %v4798_v40 = vsel %vm4796_vm15, %v1494_v59, %v8394_v14  ;;  %v1495_v51 = vsel %vm1493_vm0, %v1494_v59, %v8394_v14  ;;  %v3025_v52 = vsel %vm2942_vm12, %v3024_v53, %v3023_v50  ;;  %v2877_v3 = vsel %vm2869_vm6, %v2856_v20, %v2859_v7 }
 0x355   :  { %v4795_v29 = vsel %vm4793_vm1, %v8392_v32, %v1491_v60  ;;  %v1492_v39 = vsel %vm1490_vm2, %v8392_v32, %v1491_v60  ;;  %v3028_v41 = vsel %vm12128_vm13, %v13985_v11, %v3025_v52  ;;  %v1358_v6 = vsub.s32 0, %v12176_v16 }
 0x356   :  { %v4799_v59 = vsel %vm4792_vm3, %v4795_v29, %v4798_v40  ;;  %v1496_v14 = vsel %vm1489_vm4, %v1492_v39, %v1495_v51  ;;  %8395 = vcosq.f32 %v3028_v41  ;;  %v2879_v9 = vsel %vm2871_vm7, %v2862_v23, %v2878_v13 }
 0x357   :  { %v12204_v28 = vsel %vm1487_vm5, nan, %v4799_v59  ;;  %v12208_v32 = vsel %vm1487_vm5, nan, %v1496_v14  ;;  %8397 = vsinq.f32 %v3028_v41  ;;  %v7743_v38 = vmin.u32 %v1358_v6, %v12176_v16 }
 0x358   :  { %7997 = vmatpush3.msra.mxu0 %v12204_v28  ;;  %8032 = vmatpush3.msra.mxu1 %v12208_v32  ;;  %vm2870_vm10 = vcmp.lt.s32.totalorder %v14000_v22, 2  ;;  %v2874_v45 = vsel %vm2872_vm8, %v2862_v23, 2102212464  ;;  %v2881_v47 = vsel %vm2869_vm6, %v2859_v7, %v2862_v23  ;;  %v2882_v43 = vsel %vm2872_vm8, %v2868_v0, 1326507024 }
 0x359   :  { %v1360_v50 = vclz %v7743_v38  ;;  %v2853_v57 = vshrl.u32 %v13745_v37, %v13998_v44  ;;  %v2880_v53 = vsel %vm2870_vm10, %v2877_v3, %v2879_v9  ;;  %v2883_v60 = vsel %vm2871_vm7, %v2865_v63, %v2882_v43 }
 0x35a   :  { %v12227_v13 = vshrl.u32 %v11999_v46, 5  ;;  %v6351_v40 = vand.u32 3, %v6350_v30  ;;  %v3033_v51 = vand.u32 3, %v12134_v8  ;;  %v2885_v23 = vshll.u32 %v2845_v42, 8 }
 0x35b   :  { %v7744_v52 = vadd.s32 4294967294, %v1360_v50  ;;  %v2873_v0 = vsel %vm2869_vm6, %v2853_v57, %v2856_v20  ;;  %v2875_v44 = vsel %vm2871_vm7, %v2859_v7, %v2874_v45  ;;  %v2884_v3 = vsel %vm2870_vm10, %v2881_v47, %v2883_v60  ;;  %v14005_v60 = vld [vmem:[#allocation26_spill] sm:$0xff] }
 0x35c   :  { %v12236_v29 = vmul.u32.u64.low %v2885_v23, %v2884_v3  ;;  %v12237_v39 = vmul.u32.u64.high %v2885_v23, %v2884_v3, %v12236_v29  ;;  %v12239_v63 = vmul.u32.u64.low %v2885_v23, %v2880_v53  ;;  %v12240_v41 = vmul.u32.u64.high %v2885_v23, %v2880_v53, %v12239_v63 }
 0x35d   :  { %v14001_v8 = vfloor.f32 %v12053_v5  ;;  %v12249_v42 = vmul.f32 6.2831855, %v12124_v17  ;;  %v697_v20 = vfloor.f32 %v12073_v15  ;;  %vm7745_vm9 = vcmp.lt.s32.totalorder %v7744_v52, 0 }
 0x35e   :  { %vm1294_vm11 = vcmp.lt.s32.totalorder %v13993_v19, 0  ;;  %v1363_v7 = vsel %vm7745_vm9, 0, %v7744_v52  ;;  %v1378_v6 = vsub.s32 4, %v12163_v48  ;;  %v2876_v59 = vsel %vm2870_vm10, %v2873_v0, %v2875_v44 }
 0x35f   :  { %v12246_v30 = vsub.f32 %v12003_v27, %v14001_v8  ;;  %vm3034_vm12 = vcmp.lt.s32.totalorder %v3033_v51, 2  ;;  %vm3035_vm14 = vcmp.eq.s32.totalorder %v3033_v51, 0  ;;  %v1348_v27 = vadd.s32 %v12101_v35, %v12099_v49 }
 0x360   :  { %v1364_v5 = vsub.s32 32, %v1363_v7  ;;  %v1368_v14 = vsub.s32 4294967266, %v1363_v7  ;;  %vm3032_vm13 = vweird.f32 %v13985_v11  ;;  %vm6352_vm15 = vcmp.lt.s32.totalorder %v6351_v40, 2 }
 0x361   :  { %vm3038_vm0 = vcmp.eq.s32.totalorder %v3033_v51, 2  ;;  %vm2894_vm1 = vc.u32 %v12237_v39, %v12239_v63  ;;  %v2895_v17 = vadd.s32 1, %v12240_v41  ;;  %v1365_v9 = vshll.u32 %v12176_v16, %v1363_v7 }
 0x362   :  { %v1366_v22 = vshrl.u32 %v1348_v27, %v1364_v5  ;;  %v1369_v38 = vadd.s32 127, %v1368_v14  ;;  %v2892_v45 = vmul.u32 %v2885_v23, %v2876_v59  ;;  %vm6353_vm2 = vcmp.eq.s32.totalorder %v6351_v40, 0 }
 0x363   :  { %vm6356_vm3 = vcmp.eq.s32.totalorder %v6351_v40, 2  ;;  %v14002_v49 = vand.u32 2147483647, %v13993_v19  ;;  %v1379_v47 = vsel %vm1294_vm11, %v1378_v6, %v12163_v48  ;;  %v2896_v43 = vsel %vm2894_vm1, %v2895_v17, %v12240_v41  ;;  %v8396_v50 = vpop.eup %8395 }
 0x364   :  { %v1367_v57 = vor.u32 %v1366_v22, %v1365_v9  ;;  %v1370_v16 = vshll.u32 %v1369_v38, 23  ;;  %v2897_v53 = vadd.s32 %v2896_v43, %v2892_v45  ;;  %v1189_v23 = vand.u32 2147483647, %v14005_v60  ;;  %v8398_v52 = vpop.eup %8397 }
 0x365   :  { %vm12265_vm4 = vcmp.le.f32.partialorder %v14002_v49, 0.7853982  ;;  %v3039_v0 = vxor.u32 2147483648, %v8396_v50  ;;  %v1207_v44 = vshrl.u32 %v13778_v12, %v11737_v56  ;;  %v1210_v3 = vshrl.u32 %v13780_v31, %v11737_v56 }
 0x366   :  { %v1216_v29 = vshrl.u32 %v13798_v25, %v11737_v56  ;;  %v3036_v48 = vxor.u32 2147483648, %v8398_v52  ;;  %v1371_v8 = vor.u32 4788187, %v1370_v16  ;;  %v2898_v41 = vadd.s32 536870912, %v2897_v53 }
 0x367   :  { %v1213_v7 = vshrl.u32 %v13789_v33, %v11737_v56  ;;  %v6358_v6 = vsel %vm6356_vm3, %v3039_v0, %v8398_v52  ;;  %v3040_v59 = vsel %vm3038_vm0, %v3039_v0, %v8398_v52  ;;  %v1374_v27 = vcvt.s32.f32 %v1367_v57 }
 0x368   :  { %v1215_v5 = vshll.u32 %v13789_v33, %v11317_v10  ;;  %v6355_v14 = vsel %vm6353_vm2, %v8396_v50, %v3036_v48  ;;  %v3037_v17 = vsel %vm3035_vm14, %v8396_v50, %v3036_v48  ;;  %v1372_v9 = vand.u32 2147483647, %v1371_v8 }
 0x369   :  { %v12288_v22 = vshrl.u32 %v2898_v41, 30  ;;  %v6359_v38 = vsel %vm6352_vm15, %v6355_v14, %v6358_v6  ;;  %v3041_v45 = vsel %vm3034_vm12, %v3037_v17, %v3040_v59  ;;  %v1219_v43 = vshrl.u32 %v13801_v2, %v11737_v56 }
 0x36a   :  { %v1217_v49 = vor.u32 %v1216_v29, %v1215_v5  ;;  %v12296_v57 = vsel %vm3032_vm13, nan, %v6359_v38  ;;  %v12300_v16 = vsel %vm3032_vm13, nan, %v3041_v45  ;;  %v1375_v50 = vmul.f32 %v1374_v27, %v1372_v9 }
 0x36b   :  { %v2900_v52 = vshll.u32 %v12288_v22, 30  ;;  %7998 = vmatprep.subr.mxu0 %v12296_v57  ;;  %8033 = vmatprep.subr.mxu1 %v12300_v16  ;;  %v1196_v40 = vand.u32 8388607, %v1189_v23  ;;  %v1206_v51 = vshll.u32 %v13745_v37, %v11317_v10  ;;  %v1209_v0 = vshll.u32 %v13778_v12, %v11317_v10 }
 0x36c   :  { %v1212_v11 = vshll.u32 %v13780_v31, %v11317_v10  ;;  %v1376_v29 = vxor.u32 2147483648, %v1375_v50  ;;  %v1381_v48 = vsel %vm12265_vm4, 0, %v1379_v47  ;;  %v1218_v41 = vshll.u32 %v13798_v25, %v11317_v10 }
 0x36d   :  { %v12315_v8 = vsub.s32 %v2897_v53, %v2900_v52  ;;  %v1208_v6 = vor.u32 %v1207_v44, %v1206_v51  ;;  %v1211_v59 = vor.u32 %v1210_v3, %v1209_v0  ;;  %vm1224_vm5 = vcmp.lt.s32.totalorder %v11311_v1, 4 }
 0x36e   :  { %v1214_v27 = vor.u32 %v1213_v7, %v1212_v11  ;;  %v1377_v5 = vsel %vm1294_vm11, %v1376_v29, %v1375_v50  ;;  %v1220_v17 = vor.u32 %v1219_v43, %v1218_v41  ;;  %v1230_v9 = vsel %vm1224_vm5, %v1217_v49, 920167782 }
 0x36f   :  { %v2903_v14 = vsub.s32 0, %v12315_v8  ;;  %v12328_v47 = vsub.f32 %v12055_v61, %v697_v20  ;;  %v1380_v10 = vsel %vm12265_vm4, %v13993_v19, %v1377_v5  ;;  %v4686_v53 = vadd.s32 3, %v1381_v48 }
 0x370   :  { %v1197_v44 = vor.u32 8388608, %v1196_v40  ;;  %8399 = vcosq.f32 %v1380_v10  ;;  %vm1221_vm6 = vcmp.lt.s32.totalorder %v11311_v1, 1  ;;  %vm1223_vm7 = vcmp.lt.s32.totalorder %v11311_v1, 3 }
 0x371   :  { %v7803_v3 = vmin.u32 %v2903_v14, %v12315_v8  ;;  %8401 = vsinq.f32 %v1380_v10  ;;  %v1229_v15 = vsel %vm1221_vm6, %v1208_v6, %v1211_v59  ;;  %v1231_v61 = vsel %vm1223_vm7, %v1214_v27, %v1230_v9 }
 0x372   :  { %v1233_v20 = vsel %vm1221_vm6, %v1211_v59, %v1214_v27  ;;  %v12343_v35 = vmul.f32 6.2831855, %v12246_v30  ;;  %v1226_v38 = vsel %vm1224_vm5, %v1214_v27, 2102212464  ;;  %v1234_v45 = vsel %vm1224_vm5, %v1220_v17, 1326507024 }
 0x373   :  { %v2905_v7 = vclz %v7803_v3  ;;  %v12349_v43 = vand.u32 3, %v4686_v53  ;;  %v1205_v50 = vshrl.u32 %v13745_v37, %v11737_v56  ;;  %vm1222_vm8 = vcmp.lt.s32.totalorder %v11311_v1, 2 }
 0x374   :  { %v1235_v52 = vsel %vm1223_vm7, %v1217_v49, %v1234_v45  ;;  %v1232_v30 = vsel %vm1222_vm8, %v1229_v15, %v1231_v61  ;;  %v1237_v0 = vshll.u32 %v1197_v44, 8  ;;  %v12360_v11 = vand.u32 3, %v1381_v48 }
 0x375   :  { %v7804_v40 = vadd.s32 4294967294, %v2905_v7  ;;  %v1236_v51 = vsel %vm1222_vm8, %v1233_v20, %v1235_v52  ;;  %vm2839_vm10 = vcmp.lt.s32.totalorder %v13994_v58, 0  ;;  %v1225_v56 = vsel %vm1221_vm6, %v1205_v50, %v1208_v6 }
 0x376   :  { %v1227_v29 = vsel %vm1223_vm7, %v1211_v59, %v1226_v38  ;;  %v2893_v49 = vadd.s32 %v12239_v63, %v12237_v39  ;;  %v12369_v41 = vmul.u32.u64.low %v1237_v0, %v1236_v51  ;;  %v12370_v27 = vmul.u32.u64.high %v1237_v0, %v1236_v51, %v12369_v41 }
 0x377   :  { %vm7805_vm9 = vcmp.lt.s32.totalorder %v7804_v40, 0  ;;  %vm4692_vm11 = vcmp.eq.s32.totalorder %v12349_v43, 2  ;;  %v2923_v48 = vsub.s32 4, %v12288_v22  ;;  %vm4689_vm12 = vcmp.eq.s32.totalorder %v12349_v43, 0 }
 0x378   :  { %v2908_v5 = vsel %vm7805_vm9, 0, %v7804_v40  ;;  %v12374_v14 = vmul.u32.u64.low %v1237_v0, %v1232_v30  ;;  %v12375_v17 = vmul.u32.u64.high %v1237_v0, %v1232_v30, %v12374_v14  ;;  %v1228_v39 = vsel %vm1222_vm8, %v1225_v56, %v1227_v29 }
 0x379   :  { %v2909_v6 = vsub.s32 32, %v2908_v5  ;;  %v2913_v59 = vsub.s32 4294967266, %v2908_v5  ;;  %v2734_v63 = vand.u32 2147483647, %v11303_v26  ;;  %vm4688_vm14 = vcmp.lt.s32.totalorder %v12349_v43, 2 }
 0x37a   :  { %vm1386_vm13 = vcmp.lt.s32.totalorder %v12360_v11, 2  ;;  %vm1387_vm15 = vcmp.eq.s32.totalorder %v12360_v11, 0  ;;  %vm1390_vm0 = vcmp.eq.s32.totalorder %v12360_v11, 2  ;;  %v2910_v9 = vshll.u32 %v12315_v8, %v2908_v5 }
 0x37b   :  { %v2752_v10 = vshrl.u32 %v13778_v12, %v11768_v36  ;;  %vm1384_vm1 = vweird.f32 %v13993_v19  ;;  %v2911_v53 = vshrl.u32 %v2893_v49, %v2909_v6  ;;  %v2914_v1 = vadd.s32 127, %v2913_v59 }
 0x37c   :  { %vm1246_vm2 = vc.u32 %v12370_v27, %v12374_v14  ;;  %v2755_v44 = vshrl.u32 %v13780_v31, %v11768_v36  ;;  %v14006_v3 = vand.u32 2147483647, %v13994_v58  ;;  %v2924_v8 = vsel %vm2839_vm10, %v2923_v48, %v12288_v22 }
 0x37d   :  { %v1244_v61 = vmul.u32 %v1237_v0, %v1228_v39  ;;  %v1247_v20 = vadd.s32 1, %v12375_v17  ;;  %v2751_v7 = vshll.u32 %v13745_v37, %v11745_v18  ;;  %v2912_v38 = vor.u32 %v2911_v53, %v2910_v9  ;;  %v8400_v40 = vpop.eup %8399 }
 0x37e   :  { %vm12396_vm3 = vcmp.le.f32.partialorder %v14006_v3, 0.7853982  ;;  %v2915_v45 = vshll.u32 %v2914_v1, 23  ;;  %v2741_v50 = vand.u32 8388607, %v2734_v63  ;;  %v2754_v52 = vshll.u32 %v13778_v12, %v11745_v18  ;;  %v8402_v56 = vpop.eup %8401 }
 0x37f   :  { %v1248_v30 = vsel %vm1246_vm2, %v1247_v20, %v12375_v17  ;;  %v12411_v51 = vor.u32 %v2752_v10, %v2751_v7  ;;  %v2757_v22 = vshll.u32 %v13780_v31, %v11745_v18  ;;  %v2761_v0 = vshrl.u32 %v13798_v25, %v11768_v36 }
 0x380   :  { %v1391_v29 = vxor.u32 2147483648, %v8400_v40  ;;  %v2916_v49 = vor.u32 4788187, %v2915_v45  ;;  %v1249_v41 = vadd.s32 %v1248_v30, %v1244_v61  ;;  %v2756_v5 = vor.u32 %v2755_v44, %v2754_v52 }
 0x381   :  { %v1388_v48 = vxor.u32 2147483648, %v8402_v56  ;;  %v2919_v6 = vcvt.s32.f32 %v2912_v38  ;;  %v2758_v59 = vshrl.u32 %v13789_v33, %v11768_v36  ;;  %v2760_v17 = vshll.u32 %v13789_v33, %v11745_v18 }
 0x382   :  { %v4694_v39 = vsel %vm4692_vm11, %v1391_v29, %v8402_v56  ;;  %v1392_v9 = vsel %vm1390_vm0, %v1391_v29, %v8402_v56  ;;  %v2917_v10 = vand.u32 2147483647, %v2916_v49  ;;  %v1250_v53 = vadd.s32 536870912, %v1249_v41 }
 0x383   :  { %v4691_v1 = vsel %vm4689_vm12, %v8400_v40, %v1388_v48  ;;  %v1389_v44 = vsel %vm1387_vm15, %v8400_v40, %v1388_v48  ;;  %v2762_v3 = vor.u32 %v2761_v0, %v2760_v17  ;;  %v2764_v61 = vshrl.u32 %v13801_v2, %v11768_v36 }
 0x384   :  { %v4695_v20 = vsel %vm4688_vm14, %v4691_v1, %v4694_v39  ;;  %v1393_v7 = vsel %vm1386_vm13, %v1389_v44, %v1392_v9  ;;  %v2920_v38 = vmul.f32 %v2919_v6, %v2917_v10  ;;  %v1251_v45 = vshrl.u32 %v1250_v53, 30 }
 0x385   :  { %v12437_v52 = vsel %vm1384_vm1, nan, %v4695_v20  ;;  %v12441_v30 = vsel %vm1384_vm1, nan, %v1393_v7  ;;  %v2759_v40 = vor.u32 %v2758_v59, %v2757_v22  ;;  %v2763_v0 = vshll.u32 %v13798_v25, %v11745_v18 }
 0x386   :  { %7999 = vmatpush3.msra.mxu0 %v12437_v52  ;;  %8034 = vmatpush3.msra.mxu1 %v12441_v30  ;;  %v2921_v43 = vxor.u32 2147483648, %v2920_v38  ;;  %v2926_v11 = vsel %vm12396_vm3, 0, %v2924_v8  ;;  %v1252_v56 = vshll.u32 %v1251_v45, 30  ;;  %vm2769_vm4 = vcmp.lt.s32.totalorder %v11759_v34, 4 }
 0x387   :  { %v2742_v29 = vor.u32 8388608, %v2741_v50  ;;  %v2765_v49 = vor.u32 %v2764_v61, %v2763_v0  ;;  %vm2766_vm5 = vcmp.lt.s32.totalorder %v11759_v34, 1  ;;  %v2775_v19 = vsel %vm2769_vm4, %v2762_v3, 920167782 }
 0x388   :  { %v2922_v18 = vsel %vm2839_vm10, %v2921_v43, %v2920_v38  ;;  %v12455_v22 = vsub.s32 %v1249_v41, %v1252_v56  ;;  %vm2768_vm6 = vcmp.lt.s32.totalorder %v11759_v34, 3  ;;  %v2774_v8 = vsel %vm2766_vm5, %v12411_v51, %v2756_v5 }
 0x389   :  { %v780_v48 = vand.u32 2139095040, %v12343_v35  ;;  %v2925_v50 = vsel %vm12396_vm3, %v13994_v58, %v2922_v18  ;;  %v6246_v6 = vadd.s32 3, %v2926_v11  ;;  %v2776_v59 = vsel %vm2768_vm6, %v2759_v40, %v2775_v19 }
 0x38a   :  { %8403 = vcosq.f32 %v2925_v50  ;;  %v1255_v41 = vsub.s32 0, %v12455_v22  ;;  %vm2767_vm7 = vcmp.lt.s32.totalorder %v11759_v34, 2  ;;  %v2771_v17 = vsel %vm2769_vm4, %v2759_v40, 2102212464 }
 0x38b   :  { %8405 = vsinq.f32 %v2925_v50  ;;  %v2777_v39 = vsel %vm2767_vm7, %v2774_v8, %v2776_v59  ;;  %v2779_v15 = vsel %vm2769_vm4, %v2765_v49, 1326507024  ;;  %v2782_v9 = vshll.u32 %v2742_v29, 8 }
 0x38c   :  { %v7739_v10 = vmin.u32 %v1255_v41, %v12455_v22  ;;  %v1275_v53 = vsub.s32 4, %v1251_v45  ;;  %v2750_v1 = vshrl.u32 %v13745_v37, %v11768_v36  ;;  %v2778_v44 = vsel %vm2766_vm5, %v2756_v5, %v2759_v40 }
 0x38d   :  { %v12480_v61 = vand.u32 3, %v2926_v11  ;;  %v2780_v20 = vsel %vm2768_vm6, %v2762_v3, %v2779_v15  ;;  %v12484_v7 = vmul.u32.u64.low %v2782_v9, %v2777_v39  ;;  %v12485_v38 = vmul.u32.u64.high %v2782_v9, %v2777_v39, %v12484_v7 }
 0x38e   :  { %v12488_v0 = vand.u32 3, %v6246_v6  ;;  %v1257_v43 = vclz %v7739_v10  ;;  %v2770_v56 = vsel %vm2766_vm5, %v2750_v1, %v12411_v51  ;;  %v2772_v36 = vsel %vm2768_vm6, %v2756_v5, %v2771_v17 }
 0x38f   :  { %v12496_v40 = vand.u32 31, %v11999_v46  ;;  %v883_v11 = vand.u32 2139095040, %v12249_v42  ;;  %vm1191_vm8 = vcmp.lt.s32.totalorder %v14005_v60, 0  ;;  %v2781_v3 = vsel %vm2767_vm7, %v2778_v44, %v2780_v20 }
 0x390   :  { %v7740_v29 = vadd.s32 4294967294, %v1257_v43  ;;  %v1276_v49 = vsel %vm1191_vm8, %v1275_v53, %v1251_v45  ;;  %v12504_v19 = vmul.u32.u64.low %v2782_v9, %v2781_v3  ;;  %v12505_v18 = vmul.u32.u64.high %v2782_v9, %v2781_v3, %v12504_v19 }
 0x391   :  { %v12507_v51 = vshrl.u32 %v780_v48, 23  ;;  %v12510_v5 = vmul.f32 6.2831855, %v12328_v47  ;;  %vm12514_vm10 = vcmp.le.f32.partialorder %v1189_v23, 0.7853982  ;;  %v2773_v8 = vsel %vm2767_vm7, %v2770_v56, %v2772_v36 }
 0x392   :  { %vm6249_vm9 = vcmp.eq.s32.totalorder %v12488_v0, 0  ;;  %vm2932_vm11 = vcmp.eq.s32.totalorder %v12480_v61, 0  ;;  %vm2935_vm12 = vcmp.eq.s32.totalorder %v12480_v61, 2  ;;  %vm7741_vm14 = vcmp.lt.s32.totalorder %v7740_v29, 0 }
 0x393   :  { %v2792_v45 = vadd.s32 1, %v12485_v38  ;;  %vm6248_vm13 = vcmp.lt.s32.totalorder %v12488_v0, 2  ;;  %vm6252_vm15 = vcmp.eq.s32.totalorder %v12488_v0, 2  ;;  %vm2931_vm0 = vcmp.lt.s32.totalorder %v12480_v61, 2 }
 0x394   :  { %v1245_v23 = vadd.s32 %v12374_v14, %v12370_v27  ;;  %v1260_v34 = vsel %vm7741_vm14, 0, %v7740_v29  ;;  %v12531_v47 = vsel %vm12514_vm10, 0, %v1276_v49  ;;  %vm2929_vm1 = vweird.f32 %v13994_v58 }
 0x395   :  { %v1261_v48 = vsub.s32 32, %v1260_v34  ;;  %v1265_v50 = vsub.s32 4294967266, %v1260_v34  ;;  %v2789_v6 = vmul.u32 %v2782_v9, %v2773_v8  ;;  %v1104_v59 = vshrl.u32 %v13778_v12, %v11980_v55 }
 0x396   :  { %vm2791_vm2 = vc.u32 %v12505_v18, %v12484_v7  ;;  %v1086_v41 = vand.u32 2147483647, %v11389_v62  ;;  %v1103_v27 = vshll.u32 %v13745_v37, %v11779_v4  ;;  %v1106_v14 = vshll.u32 %v13778_v12, %v11779_v4 }
 0x397   :  { %v1262_v17 = vshll.u32 %v12455_v22, %v1260_v34  ;;  %v1263_v39 = vshrl.u32 %v1245_v23, %v1261_v48  ;;  %v1266_v15 = vadd.s32 127, %v1265_v50  ;;  %v2793_v9 = vsel %vm2791_vm2, %v2792_v45, %v12485_v38  ;;  %v8404_v10 = vpop.eup %8403 }
 0x398   :  { %v2794_v53 = vadd.s32 %v2793_v9, %v2789_v6  ;;  %v1107_v1 = vshrl.u32 %v13780_v31, %v11980_v55  ;;  %v1109_v44 = vshll.u32 %v13780_v31, %v11779_v4  ;;  %v1113_v20 = vshrl.u32 %v13798_v25, %v11980_v55  ;;  %v8406_v43 = vpop.eup %8405 }
 0x399   :  { %v2936_v56 = vxor.u32 2147483648, %v8404_v10  ;;  %v1264_v36 = vor.u32 %v1263_v39, %v1262_v17  ;;  %v1267_v3 = vshll.u32 %v1266_v15, 23  ;;  %v1105_v22 = vor.u32 %v1104_v59, %v1103_v27 }
 0x39a   :  { %v2933_v29 = vxor.u32 2147483648, %v8406_v43  ;;  %v2795_v49 = vadd.s32 536870912, %v2794_v53  ;;  %v1110_v38 = vshrl.u32 %v13789_v33, %v11980_v55  ;;  %v1112_v19 = vshll.u32 %v13789_v33, %v11779_v4 }
 0x39b   :  { %v6254_v8 = vsel %vm6252_vm15, %v2936_v56, %v8406_v43  ;;  %v2937_v45 = vsel %vm2935_vm12, %v2936_v56, %v8406_v43  ;;  %v1268_v23 = vor.u32 4788187, %v1267_v3  ;;  %v1116_v34 = vshrl.u32 %v13801_v2, %v11980_v55 }
 0x39c   :  { %v6251_v48 = vsel %vm6249_vm9, %v8404_v10, %v2933_v29  ;;  %v2934_v50 = vsel %vm2932_vm11, %v8404_v10, %v2933_v29  ;;  %v12565_v6 = vshrl.u32 %v2795_v49, 30  ;;  %v1114_v59 = vor.u32 %v1113_v20, %v1112_v19  ;;  %v14011_v49 = vld [vmem:[#allocation56_spill] sm:$0xff] }
 0x39d   :  { %v6255_v27 = vsel %vm6248_vm13, %v6251_v48, %v6254_v8  ;;  %v2938_v17 = vsel %vm2931_vm0, %v2934_v50, %v2937_v45  ;;  %v1269_v39 = vand.u32 2147483647, %v1268_v23  ;;  %v1271_v15 = vcvt.s32.f32 %v1264_v36 }
 0x39e   :  { %v12573_v9 = vsel %vm2929_vm1, nan, %v6255_v27  ;;  %v12577_v43 = vsel %vm2929_vm1, nan, %v2938_v17  ;;  %v2797_v10 = vshll.u32 %v12565_v6, 30  ;;  %v1115_v20 = vshll.u32 %v13798_v25, %v11779_v4 }
 0x39f   :  { %8000 = vmatprep.subr.mxu0 %v12573_v9  ;;  %8035 = vmatprep.subr.mxu1 %v12577_v43  ;;  %v1272_v61 = vmul.f32 %v1271_v15, %v1269_v39  ;;  %v1093_v0 = vand.u32 8388607, %v1086_v41  ;;  %v1108_v56 = vor.u32 %v1107_v1, %v1106_v14  ;;  %v1111_v36 = vor.u32 %v1110_v38, %v1109_v44 }
 0x3a0   :  { %v884_v58 = vshrl.u32 %v883_v11, 23  ;;  %v12588_v3 = vsub.s32 %v2794_v53, %v2797_v10  ;;  %v1117_v29 = vor.u32 %v1116_v34, %v1115_v20  ;;  %vm1121_vm3 = vcmp.lt.s32.totalorder %v14011_v49, 4 }
 0x3a1   :  { %v7722_v4 = vadd.s32 4294967169, %v12507_v51  ;;  %v2428_v19 = vand.u32 2139095040, %v12510_v5  ;;  %v1273_v8 = vxor.u32 2147483648, %v1272_v61  ;;  %v1127_v45 = vsel %vm1121_vm3, %v1114_v59, 920167782 }
 0x3a2   :  { %v4582_v23 = vadd.s32 3, %v12531_v47  ;;  %v2800_v14 = vsub.s32 0, %v12588_v3  ;;  %vm1118_vm4 = vcmp.lt.s32.totalorder %v14011_v49, 1  ;;  %vm1120_vm5 = vcmp.lt.s32.totalorder %v14011_v49, 3 }
 0x3a3   :  { %v1274_v11 = vsel %vm1191_vm8, %v1273_v8, %v1272_v61  ;;  %v1094_v53 = vor.u32 8388608, %v1093_v0  ;;  %v1126_v51 = vsel %vm1118_vm4, %v1105_v22, %v1108_v56  ;;  %v1128_v1 = vsel %vm1120_vm5, %v1111_v36, %v1127_v45 }
 0x3a4   :  { %v1277_v44 = vsel %vm12514_vm10, %v14005_v60, %v1274_v11  ;;  %v7799_v38 = vmin.u32 %v2800_v14, %v12588_v3  ;;  %v1123_v34 = vsel %vm1121_vm3, %v1111_v36, 2102212464  ;;  %v1131_v48 = vsel %vm1121_vm3, %v1117_v29, 1326507024 }
 0x3a5   :  { %8407 = vcosq.f32 %v1277_v44  ;;  %v1102_v50 = vshrl.u32 %v13745_v37, %v11980_v55  ;;  %vm1119_vm6 = vcmp.lt.s32.totalorder %v14011_v49, 2  ;;  %v1130_v27 = vsel %vm1118_vm4, %v1108_v56, %v1111_v36 }
 0x3a6   :  { %v7726_v17 = vadd.s32 4294967169, %v884_v58  ;;  %8409 = vsinq.f32 %v1277_v44  ;;  %v2802_v46 = vclz %v7799_v38  ;;  %v1129_v39 = vsel %vm1119_vm6, %v1126_v51, %v1128_v1  ;;  %v14012_v44 = vld [vmem:[#allocation36_spill] sm:$0xff] }
 0x3a7   :  { %v1122_v15 = vsel %vm1118_vm4, %v1102_v50, %v1105_v22  ;;  %v1124_v10 = vsel %vm1120_vm5, %v1108_v56, %v1123_v34  ;;  %v1132_v55 = vsel %vm1120_vm5, %v1114_v59, %v1131_v48  ;;  %v1134_v20 = vshll.u32 %v1094_v53, 8 }
 0x3a8   :  { %v12626_v61 = vand.u32 3, %v4582_v23  ;;  %v12629_v0 = vand.u32 3, %v12531_v47  ;;  %v7800_v36 = vadd.s32 4294967294, %v2802_v46  ;;  %v1133_v58 = vsel %vm1119_vm6, %v1130_v27, %v1132_v55 }
 0x3a9   :  { %v12633_v29 = vmul.u32.u64.low %v1134_v20, %v1133_v58  ;;  %v12634_v8 = vmul.u32.u64.high %v1134_v20, %v1133_v58, %v12633_v29  ;;  %v12636_v22 = vmul.u32.u64.low %v1134_v20, %v1129_v39  ;;  %v12637_v45 = vmul.u32.u64.high %v1134_v20, %v1129_v39, %v12636_v22 }
 0x3aa   :  { %v12641_v56 = vsub.s32 32, %v12496_v40  ;;  %v12643_v59 = vshrl.u32 %v2428_v19, 23  ;;  %vm7801_vm7 = vcmp.lt.s32.totalorder %v7800_v36, 0  ;;  %v1125_v47 = vsel %vm1119_vm6, %v1122_v15, %v1124_v10 }
 0x3ab   :  { %v12647_v23 = vadd.s32 1, %v7722_v4  ;;  %v12649_v14 = vadd.s32 1, %v7726_v17  ;;  %vm2736_vm8 = vcmp.lt.s32.totalorder %v11303_v26, 0  ;;  %v2805_v11 = vsel %vm7801_vm7, 0, %v7800_v36 }
 0x3ac   :  { %vm1287_vm10 = vcmp.eq.s32.totalorder %v12629_v0, 2  ;;  %v2790_v53 = vadd.s32 %v12484_v7, %v12505_v18  ;;  %v2806_v51 = vsub.s32 32, %v2805_v11  ;;  %v2810_v1 = vsub.s32 4294967266, %v2805_v11 }
 0x3ad   :  { %v2820_v19 = vsub.s32 4, %v12565_v6  ;;  %vm4585_vm9 = vcmp.eq.s32.totalorder %v12626_v61, 0  ;;  %vm1284_vm11 = vcmp.eq.s32.totalorder %v12629_v0, 0  ;;  %v1141_v49 = vmul.u32 %v1134_v20, %v1125_v47 }
 0x3ae   :  { %vm1143_vm12 = vc.u32 %v12634_v8, %v12636_v22  ;;  %v1144_v4 = vadd.s32 1, %v12637_v45  ;;  %v2631_v38 = vand.u32 2147483647, %v14012_v44  ;;  %vm4584_vm14 = vcmp.lt.s32.totalorder %v12626_v61, 2 }
 0x3af   :  { %vm1283_vm13 = vcmp.lt.s32.totalorder %v12629_v0, 2  ;;  %v2807_v7 = vshll.u32 %v12588_v3, %v2805_v11  ;;  %v2808_v18 = vshrl.u32 %v2790_v53, %v2806_v51  ;;  %v2811_v34 = vadd.s32 127, %v2810_v1 }
 0x3b0   :  { %v2649_v48 = vshrl.u32 %v13778_v12, %v12641_v56  ;;  %vm1281_vm15 = vweird.f32 %v14005_v60  ;;  %vm4588_vm0 = vcmp.eq.s32.totalorder %v12626_v61, 2  ;;  %v1145_v50 = vsel %vm1143_vm12, %v1144_v4, %v12637_v45 }
 0x3b1   :  { %v2652_v27 = vshrl.u32 %v13780_v31, %v12641_v56  ;;  %v2655_v17 = vshrl.u32 %v13789_v33, %v12641_v56  ;;  %v2809_v46 = vor.u32 %v2808_v18, %v2807_v7  ;;  %v2812_v39 = vshll.u32 %v2811_v34, 23 }
 0x3b2   :  { %v1146_v3 = vadd.s32 %v1145_v50, %v1141_v49  ;;  %v2648_v15 = vshll.u32 %v13745_v37, %v12496_v40  ;;  %v2821_v10 = vsel %vm2736_vm8, %v2820_v19, %v12565_v6  ;;  %v2651_v55 = vshll.u32 %v13778_v12, %v12496_v40  ;;  %v8408_v58 = vpop.eup %8407 }
 0x3b3   :  { %v2654_v20 = vshll.u32 %v13780_v31, %v12496_v40  ;;  %v2658_v36 = vshrl.u32 %v13798_v25, %v12641_v56  ;;  %vm12687_vm1 = vcmp.le.f32.partialorder %v2734_v63, 0.7853982  ;;  %v2813_v45 = vor.u32 4788187, %v2812_v39  ;;  %v8410_v53 = vpop.eup %8409 }
 0x3b4   :  { %v1147_v47 = vadd.s32 536870912, %v1146_v3  ;;  %v2638_v6 = vand.u32 8388607, %v2631_v38  ;;  %v2650_v11 = vor.u32 %v2649_v48, %v2648_v15  ;;  %v1288_v51 = vxor.u32 2147483648, %v8408_v58 }
 0x3b5   :  { %v2653_v1 = vor.u32 %v2652_v27, %v2651_v55  ;;  %v2656_v19 = vor.u32 %v2655_v17, %v2654_v20  ;;  %v2657_v49 = vshll.u32 %v13789_v33, %v12496_v40  ;;  %v1285_v4 = vxor.u32 2147483648, %v8410_v53 }
 0x3b6   :  { %v2814_v7 = vand.u32 2147483647, %v2813_v45  ;;  %v2816_v18 = vcvt.s32.f32 %v2809_v46  ;;  %v12695_v63 = vshrl.u32 %v1147_v47, 30  ;;  %v4590_v34 = vsel %vm4588_vm0, %v1288_v51, %v8410_v53 }
 0x3b7   :  { %v1289_v50 = vsel %vm1287_vm10, %v1288_v51, %v8410_v53  ;;  %v2659_v39 = vor.u32 %v2658_v36, %v2657_v49  ;;  %v2661_v48 = vshrl.u32 %v13801_v2, %v12641_v56  ;;  %v4587_v27 = vsel %vm4585_vm9, %v8408_v58, %v1285_v4 }
 0x3b8   :  { %v1286_v17 = vsel %vm1284_vm11, %v8408_v58, %v1285_v4  ;;  %v2817_v15 = vmul.f32 %v2816_v18, %v2814_v7  ;;  %v1149_v46 = vshll.u32 %v12695_v63, 30  ;;  %v4591_v55 = vsel %vm4584_vm14, %v4587_v27, %v4590_v34 }
 0x3b9   :  { %v1290_v20 = vsel %vm1283_vm13, %v1286_v17, %v1289_v50  ;;  %v2660_v36 = vshll.u32 %v13798_v25, %v12496_v40  ;;  %vm2666_vm2 = vcmp.lt.s32.totalorder %v12227_v13, 4  ;;  %v12717_v45 = vsel %vm1281_vm15, nan, %v4591_v55 }
 0x3ba   :  { %v12721_v58 = vsel %vm1281_vm15, nan, %v1290_v20  ;;  %v2818_v47 = vxor.u32 2147483648, %v2817_v15  ;;  %v12723_v53 = vsub.s32 %v1146_v3, %v1149_v46  ;;  %8001 = vmatpush3.msra.mxu0 %v12717_v45  ;;  %v2639_v61 = vor.u32 8388608, %v2638_v6 }
 0x3bb   :  { %8036 = vmatpush3.msra.mxu1 %v12721_v58  ;;  %v2662_v0 = vor.u32 %v2661_v48, %v2660_v36  ;;  %vm2663_vm3 = vcmp.lt.s32.totalorder %v12227_v13, 1  ;;  %v2672_v40 = vsel %vm2666_vm2, %v2659_v39, 920167782  ;;  %vm2665_vm4 = vcmp.lt.s32.totalorder %v12227_v13, 3 }
 0x3bc   :  { %v2819_v51 = vsel %vm2736_vm8, %v2818_v47, %v2817_v15  ;;  %v1152_v60 = vsub.s32 0, %v12723_v53  ;;  %v2671_v3 = vsel %vm2663_vm3, %v2650_v11, %v2653_v1  ;;  %v7786_v49 = vadd.s32 4294967169, %v12643_v59 }
 0x3bd   :  { %v2822_v6 = vsel %vm12687_vm1, %v11303_v26, %v2819_v51  ;;  %v2823_v4 = vsel %vm12687_vm1, 0, %v2821_v10  ;;  %v2673_v7 = vsel %vm2665_vm4, %v2656_v19, %v2672_v40  ;;  %vm2664_vm5 = vcmp.lt.s32.totalorder %v12227_v13, 2 }
 0x3be   :  { %8411 = vcosq.f32 %v2822_v6  ;;  %v7735_v18 = vmin.u32 %v1152_v60, %v12723_v53  ;;  %v2668_v34 = vsel %vm2666_vm2, %v2656_v19, 2102212464  ;;  %v2647_v59 = vshrl.u32 %v13745_v37, %v12641_v56 }
 0x3bf   :  { %8413 = vsinq.f32 %v2822_v6  ;;  %v2674_v50 = vsel %vm2664_vm5, %v2671_v3, %v2673_v7  ;;  %v2675_v10 = vsel %vm2663_vm3, %v2653_v1, %v2656_v19  ;;  %vm891_vm6 = vcmp.gt.s32.totalorder %v12649_v14, 0 }
 0x3c0   :  { %v1154_v29 = vclz %v7735_v18  ;;  %v2676_v48 = vsel %vm2666_vm2, %v2662_v0, 1326507024  ;;  %v2679_v27 = vshll.u32 %v2639_v61, 8  ;;  %v6142_v17 = vadd.s32 3, %v2823_v4 }
 0x3c1   :  { %v2667_v15 = vsel %vm2663_vm3, %v2647_v59, %v2650_v11  ;;  %v2669_v56 = vsel %vm2665_vm4, %v2653_v1, %v2668_v34  ;;  %v2677_v46 = vsel %vm2665_vm4, %v2659_v39, %v2676_v48  ;;  %v2827_v47 = vand.u32 3, %v2823_v4 }
 0x3c2   :  { %v7736_v55 = vadd.s32 4294967294, %v1154_v29  ;;  %v2678_v19 = vsel %vm2664_vm5, %v2675_v10, %v2677_v46  ;;  %v12765_v20 = vmul.u32.u64.low %v2679_v27, %v2674_v50  ;;  %v12766_v36 = vmul.u32.u64.high %v2679_v27, %v2674_v50, %v12765_v20 }
 0x3c3   :  { %v1172_v61 = vsub.s32 4, %v12695_v63  ;;  %v12770_v0 = vmul.u32.u64.low %v2679_v27, %v2678_v19  ;;  %v12771_v40 = vmul.u32.u64.high %v2679_v27, %v2678_v19, %v12770_v0  ;;  %v12774_v11 = vsel %vm891_vm6, %v12649_v14, 0 }
 0x3c4   :  { %v12776_v1 = vadd.s32 1, %v7786_v49  ;;  %vm7737_vm7 = vcmp.lt.s32.totalorder %v7736_v55, 0  ;;  %v2670_v39 = vsel %vm2664_vm5, %v2667_v15, %v2669_v56  ;;  %v6143_v51 = vand.u32 3, %v6142_v17  ;;  %v14018_v17 = vld [vmem:[#allocation55_spill] sm:$0xff]  ;;  %v14019_v15 = vld [vmem:[#allocation13_spill] sm:$0xff] }
 0x3c5   :  { %vm12782_vm8 = vcmp.le.f32.partialorder %v1086_v41, 0.7853982  ;;  %vm1088_vm10 = vcmp.lt.s32.totalorder %v11389_v62, 0  ;;  %v1157_v3 = vsel %vm7737_vm7, 0, %v7736_v55  ;;  %v1142_v14 = vadd.s32 %v12636_v22, %v12634_v8  ;;  %v14017_v41 = vld [vmem:[#allocation32_spill] sm:$0xff] }
 0x3c6   :  { %v1158_v6 = vsub.s32 32, %v1157_v3  ;;  %v1162_v49 = vsub.s32 4294967266, %v1157_v3  ;;  %v2689_v4 = vadd.s32 1, %v12766_v36  ;;  %vm2828_vm9 = vcmp.lt.s32.totalorder %v2827_v47, 2 }
 0x3c7   :  { %v1173_v13 = vsel %vm1088_vm10, %v1172_v61, %v12695_v63  ;;  %v2686_v7 = vmul.u32 %v2679_v27, %v2670_v39  ;;  %vm2688_vm11 = vc.u32 %v12771_v40, %v12765_v20  ;;  %v13720_v18 = vand.u32 2147483647, %v14017_v41 }
 0x3c8   :  { %vm2826_vm12 = vweird.f32 %v11303_v26  ;;  %v1159_v34 = vshll.u32 %v12723_v53, %v1157_v3  ;;  %v1160_v8 = vshrl.u32 %v1142_v14, %v1158_v6  ;;  %v1163_v22 = vadd.s32 127, %v1162_v49 }
 0x3c9   :  { %v2690_v59 = vsel %vm2688_vm11, %v2689_v4, %v12766_v36  ;;  %vm6144_vm14 = vcmp.lt.s32.totalorder %v6143_v51, 2  ;;  %vm2829_vm13 = vcmp.eq.s32.totalorder %v2827_v47, 0  ;;  %vm2832_vm15 = vcmp.eq.s32.totalorder %v2827_v47, 2 }
 0x3ca   :  { %v2691_v50 = vadd.s32 %v2690_v59, %v2686_v7  ;;  %vm6145_vm0 = vcmp.eq.s32.totalorder %v6143_v51, 0  ;;  %vm6148_vm1 = vcmp.eq.s32.totalorder %v6143_v51, 2  ;;  %v1161_v63 = vor.u32 %v1160_v8, %v1159_v34 }
 0x3cb   :  { %v1164_v10 = vshll.u32 %v1163_v22, 23  ;;  %v8412_v29 = vpop.eup %8411  ;;  %v1175_v48 = vsel %vm12782_vm8, 0, %v1173_v13  ;;  %v1000_v53 = vshll.u32 %v13745_v37, %v14018_v17  ;;  %v1001_v56 = vshrl.u32 %v13778_v12, %v14019_v15 }
 0x3cc   :  { %v2692_v27 = vadd.s32 536870912, %v2691_v50  ;;  %v8414_v46 = vpop.eup %8413  ;;  %v2833_v55 = vxor.u32 2147483648, %v8412_v29  ;;  %v990_v36 = vand.u32 8388607, %v13720_v18  ;;  %v1003_v61 = vshll.u32 %v13778_v12, %v14018_v17 }
 0x3cd   :  { %v1165_v19 = vor.u32 4788187, %v1164_v10  ;;  %v2830_v0 = vxor.u32 2147483648, %v8414_v46  ;;  %v1004_v3 = vshrl.u32 %v13780_v31, %v14019_v15  ;;  %v1006_v14 = vshll.u32 %v13780_v31, %v14018_v17 }
 0x3ce   :  { %v12809_v39 = vshrl.u32 %v2692_v27, 30  ;;  %v6150_v6 = vsel %vm6148_vm1, %v2833_v55, %v8414_v46  ;;  %v2834_v49 = vsel %vm2832_vm15, %v2833_v55, %v8414_v46  ;;  %v1168_v13 = vcvt.s32.f32 %v1161_v63 }
 0x3cf   :  { %v1166_v4 = vand.u32 2147483647, %v1165_v19  ;;  %v6147_v7 = vsel %vm6145_vm0, %v8412_v29, %v2830_v0  ;;  %v2831_v34 = vsel %vm2829_vm13, %v8412_v29, %v2830_v0  ;;  %v1007_v22 = vshrl.u32 %v13789_v33, %v14019_v15 }
 0x3d0   :  { %v2694_v8 = vshll.u32 %v12809_v39, 30  ;;  %v6151_v59 = vsel %vm6144_vm14, %v6147_v7, %v6150_v6  ;;  %v2835_v10 = vsel %vm2828_vm9, %v2831_v34, %v2834_v49  ;;  %v1010_v18 = vshrl.u32 %v13798_v25, %v14019_v15 }
 0x3d1   :  { %v1169_v27 = vmul.f32 %v1168_v13, %v1166_v4  ;;  %v12828_v63 = vsel %vm2826_vm12, nan, %v6151_v59  ;;  %v12832_v29 = vsel %vm2826_vm12, nan, %v2835_v10  ;;  %v1013_v51 = vshrl.u32 %v13801_v2, %v14019_v15 }
 0x3d2   :  { %v12834_v46 = vsub.s32 %v2691_v50, %v2694_v8  ;;  %8002 = vmatprep.subr.mxu0 %v12828_v63  ;;  %8037 = vmatprep.subr.mxu1 %v12832_v29  ;;  %v4478_v55 = vadd.s32 3, %v1175_v48  ;;  %v1002_v19 = vor.u32 %v1001_v56, %v1000_v53  ;;  %v1009_v0 = vshll.u32 %v13789_v33, %v14018_v17 }
 0x3d3   :  { %v1170_v47 = vxor.u32 2147483648, %v1169_v27  ;;  %v1005_v26 = vor.u32 %v1004_v3, %v1003_v61  ;;  %v1008_v49 = vor.u32 %v1007_v22, %v1006_v14  ;;  %v1012_v50 = vshll.u32 %v13798_v25, %v14018_v17  ;;  %v14020_v14 = vld [vmem:[#allocation43_spill] sm:$0xff] }
 0x3d4   :  { %v2697_v6 = vsub.s32 0, %v12834_v46  ;;  %v12847_v13 = vand.u32 3, %v1175_v48  ;;  %v999_v7 = vshrl.u32 %v13745_v37, %v14019_v15  ;;  %v1011_v34 = vor.u32 %v1010_v18, %v1009_v0 }
 0x3d5   :  { %v1171_v4 = vsel %vm1088_vm10, %v1170_v47, %v1169_v27  ;;  %vm2633_vm2 = vcmp.lt.s32.totalorder %v14012_v44, 0  ;;  %v991_v61 = vor.u32 8388608, %v990_v36  ;;  %v1014_v3 = vor.u32 %v1013_v51, %v1012_v50 }
 0x3d6   :  { %v1174_v53 = vsel %vm12782_vm8, %v11389_v62, %v1171_v4  ;;  %v7795_v56 = vmin.u32 %v2697_v6, %v12834_v46  ;;  %v2717_v17 = vsub.s32 4, %v12809_v39  ;;  %vm1015_vm3 = vcmp.lt.s32.totalorder %v14020_v14, 1 }
 0x3d7   :  { %8415 = vcosq.f32 %v1174_v53  ;;  %vm1018_vm4 = vcmp.lt.s32.totalorder %v14020_v14, 4  ;;  %v1023_v15 = vsel %vm1015_vm3, %v1002_v19, %v1005_v26  ;;  %vm1016_vm5 = vcmp.lt.s32.totalorder %v14020_v14, 2 }
 0x3d8   :  { %8417 = vsinq.f32 %v1174_v53  ;;  %v2699_v48 = vclz %v7795_v56  ;;  %v1020_v18 = vsel %vm1018_vm4, %v1008_v49, 2102212464  ;;  %vm1017_vm6 = vcmp.lt.s32.totalorder %v14020_v14, 3 }
 0x3d9   :  { %v1024_v60 = vsel %vm1018_vm4, %v1011_v34, 920167782  ;;  %v1027_v8 = vsel %vm1015_vm3, %v1005_v26, %v1008_v49  ;;  %v1028_v59 = vsel %vm1018_vm4, %v1014_v3, 1326507024  ;;  %v1031_v10 = vshll.u32 %v991_v61, 8  ;;  %v14023_v3 = vld [vmem:[#allocation53_spill] sm:$0xff] }
 0x3da   :  { %v7796_v22 = vadd.s32 4294967294, %v2699_v48  ;;  %v1025_v36 = vsel %vm1017_vm6, %v1008_v49, %v1024_v60  ;;  %v1019_v27 = vsel %vm1015_vm3, %v999_v7, %v1002_v19  ;;  %v1021_v51 = vsel %vm1017_vm6, %v1005_v26, %v1020_v18 }
 0x3db   :  { %v1026_v47 = vsel %vm1016_vm5, %v1023_v15, %v1025_v36  ;;  %v1029_v0 = vsel %vm1017_vm6, %v1011_v34, %v1028_v59  ;;  %v4479_v53 = vand.u32 3, %v4478_v55  ;;  %v2687_v19 = vadd.s32 %v12765_v20, %v12771_v40 }
 0x3dc   :  { %vm7797_vm7 = vcmp.lt.s32.totalorder %v7796_v22, 0  ;;  %v1030_v6 = vsel %vm1016_vm5, %v1027_v8, %v1029_v0  ;;  %v12865_v50 = vmul.u32.u64.low %v1031_v10, %v1026_v47  ;;  %v12866_v4 = vmul.u32.u64.high %v1031_v10, %v1026_v47, %v12865_v50 }
 0x3dd   :  { %v2702_v56 = vsel %vm7797_vm7, 0, %v7796_v22  ;;  %v12869_v48 = vmul.u32.u64.low %v1031_v10, %v1030_v6  ;;  %v12870_v49 = vmul.u32.u64.high %v1031_v10, %v1030_v6, %v12869_v48  ;;  %v1022_v34 = vsel %vm1016_vm5, %v1019_v27, %v1021_v51 }
 0x3de   :  { %v2703_v26 = vsub.s32 32, %v2702_v56  ;;  %v2707_v7 = vsub.s32 4294967266, %v2702_v56  ;;  %vm1181_vm8 = vcmp.eq.s32.totalorder %v12847_v13, 0  ;;  %vm12879_vm10 = vcmp.le.f32.partialorder %v2631_v38, 0.7853982 }
 0x3df   :  { %v2718_v55 = vsel %vm2633_vm2, %v2717_v17, %v12809_v39  ;;  %v2528_v18 = vand.u32 2147483647, %v14023_v3  ;;  %vm1180_vm9 = vcmp.lt.s32.totalorder %v12847_v13, 2  ;;  %v2704_v20 = vshll.u32 %v12834_v46, %v2702_v56 }
 0x3e0   :  { %v2705_v40 = vshrl.u32 %v2687_v19, %v2703_v26  ;;  %v2708_v14 = vadd.s32 127, %v2707_v7  ;;  %v1041_v15 = vadd.s32 1, %v12866_v4  ;;  %vm1178_vm11 = vweird.f32 %v11389_v62 }
 0x3e1   :  { %vm4480_vm12 = vcmp.lt.s32.totalorder %v4479_v53, 2  ;;  %vm1184_vm14 = vcmp.eq.s32.totalorder %v12847_v13, 2  ;;  %v1038_v38 = vmul.u32 %v1031_v10, %v1022_v34  ;;  %vm1040_vm13 = vc.u32 %v12870_v49, %v12865_v50 }
 0x3e2   :  { %vm4481_vm15 = vcmp.eq.s32.totalorder %v4479_v53, 0  ;;  %v2706_v39 = vor.u32 %v2705_v40, %v2704_v20  ;;  %v2709_v17 = vshll.u32 %v2708_v14, 23  ;;  %v1042_v60 = vsel %vm1040_vm13, %v1041_v15, %v12866_v4 }
 0x3e3   :  { %vm4484_vm0 = vcmp.eq.s32.totalorder %v4479_v53, 2  ;;  %v2720_v46 = vsel %vm12879_vm10, 0, %v2718_v55  ;;  %v1043_v8 = vadd.s32 %v1042_v60, %v1038_v38  ;;  %v12899_v22 = vand.u32 8388607, %v2528_v18 }
 0x3e4   :  { %v8416_v36 = vpop.eup %8415  ;;  %v2710_v59 = vor.u32 4788187, %v2709_v17  ;;  %v2545_v10 = vshll.u32 %v13745_v37, %v11782_v54  ;;  %v2546_v27 = vshrl.u32 %v13778_v12, %v11990_v24  ;;  %v2548_v51 = vshll.u32 %v13778_v12, %v11782_v54 }
 0x3e5   :  { %v8418_v47 = vpop.eup %8417  ;;  %v1185_v0 = vxor.u32 2147483648, %v8416_v36  ;;  %v1044_v6 = vadd.s32 536870912, %v1043_v8  ;;  %v2549_v4 = vshrl.u32 %v13780_v31, %v11990_v24  ;;  %v2555_v56 = vshrl.u32 %v13798_v25, %v11990_v24 }
 0x3e6   :  { %v1182_v48 = vxor.u32 2147483648, %v8418_v47  ;;  %v2711_v19 = vand.u32 2147483647, %v2710_v59  ;;  %v2713_v26 = vcvt.s32.f32 %v2706_v39  ;;  %v2551_v7 = vshll.u32 %v13780_v31, %v11782_v54 }
 0x3e7   :  { %v4486_v34 = vsel %vm4484_vm0, %v1185_v0, %v8418_v47  ;;  %v1186_v55 = vsel %vm1184_vm14, %v1185_v0, %v8418_v47  ;;  %v12916_v20 = vshrl.u32 %v1044_v6, 30  ;;  %v2554_v40 = vshll.u32 %v13789_v33, %v11782_v54 }
 0x3e8   :  { %v4483_v14 = vsel %vm4481_vm15, %v8416_v36, %v1182_v48  ;;  %v1183_v15 = vsel %vm1181_vm8, %v8416_v36, %v1182_v48  ;;  %v2714_v38 = vmul.f32 %v2713_v26, %v2711_v19  ;;  %v2552_v39 = vshrl.u32 %v13789_v33, %v11990_v24 }
 0x3e9   :  { %v4487_v17 = vsel %vm4480_vm12, %v4483_v14, %v4486_v34  ;;  %v1187_v60 = vsel %vm1180_vm9, %v1183_v15, %v1186_v55  ;;  %v1046_v59 = vshll.u32 %v12916_v20, 30  ;;  %v2556_v47 = vor.u32 %v2555_v56, %v2554_v40 }
 0x3ea   :  { %v12931_v0 = vsel %vm1178_vm11, nan, %v4487_v17  ;;  %v12935_v6 = vsel %vm1178_vm11, nan, %v1187_v60  ;;  %v2715_v36 = vxor.u32 2147483648, %v2714_v38  ;;  %v2558_v48 = vshrl.u32 %v13801_v2, %v11990_v24 }
 0x3eb   :  { %v12940_v53 = vshrl.u32 %v12774_v11, 5  ;;  %v12943_v13 = vand.u32 31, %v12774_v11  ;;  %8003 = vmatpush3.msra.mxu0 %v12931_v0  ;;  %8038 = vmatpush3.msra.mxu1 %v12935_v6  ;;  %v12947_v56 = vsub.s32 %v1043_v8, %v1046_v59  ;;  %v2547_v19 = vor.u32 %v2546_v27, %v2545_v10 }
 0x3ec   :  { %v2716_v62 = vsel %vm2633_vm2, %v2715_v36, %v2714_v38  ;;  %v2550_v26 = vor.u32 %v2549_v4, %v2548_v51  ;;  %v2553_v34 = vor.u32 %v2552_v39, %v2551_v7  ;;  %v2557_v55 = vshll.u32 %v13798_v25, %v11782_v54 }
 0x3ed   :  { %v2719_v11 = vsel %vm12879_vm10, %v14012_v44, %v2716_v62  ;;  %v6038_v40 = vadd.s32 3, %v2720_v46  ;;  %v1049_v14 = vsub.s32 0, %v12947_v56  ;;  %vm2563_vm1 = vcmp.lt.s32.totalorder %v11983_v21, 4 }
 0x3ee   :  { %8419 = vcosq.f32 %v2719_v11  ;;  %v2536_v8 = vor.u32 8388608, %v12899_v22  ;;  %v2559_v10 = vor.u32 %v2558_v48, %v2557_v55  ;;  %v2569_v27 = vsel %vm2563_vm1, %v2556_v47, 920167782 }
 0x3ef   :  { %8421 = vsinq.f32 %v2719_v11  ;;  %v7731_v51 = vmin.u32 %v1049_v14, %v12947_v56  ;;  %vm2560_vm2 = vcmp.lt.s32.totalorder %v11983_v21, 1  ;;  %vm2562_vm3 = vcmp.lt.s32.totalorder %v11983_v21, 3 }
 0x3f0   :  { %v12965_v54 = vsub.s32 32, %v12943_v13  ;;  %vm985_vm4 = vcmp.lt.s32.totalorder %v14017_v41, 0  ;;  %v2568_v61 = vsel %vm2560_vm2, %v2547_v19, %v2550_v26  ;;  %v2570_v22 = vsel %vm2562_vm3, %v2553_v34, %v2569_v27 }
 0x3f1   :  { %v12972_v4 = vand.u32 3, %v6038_v40  ;;  %v12974_v7 = vand.u32 3, %v2720_v46  ;;  %v1051_v15 = vclz %v7731_v51  ;;  %v2565_v38 = vsel %vm2563_vm1, %v2553_v34, 2102212464 }
 0x3f2   :  { %v2544_v39 = vshrl.u32 %v13745_v37, %v11990_v24  ;;  %vm2561_vm5 = vcmp.lt.s32.totalorder %v11983_v21, 2  ;;  %v2572_v17 = vsel %vm2560_vm2, %v2550_v26, %v2553_v34  ;;  %v2573_v60 = vsel %vm2563_vm1, %v2559_v10, 1326507024 }
 0x3f3   :  { %v7732_v59 = vadd.s32 4294967294, %v1051_v15  ;;  %v2571_v46 = vsel %vm2561_vm5, %v2568_v61, %v2570_v22  ;;  %v2574_v36 = vsel %vm2562_vm3, %v2556_v47, %v2573_v60  ;;  %v2576_v48 = vshll.u32 %v2536_v8, 8 }
 0x3f4   :  { %v1069_v62 = vsub.s32 4, %v12916_v20  ;;  %v2564_v24 = vsel %vm2560_vm2, %v2544_v39, %v2547_v19  ;;  %v2566_v55 = vsel %vm2562_vm3, %v2550_v26, %v2565_v38  ;;  %v2575_v34 = vsel %vm2561_vm5, %v2572_v17, %v2574_v36 }
 0x3f5   :  { %vm2729_vm6 = vcmp.eq.s32.totalorder %v12974_v7, 2  ;;  %vm7733_vm7 = vcmp.lt.s32.totalorder %v7732_v59, 0  ;;  %v12997_v11 = vmul.u32.u64.low %v2576_v48, %v2575_v34  ;;  %v12998_v40 = vmul.u32.u64.high %v2576_v48, %v2575_v34, %v12997_v11 }
 0x3f6   :  { %vm6041_vm8 = vcmp.eq.s32.totalorder %v12972_v4, 0  ;;  %vm2726_vm10 = vcmp.eq.s32.totalorder %v12974_v7, 0  ;;  %v1054_v47 = vsel %vm7733_vm7, 0, %v7732_v59  ;;  %vm6040_vm9 = vcmp.lt.s32.totalorder %v12972_v4, 2 }
 0x3f7   :  { %v13002_v14 = vmul.u32.u64.low %v2576_v48, %v2571_v46  ;;  %v13003_v8 = vmul.u32.u64.high %v2576_v48, %v2571_v46, %v13002_v14  ;;  %vm2725_vm11 = vcmp.lt.s32.totalorder %v12974_v7, 2  ;;  %v1039_v19 = vadd.s32 %v12865_v50, %v12870_v49 }
 0x3f8   :  { %v1055_v26 = vsub.s32 32, %v1054_v47  ;;  %v1059_v10 = vsub.s32 4294967266, %v1054_v47  ;;  %v2567_v27 = vsel %vm2561_vm5, %v2564_v24, %v2566_v55  ;;  %vm2723_vm12 = vweird.f32 %v14012_v44 }
 0x3f9   :  { %vm6044_vm14 = vcmp.eq.s32.totalorder %v12972_v4, 2  ;;  %v1056_v51 = vshll.u32 %v12947_v56, %v1054_v47  ;;  %v1070_v61 = vsel %vm985_vm4, %v1069_v62, %v12916_v20  ;;  %v898_v22 = vshrl.u32 %v13778_v12, %v12965_v54 }
 0x3fa   :  { %v1057_v15 = vshrl.u32 %v1039_v19, %v1055_v26  ;;  %v1060_v50 = vadd.s32 127, %v1059_v10  ;;  %vm2585_vm13 = vc.u32 %v12998_v40, %v13002_v14  ;;  %v897_v21 = vshll.u32 %v13745_v37, %v12943_v13 }
 0x3fb   :  { %v2583_v49 = vmul.u32 %v2576_v48, %v2567_v27  ;;  %v2586_v38 = vadd.s32 1, %v13003_v8  ;;  %v13722_v56 = vand.u32 2147483647, %v12249_v42  ;;  %v900_v39 = vshll.u32 %v13778_v12, %v12943_v13  ;;  %v8420_v20 = vpop.eup %8419 }
 0x3fc   :  { %v1058_v17 = vor.u32 %v1057_v15, %v1056_v51  ;;  %v1061_v60 = vshll.u32 %v1060_v50, 23  ;;  %v13028_v59 = vor.u32 %v898_v22, %v897_v21  ;;  %v901_v46 = vshrl.u32 %v13780_v31, %v12965_v54  ;;  %v8422_v36 = vpop.eup %8421  ;;  %v13052_v21 = vld [vmem:[%s13534_s3 + $0x8] sm:$0xff] }
 0x3fd   :  { %v2730_v62 = vxor.u32 2147483648, %v8420_v20  ;;  %v2587_v24 = vsel %vm2585_vm13, %v2586_v38, %v13003_v8  ;;  %v903_v48 = vshll.u32 %v13780_v31, %v12943_v13  ;;  %v907_v55 = vshrl.u32 %v13798_v25, %v12965_v54  ;;  %7470 = vmatprep.mubr.f32.mxu0 %v13052_v21 }
 0x3fe   :  { %v2727_v34 = vxor.u32 2147483648, %v8422_v36  ;;  %v1062_v11 = vor.u32 4788187, %v1061_v60  ;;  %v2588_v47 = vadd.s32 %v2587_v24, %v2583_v49  ;;  %v904_v19 = vshrl.u32 %v13789_v33, %v12965_v54  ;;  %v13057_v49 = vld [vmem:[%s13535_s2 + $0x8] sm:$0xff] }
 0x3ff   :  { %v6046_v26 = vsel %vm6044_vm14, %v2730_v62, %v8422_v36  ;;  %v2731_v10 = vsel %vm2729_vm6, %v2730_v62, %v8422_v36  ;;  %v1065_v27 = vcvt.s32.f32 %v1058_v17  ;;  %v906_v8 = vshll.u32 %v13789_v33, %v12943_v13  ;;  %14024 = vst [vmem:[#allocation39_spill] sm:$0xff] %v13057_v49  ;;  %7540 = vmatprep.mubr.f32.mxu1 %v13057_v49 }
 0x400   :  { %v6043_v51 = vsel %vm6041_vm8, %v8420_v20, %v2727_v34  ;;  %v2728_v22 = vsel %vm2726_vm10, %v8420_v20, %v2727_v34  ;;  %v1063_v15 = vand.u32 2147483647, %v1062_v11  ;;  %v2589_v50 = vadd.s32 536870912, %v2588_v47 }
 0x401   :  { %v6047_v38 = vsel %vm6040_vm9, %v6043_v51, %v6046_v26  ;;  %v2732_v17 = vsel %vm2725_vm11, %v2728_v22, %v2731_v10  ;;  %v908_v60 = vor.u32 %v907_v55, %v906_v8  ;;  %v910_v20 = vshrl.u32 %v13801_v2, %v12965_v54 }
 0x402   :  { %v13068_v36 = vsel %vm2723_vm12, nan, %v6047_v38  ;;  %v13072_v62 = vsel %vm2723_vm12, nan, %v2732_v17  ;;  %v1066_v24 = vmul.f32 %v1065_v27, %v1063_v15  ;;  %v13074_v4 = vshrl.u32 %v2589_v50, 30 }
 0x403   :  { %8004 = vmatprep.subr.mxu0 %v13068_v36  ;;  %8039 = vmatprep.subr.mxu1 %v13072_v62  ;;  %v887_v7 = vand.u32 8388607, %v13722_v56  ;;  %v902_v55 = vor.u32 %v901_v46, %v900_v39  ;;  %v905_v34 = vor.u32 %v904_v19, %v903_v48  ;;  %v909_v11 = vshll.u32 %v13798_v25, %v12943_v13 }
 0x404   :  { %v14025_v44 = vand.u32 2147483647, %v14017_v41  ;;  %v1067_v26 = vxor.u32 2147483648, %v1066_v24  ;;  %v2591_v10 = vshll.u32 %v13074_v4, 30  ;;  %vm915_vm0 = vcmp.lt.s32.totalorder %v12940_v53, 4 }
 0x405   :  { %vm2436_vm1 = vcmp.gt.s32.totalorder %v12776_v1, 0  ;;  %v911_v8 = vor.u32 %v910_v20, %v909_v11  ;;  %v921_v51 = vsel %vm915_vm0, %v908_v60, 920167782  ;;  %vm912_vm2 = vcmp.lt.s32.totalorder %v12940_v53, 1 }
 0x406   :  { %vm984_vm15 = vcmp.le.f32.partialorder %v14025_v44, 0.7853982  ;;  %v1068_v39 = vsel %vm985_vm4, %v1067_v26, %v1066_v24  ;;  %v13092_v46 = vsub.s32 %v2588_v47, %v2591_v10  ;;  %vm914_vm3 = vcmp.lt.s32.totalorder %v12940_v53, 3 }
 0x407   :  { %v1072_v27 = vsel %vm984_vm15, 0, %v1070_v61  ;;  %v1071_v13 = vsel %vm984_vm15, %v14017_v41, %v1068_v39  ;;  %v888_v48 = vor.u32 8388608, %v887_v7  ;;  %v920_v61 = vsel %vm912_vm2, %v13028_v59, %v902_v55 }
 0x408   :  { %v922_v19 = vsel %vm914_vm3, %v905_v34, %v921_v51  ;;  %v2437_v22 = vsel %vm2436_vm1, %v12776_v1, 0  ;;  %8423 = vcosq.f32 %v1071_v13  ;;  %v4374_v15 = vadd.s32 3, %v1072_v27 }
 0x409   :  { %v2594_v47 = vsub.s32 0, %v13092_v46  ;;  %8425 = vsinq.f32 %v1071_v13  ;;  %v896_v50 = vshrl.u32 %v13745_v37, %v12965_v54  ;;  %vm913_vm4 = vcmp.lt.s32.totalorder %v12940_v53, 2 }
 0x40a   :  { %v925_v38 = vsel %vm915_vm0, %v911_v8, 1326507024  ;;  %v917_v20 = vsel %vm915_vm0, %v905_v34, 2102212464  ;;  %v923_v1 = vsel %vm913_vm4, %v920_v61, %v922_v19  ;;  %v924_v24 = vsel %vm912_vm2, %v902_v55, %v905_v34 }
 0x40b   :  { %v7791_v17 = vmin.u32 %v2594_v47, %v13092_v46  ;;  %vm788_vm5 = vcmp.gt.s32.totalorder %v12647_v23, 0  ;;  %v13117_v7 = vand.u32 31, %v2437_v22  ;;  %v926_v54 = vsel %vm914_vm3, %v908_v60, %v925_v38 }
 0x40c   :  { %v928_v11 = vshll.u32 %v888_v48, 8  ;;  %v13121_v44 = vand.u32 3, %v4374_v15  ;;  %v13123_v26 = vand.u32 3, %v1072_v27  ;;  %v916_v8 = vsel %vm912_vm2, %v896_v50, %v13028_v59 }
 0x40d   :  { %v2596_v10 = vclz %v7791_v17  ;;  %v918_v34 = vsel %vm914_vm3, %v902_v55, %v917_v20  ;;  %v927_v51 = vsel %vm913_vm4, %v924_v24, %v926_v54  ;;  %v13137_v60 = vsel %vm788_vm5, %v12647_v23, 0 }
 0x40e   :  { %v13132_v39 = vmul.u32.u64.low %v928_v11, %v923_v1  ;;  %v13133_v13 = vmul.u32.u64.high %v928_v11, %v923_v1, %v13132_v39  ;;  %v13139_v48 = vmul.u32.u64.low %v928_v11, %v927_v51  ;;  %v13140_v61 = vmul.u32.u64.high %v928_v11, %v927_v51, %v13139_v48 }
 0x40f   :  { %v7792_v27 = vadd.s32 4294967294, %v2596_v10  ;;  %v13142_v19 = vshrl.u32 %v2437_v22, 5  ;;  %v13145_v59 = vsub.s32 32, %v13117_v7  ;;  %vm2530_vm6 = vcmp.lt.s32.totalorder %v14023_v3, 0 }
 0x410   :  { %v2614_v55 = vsub.s32 4, %v13074_v4  ;;  %vm1078_vm7 = vcmp.eq.s32.totalorder %v13123_v26, 0  ;;  %vm1081_vm8 = vcmp.eq.s32.totalorder %v13123_v26, 2  ;;  %v919_v23 = vsel %vm913_vm4, %v916_v8, %v918_v34 }
 0x411   :  { %vm7793_vm10 = vcmp.lt.s32.totalorder %v7792_v27, 0  ;;  %vm4376_vm9 = vcmp.lt.s32.totalorder %v13121_v44, 2  ;;  %vm4377_vm11 = vcmp.eq.s32.totalorder %v13121_v44, 0  ;;  %vm1077_vm12 = vcmp.lt.s32.totalorder %v13123_v26, 2 }
 0x412   :  { %v2599_v22 = vsel %vm7793_vm10, 0, %v7792_v27  ;;  %v938_v15 = vadd.s32 1, %v13133_v13  ;;  %v13721_v47 = vand.u32 2147483647, %v12510_v5  ;;  %vm1075_vm14 = vweird.f32 %v14017_v41 }
 0x413   :  { %vm4380_vm13 = vcmp.eq.s32.totalorder %v13121_v44, 2  ;;  %v2584_v50 = vadd.s32 %v13002_v14, %v12998_v40  ;;  %v2600_v53 = vsub.s32 32, %v2599_v22  ;;  %v2604_v38 = vsub.s32 4294967266, %v2599_v22 }
 0x414   :  { %vm13164_vm15 = vcmp.le.f32.partialorder %v2528_v18, 0.7853982  ;;  %v2615_v20 = vsel %vm2530_vm6, %v2614_v55, %v13074_v4  ;;  %v935_v1 = vmul.u32 %v928_v11, %v919_v23  ;;  %vm937_vm0 = vc.u32 %v13140_v61, %v13132_v39 }
 0x415   :  { %v2442_v24 = vshll.u32 %v13745_v37, %v13117_v7  ;;  %v2601_v40 = vshll.u32 %v13092_v46, %v2599_v22  ;;  %v2602_v14 = vshrl.u32 %v2584_v50, %v2600_v53  ;;  %v2605_v54 = vadd.s32 127, %v2604_v38  ;;  %v8424_v10 = vpop.eup %8423 }
 0x416   :  { %v939_v18 = vsel %vm937_vm0, %v938_v15, %v13133_v13  ;;  %v13179_v34 = vand.u32 8388607, %v13721_v47  ;;  %v2443_v4 = vshrl.u32 %v13778_v12, %v13145_v59  ;;  %v2445_v11 = vshll.u32 %v13778_v12, %v13117_v7  ;;  %v8426_v51 = vpop.eup %8425 }
 0x417   :  { %v940_v8 = vadd.s32 %v939_v18, %v935_v1  ;;  %v1082_v27 = vxor.u32 2147483648, %v8424_v10  ;;  %v2603_v48 = vor.u32 %v2602_v14, %v2601_v40  ;;  %v2606_v46 = vshll.u32 %v2605_v54, 23 }
 0x418   :  { %v2446_v55 = vshrl.u32 %v13780_v31, %v13145_v59  ;;  %v1079_v13 = vxor.u32 2147483648, %v8426_v51  ;;  %v2449_v22 = vshrl.u32 %v13789_v33, %v13145_v59  ;;  %v2451_v15 = vshll.u32 %v13789_v33, %v13117_v7 }
 0x419   :  { %v941_v23 = vadd.s32 536870912, %v940_v8  ;;  %v4382_v50 = vsel %vm4380_vm13, %v1082_v27, %v8426_v51  ;;  %v1083_v53 = vsel %vm1081_vm8, %v1082_v27, %v8426_v51  ;;  %v2607_v38 = vor.u32 4788187, %v2606_v46 }
 0x41a   :  { %v2452_v1 = vshrl.u32 %v13798_v25, %v13145_v59  ;;  %v4379_v40 = vsel %vm4377_vm11, %v8424_v10, %v1079_v13  ;;  %v1080_v14 = vsel %vm1078_vm7, %v8424_v10, %v1079_v13  ;;  %v2455_v18 = vshrl.u32 %v13801_v2, %v13145_v59 }
 0x41b   :  { %v13201_v54 = vshrl.u32 %v941_v23, 30  ;;  %v4383_v47 = vsel %vm4376_vm9, %v4379_v40, %v4382_v50  ;;  %v1084_v51 = vsel %vm1077_vm12, %v1080_v14, %v1083_v53  ;;  %v2608_v27 = vand.u32 2147483647, %v2607_v38 }
 0x41c   :  { %v2610_v46 = vcvt.s32.f32 %v2603_v48  ;;  %v13211_v56 = vsel %vm1075_vm14, nan, %v4383_v47  ;;  %v13215_v10 = vsel %vm1075_vm14, nan, %v1084_v51  ;;  %v2454_v23 = vshll.u32 %v13798_v25, %v13117_v7 }
 0x41d   :  { %v943_v13 = vshll.u32 %v13201_v54, 30  ;;  %8005 = vmatpush3.msra.mxu0 %v13211_v56  ;;  %8040 = vmatpush3.msra.mxu1 %v13215_v10  ;;  %v2617_v26 = vsel %vm13164_vm15, 0, %v2615_v20  ;;  %v2448_v47 = vshll.u32 %v13780_v31, %v13117_v7  ;;  %v2453_v48 = vor.u32 %v2452_v1, %v2451_v15 }
 0x41e   :  { %v2611_v44 = vmul.f32 %v2610_v46, %v2608_v27  ;;  %v2444_v50 = vor.u32 %v2443_v4, %v2442_v24  ;;  %v2447_v53 = vor.u32 %v2446_v55, %v2445_v11  ;;  %v2456_v38 = vor.u32 %v2455_v18, %v2454_v23 }
 0x41f   :  { %v13226_v41 = vsub.s32 %v940_v8, %v943_v13  ;;  %v13229_v40 = vand.u32 31, %v13137_v60  ;;  %v2450_v51 = vor.u32 %v2449_v22, %v2448_v47  ;;  %v5934_v49 = vadd.s32 3, %v2617_v26 }
 0x420   :  { %v2612_v14 = vxor.u32 2147483648, %v2611_v44  ;;  %v2433_v46 = vor.u32 8388608, %v13179_v34  ;;  %vm2460_vm1 = vcmp.lt.s32.totalorder %v13142_v19, 4  ;;  %vm2457_vm2 = vcmp.lt.s32.totalorder %v13142_v19, 1 }
 0x421   :  { %v946_v27 = vsub.s32 0, %v13226_v41  ;;  %vm2459_vm3 = vcmp.lt.s32.totalorder %v13142_v19, 3  ;;  %v2466_v20 = vsel %vm2460_vm1, %v2453_v48, 920167782  ;;  %v2465_v4 = vsel %vm2457_vm2, %v2444_v50, %v2447_v53 }
 0x422   :  { %v2613_v7 = vsel %vm2530_vm6, %v2612_v14, %v2611_v44  ;;  %v2470_v34 = vsel %vm2460_vm1, %v2456_v38, 1326507024  ;;  %v2462_v11 = vsel %vm2460_vm1, %v2450_v51, 2102212464  ;;  %v2467_v55 = vsel %vm2459_vm3, %v2450_v51, %v2466_v20 }
 0x423   :  { %v2616_v24 = vsel %vm13164_vm15, %v14023_v3, %v2613_v7  ;;  %v7727_v8 = vmin.u32 %v946_v27, %v13226_v41  ;;  %v2469_v22 = vsel %vm2457_vm2, %v2447_v53, %v2450_v51  ;;  %v2441_v17 = vshrl.u32 %v13745_v37, %v13145_v59 }
 0x424   :  { %8427 = vcosq.f32 %v2616_v24  ;;  %vm2458_vm4 = vcmp.lt.s32.totalorder %v13142_v19, 2  ;;  %v13251_v1 = vand.u32 3, %v2617_v26  ;;  %v2471_v13 = vsel %vm2459_vm3, %v2453_v48, %v2470_v34 }
 0x425   :  { %8429 = vsinq.f32 %v2616_v24  ;;  %v948_v15 = vclz %v7727_v8  ;;  %v2468_v18 = vsel %vm2458_vm4, %v2465_v4, %v2467_v55  ;;  %v2473_v23 = vshll.u32 %v2433_v46, 8 }
 0x426   :  { %v2461_v47 = vsel %vm2457_vm2, %v2441_v17, %v2444_v50  ;;  %v2463_v38 = vsel %vm2459_vm3, %v2447_v53, %v2462_v11  ;;  %v2472_v14 = vsel %vm2458_vm4, %v2469_v22, %v2471_v13  ;;  %v13267_v26 = vshrl.u32 %v13137_v60, 5 }
 0x427   :  { %v7728_v44 = vadd.s32 4294967294, %v948_v15  ;;  %v13259_v51 = vmul.u32.u64.low %v2473_v23, %v2472_v14  ;;  %v13260_v27 = vmul.u32.u64.high %v2473_v23, %v2472_v14, %v13259_v51  ;;  %v5935_v48 = vand.u32 3, %v5934_v49 }
 0x428   :  { %v13262_v59 = vmul.u32.u64.low %v2473_v23, %v2468_v18  ;;  %v13263_v7 = vmul.u32.u64.high %v2473_v23, %v2468_v18, %v13262_v59  ;;  %v2464_v20 = vsel %vm2458_vm4, %v2461_v47, %v2463_v38  ;;  %v13270_v50 = vsub.s32 32, %v13229_v40 }
 0x429   :  { %vm7729_vm5 = vcmp.lt.s32.totalorder %v7728_v44, 0  ;;  %v936_v19 = vadd.s32 %v13132_v39, %v13140_v61  ;;  %vm2623_vm6 = vcmp.eq.s32.totalorder %v13251_v1, 0  ;;  %v777_v60 = vand.u32 2147483647, %v12343_v35 }
 0x42a   :  { %v951_v46 = vsel %vm7729_vm5, 0, %v7728_v44  ;;  %vm2482_vm7 = vc.u32 %v13260_v27, %v13262_v59  ;;  %v2483_v8 = vadd.s32 1, %v13263_v7  ;;  %vm2622_vm8 = vcmp.lt.s32.totalorder %v13251_v1, 2 }
 0x42b   :  { %v952_v53 = vsub.s32 32, %v951_v46  ;;  %v956_v24 = vsub.s32 4294967266, %v951_v46  ;;  %v953_v49 = vshll.u32 %v13226_v41, %v951_v46  ;;  %v2480_v11 = vmul.u32 %v2473_v23, %v2464_v20 }
 0x42c   :  { %vm2620_vm10 = vweird.f32 %v14023_v3  ;;  %vm5936_vm9 = vcmp.lt.s32.totalorder %v5935_v48, 2  ;;  %vm5937_vm11 = vcmp.eq.s32.totalorder %v5935_v48, 0  ;;  %vm2626_vm12 = vcmp.eq.s32.totalorder %v13251_v1, 2 }
 0x42d   :  { %v954_v4 = vshrl.u32 %v936_v19, %v952_v53  ;;  %v957_v34 = vadd.s32 127, %v956_v24  ;;  %v2484_v39 = vsel %vm2482_vm7, %v2483_v8, %v13263_v7  ;;  %vm5940_vm14 = vcmp.eq.s32.totalorder %v5935_v48, 2 }
 0x42e   :  { %v2485_v22 = vadd.s32 %v2484_v39, %v2480_v11  ;;  %vm882_vm13 = vcmp.lt.s32.totalorder %v12249_v42, 0  ;;  %v966_v15 = vsub.s32 4, %v13201_v54  ;;  %v13288_v41 = vand.u32 8388607, %v777_v60 }
 0x42f   :  { %v955_v61 = vor.u32 %v954_v4, %v953_v49  ;;  %v958_v55 = vshll.u32 %v957_v34, 23  ;;  %v794_v17 = vshll.u32 %v13745_v37, %v13229_v40  ;;  %v804_v18 = vshrl.u32 %v13798_v25, %v13270_v50 }
 0x430   :  { %v14028_v23 = vand.u32 2147483647, %v12249_v42  ;;  %v2486_v38 = vadd.s32 536870912, %v2485_v22  ;;  %v795_v14 = vshrl.u32 %v13778_v12, %v13270_v50  ;;  %v797_v51 = vshll.u32 %v13778_v12, %v13229_v40 }
 0x431   :  { %v8428_v13 = vpop.eup %8427  ;;  %v959_v47 = vor.u32 4788187, %v958_v55  ;;  %v798_v20 = vshrl.u32 %v13780_v31, %v13270_v50  ;;  %v801_v19 = vshrl.u32 %v13789_v33, %v13270_v50  ;;  %v803_v53 = vshll.u32 %v13789_v33, %v13229_v40 }
 0x432   :  { %vm13296_vm15 = vcmp.le.f32.partialorder %v14028_v23, 0.7853982  ;;  %v8430_v7 = vpop.eup %8429  ;;  %v2627_v46 = vxor.u32 2147483648, %v8428_v13  ;;  %v962_v49 = vcvt.s32.f32 %v955_v61  ;;  %v13310_v4 = vshrl.u32 %v2486_v38, 30 }
 0x433   :  { %v2624_v24 = vxor.u32 2147483648, %v8430_v7  ;;  %v960_v8 = vand.u32 2147483647, %v959_v47  ;;  %v805_v11 = vor.u32 %v804_v18, %v803_v53  ;;  %v807_v39 = vshrl.u32 %v13801_v2, %v13270_v50 }
 0x434   :  { %v5942_v34 = vsel %vm5940_vm14, %v2627_v46, %v8430_v7  ;;  %v2628_v12 = vsel %vm2626_vm12, %v2627_v46, %v8430_v7  ;;  %v2488_v47 = vshll.u32 %v13310_v4, 30  ;;  %v800_v7 = vshll.u32 %v13780_v31, %v13229_v40 }
 0x435   :  { %v5939_v55 = vsel %vm5937_vm11, %v8428_v13, %v2624_v24  ;;  %v2625_v23 = vsel %vm2623_vm6, %v8428_v13, %v2624_v24  ;;  %v963_v33 = vmul.f32 %v962_v49, %v960_v8  ;;  %v806_v18 = vshll.u32 %v13798_v25, %v13229_v40 }
 0x436   :  { %v5943_v61 = vsel %vm5936_vm9, %v5939_v55, %v5942_v34  ;;  %v2629_v38 = vsel %vm2622_vm8, %v2625_v23, %v2628_v12  ;;  %v2489_v48 = vsub.s32 %v2485_v22, %v2488_v47  ;;  %v796_v1 = vor.u32 %v795_v14, %v794_v17 }
 0x437   :  { %v13330_v2 = vsel %vm2620_vm10, nan, %v5943_v61  ;;  %v13334_v13 = vsel %vm2620_vm10, nan, %v2629_v38  ;;  %v964_v46 = vxor.u32 2147483648, %v963_v33  ;;  %v799_v53 = vor.u32 %v798_v20, %v797_v51 }
 0x438   :  { %8006 = vmatprep.subr.mxu0 %v13330_v2  ;;  %8041 = vmatprep.subr.mxu1 %v13334_v13  ;;  %v802_v31 = vor.u32 %v801_v19, %v800_v7  ;;  %vm812_vm0 = vcmp.lt.s32.totalorder %v13267_v26, 4  ;;  %v2491_v40 = vsub.s32 0, %v2489_v48  ;;  %v808_v24 = vor.u32 %v807_v39, %v806_v18 }
 0x439   :  { %v965_v25 = vsel %vm882_vm13, %v964_v46, %v963_v33  ;;  %v818_v3 = vsel %vm812_vm0, %v805_v11, 920167782  ;;  %v967_v22 = vsel %vm882_vm13, %v966_v15, %v13201_v54  ;;  %v785_v14 = vor.u32 8388608, %v13288_v41 }
 0x43a   :  { %v968_v17 = vsel %vm13296_vm15, %v12249_v42, %v965_v25  ;;  %v7787_v51 = vmin.u32 %v2491_v40, %v2489_v48  ;;  %vm809_vm1 = vcmp.lt.s32.totalorder %v13267_v26, 1  ;;  %vm811_vm2 = vcmp.lt.s32.totalorder %v13267_v26, 3 }
 0x43b   :  { %8431 = vcosq.f32 %v968_v17  ;;  %v817_v20 = vsel %vm809_vm1, %v796_v1, %v799_v53  ;;  %v819_v19 = vsel %vm811_vm2, %v802_v31, %v818_v3  ;;  %v821_v54 = vsel %vm809_vm1, %v799_v53, %v802_v31 }
 0x43c   :  { %8433 = vsinq.f32 %v968_v17  ;;  %v969_v15 = vsel %vm13296_vm15, 0, %v967_v22  ;;  %v2493_v41 = vclz %v7787_v51  ;;  %v822_v8 = vsel %vm812_vm0, %v808_v24, 1326507024 }
 0x43d   :  { %v793_v49 = vshrl.u32 %v13745_v37, %v13270_v50  ;;  %vm810_vm3 = vcmp.lt.s32.totalorder %v13267_v26, 2  ;;  %v814_v34 = vsel %vm812_vm0, %v802_v31, 2102212464  ;;  %v823_v12 = vsel %vm811_vm2, %v805_v11, %v822_v8 }
 0x43e   :  { %v7788_v39 = vadd.s32 4294967294, %v2493_v41  ;;  %v820_v44 = vsel %vm810_vm3, %v817_v20, %v819_v19  ;;  %v824_v55 = vsel %vm810_vm3, %v821_v54, %v823_v12  ;;  %v825_v23 = vshll.u32 %v785_v14, 8 }
 0x43f   :  { %v813_v33 = vsel %vm809_vm1, %v793_v49, %v796_v1  ;;  %v815_v37 = vsel %vm811_vm2, %v799_v53, %v814_v34  ;;  %v4270_v61 = vadd.s32 3, %v969_v15  ;;  %v2481_v18 = vadd.s32 %v13262_v59, %v13260_v27 }
 0x440   :  { %vm7789_vm4 = vcmp.lt.s32.totalorder %v7788_v39, 0  ;;  %v13377_v50 = vmul.u32.u64.low %v825_v23, %v824_v55  ;;  %v13378_v47 = vmul.u32.u64.high %v825_v23, %v824_v55, %v13377_v50  ;;  %v973_v25 = vand.u32 3, %v969_v15 }
 0x441   :  { %v2496_v11 = vsel %vm7789_vm4, 0, %v7788_v39  ;;  %v13380_v38 = vmul.u32.u64.low %v825_v23, %v820_v44  ;;  %v13381_v7 = vmul.u32.u64.high %v825_v23, %v820_v44, %v13380_v38  ;;  %v816_v1 = vsel %vm810_vm3, %v813_v33, %v815_v37 }
 0x442   :  { %v2497_v46 = vsub.s32 32, %v2496_v11  ;;  %v2501_v31 = vsub.s32 4294967266, %v2496_v11  ;;  %v2498_v40 = vshll.u32 %v2489_v48, %v2496_v11  ;;  %v4271_v3 = vand.u32 3, %v4270_v61 }
 0x443   :  { %vm834_vm5 = vc.u32 %v13378_v47, %v13380_v38  ;;  %v835_v22 = vadd.s32 1, %v13381_v7  ;;  %v832_v51 = vmul.u32 %v825_v23, %v816_v1  ;;  %vm972_vm6 = vweird.f32 %v12249_v42 }
 0x444   :  { %v2499_v53 = vshrl.u32 %v2481_v18, %v2497_v46  ;;  %v2502_v24 = vadd.s32 127, %v2501_v31  ;;  %vm975_vm7 = vcmp.eq.s32.totalorder %v973_v25, 0  ;;  %vm978_vm8 = vcmp.eq.s32.totalorder %v973_v25, 2 }
 0x445   :  { %v836_v27 = vsel %vm834_vm5, %v835_v22, %v13381_v7  ;;  %vm4273_vm10 = vcmp.eq.s32.totalorder %v4271_v3, 0  ;;  %vm4276_vm9 = vcmp.eq.s32.totalorder %v4271_v3, 2  ;;  %vm4272_vm11 = vcmp.lt.s32.totalorder %v4271_v3, 2 }
 0x446   :  { %v2500_v17 = vor.u32 %v2499_v53, %v2498_v40  ;;  %v2503_v14 = vshll.u32 %v2502_v24, 23  ;;  %v837_v19 = vadd.s32 %v836_v27, %v832_v51  ;;  %vm974_vm12 = vcmp.lt.s32.totalorder %v973_v25, 2 }
 0x447   :  { %vm2427_vm14 = vcmp.lt.s32.totalorder %v12510_v5, 0  ;;  %v2511_v7 = vsub.s32 4, %v13310_v4  ;;  %v14031_v18 = vand.u32 2147483647, %v12510_v5  ;;  %vm2517_vm0 = vweird.f32 %v12510_v5 }
 0x448   :  { %v8432_v20 = vpop.eup %8431  ;;  %v2504_v48 = vor.u32 4788187, %v2503_v14  ;;  %v2507_v15 = vcvt.s32.f32 %v2500_v17  ;;  %v838_v34 = vadd.s32 536870912, %v837_v19  ;;  %v833_v14 = vadd.s32 %v13380_v38, %v13378_v47 }
 0x449   :  { %v8434_v59 = vpop.eup %8433  ;;  %v979_v26 = vxor.u32 2147483648, %v8432_v20  ;;  %vm2426_vm13 = vcmp.le.f32.partialorder %v14031_v18, 0.7853982  ;;  %v2512_v1 = vsel %vm2427_vm14, %v2511_v7, %v13310_v4 }
 0x44a   :  { %v976_v54 = vxor.u32 2147483648, %v8434_v59  ;;  %v2505_v49 = vand.u32 2147483647, %v2504_v48  ;;  %v13394_v33 = vshrl.u32 %v838_v34, 30  ;;  %v2514_v53 = vsel %vm2426_vm13, 0, %v2512_v1 }
 0x44b   :  { %v4278_v41 = vsel %vm4276_vm9, %v979_v26, %v8434_v59  ;;  %v980_v8 = vsel %vm978_vm8, %v979_v26, %v8434_v59  ;;  %v5830_v22 = vadd.s32 3, %v2514_v53  ;;  %v2518_v59 = vand.u32 3, %v2514_v53 }
 0x44c   :  { %v4275_v12 = vsel %vm4273_vm10, %v8432_v20, %v976_v54  ;;  %v977_v39 = vsel %vm975_vm7, %v8432_v20, %v976_v54  ;;  %v2508_v23 = vmul.f32 %v2507_v15, %v2505_v49  ;;  %v840_v11 = vshll.u32 %v13394_v33, 30 }
 0x44d   :  { %v4279_v44 = vsel %vm4272_vm11, %v4275_v12, %v4278_v41  ;;  %v981_v55 = vsel %vm974_vm12, %v977_v39, %v980_v8  ;;  %v5831_v27 = vand.u32 3, %v5830_v22  ;;  %vm2520_vm2 = vcmp.eq.s32.totalorder %v2518_v59, 0 }
 0x44e   :  { %v13398_v37 = vsel %vm972_vm6, nan, %v4279_v44  ;;  %v13402_v50 = vsel %vm972_vm6, nan, %v981_v55  ;;  %v2509_v61 = vxor.u32 2147483648, %v2508_v23  ;;  %v841_v31 = vsub.s32 %v837_v19, %v840_v11 }
 0x44f   :  { %8007 = vmatpush3.msra.mxu0 %v13398_v37  ;;  %8042 = vmatpush3.msra.mxu1 %v13402_v50  ;;  %vm5836_vm1 = vcmp.eq.s32.totalorder %v5831_v27, 2  ;;  %vm2523_vm3 = vcmp.eq.s32.totalorder %v2518_v59, 2  ;;  %vm5833_vm4 = vcmp.eq.s32.totalorder %v5831_v27, 0  ;;  %vm5832_vm5 = vcmp.lt.s32.totalorder %v5831_v27, 2 }
 0x450   :  { %v2510_v46 = vsel %vm2427_vm14, %v2509_v61, %v2508_v23  ;;  %v843_v25 = vsub.s32 0, %v841_v31  ;;  %vm2519_vm6 = vcmp.lt.s32.totalorder %v2518_v59, 2  ;;  %vm779_vm7 = vcmp.lt.s32.totalorder %v12343_v35, 0 }
 0x451   :  { %v2513_v42 = vsel %vm2426_vm13, %v12510_v5, %v2510_v46  ;;  %vm778_vm8 = vcmp.le.f32.partialorder %v777_v60, 0.7853982 }
 0x452   :  { %8435 = vcosq.f32 %v2513_v42  ;;  %v7723_v40 = vmin.u32 %v843_v25, %v841_v31 }
 0x453   :  { %8437 = vsinq.f32 %v2513_v42 }
 0x454   :  { %v845_v24 = vclz %v7723_v40 }
 0x456   :  { %v7724_v3 = vadd.s32 4294967294, %v845_v24 }
 0x458   :  { %vm7725_vm15 = vcmp.lt.s32.totalorder %v7724_v3, 0 }
 0x459   :  { %v848_v17 = vsel %vm7725_vm15, 0, %v7724_v3  ;;  %vm869_vm15 = vweird.f32 %v12343_v35 }
 0x45a   :  { %v849_v51 = vsub.s32 32, %v848_v17  ;;  %v853_v20 = vsub.s32 4294967266, %v848_v17  ;;  %v850_v26 = vshll.u32 %v841_v31, %v848_v17  ;;  %v863_v31 = vsub.s32 4, %v13394_v33 }
 0x45c   :  { %v851_v48 = vshrl.u32 %v833_v14, %v849_v51  ;;  %v854_v19 = vadd.s32 127, %v853_v20  ;;  %v864_v5 = vsel %vm779_vm7, %v863_v31, %v13394_v33  ;;  %v14049_v31 = vld [vmem:[#allocation48_spill] sm:$0xff] }
 0x45d   :  { %v866_v1 = vsel %vm778_vm8, 0, %v864_v5  ;;  %v14052_v5 = vld [vmem:[#allocation3_spill] sm:$0xff] }
 0x45e   :  { %v852_v41 = vor.u32 %v851_v48, %v850_v26  ;;  %v855_v8 = vshll.u32 %v854_v19, 23  ;;  %v4166_v40 = vadd.s32 3, %v866_v1  ;;  %v870_v24 = vand.u32 3, %v866_v1  ;;  %v13436_v26 = vld [vmem:[%s13534_s3] sm:$0xff]  ;;  %v14053_v1 = vld [vmem:[#allocation37_spill] sm:$0xff] }
 0x45f   :  { %v8436_v54 = vpop.eup %8435  ;;  %v13441_v48 = vld [vmem:[%s13535_s2] sm:$0xff] }
 0x460   :  { %v8438_v4 = vpop.eup %8437  ;;  %v2524_v15 = vxor.u32 2147483648, %v8436_v54  ;;  %v856_v34 = vor.u32 4788187, %v855_v8  ;;  %v859_v61 = vcvt.s32.f32 %v852_v41  ;;  %v4167_v53 = vand.u32 3, %v4166_v40  ;;  %v14035_v41 = vld [vmem:[#allocation33_spill] sm:$0xff]  ;;  %v14036_v8 = vld [vmem:[#allocation16_spill] sm:$0xff] }
 0x461   :  { %v2521_v49 = vxor.u32 2147483648, %v8438_v4  ;;  %vm875_vm9 = vcmp.eq.s32.totalorder %v870_v24, 2  ;;  %vm872_vm12 = vcmp.eq.s32.totalorder %v870_v24, 0  ;;  %vm871_vm13 = vcmp.lt.s32.totalorder %v870_v24, 2  ;;  %v14054_v40 = vld [vmem:[#allocation41_spill] sm:$0xff]  ;;  %v14056_v24 = vld [vmem:[#allocation28_spill] sm:$0xff] }
 0x462   :  { %v5838_v47 = vsel %vm5836_vm1, %v2524_v15, %v8438_v4  ;;  %v2525_v38 = vsel %vm2523_vm3, %v2524_v15, %v8438_v4  ;;  %v857_v23 = vand.u32 2147483647, %v856_v34  ;;  %vm4172_vm10 = vcmp.eq.s32.totalorder %v4167_v53, 2  ;;  %v14033_v4 = vld [vmem:[#allocation30_spill] sm:$0xff]  ;;  %v14040_v34 = vld [vmem:[#allocation15_spill] sm:$0xff] }
 0x463   :  { %v5835_v12 = vsel %vm5833_vm4, %v8436_v54, %v2521_v49  ;;  %v2522_v39 = vsel %vm2520_vm2, %v8436_v54, %v2521_v49  ;;  %vm4169_vm11 = vcmp.eq.s32.totalorder %v4167_v53, 0  ;;  %vm4168_vm14 = vcmp.lt.s32.totalorder %v4167_v53, 2  ;;  %v14034_v15 = vld [vmem:[#allocation34_spill] sm:$0xff] }
 0x464   :  { %v5839_v44 = vsel %vm5832_vm5, %v5835_v12, %v5838_v47  ;;  %v2526_v55 = vsel %vm2519_vm6, %v2522_v39, %v2525_v38  ;;  %v860_v18 = vmul.f32 %v859_v61, %v857_v23  ;;  %v14037_v49 = vld [vmem:[#allocation18_spill] sm:$0xff]  ;;  %v14038_v47 = vld [vmem:[#allocation8_spill] sm:$0xff]  ;;  %v14041_v12 = vld [vmem:[#allocation11_spill] sm:$0xff] }
 0x465   :  { %v13418_v11 = vsel %vm2517_vm0, nan, %v5839_v44  ;;  %v13422_v7 = vsel %vm2517_vm0, nan, %v2526_v55  ;;  %v14039_v38 = vld [vmem:[#allocation12_spill] sm:$0xff]  ;;  %v14042_v39 = vld [vmem:[#allocation21_spill] sm:$0xff]  ;;  %v14044_v55 = vld [vmem:[#allocation2_spill] sm:$0xff] }
 0x466   :  { %8008 = vmatprep.subr.mxu0 %v13418_v11  ;;  %8043 = vmatprep.subr.mxu1 %v13422_v7  ;;  %v861_v46 = vxor.u32 2147483648, %v860_v18  ;;  %v14043_v44 = vld [vmem:[#allocation17_spill] sm:$0xff]  ;;  %v14045_v23 = vld [vmem:[#allocation10_spill] sm:$0xff]  ;;  %v14046_v61 = vld [vmem:[#allocation27_spill] sm:$0xff] }
 0x467   :  { %v14055_v53 = vld [vmem:[#allocation42_spill] sm:$0xff] }
 0x468   :  { %v862_v42 = vsel %vm779_vm7, %v861_v46, %v860_v18  ;;  %v14047_v18 = vld [vmem:[#allocation25_spill] sm:$0xff] }
 0x469   :  { %v865_v25 = vsel %vm778_vm8, %v12343_v35, %v862_v42  ;;  %v14032_v35 = vld [vmem:[#allocation31_spill] sm:$0xff]  ;;  %v14048_v46 = vld [vmem:[#allocation9_spill] sm:$0xff]  ;;  %v14050_v42 = vld [vmem:[#allocation38_spill] sm:$0xff] }
 0x46a   :  { %8439 = vcosq.f32 %v865_v25 }
 0x46b   :  { %8441 = vsinq.f32 %v865_v25  ;;  %v14051_v25 = vld [vmem:[#allocation35_spill] sm:$0xff] }
 0x477   :  { %v8440_v3 = vpop.eup %8439 }
 0x478   :  { %v8442_v22 = vpop.eup %8441  ;;  %v876_v17 = vxor.u32 2147483648, %v8440_v3 }
 0x479   :  { %v873_v14 = vxor.u32 2147483648, %v8442_v22 }
 0x47a   :  { %v4174_v51 = vsel %vm4172_vm10, %v876_v17, %v8442_v22  ;;  %v877_v60 = vsel %vm875_vm9, %v876_v17, %v8442_v22  ;;  %v14058_v22 = vld [vmem:[#allocation51_spill] sm:$0xff]  ;;  %v14059_v17 = vld [vmem:[#allocation52_spill] sm:$0xff] }
 0x47b   :  { %v4171_v20 = vsel %vm4169_vm11, %v8440_v3, %v873_v14  ;;  %v874_v27 = vsel %vm872_vm12, %v8440_v3, %v873_v14  ;;  %v14057_v3 = vld [vmem:[#allocation45_spill] sm:$0xff]  ;;  %v14060_v14 = vld [vmem:[#allocation23_spill] sm:$0xff] }
 0x47c   :  { %v4175_v33 = vsel %vm4168_vm14, %v4171_v20, %v4174_v51  ;;  %v878_v59 = vsel %vm871_vm13, %v874_v27, %v877_v60  ;;  %v14061_v51 = vld [vmem:[#allocation20_spill] sm:$0xff]  ;;  %v14062_v60 = vld [vmem:[#allocation5_spill] sm:$0xff]  ;;  %v14064_v27 = vld [vmem:[#allocation22_spill] sm:$0xff] }
 0x47d   :  { %v13443_v19 = vsel %vm869_vm15, nan, %v4175_v33  ;;  %v13445_v54 = vsel %vm869_vm15, nan, %v878_v59  ;;  %v14063_v20 = vld [vmem:[#allocation40_spill] sm:$0xff]  ;;  %v14065_v33 = vld [vmem:[#allocation7_spill] sm:$0xff] }
 0x47e   :  { %8009 = vmatpush3.msra.mxu0 %v13443_v19  ;;  %8044 = vmatpush3.msra.mxu1 %v13445_v54  ;;  %v14066_v59 = vld [vmem:[#allocation19_spill] sm:$0xff] }
 0x47f   :  { %7471 = vmatmul.mubr.f32.vlgmr.msra.gmra.mxu0 %v13436_v26  ;;  %7541 = vmatmul.mubr.f32.vlgmr.msra.gmra.mxu1 %v13441_v48 }
 0x480   :  { %8048 = vmatprep.subr.mxu0 %v14032_v35  ;;  %8083 = vmatprep.subr.mxu1 %v14033_v4  ;;  %v14067_v35 = vld [vmem:[#allocation6_spill] sm:$0xff]  ;;  %v14068_v4 = vld [vmem:[#allocation47_spill] sm:$0xff] }
 0x481   :  { %8049 = vmatpush3.msra.mxu0 %v14034_v15  ;;  %8084 = vmatpush3.msra.mxu1 %v14035_v41  ;;  %v14069_v15 = vld [vmem:[#allocation50_spill] sm:$0xff] }
 0x482   :  { %8050 = vmatprep.subr.mxu0 %v14036_v8  ;;  %8085 = vmatprep.subr.mxu1 %v14037_v49 }
 0x483   :  { %8051 = vmatpush3.msra.mxu0 %v14038_v47  ;;  %8086 = vmatpush3.msra.mxu1 %v14039_v38 }
 0x484   :  { %8052 = vmatprep.subr.mxu0 %v14040_v34  ;;  %8087 = vmatprep.subr.mxu1 %v14041_v12 }
 0x485   :  { %8053 = vmatpush3.msra.mxu0 %v14042_v39  ;;  %8088 = vmatpush3.msra.mxu1 %v14043_v44 }
 0x486   :  { %8054 = vmatprep.subr.mxu0 %v14044_v55  ;;  %8089 = vmatprep.subr.mxu1 %v14045_v23 }
 0x487   :  { %8055 = vmatpush3.msra.mxu0 %v14046_v61  ;;  %8090 = vmatpush3.msra.mxu1 %v14047_v18 }
 0x488   :  { %8056 = vmatprep.subr.mxu0 %v14048_v46  ;;  %8091 = vmatprep.subr.mxu1 %v14049_v31 }
 0x489   :  { %8057 = vmatpush3.msra.mxu0 %v14050_v42  ;;  %8092 = vmatpush3.msra.mxu1 %v14051_v25 }
 0x48a   :  { %8058 = vmatprep.subr.mxu0 %v14052_v5  ;;  %8093 = vmatprep.subr.mxu1 %v14053_v1 }
 0x48b   :  { %8059 = vmatpush3.msra.mxu0 %v14054_v40  ;;  %8094 = vmatpush3.msra.mxu1 %v14055_v53 }
 0x48c   :  { %8060 = vmatprep.subr.mxu0 %v14056_v24  ;;  %8095 = vmatprep.subr.mxu1 %v14057_v3 }
 0x48d   :  { %8061 = vmatpush3.msra.mxu0 %v14058_v22  ;;  %8096 = vmatpush3.msra.mxu1 %v14059_v17 }
 0x48e   :  { %8062 = vmatprep.subr.mxu0 %v14060_v14  ;;  %8097 = vmatprep.subr.mxu1 %v14061_v51 }
 0x48f   :  { %8063 = vmatpush3.msra.mxu0 %v14062_v60  ;;  %8098 = vmatpush3.msra.mxu1 %v14063_v20 }
 0x490   :  { %8064 = vmatprep.subr.mxu0 %v14064_v27  ;;  %8099 = vmatprep.subr.mxu1 %v14065_v33 }
 0x491   :  { %8065 = vmatpush3.msra.mxu0 %v14066_v59  ;;  %8100 = vmatpush3.msra.mxu1 %v14067_v35 }
 0x492   :  { %8066 = vmatprep.subr.mxu0 %v14068_v4  ;;  %8101 = vmatprep.subr.mxu1 %v14069_v15 }
 0x493   :  { %8067 = vmatpush3.msra.mxu0 %v12208_v32  ;;  %8102 = vmatpush3.msra.mxu1 %v12204_v28  ;;  %v14070_v28 = vld [vmem:[#allocation39_spill] sm:$0xff] }
 0x494   :  { %8068 = vmatprep.subr.mxu0 %v12300_v16  ;;  %8103 = vmatprep.subr.mxu1 %v12296_v57 }
 0x495   :  { %8069 = vmatpush3.msra.mxu0 %v12441_v30  ;;  %8104 = vmatpush3.msra.mxu1 %v12437_v52 }
 0x496   :  { %8070 = vmatprep.subr.mxu0 %v12577_v43  ;;  %8105 = vmatprep.subr.mxu1 %v12573_v9 }
 0x497   :  { %8071 = vmatpush3.msra.mxu0 %v12721_v58  ;;  %8106 = vmatpush3.msra.mxu1 %v12717_v45 }
 0x498   :  { %8072 = vmatprep.subr.mxu0 %v12832_v29  ;;  %8107 = vmatprep.subr.mxu1 %v12828_v63  ;;  %v7695_v63 = vld [vmem:[%s13536_s4] sm:$0x3] }
 0x499   :  { %8073 = vmatpush3.msra.mxu0 %v12935_v6  ;;  %8108 = vmatpush3.msra.mxu1 %v12931_v0 }
 0x49a   :  { %8074 = vmatprep.subr.mxu0 %v13072_v62  ;;  %8109 = vmatprep.subr.mxu1 %v13068_v36 }
 0x49b   :  { %8075 = vmatpush3.msra.mxu0 %v13215_v10  ;;  %8110 = vmatpush3.msra.mxu1 %v13211_v56 }
 0x49c   :  { %8076 = vmatprep.subr.mxu0 %v13334_v13  ;;  %8111 = vmatprep.subr.mxu1 %v13330_v2 }
 0x49d   :  { %8077 = vmatpush3.msra.mxu0 %v13402_v50  ;;  %8112 = vmatpush3.msra.mxu1 %v13398_v37 }
 0x49e   :  { %8078 = vmatprep.subr.mxu0 %v13422_v7  ;;  %8113 = vmatprep.subr.mxu1 %v13418_v11 }
 0x49f   :  { %8079 = vmatpush3.msra.mxu0 %v13445_v54  ;;  %7613 = vmatprep.mubr.f32.mxu0 %v13052_v21  ;;  %v14071_v21 = vld [vmem:[#allocation4_spill] sm:$0xff] }
 0x4a0   :  { %8114 = vmatpush3.msra.mxu1 %v13443_v19  ;;  %7683 = vmatprep.mubr.f32.mxu1 %v14070_v28  ;;  %v14072_v36 = vsub.s32 0, %v14071_v21  ;;  %v14073_v10 = vsub.s32 1, %v14071_v21 }
 0x4a1   :  { %7614 = vmatmul.mubr.f32.vlgmr.msra.gmra.mxu0 %v13436_v26  ;;  %7684 = vmatmul.mubr.f32.vlgmr.msra.gmra.mxu1 %v13441_v48 }
 0x4a2   :  { %v7701_v62 = vrot.slane %v7695_v63, %v14072_v36  ;;  %v7706_v2 = vrot.slane %v7695_v63, %v14073_v10 }
 0x53f   :  { %v8010_v32 = vpop.f32.mrf.mxu0  ;;  %v8045_v57 = vpop.f32.mrf.mxu1 }
 0x541   :  { %v8011_v16 = vpop.f32.mrf.mxu0  ;;  %v8046_v52 = vpop.f32.mrf.mxu1 }
 0x542   :  { %v8012_v30 = vadd.f32 %v8011_v16, %v8010_v32  ;;  %v8047_v9 = vadd.f32 %v8046_v52, %v8045_v57 }
 0x544   :  { %v7543_v58 = vadd.f32 %v8047_v9, %v8012_v30 }
 0x546   :  { %v7702_v37 = vmul.f32 %v7701_v62, %v7543_v58  ;;  %v7711_v50 = vmul.f32 %v7706_v2, %v7543_v58 }
 0x561   :  { %v8080_v43 = vpop.f32.mrf.mxu0  ;;  %v8115_v45 = vpop.f32.mrf.mxu1 }
 0x563   :  { %v8081_v29 = vpop.f32.mrf.mxu0  ;;  %v8116_v0 = vpop.f32.mrf.mxu1 }
 0x564   :  { %v8082_v6 = vadd.f32 %v8081_v29, %v8080_v43  ;;  %v8117_v56 = vadd.f32 %v8116_v0, %v8115_v45 }
 0x566   :  { %v7689_v13 = vsub.f32 %v8082_v6, %v8117_v56 }
 0x568   :  { %v7707_v11 = vmul.f32 %v7706_v2, %v7689_v13  ;;  %v7710_v7 = vmul.f32 %v7701_v62, %v7689_v13 }
 0x56a   :  { %v7708_v26 = vadd.f32 %v7707_v11, %v7702_v37  ;;  %v7712_v48 = vsub.f32 %v7710_v7, %v7711_v50 }
 0x56c   :  { %7709 = vst [vmem:[%s13537_s5] sm:$0xff] %v7708_v26  ;;  %7713 = vst [vmem:[%s13538_s6] sm:$0xff] %v7712_v48 }

</bundles_post_ra>
